<compile_context>
chip_gen: v7x
topology: tpu7x:2x2x1
jax: 0.10.0
libtpu: 0.0.40
codegen_flags: <defaults>
</compile_context>

<pallas_src>
import jax
import jax.numpy as jnp
from jax.experimental import pallas as pl
from jax.experimental.pallas import tpu as pltpu


# ----------------------------------------------------------------------------
# Fused BasicBlock Pallas kernel (Bt batch elements per grid step, NHWC layout)
# ----------------------------------------------------------------------------
def _make_block_kernel(stride, Bt, Ho, Wo, Cin, Cout, Cpad, Hp, has_sc_conv):
    M = Ho * Wo
    Mt = Bt * M
    Hh = Ho + 2                      # rows per image inside the hpad scratch
    SC_LO = 4 * Cin                  # center tap (dy=1, dx=1) column block in slab1

    def _phase(dy, dx):
        # (phase index, row offset, col offset) of conv tap (dy, dx) inside the
        # phase-stacked padded input (phases stacked along the row axis).
        if stride == 1:
            return 0, dy, dx
        return (dy % 2) * 2 + (dx % 2), dy // 2, dx // 2

    def kernel(*refs):
        if has_sc_conv:
            (x_ref, w1_ref, s1_ref, b1_ref, w2_ref, s2_ref, b2_ref,
             wsc_ref, ssc_ref, bsc_ref, o_ref, slab1_ref, hpad_ref, slab2_ref) = refs
        else:
            (x_ref, w1_ref, s1_ref, b1_ref, w2_ref, s2_ref, b2_ref,
             o_ref, slab1_ref, hpad_ref, slab2_ref) = refs

        # ---- im2col slab #1 in VMEM: (Bt*M, 9*Cin) bf16 ------------------------
        for b in range(Bt):
            r_lo = b * M
            for t in range(9):
                dy, dx = t // 3, t % 3
                p, ry, rx = _phase(dy, dx)
                r0 = p * Hp + ry
                v = x_ref[b, r0:r0 + Ho, rx:rx + Wo, :]            # (Ho, Wo, Cin)
                slab1_ref[r_lo:r_lo + M, t * Cin:(t + 1) * Cin] = v.reshape(M, Cin)

        # ---- conv1 + bn1 + relu: ONE K=9*Cin matmul (accumulates in the MXU) ---
        h = jnp.dot(slab1_ref[...], w1_ref[...], preferred_element_type=jnp.float32)
        h = jnp.maximum(h * s1_ref[...] + b1_ref[...], 0.0).astype(jnp.bfloat16)

        # ---- stash relu(bn1(conv1)) zero-padded in VMEM (never hits HBM).
        #      Zero ONLY the 1-wide halo strips; the interior is overwritten.
        #      (No program_id==0 one-time init: wrong on v7x megacore.) ----------
        zrow = jnp.zeros((1, Wo + 2, Cout), jnp.bfloat16)
        zcol = jnp.zeros((Ho, 1, Cout), jnp.bfloat16)
        for b in range(Bt):
            o0 = b * Hh
            hpad_ref[o0:o0 + 1, :, :] = zrow
            hpad_ref[o0 + Ho + 1:o0 + Ho + 2, :, :] = zrow
            hpad_ref[o0 + 1:o0 + Ho + 1, 0:1, :] = zcol
            hpad_ref[o0 + 1:o0 + Ho + 1, Wo + 1:Wo + 2, :] = zcol
            hpad_ref[o0 + 1:o0 + Ho + 1, 1:Wo + 1, :] = (
                h[b * M:(b + 1) * M].reshape(Ho, Wo, Cout))

        # ---- im2col slab #2 in VMEM: (Bt*M, 9*Cout) bf16 -----------------------
        for b in range(Bt):
            r_lo = b * M
            o0 = b * Hh
            for t in range(9):
                dy, dx = t // 3, t % 3
                v = hpad_ref[o0 + dy:o0 + dy + Ho, dx:dx + Wo, :]   # (Ho, Wo, Cout)
                slab2_ref[r_lo:r_lo + M, t * Cout:(t + 1) * Cout] = v.reshape(M, Cout)

        # ---- conv2 + bn2: ONE K=9*Cout matmul; N = Cpad (>=128, lane-dense) ----
        out = jnp.dot(slab2_ref[...], w2_ref[...], preferred_element_type=jnp.float32)
        out = out * s2_ref[...] + b2_ref[...]

        # ---- shortcut: reuse center-tap columns already copied into slab1 ------
        sc_in = slab1_ref[:, SC_LO:SC_LO + Cin]                    # (Mt, Cin) bf16
        if has_sc_conv:
            sc = jnp.dot(sc_in, wsc_ref[...], preferred_element_type=jnp.float32)
            out = out + (sc * ssc_ref[...] + bsc_ref[...])
        else:
            sc = sc_in.astype(jnp.float32)
            if Cpad != Cin:                     # pad identity shortcut to Cpad lanes
                sc = jnp.concatenate(
                    [sc, jnp.zeros((Mt, Cpad - Cin), jnp.float32)], axis=-1)
            out = out + sc

        # Lane-dense (Cpad multiple of 128) bf16 store.
        o_ref[...] = jnp.maximum(out, 0.0).astype(o_ref.dtype)

    return kernel


def _auto_bt(batch, bytes_per_image, budget=12 << 20):
    """Pick batch-tile so per-step working set stays modest and >=4 grid steps
    remain whenever the batch allows it (keeps double-buffering busy on v7x)."""
    bt = max(1, min(batch, budget // max(bytes_per_image, 1)))
    while bt > 1 and batch // bt < 4:
        bt -= 1
    while batch % bt:
        bt -= 1
    return bt


def basic_block_nhwc(x_nhwc, p):
    """x_nhwc: [B, H, W, Cin]; returns NHWC bf16 [B, Ho, Wo, Cout] (for chaining)."""
    stride = p["stride"]
    has_sc = "wsc" in p
    Cout, Cpad = p["cout"], p["cpad"]

    B, H, W, Cin = x_nhwc.shape
    assert H % stride == 0 and W % stride == 0, "even spatial dims required for stride 2"
    Ho, Wo = H // stride, W // stride
    M = Ho * Wo

    # pad=1 once; stride handled via a zero-duplication phase split so the kernel
    # only ever takes contiguous static slices (no im2col HBM blowup).
    xp = jnp.pad(x_nhwc, ((0, 0), (1, 1), (1, 1), (0, 0)))
    if stride == 1:
        xph, Hp, Wp, P = xp, H + 2, W + 2, 1
    else:
        phases = [xp[:, py::2, px::2, :] for py in (0, 1) for px in (0, 1)]
        xph = jnp.concatenate(phases, axis=1)               # [B, 4*(Ho+1), Wo+1, Cin]
        Hp, Wp, P = Ho + 1, Wo + 1, 4
    xph = xph.astype(jnp.bfloat16)                          # bf16 MXU operands

    # ---- batch-tile choice + VMEM budget -----------------------------------
    per_img = 2 * (P * Hp * Wp * Cin                        # bf16 input tile
                   + M * 9 * Cin + M * 9 * Cout             # im2col slabs
                   + (Ho + 2) * (Wo + 2) * Cout             # padded activation
                   + M * Cpad)                              # bf16 output tile
    Bt = _auto_bt(B, per_img)
    if (Bt * M) % 8 != 0:          # keep output block sublane-aligned unless full
        Bt = B
    Mt = Bt * M

    w_bytes = sum(int(v.size) * v.dtype.itemsize for v in p.values()
                  if hasattr(v, "dtype"))
    est = Bt * per_img * 2 + w_bytes * 2 + (4 << 20)
    vmem_limit = int(min(max(est, 32 << 20), 48 << 20))     # stays inside v7x's 64 MiB

    kernel = _make_block_kernel(stride, Bt, Ho, Wo, Cin, Cout, Cpad, Hp, has_sc)

    in_specs = [
        pl.BlockSpec((Bt, P * Hp, Wp, Cin), lambda i: (i, 0, 0, 0)),
        pl.BlockSpec((9 * Cin, Cout), lambda i: (0, 0)),
        pl.BlockSpec((1, Cout), lambda i: (0, 0)),
        pl.BlockSpec((1, Cout), lambda i: (0, 0)),
        pl.BlockSpec((9 * Cout, Cpad), lambda i: (0, 0)),
        pl.BlockSpec((1, Cpad), lambda i: (0, 0)),
        pl.BlockSpec((1, Cpad), lambda i: (0, 0)),
    ]
    args = [xph, p["w1"], p["s1"], p["b1"], p["w2"], p["s2"], p["b2"]]
    if has_sc:
        in_specs += [
            pl.BlockSpec((Cin, Cpad), lambda i: (0, 0)),
            pl.BlockSpec((1, Cpad), lambda i: (0, 0)),
            pl.BlockSpec((1, Cpad), lambda i: (0, 0)),
        ]
        args += [p["wsc"], p["ssc"], p["bsc"]]

    out = pl.pallas_call(
        kernel,
        out_shape=jax.ShapeDtypeStruct((B * M, Cpad), jnp.bfloat16),
        grid=(B // Bt,),
        in_specs=in_specs,
        out_specs=pl.BlockSpec((Mt, Cpad), lambda i: (i, 0)),
        scratch_shapes=[
            pltpu.VMEM((Mt, 9 * Cin), jnp.bfloat16),          # conv1 im2col slab
            pltpu.VMEM((Bt * (Ho + 2), Wo + 2, Cout), jnp.bfloat16),  # padded act.
            pltpu.VMEM((Mt, 9 * Cout), jnp.bfloat16),         # conv2 im2col slab
        ],
        compiler_params=pltpu.CompilerParams(
            dimension_semantics=("parallel",),
            vmem_limit_bytes=vmem_limit),
    )(*args)

    out = out.reshape(B, Ho, Wo, Cpad)
    return out[:, :, :, :Cout]                               # drop lane padding


def basic_block_apply(x_nchw, p):
    """Torch-layout entry point: x_nchw [B, Cin, H, W] f32 -> [B, Cout, Ho, Wo] f32."""
    x = jnp.transpose(x_nchw, (0, 2, 3, 1))                  # NCHW -> NHWC (C on lanes)
    y = basic_block_nhwc(x, p)
    return jnp.transpose(y, (0, 3, 1, 2)).astype(jnp.float32)


# ----------------------------------------------------------------------------
# Parameter prep (done ONCE, outside the forward pass)
# ----------------------------------------------------------------------------
def _fold_bn(gamma, beta, mean, var, eps=1e-5):
    scale = gamma / jnp.sqrt(var + eps)
    return scale, beta - mean * scale


def _pack_conv3x3(w_oihw):
    co, ci, kh, kw = w_oihw.shape
    # [Cout,Cin,3,3] -> [9*Cin, Cout]; row index = (dy*3+dx)*Cin + ci (slab order).
    return jnp.transpose(w_oihw, (2, 3, 1, 0)).reshape(kh * kw * ci, co).astype(jnp.bfloat16)


def pack_block_params(raw):
    co = raw["conv1_w"].shape[0]
    cpad = ((co + 127) // 128) * 128          # lane-dense epilogue/output width

    def pad_cols(w):
        return jnp.pad(w, ((0, 0), (0, cpad - co)))

    def pad_bn(v):
        return jnp.pad(v.reshape(1, co), ((0, 0), (0, cpad - co))).astype(jnp.float32)

    s1, b1 = _fold_bn(*raw["bn1"])
    s2, b2 = _fold_bn(*raw["bn2"])
    p = {
        "stride": raw["stride"], "cout": co, "cpad": cpad,
        "w1": _pack_conv3x3(raw["conv1_w"]),                       # (9*Cin, Cout)
        "s1": s1.reshape(1, co).astype(jnp.float32),
        "b1": b1.reshape(1, co).astype(jnp.float32),
        "w2": pad_cols(_pack_conv3x3(raw["conv2_w"])),             # (9*Cout, Cpad)
        "s2": pad_bn(s2),
        "b2": pad_bn(b2),
    }
    if "sc_w" in raw:
        ss, sb = _fold_bn(*raw["sc_bn"])
        p["wsc"] = pad_cols(jnp.transpose(raw["sc_w"][:, :, 0, 0]).astype(jnp.bfloat16))
        p["ssc"] = pad_bn(ss)
        p["bsc"] = pad_bn(sb)
    return p


def init_block_raw(key, in_planes, planes, stride):
    ks = jax.random.split(key, 6)

    def conv_w(k, cout, cin, ksz):
        fan = cin * ksz * ksz
        return jax.random.normal(k, (cout, cin, ksz, ksz), jnp.float32) * (2.0 / fan) ** 0.5

    def bn_stats(k, c):
        k1, k2, k3, k4 = jax.random.split(k, 4)
        gamma = 1.0 + 0.1 * jax.random.normal(k1, (c,), jnp.float32)
        beta = 0.1 * jax.random.normal(k2, (c,), jnp.float32)
        mean = 0.1 * jax.random.normal(k3, (c,), jnp.float32)
        var = 1.0 + 0.1 * jnp.abs(jax.random.normal(k4, (c,), jnp.float32))
        return gamma, beta, mean, var

    raw = {"stride": stride,
           "conv1_w": conv_w(ks[0], planes, in_planes, 3), "bn1": bn_stats(ks[1], planes),
           "conv2_w": conv_w(ks[2], planes, planes, 3), "bn2": bn_stats(ks[3], planes)}
    if stride != 1 or in_planes != planes:
        raw["sc_w"] = conv_w(ks[4], planes, in_planes, 1)
        raw["sc_bn"] = bn_stats(ks[5], planes)
    return raw


# ----------------------------------------------------------------------------
# Plain-JAX reference (f32, HIGHEST precision) for correctness checking
# ----------------------------------------------------------------------------
def basic_block_reference(x_nchw, raw):
    x = jnp.transpose(x_nchw, (0, 2, 3, 1)).astype(jnp.float32)
    s = raw["stride"]

    def conv(v, w_oihw, stride, pad):
        return jax.lax.conv_general_dilated(
            v, jnp.transpose(w_oihw, (2, 3, 1, 0)), (stride, stride),
            [(pad, pad), (pad, pad)],
            dimension_numbers=("NHWC", "HWIO", "NHWC"),
            precision=jax.lax.Precision.HIGHEST)

    sc1, bi1 = _fold_bn(*raw["bn1"])
    sc2, bi2 = _fold_bn(*raw["bn2"])
    out = jax.nn.relu(conv(x, raw["conv1_w"], s, 1) * sc1 + bi1)
    out = conv(out, raw["conv2_w"], 1, 1) * sc2 + bi2
    if "sc_w" in raw:
        scs, scb = _fold_bn(*raw["sc_bn"])
        short = conv(x, raw["sc_w"], s, 0) * scs + scb
    else:
        short = x
    out = jax.nn.relu(out + short)
    return jnp.transpose(out, (0, 3, 1, 2))


# ----------------------------------------------------------------------------
if __name__ == "__main__":
    key = jax.random.PRNGKey(0)
    kx, ka, kb = jax.random.split(key, 3)
    # Small BasicBlock-shaped input: batch=2, 64 channels, 16x16 spatial.
    x = jax.random.normal(kx, (2, 64, 16, 16), jnp.float32)

    configs = [
        ("identity shortcut, stride=1", init_block_raw(ka, 64, 64, 1)),
        ("conv shortcut,    stride=2", init_block_raw(kb, 64, 128, 2)),
    ]

    for name, raw in configs:
        packed = pack_block_params(raw)
        fwd = jax.jit(lambda v, _p=packed: basic_block_apply(v, _p))
        out = jax.block_until_ready(fwd(x))
        ref = basic_block_reference(x, raw)

        assert out.shape == ref.shape, (name, out.shape, ref.shape)
        assert bool(jnp.all(jnp.isfinite(out))), name
        err = float(jnp.max(jnp.abs(out - ref)))
        scale = float(jnp.max(jnp.abs(ref))) + 1e-6
        assert err <= 0.05 * scale + 0.05, (name, err, scale)

    print("KERNEL_OK")
</pallas_src>

<mosaic_0001>
module attributes {stable_mosaic.version = 11 : i64} {
  func.func @kernel(%arg0: i32, %arg1: memref<1x18x18x64xbf16, #tpu.memory_space<vmem>>, %arg2: memref<576x64xbf16, #tpu.memory_space<vmem>>, %arg3: memref<1x64xf32, #tpu.memory_space<vmem>>, %arg4: memref<1x64xf32, #tpu.memory_space<vmem>>, %arg5: memref<576x128xbf16, #tpu.memory_space<vmem>>, %arg6: memref<1x128xf32, #tpu.memory_space<vmem>>, %arg7: memref<1x128xf32, #tpu.memory_space<vmem>>, %arg8: memref<256x128xbf16, #tpu.memory_space<vmem>>, %arg9: memref<256x576xbf16, #tpu.memory_space<vmem>>, %arg10: memref<18x18x64xbf16, #tpu.memory_space<vmem>>, %arg11: memref<256x576xbf16, #tpu.memory_space<vmem>>) attributes {dimension_semantics = [#tpu.dimension_semantics<parallel>], iteration_bounds = array<i64: 2>, scalar_prefetch = 0 : i64, scratch_operands = 3 : i64, tpu.core_type = #tpu.core_type<tc>, window_params = [{transform_indices = @transform_0, window_bounds = array<i64: 1, 18, 18, 64>}, {pipeline_mode = #tpu.pipeline_mode<synchronous>, transform_indices = @transform_1, window_bounds = array<i64: 576, 64>}, {pipeline_mode = #tpu.pipeline_mode<synchronous>, transform_indices = @transform_2, window_bounds = array<i64: 1, 64>}, {pipeline_mode = #tpu.pipeline_mode<synchronous>, transform_indices = @transform_3, window_bounds = array<i64: 1, 64>}, {pipeline_mode = #tpu.pipeline_mode<synchronous>, transform_indices = @transform_4, window_bounds = array<i64: 576, 128>}, {pipeline_mode = #tpu.pipeline_mode<synchronous>, transform_indices = @transform_5, window_bounds = array<i64: 1, 128>}, {pipeline_mode = #tpu.pipeline_mode<synchronous>, transform_indices = @transform_6, window_bounds = array<i64: 1, 128>}, {transform_indices = @transform_7, window_bounds = array<i64: 256, 128>}]} {
    %c0 = arith.constant 0 : index
    %c0_0 = arith.constant 0 : index
    %c0_1 = arith.constant 0 : index
    %c0_2 = arith.constant 0 : index
    %0 = vector.load %arg1[%c0, %c0_0, %c0_1, %c0_2] : memref<1x18x18x64xbf16, #tpu.memory_space<vmem>>, vector<1x16x16x64xbf16>
    %1 = vector.shape_cast %0 : vector<1x16x16x64xbf16> to vector<16x16x64xbf16>
    %2 = vector.shape_cast %1 : vector<16x16x64xbf16> to vector<256x64xbf16>
    %c0_3 = arith.constant 0 : index
    %c0_4 = arith.constant 0 : index
    %3 = vector.load %arg9[%c0_3, %c0_4] : memref<256x576xbf16, #tpu.memory_space<vmem>>, vector<256x64xbf16>
    tpu.vector_store %arg9[%c0_3, %c0_4], %2 {strides = array<i32>} : memref<256x576xbf16, #tpu.memory_space<vmem>>, vector<256x64xbf16>,
    %c0_5 = arith.constant 0 : index
    %c0_6 = arith.constant 0 : index
    %c1 = arith.constant 1 : index
    %c0_7 = arith.constant 0 : index
    %4 = vector.load %arg1[%c0_5, %c0_6, %c1, %c0_7] : memref<1x18x18x64xbf16, #tpu.memory_space<vmem>>, vector<1x16x16x64xbf16>
    %5 = vector.shape_cast %4 : vector<1x16x16x64xbf16> to vector<16x16x64xbf16>
    %6 = vector.shape_cast %5 : vector<16x16x64xbf16> to vector<256x64xbf16>
    %c0_8 = arith.constant 0 : index
    %c64 = arith.constant 64 : index
    %7 = vector.load %arg9[%c0_8, %c64] : memref<256x576xbf16, #tpu.memory_space<vmem>>, vector<256x64xbf16>
    tpu.vector_store %arg9[%c0_8, %c64], %6 {strides = array<i32>} : memref<256x576xbf16, #tpu.memory_space<vmem>>, vector<256x64xbf16>,
    %c0_9 = arith.constant 0 : index
    %c0_10 = arith.constant 0 : index
    %c2 = arith.constant 2 : index
    %c0_11 = arith.constant 0 : index
    %8 = vector.load %arg1[%c0_9, %c0_10, %c2, %c0_11] : memref<1x18x18x64xbf16, #tpu.memory_space<vmem>>, vector<1x16x16x64xbf16>
    %9 = vector.shape_cast %8 : vector<1x16x16x64xbf16> to vector<16x16x64xbf16>
    %10 = vector.shape_cast %9 : vector<16x16x64xbf16> to vector<256x64xbf16>
    %c0_12 = arith.constant 0 : index
    %c128 = arith.constant 128 : index
    %11 = vector.load %arg9[%c0_12, %c128] : memref<256x576xbf16, #tpu.memory_space<vmem>>, vector<256x64xbf16>
    tpu.vector_store %arg9[%c0_12, %c128], %10 {strides = array<i32>} : memref<256x576xbf16, #tpu.memory_space<vmem>>, vector<256x64xbf16>,
    %c0_13 = arith.constant 0 : index
    %c1_14 = arith.constant 1 : index
    %c0_15 = arith.constant 0 : index
    %c0_16 = arith.constant 0 : index
    %12 = vector.load %arg1[%c0_13, %c1_14, %c0_15, %c0_16] : memref<1x18x18x64xbf16, #tpu.memory_space<vmem>>, vector<1x16x16x64xbf16>
    %13 = vector.shape_cast %12 : vector<1x16x16x64xbf16> to vector<16x16x64xbf16>
    %14 = vector.shape_cast %13 : vector<16x16x64xbf16> to vector<256x64xbf16>
    %c0_17 = arith.constant 0 : index
    %c192 = arith.constant 192 : index
    %15 = vector.load %arg9[%c0_17, %c192] : memref<256x576xbf16, #tpu.memory_space<vmem>>, vector<256x64xbf16>
    tpu.vector_store %arg9[%c0_17, %c192], %14 {strides = array<i32>} : memref<256x576xbf16, #tpu.memory_space<vmem>>, vector<256x64xbf16>,
    %c0_18 = arith.constant 0 : index
    %c1_19 = arith.constant 1 : index
    %c1_20 = arith.constant 1 : index
    %c0_21 = arith.constant 0 : index
    %16 = vector.load %arg1[%c0_18, %c1_19, %c1_20, %c0_21] : memref<1x18x18x64xbf16, #tpu.memory_space<vmem>>, vector<1x16x16x64xbf16>
    %17 = vector.shape_cast %16 : vector<1x16x16x64xbf16> to vector<16x16x64xbf16>
    %18 = vector.shape_cast %17 : vector<16x16x64xbf16> to vector<256x64xbf16>
    %c0_22 = arith.constant 0 : index
    %c256 = arith.constant 256 : index
    %19 = vector.load %arg9[%c0_22, %c256] : memref<256x576xbf16, #tpu.memory_space<vmem>>, vector<256x64xbf16>
    tpu.vector_store %arg9[%c0_22, %c256], %18 {strides = array<i32>} : memref<256x576xbf16, #tpu.memory_space<vmem>>, vector<256x64xbf16>,
    %c0_23 = arith.constant 0 : index
    %c1_24 = arith.constant 1 : index
    %c2_25 = arith.constant 2 : index
    %c0_26 = arith.constant 0 : index
    %20 = vector.load %arg1[%c0_23, %c1_24, %c2_25, %c0_26] : memref<1x18x18x64xbf16, #tpu.memory_space<vmem>>, vector<1x16x16x64xbf16>
    %21 = vector.shape_cast %20 : vector<1x16x16x64xbf16> to vector<16x16x64xbf16>
    %22 = vector.shape_cast %21 : vector<16x16x64xbf16> to vector<256x64xbf16>
    %c0_27 = arith.constant 0 : index
    %c320 = arith.constant 320 : index
    %23 = vector.load %arg9[%c0_27, %c320] : memref<256x576xbf16, #tpu.memory_space<vmem>>, vector<256x64xbf16>
    tpu.vector_store %arg9[%c0_27, %c320], %22 {strides = array<i32>} : memref<256x576xbf16, #tpu.memory_space<vmem>>, vector<256x64xbf16>,
    %c0_28 = arith.constant 0 : index
    %c2_29 = arith.constant 2 : index
    %c0_30 = arith.constant 0 : index
    %c0_31 = arith.constant 0 : index
    %24 = vector.load %arg1[%c0_28, %c2_29, %c0_30, %c0_31] : memref<1x18x18x64xbf16, #tpu.memory_space<vmem>>, vector<1x16x16x64xbf16>
    %25 = vector.shape_cast %24 : vector<1x16x16x64xbf16> to vector<16x16x64xbf16>
    %26 = vector.shape_cast %25 : vector<16x16x64xbf16> to vector<256x64xbf16>
    %c0_32 = arith.constant 0 : index
    %c384 = arith.constant 384 : index
    %27 = vector.load %arg9[%c0_32, %c384] : memref<256x576xbf16, #tpu.memory_space<vmem>>, vector<256x64xbf16>
    tpu.vector_store %arg9[%c0_32, %c384], %26 {strides = array<i32>} : memref<256x576xbf16, #tpu.memory_space<vmem>>, vector<256x64xbf16>,
    %c0_33 = arith.constant 0 : index
    %c2_34 = arith.constant 2 : index
    %c1_35 = arith.constant 1 : index
    %c0_36 = arith.constant 0 : index
    %28 = vector.load %arg1[%c0_33, %c2_34, %c1_35, %c0_36] : memref<1x18x18x64xbf16, #tpu.memory_space<vmem>>, vector<1x16x16x64xbf16>
    %29 = vector.shape_cast %28 : vector<1x16x16x64xbf16> to vector<16x16x64xbf16>
    %30 = vector.shape_cast %29 : vector<16x16x64xbf16> to vector<256x64xbf16>
    %c0_37 = arith.constant 0 : index
    %c448 = arith.constant 448 : index
    %31 = vector.load %arg9[%c0_37, %c448] : memref<256x576xbf16, #tpu.memory_space<vmem>>, vector<256x64xbf16>
    tpu.vector_store %arg9[%c0_37, %c448], %30 {strides = array<i32>} : memref<256x576xbf16, #tpu.memory_space<vmem>>, vector<256x64xbf16>,
    %c0_38 = arith.constant 0 : index
    %c2_39 = arith.constant 2 : index
    %c2_40 = arith.constant 2 : index
    %c0_41 = arith.constant 0 : index
    %32 = vector.load %arg1[%c0_38, %c2_39, %c2_40, %c0_41] : memref<1x18x18x64xbf16, #tpu.memory_space<vmem>>, vector<1x16x16x64xbf16>
    %33 = vector.shape_cast %32 : vector<1x16x16x64xbf16> to vector<16x16x64xbf16>
    %34 = vector.shape_cast %33 : vector<16x16x64xbf16> to vector<256x64xbf16>
    %c0_42 = arith.constant 0 : index
    %c512 = arith.constant 512 : index
    %35 = vector.load %arg9[%c0_42, %c512] : memref<256x576xbf16, #tpu.memory_space<vmem>>, vector<256x64xbf16>
    tpu.vector_store %arg9[%c0_42, %c512], %34 {strides = array<i32>} : memref<256x576xbf16, #tpu.memory_space<vmem>>, vector<256x64xbf16>,
    %c0_43 = arith.constant 0 : index
    %c0_44 = arith.constant 0 : index
    %36 = vector.load %arg9[%c0_43, %c0_44] : memref<256x576xbf16, #tpu.memory_space<vmem>>, vector<256x576xbf16>
    %c0_45 = arith.constant 0 : index
    %c0_46 = arith.constant 0 : index
    %37 = vector.load %arg2[%c0_45, %c0_46] : memref<576x64xbf16, #tpu.memory_space<vmem>>, vector<576x64xbf16>
    %cst = arith.constant dense<0.000000e+00> : vector<256x64xf32>
    %38 = tpu.matmul %36, %37, %cst {dimension_numbers = #tpu.dot_dimension_numbers<[1], [0], [0], [1], [0, 0, 1, 1], [], []>} : vector<256x576xbf16>, vector<576x64xbf16>, vector<256x64xf32> -> vector<256x64xf32>
    %c0_47 = arith.constant 0 : index
    %c0_48 = arith.constant 0 : index
    %39 = vector.load %arg3[%c0_47, %c0_48] : memref<1x64xf32, #tpu.memory_space<vmem>>, vector<1x64xf32>
    %40 = vector.broadcast %39 : vector<1x64xf32> to vector<256x64xf32>
    %41 = arith.mulf %38, %40 : vector<256x64xf32>
    %c0_49 = arith.constant 0 : index
    %c0_50 = arith.constant 0 : index
    %42 = vector.load %arg4[%c0_49, %c0_50] : memref<1x64xf32, #tpu.memory_space<vmem>>, vector<1x64xf32>
    %43 = vector.broadcast %42 : vector<1x64xf32> to vector<256x64xf32>
    %44 = arith.addf %41, %43 : vector<256x64xf32>
    %cst_51 = arith.constant 0.000000e+00 : f32
    %45 = vector.broadcast %cst_51 : f32 to vector<256x64xf32>
    %46 = arith.maximumf %44, %45 : vector<256x64xf32>
    %47 = arith.truncf %46 : vector<256x64xf32> to vector<256x64xbf16>
    %cst_52 = arith.constant 0.000000e+00 : bf16
    %48 = vector.broadcast %cst_52 : bf16 to vector<1x18x64xbf16>
    %cst_53 = arith.constant 0.000000e+00 : bf16
    %49 = vector.broadcast %cst_53 : bf16 to vector<16x1x64xbf16>
    %c0_54 = arith.constant 0 : index
    %c0_55 = arith.constant 0 : index
    %c0_56 = arith.constant 0 : index
    %50 = vector.load %arg10[%c0_54, %c0_55, %c0_56] : memref<18x18x64xbf16, #tpu.memory_space<vmem>>, vector<1x18x64xbf16>
    tpu.vector_store %arg10[%c0_54, %c0_55, %c0_56], %48 {strides = array<i32>} : memref<18x18x64xbf16, #tpu.memory_space<vmem>>, vector<1x18x64xbf16>,
    %c17 = arith.constant 17 : index
    %c0_57 = arith.constant 0 : index
    %c0_58 = arith.constant 0 : index
    %51 = vector.load %arg10[%c17, %c0_57, %c0_58] : memref<18x18x64xbf16, #tpu.memory_space<vmem>>, vector<1x18x64xbf16>
    tpu.vector_store %arg10[%c17, %c0_57, %c0_58], %48 {strides = array<i32>} : memref<18x18x64xbf16, #tpu.memory_space<vmem>>, vector<1x18x64xbf16>,
    %c1_59 = arith.constant 1 : index
    %c0_60 = arith.constant 0 : index
    %c0_61 = arith.constant 0 : index
    %52 = vector.load %arg10[%c1_59, %c0_60, %c0_61] : memref<18x18x64xbf16, #tpu.memory_space<vmem>>, vector<16x1x64xbf16>
    tpu.vector_store %arg10[%c1_59, %c0_60, %c0_61], %49 {strides = array<i32>} : memref<18x18x64xbf16, #tpu.memory_space<vmem>>, vector<16x1x64xbf16>,
    %c1_62 = arith.constant 1 : index
    %c17_63 = arith.constant 17 : index
    %c0_64 = arith.constant 0 : index
    %53 = vector.load %arg10[%c1_62, %c17_63, %c0_64] : memref<18x18x64xbf16, #tpu.memory_space<vmem>>, vector<16x1x64xbf16>
    tpu.vector_store %arg10[%c1_62, %c17_63, %c0_64], %49 {strides = array<i32>} : memref<18x18x64xbf16, #tpu.memory_space<vmem>>, vector<16x1x64xbf16>,
    %54 = vector.shape_cast %47 : vector<256x64xbf16> to vector<16x16x64xbf16>
    %c1_65 = arith.constant 1 : index
    %c1_66 = arith.constant 1 : index
    %c0_67 = arith.constant 0 : index
    %55 = vector.load %arg10[%c1_65, %c1_66, %c0_67] : memref<18x18x64xbf16, #tpu.memory_space<vmem>>, vector<16x16x64xbf16>
    tpu.vector_store %arg10[%c1_65, %c1_66, %c0_67], %54 {strides = array<i32>} : memref<18x18x64xbf16, #tpu.memory_space<vmem>>, vector<16x16x64xbf16>,
    %c0_68 = arith.constant 0 : index
    %c0_69 = arith.constant 0 : index
    %c0_70 = arith.constant 0 : index
    %56 = vector.load %arg10[%c0_68, %c0_69, %c0_70] : memref<18x18x64xbf16, #tpu.memory_space<vmem>>, vector<16x16x64xbf16>
    %57 = vector.shape_cast %56 : vector<16x16x64xbf16> to vector<256x64xbf16>
    %c0_71 = arith.constant 0 : index
    %c0_72 = arith.constant 0 : index
    %58 = vector.load %arg11[%c0_71, %c0_72] : memref<256x576xbf16, #tpu.memory_space<vmem>>, vector<256x64xbf16>
    tpu.vector_store %arg11[%c0_71, %c0_72], %57 {strides = array<i32>} : memref<256x576xbf16, #tpu.memory_space<vmem>>, vector<256x64xbf16>,
    %c0_73 = arith.constant 0 : index
    %c1_74 = arith.constant 1 : index
    %c0_75 = arith.constant 0 : index
    %59 = vector.load %arg10[%c0_73, %c1_74, %c0_75] : memref<18x18x64xbf16, #tpu.memory_space<vmem>>, vector<16x16x64xbf16>
    %60 = vector.shape_cast %59 : vector<16x16x64xbf16> to vector<256x64xbf16>
    %c0_76 = arith.constant 0 : index
    %c64_77 = arith.constant 64 : index
    %61 = vector.load %arg11[%c0_76, %c64_77] : memref<256x576xbf16, #tpu.memory_space<vmem>>, vector<256x64xbf16>
    tpu.vector_store %arg11[%c0_76, %c64_77], %60 {strides = array<i32>} : memref<256x576xbf16, #tpu.memory_space<vmem>>, vector<256x64xbf16>,
    %c0_78 = arith.constant 0 : index
    %c2_79 = arith.constant 2 : index
    %c0_80 = arith.constant 0 : index
    %62 = vector.load %arg10[%c0_78, %c2_79, %c0_80] : memref<18x18x64xbf16, #tpu.memory_space<vmem>>, vector<16x16x64xbf16>
    %63 = vector.shape_cast %62 : vector<16x16x64xbf16> to vector<256x64xbf16>
    %c0_81 = arith.constant 0 : index
    %c128_82 = arith.constant 128 : index
    %64 = vector.load %arg11[%c0_81, %c128_82] : memref<256x576xbf16, #tpu.memory_space<vmem>>, vector<256x64xbf16>
    tpu.vector_store %arg11[%c0_81, %c128_82], %63 {strides = array<i32>} : memref<256x576xbf16, #tpu.memory_space<vmem>>, vector<256x64xbf16>,
    %c1_83 = arith.constant 1 : index
    %c0_84 = arith.constant 0 : index
    %c0_85 = arith.constant 0 : index
    %65 = vector.load %arg10[%c1_83, %c0_84, %c0_85] : memref<18x18x64xbf16, #tpu.memory_space<vmem>>, vector<16x16x64xbf16>
    %66 = vector.shape_cast %65 : vector<16x16x64xbf16> to vector<256x64xbf16>
    %c0_86 = arith.constant 0 : index
    %c192_87 = arith.constant 192 : index
    %67 = vector.load %arg11[%c0_86, %c192_87] : memref<256x576xbf16, #tpu.memory_space<vmem>>, vector<256x64xbf16>
    tpu.vector_store %arg11[%c0_86, %c192_87], %66 {strides = array<i32>} : memref<256x576xbf16, #tpu.memory_space<vmem>>, vector<256x64xbf16>,
    %c1_88 = arith.constant 1 : index
    %c1_89 = arith.constant 1 : index
    %c0_90 = arith.constant 0 : index
    %68 = vector.load %arg10[%c1_88, %c1_89, %c0_90] : memref<18x18x64xbf16, #tpu.memory_space<vmem>>, vector<16x16x64xbf16>
    %69 = vector.shape_cast %68 : vector<16x16x64xbf16> to vector<256x64xbf16>
    %c0_91 = arith.constant 0 : index
    %c256_92 = arith.constant 256 : index
    %70 = vector.load %arg11[%c0_91, %c256_92] : memref<256x576xbf16, #tpu.memory_space<vmem>>, vector<256x64xbf16>
    tpu.vector_store %arg11[%c0_91, %c256_92], %69 {strides = array<i32>} : memref<256x576xbf16, #tpu.memory_space<vmem>>, vector<256x64xbf16>,
    %c1_93 = arith.constant 1 : index
    %c2_94 = arith.constant 2 : index
    %c0_95 = arith.constant 0 : index
    %71 = vector.load %arg10[%c1_93, %c2_94, %c0_95] : memref<18x18x64xbf16, #tpu.memory_space<vmem>>, vector<16x16x64xbf16>
    %72 = vector.shape_cast %71 : vector<16x16x64xbf16> to vector<256x64xbf16>
    %c0_96 = arith.constant 0 : index
    %c320_97 = arith.constant 320 : index
    %73 = vector.load %arg11[%c0_96, %c320_97] : memref<256x576xbf16, #tpu.memory_space<vmem>>, vector<256x64xbf16>
    tpu.vector_store %arg11[%c0_96, %c320_97], %72 {strides = array<i32>} : memref<256x576xbf16, #tpu.memory_space<vmem>>, vector<256x64xbf16>,
    %c2_98 = arith.constant 2 : index
    %c0_99 = arith.constant 0 : index
    %c0_100 = arith.constant 0 : index
    %74 = vector.load %arg10[%c2_98, %c0_99, %c0_100] : memref<18x18x64xbf16, #tpu.memory_space<vmem>>, vector<16x16x64xbf16>
    %75 = vector.shape_cast %74 : vector<16x16x64xbf16> to vector<256x64xbf16>
    %c0_101 = arith.constant 0 : index
    %c384_102 = arith.constant 384 : index
    %76 = vector.load %arg11[%c0_101, %c384_102] : memref<256x576xbf16, #tpu.memory_space<vmem>>, vector<256x64xbf16>
    tpu.vector_store %arg11[%c0_101, %c384_102], %75 {strides = array<i32>} : memref<256x576xbf16, #tpu.memory_space<vmem>>, vector<256x64xbf16>,
    %c2_103 = arith.constant 2 : index
    %c1_104 = arith.constant 1 : index
    %c0_105 = arith.constant 0 : index
    %77 = vector.load %arg10[%c2_103, %c1_104, %c0_105] : memref<18x18x64xbf16, #tpu.memory_space<vmem>>, vector<16x16x64xbf16>
    %78 = vector.shape_cast %77 : vector<16x16x64xbf16> to vector<256x64xbf16>
    %c0_106 = arith.constant 0 : index
    %c448_107 = arith.constant 448 : index
    %79 = vector.load %arg11[%c0_106, %c448_107] : memref<256x576xbf16, #tpu.memory_space<vmem>>, vector<256x64xbf16>
    tpu.vector_store %arg11[%c0_106, %c448_107], %78 {strides = array<i32>} : memref<256x576xbf16, #tpu.memory_space<vmem>>, vector<256x64xbf16>,
    %c2_108 = arith.constant 2 : index
    %c2_109 = arith.constant 2 : index
    %c0_110 = arith.constant 0 : index
    %80 = vector.load %arg10[%c2_108, %c2_109, %c0_110] : memref<18x18x64xbf16, #tpu.memory_space<vmem>>, vector<16x16x64xbf16>
    %81 = vector.shape_cast %80 : vector<16x16x64xbf16> to vector<256x64xbf16>
    %c0_111 = arith.constant 0 : index
    %c512_112 = arith.constant 512 : index
    %82 = vector.load %arg11[%c0_111, %c512_112] : memref<256x576xbf16, #tpu.memory_space<vmem>>, vector<256x64xbf16>
    tpu.vector_store %arg11[%c0_111, %c512_112], %81 {strides = array<i32>} : memref<256x576xbf16, #tpu.memory_space<vmem>>, vector<256x64xbf16>,
    %c0_113 = arith.constant 0 : index
    %c0_114 = arith.constant 0 : index
    %83 = vector.load %arg11[%c0_113, %c0_114] : memref<256x576xbf16, #tpu.memory_space<vmem>>, vector<256x576xbf16>
    %c0_115 = arith.constant 0 : index
    %c0_116 = arith.constant 0 : index
    %84 = vector.load %arg5[%c0_115, %c0_116] : memref<576x128xbf16, #tpu.memory_space<vmem>>, vector<576x128xbf16>
    %cst_117 = arith.constant dense<0.000000e+00> : vector<256x128xf32>
    %85 = tpu.matmul %83, %84, %cst_117 {dimension_numbers = #tpu.dot_dimension_numbers<[1], [0], [0], [1], [0, 0, 1, 1], [], []>} : vector<256x576xbf16>, vector<576x128xbf16>, vector<256x128xf32> -> vector<256x128xf32>
    %c0_118 = arith.constant 0 : index
    %c0_119 = arith.constant 0 : index
    %86 = vector.load %arg6[%c0_118, %c0_119] : memref<1x128xf32, #tpu.memory_space<vmem>>, vector<1x128xf32>
    %87 = vector.broadcast %86 : vector<1x128xf32> to vector<256x128xf32>
    %88 = arith.mulf %85, %87 : vector<256x128xf32>
    %c0_120 = arith.constant 0 : index
    %c0_121 = arith.constant 0 : index
    %89 = vector.load %arg7[%c0_120, %c0_121] : memref<1x128xf32, #tpu.memory_space<vmem>>, vector<1x128xf32>
    %90 = vector.broadcast %89 : vector<1x128xf32> to vector<256x128xf32>
    %91 = arith.addf %88, %90 : vector<256x128xf32>
    %c0_122 = arith.constant 0 : index
    %c256_123 = arith.constant 256 : index
    %92 = vector.load %arg9[%c0_122, %c256_123] : memref<256x576xbf16, #tpu.memory_space<vmem>>, vector<256x64xbf16>
    %93 = arith.extf %92 : vector<256x64xbf16> to vector<256x64xf32>
    %cst_124 = arith.constant 0.000000e+00 : f32
    %94 = vector.broadcast %cst_124 : f32 to vector<256x64xf32>
    %95 = tpu.concatenate %93, %94 in 1 : vector<256x64xf32>, vector<256x64xf32> -> vector<256x128xf32>
    %96 = arith.addf %91, %95 : vector<256x128xf32>
    %cst_125 = arith.constant 0.000000e+00 : f32
    %97 = vector.broadcast %cst_125 : f32 to vector<256x128xf32>
    %98 = arith.maximumf %96, %97 : vector<256x128xf32>
    %99 = arith.truncf %98 : vector<256x128xf32> to vector<256x128xbf16>
    %c0_126 = arith.constant 0 : index
    %c0_127 = arith.constant 0 : index
    %100 = vector.load %arg8[%c0_126, %c0_127] : memref<256x128xbf16, #tpu.memory_space<vmem>>, vector<256x128xbf16>
    tpu.vector_store %arg8[%c0_126, %c0_127], %99 {strides = array<i32>} : memref<256x128xbf16, #tpu.memory_space<vmem>>, vector<256x128xbf16>,
    return
  }
  func.func @transform_0(%arg0: i32) -> (i32, i32, i32, i32) {
    %c0_i32 = arith.constant 0 : i32
    %c0_i32_0 = arith.constant 0 : i32
    %c0_i32_1 = arith.constant 0 : i32
    %c0_i32_2 = arith.constant 0 : i32
    return %arg0, %c0_i32, %c0_i32_0, %c0_i32_1 : i32, i32, i32, i32
  }
  func.func @transform_1(%arg0: i32) -> (i32, i32) {
    %c0_i32 = arith.constant 0 : i32
    %c0_i32_0 = arith.constant 0 : i32
    %c0_i32_1 = arith.constant 0 : i32
    return %c0_i32, %c0_i32_0 : i32, i32
  }
  func.func @transform_2(%arg0: i32) -> (i32, i32) {
    %c0_i32 = arith.constant 0 : i32
    %c0_i32_0 = arith.constant 0 : i32
    %c0_i32_1 = arith.constant 0 : i32
    return %c0_i32, %c0_i32_0 : i32, i32
  }
  func.func @transform_3(%arg0: i32) -> (i32, i32) {
    %c0_i32 = arith.constant 0 : i32
    %c0_i32_0 = arith.constant 0 : i32
    %c0_i32_1 = arith.constant 0 : i32
    return %c0_i32, %c0_i32_0 : i32, i32
  }
  func.func @transform_4(%arg0: i32) -> (i32, i32) {
    %c0_i32 = arith.constant 0 : i32
    %c0_i32_0 = arith.constant 0 : i32
    %c0_i32_1 = arith.constant 0 : i32
    return %c0_i32, %c0_i32_0 : i32, i32
  }
  func.func @transform_5(%arg0: i32) -> (i32, i32) {
    %c0_i32 = arith.constant 0 : i32
    %c0_i32_0 = arith.constant 0 : i32
    %c0_i32_1 = arith.constant 0 : i32
    return %c0_i32, %c0_i32_0 : i32, i32
  }
  func.func @transform_6(%arg0: i32) -> (i32, i32) {
    %c0_i32 = arith.constant 0 : i32
    %c0_i32_0 = arith.constant 0 : i32
    %c0_i32_1 = arith.constant 0 : i32
    return %c0_i32, %c0_i32_0 : i32, i32
  }
  func.func @transform_7(%arg0: i32) -> (i32, i32) {
    %c0_i32 = arith.constant 0 : i32
    %c0_i32_0 = arith.constant 0 : i32
    return %arg0, %c0_i32 : i32, i32
  }
}

</mosaic_0001>

<bundles_post_ra>
// kernel: _lambda_.1
= control target key start
LH: loop header
LB: loop body
LE: loop exit
PB: predicated region body
PF: predicated region fallthrough
CT: control target
= control target key end

     0   :  { %s10983_s24 = smov 0   ;;  %s13888_s0 = inlined_call_operand.vmem [shape: bf16[2,18,18,64], index: 0, kind: input, shape index: {}]   ;;  %s13889_s1 = inlined_call_operand.vmem [shape: bf16[576,64], index: 1, kind: input, shape index: {}]   ;;  %s13890_s2 = inlined_call_operand.vmem [shape: f32[1,64], index: 2, kind: input, shape index: {}]   ;;  %s13891_s3 = inlined_call_operand.vmem [shape: f32[1,64], index: 3, kind: input, shape index: {}]   ;;  %s13892_s4 = inlined_call_operand.vmem [shape: bf16[576,128], index: 4, kind: input, shape index: {}]   ;;  %s13893_s5 = inlined_call_operand.vmem [shape: f32[1,128], index: 5, kind: input, shape index: {}]   ;;  %s13894_s6 = inlined_call_operand.vmem [shape: f32[1,128], index: 6, kind: input, shape index: {}]   ;;  %s13895_s7 = inlined_call_operand.vmem [shape: bf16[512,128], index: 7, kind: output, shape index: {}]  }
   0x1 LB: > { %s10989_s25 = sadd.s32 4294967295, %s10939_s24   ;;  %p9205_p0 = scmp.ge.s32.totalorder %s10939_s24, 1  ;;  %s10939_s24 = sphi %s10983_s24, %s17_s24  }
   0x2   : > { %p237_p1 = scmp.lt.s32.totalorder %s10939_s24, 3 }
   0x4   : > { %p238_p2 = pnand %p9205_p0, %p237_p1 }
   0x6   : > { %241 = sbr.rel (%p238_p2) target bundleno = 1173 (0x495), region = 48 }
   0xd   : > { %p269_p3 = scmp.lt.s32.totalorder %s10989_s25, 1  ;;  %v10777_v0 = vld [vmem:[%s13889_s1 + $0x40] sm:$0xff]   ;;  %vm474_vm0 = vsmask.f32 3328  ;;  %vm475_vm1 = vsmask.f32 7440 }
   0xe   : > { %v10778_v1 = vld [vmem:[%s13889_s1] sm:$0xff]   ;;  %10182 = vmatprep.subr.bf16.mxu0 %v10777_v0  ;;  %v10779_v2 = vld [vmem:[%s13889_s1 + $0x48] sm:$0xff]   ;;  %v10781_v4 = vld [vmem:[%s13889_s1 + $0x50] sm:$0xff]   ;;  %s10941_s18 = smov 64   ;;  %vm409_vm3 = vcmask 523264   ;;  %vm1070_vm4 = vcmask 1042432  }
   0xf   : > { %s270_s26 = scalar_select %p269_p3, %s10989_s25, 1  ;;  %10183 = vmatpush3.bf16.msra.mxu0 %v10778_v1  ;;  %v10780_v3 = vld [vmem:[%s13889_s1 + $0x8] sm:$0xff]   ;;  %vm11028_vm2 = vmor %vm474_vm0, %vm475_vm1  ;;  %vm1071_vm5 = vcmask 1046532   ;;  %vm957_vm7 = vcmask 1048064   ;;  %vm4279_vm8 = vcmask 516096   ;;  %vm4276_vm13 = vcmask 519168  }
  0x10   : > { %10184 = vmatprep.subr.bf16.mxu0 %v10779_v2  ;;  %vm11243_vm6 = vmor %vm1070_vm4, %vm1071_vm5  ;;  %vm4287_vm9 = vsmask.f32 256  ;;  %vm4337_vm10 = vsmask.f32 7938  ;;  %vm4467_vm14 = vsmask.f32 4368 }
  0x11   : > { %s10750_s8 = smul.u32 216, %s270_s26  ;;  %vm12115_vm11 = vmand %vm4279_vm8, %vm4287_vm9 }
  0x12   : > { %vm12123_vm12 = vmand %vm4279_vm8, %vm4337_vm10 }
  0x13   : > { %s11010_s15 = scalar_lea.vmem %s13888_s0, %s10750_s8  ;;  %10185 = vmatpush3.bf16.msra.mxu0 %v10780_v3  ;;  %vm12335_vm15 = vmand %vm4276_vm13, %vm4337_vm10 }
  0x14   : > { %v10761_v5 = vld [vmem:[%s11010_s15 + $0xc] sm:$0xff]   ;;  %v10762_v6 = vld [vmem:[%s11010_s15 + $0x18] sm:$0xff]   ;;  %v426_v7 = vld [vmem:[%s11010_s15] sm:$0xf]  ;;  %10186 = vmatprep.subr.bf16.mxu0 %v10781_v4 }
  0x15   : > { %1378 = vrot.lane.b32.xlu0 %v10761_v5, %s10941_s18  ;;  %v427_v8 = vld [vmem:[%s11010_s15 + $0x4] sm:$0xf]  ;;  %v428_v9 = vld [vmem:[%s11010_s15 + $0x8] sm:$0x1]  ;;  %1380 = vrot.lane.b32.xlu1 %v10762_v6, %s10941_s18  ;;  %v478_v10 = vshrl.u32 %v426_v7, 16  ;;  %v481_v11 = vshll.u32 %v426_v7, 16  ;;  %vm12344_vm0 = vmor %vm4287_vm9, %vm4467_vm14 }
  0x16   : > { %v487_v12 = vshll.u32 %v427_v8, 16  ;;  %v491_v13 = vshrl.u32 %v427_v8, 16  ;;  %v429_v14 = vld [vmem:[%s11010_s15 + $0xc] sm:$0xf]  ;;  %v497_v15 = vshll.u32 %v428_v9, 16  ;;  %v10763_v52 = vld [vmem:[%s11010_s15 + $0x24] sm:$0xff]  }
  0x17   : > { %v430_v16 = vld [vmem:[%s11010_s15 + $0x10] sm:$0xf]  ;;  %v431_v17 = vld [vmem:[%s11010_s15 + $0x14] sm:$0x1]  ;;  %v502_v18 = vshrl.u32 %v429_v14, 16  ;;  %v480_v19 = vrot.slane %v478_v10, 4 }
  0x18   : > { %v483_v20 = vrot.slane %v481_v11, 5  ;;  %v489_v21 = vrot.slane %v487_v12, 5  ;;  %v493_v22 = vrot.slane %v491_v13, 4  ;;  %v499_v23 = vrot.slane %v497_v15, 5  ;;  %v432_v31 = vld [vmem:[%s11010_s15 + $0x18] sm:$0xf] }
  0x19   : > { %v504_v24 = vrot.slane %v502_v18, 4  ;;  %v505_v25 = vshll.u32 %v429_v14, 16  ;;  %v511_v26 = vshll.u32 %v430_v16, 16  ;;  %v515_v29 = vshrl.u32 %v430_v16, 16  ;;  %v433_v35 = vld [vmem:[%s11010_s15 + $0x1c] sm:$0xf] }
  0x1a   : > { %v484_v27 = vor.u32 %v483_v20, %v480_v19  ;;  %v494_v28 = vor.u32 %v493_v22, %v489_v21  ;;  %v521_v30 = vshll.u32 %v431_v17, 16  ;;  %v434_v36 = vld [vmem:[%s11010_s15 + $0x20] sm:$0x1]  ;;  %v526_v42 = vshrl.u32 %v432_v31, 16  ;;  %v435_v49 = vld [vmem:[%s11010_s15 + $0x24] sm:$0xf] }
  0x1b   : > { %v507_v33 = vrot.slane %v505_v25, 5  ;;  %v513_v34 = vrot.slane %v511_v26, 5  ;;  %v517_v39 = vrot.slane %v515_v29, 4  ;;  %v529_v43 = vshll.u32 %v432_v31, 16  ;;  %v436_v55 = vld [vmem:[%s11010_s15 + $0x28] sm:$0xf] }
  0x1c   : > { %v485_v37 = vrot.slane %v484_v27, 4  ;;  %v495_v38 = vrot.slane %v494_v28, 4  ;;  %v523_v40 = vrot.slane %v521_v30, 5  ;;  %v535_v44 = vshll.u32 %v433_v35, 16  ;;  %v437_v62 = vld [vmem:[%s11010_s15 + $0x2c] sm:$0x1] }
  0x1d   : > { %v508_v41 = vor.u32 %v507_v33, %v504_v24  ;;  %v518_v47 = vor.u32 %v517_v39, %v513_v34  ;;  %v539_v48 = vshrl.u32 %v433_v35, 16  ;;  %v528_v53 = vrot.slane %v526_v42, 4  ;;  %v438_v5 = vld [vmem:[%s11010_s15 + $0x30] sm:$0xf]  ;;  %v439_v6 = vld [vmem:[%s11010_s15 + $0x34] sm:$0xf] }
  0x1e   : > { %v490_v45 = vsel %vm11028_vm2, %v485_v37, %v489_v21  ;;  %v500_v46 = vsel %vm11028_vm2, %v495_v38, %v499_v23  ;;  %v531_v54 = vrot.slane %v529_v43, 5  ;;  %v537_v57 = vrot.slane %v535_v44, 5  ;;  %v10764_v9 = vld [vmem:[%s11010_s15 + $0x30] sm:$0xff]   ;;  %v440_v18 = vld [vmem:[%s11010_s15 + $0x38] sm:$0x1]  ;;  %v10765_v37 = vld [vmem:[%s11010_s15 + $0x3c] sm:$0xff]  }
  0x1f   : > { %v9225_v50 = vcombine.low %v490_v45, %v500_v46  ;;  %v509_v51 = vrot.slane %v508_v41, 4  ;;  %v519_v56 = vrot.slane %v518_v47, 4  ;;  %v541_v58 = vrot.slane %v539_v48, 4  ;;  %v441_v21 = vld [vmem:[%s11010_s15 + $0x3c] sm:$0xf] }
  0x20   : > { %v545_v59 = vshll.u32 %v434_v36, 16  ;;  %v532_v61 = vor.u32 %v531_v54, %v528_v53  ;;  %v550_v63 = vshrl.u32 %v435_v49, 16  ;;  %v553_v0 = vshll.u32 %v435_v49, 16  ;;  %v442_v26 = vld [vmem:[%s11010_s15 + $0x40] sm:$0xf] }
  0x21   : > { %909 = vrot.lane.b32.xlu0 %v9225_v50, %s10941_s18  ;;  %v514_v60 = vsel %vm11028_vm2, %v509_v51, %v513_v34  ;;  %v524_v1 = vsel %vm11028_vm2, %v519_v56, %v523_v40  ;;  %v542_v2 = vor.u32 %v541_v58, %v537_v57  ;;  %v559_v4 = vshll.u32 %v436_v55, 16  ;;  %v443_v39 = vld [vmem:[%s11010_s15 + $0x44] sm:$0x1]  ;;  %v444_v46 = vld [vmem:[%s11010_s15 + $0x48] sm:$0xf] }
  0x22   : > { %v547_v3 = vrot.slane %v545_v59, 5  ;;  %v9226_v7 = vcombine.low %v514_v60, %v524_v1  ;;  %v533_v8 = vrot.slane %v532_v61, 4  ;;  %v552_v10 = vrot.slane %v550_v63, 4  ;;  %v10766_v58 = vld [vmem:[%s11010_s15 + $0x48] sm:$0xff]   ;;  %v446_v61 = vld [vmem:[%s11010_s15 + $0x50] sm:$0x1] }
  0x23   : > { %v555_v11 = vrot.slane %v553_v0, 5  ;;  %v543_v12 = vrot.slane %v542_v2, 4  ;;  %v561_v13 = vrot.slane %v559_v4, 5  ;;  %v563_v14 = vshrl.u32 %v436_v55, 16  ;;  %v445_v55 = vld [vmem:[%s11010_s15 + $0x4c] sm:$0xf] }
  0x24   : > { %v569_v15 = vshll.u32 %v437_v62, 16  ;;  %911 = vrot.lane.b32.xlu1 %v9226_v7, %s10941_s18  ;;  %v538_v16 = vsel %vm11028_vm2, %v533_v8, %v537_v57  ;;  %v574_v19 = vshrl.u32 %v438_v5, 16  ;;  %v577_v20 = vshll.u32 %v438_v5, 16  ;;  %v447_v62 = vld [vmem:[%s11010_s15 + $0x54] sm:$0xf] }
  0x25   : > { %1382 = vrot.lane.b32.xlu0 %v10763_v52, %s10941_s18  ;;  %v556_v17 = vor.u32 %v555_v11, %v552_v10  ;;  %v548_v22 = vsel %vm11028_vm2, %v543_v12, %v547_v3  ;;  %v565_v23 = vrot.slane %v563_v14, 4  ;;  %v583_v25 = vshll.u32 %v439_v6, 16  ;;  %v10767_v8 = vld [vmem:[%s11010_s15 + $0x54] sm:$0xff]  }
  0x26   : > { %v571_v24 = vrot.slane %v569_v15, 5  ;;  %v9227_v27 = vcombine.low %v538_v16, %v548_v22  ;;  %v576_v29 = vrot.slane %v574_v19, 4  ;;  %v579_v30 = vrot.slane %v577_v20, 5  ;;  %v448_v12 = vld [vmem:[%s11010_s15 + $0x58] sm:$0xf] }
  0x27   : > { %v557_v28 = vrot.slane %v556_v17, 4  ;;  %v566_v31 = vor.u32 %v565_v23, %v561_v13  ;;  %v585_v33 = vrot.slane %v583_v25, 5  ;;  %v587_v34 = vshrl.u32 %v439_v6, 16  ;;  %v449_v17 = vld [vmem:[%s11010_s15 + $0x5c] sm:$0x1] }
  0x28   : > { %v593_v35 = vshll.u32 %v440_v18, 16  ;;  %913 = vrot.lane.b32.xlu1 %v9227_v27, %s10941_s18  ;;  %v580_v38 = vor.u32 %v579_v30, %v576_v29  ;;  %v598_v40 = vshrl.u32 %v441_v21, 16  ;;  %v601_v41 = vshll.u32 %v441_v21, 16  ;;  %v450_v18 = vld [vmem:[%s11010_s15 + $0x60] sm:$0xf] }
  0x29   : > { %1384 = vrot.lane.b32.xlu0 %v10764_v9, %s10941_s18  ;;  %v562_v36 = vsel %vm11028_vm2, %v557_v28, %v561_v13  ;;  %v567_v42 = vrot.slane %v566_v31, 4  ;;  %v589_v43 = vrot.slane %v587_v34, 4  ;;  %v607_v45 = vshll.u32 %v442_v26, 16  ;;  %v10768_v30 = vld [vmem:[%s11010_s15 + $0x60] sm:$0xff]  }
  0x2a   : > { %v595_v44 = vrot.slane %v593_v35, 5  ;;  %v581_v47 = vrot.slane %v580_v38, 4  ;;  %v600_v48 = vrot.slane %v598_v40, 4  ;;  %v603_v49 = vrot.slane %v601_v41, 5  ;;  %v452_v38 = vld [vmem:[%s11010_s15 + $0x68] sm:$0x1] }
  0x2b   : > { %v611_v50 = vshrl.u32 %v442_v26, 16  ;;  %v572_v51 = vsel %vm11028_vm2, %v567_v42, %v571_v24  ;;  %v590_v52 = vor.u32 %v589_v43, %v585_v33  ;;  %v609_v53 = vrot.slane %v607_v45, 5  ;;  %v10782_v43 = vld [vmem:[%s13889_s1 + $0x10] sm:$0xff]  }
  0x2c   : > { %v617_v54 = vshll.u32 %v443_v39, 16  ;;  %v9228_v56 = vcombine.low %v562_v36, %v572_v51  ;;  %v586_v57 = vsel %vm11028_vm2, %v581_v47, %v585_v33  ;;  %v604_v59 = vor.u32 %v603_v49, %v600_v48  ;;  %v451_v33 = vld [vmem:[%s11010_s15 + $0x64] sm:$0xf]  ;;  %v10769_v47 = vld [vmem:[%s11010_s15 + $0x6c] sm:$0xff]   ;;  %10187 = vmatpush3.bf16.msra.mxu0 %v10782_v43 }
  0x2d   : > { %1386 = vrot.lane.b32.xlu0 %v10765_v37, %s10941_s18  ;;  %v613_v60 = vrot.slane %v611_v50, 4  ;;  %v591_v63 = vrot.slane %v590_v52, 4  ;;  %v622_v1 = vshrl.u32 %v444_v46, 16  ;;  %v625_v2 = vshll.u32 %v444_v46, 16  ;;  %v453_v49 = vld [vmem:[%s11010_s15 + $0x6c] sm:$0xf] }
  0x2e   : > { %v619_v0 = vrot.slane %v617_v54, 5  ;;  %915 = vrot.lane.b32.xlu1 %v9228_v56, %s10941_s18  ;;  %v605_v3 = vrot.slane %v604_v59, 4  ;;  %v631_v5 = vshll.u32 %v445_v55, 16  ;;  %v635_v6 = vshrl.u32 %v445_v55, 16  ;;  %v454_v54 = vld [vmem:[%s11010_s15 + $0x70] sm:$0xf] }
  0x2f   : > { %v614_v4 = vor.u32 %v613_v60, %v609_v53  ;;  %v596_v7 = vsel %vm11028_vm2, %v591_v63, %v595_v44  ;;  %v624_v9 = vrot.slane %v622_v1, 4  ;;  %v627_v10 = vrot.slane %v625_v2, 5  ;;  %v10783_v55 = vld [vmem:[%s13889_s1 + $0x58] sm:$0xff]   ;;  %v455_v60 = vld [vmem:[%s11010_s15 + $0x74] sm:$0x1]  ;;  %v10785_v2 = vld [vmem:[%s13889_s1 + $0x60] sm:$0xff]  }
  0x30   : > { %v641_v11 = vshll.u32 %v446_v61, 16  ;;  %v9229_v13 = vcombine.low %v586_v57, %v596_v7  ;;  %v610_v14 = vsel %vm11028_vm2, %v605_v3, %v609_v53  ;;  %v633_v16 = vrot.slane %v631_v5, 5  ;;  %v10784_v61 = vld [vmem:[%s13889_s1 + $0x18] sm:$0xff]   ;;  %10188 = vmatprep.subr.bf16.mxu0 %v10783_v55 }
  0x31   : > { %1388 = vrot.lane.b32.xlu0 %v10766_v58, %s10941_s18  ;;  %v615_v15 = vrot.slane %v614_v4, 4  ;;  %v628_v19 = vor.u32 %v627_v10, %v624_v9  ;;  %v637_v20 = vrot.slane %v635_v6, 4  ;;  %v646_v22 = vshrl.u32 %v447_v62, 16  ;;  %v456_v7 = vld [vmem:[%s11010_s15 + $0x78] sm:$0xf]  ;;  %10189 = vmatpush3.bf16.msra.mxu0 %v10784_v61 }
  0x32   : > { %v643_v21 = vrot.slane %v641_v11, 5  ;;  %917 = vrot.lane.b32.xlu1 %v9229_v13, %s10941_s18  ;;  %v649_v24 = vshll.u32 %v447_v62, 16  ;;  %v655_v25 = vshll.u32 %v448_v12, 16  ;;  %v659_v26 = vshrl.u32 %v448_v12, 16  ;;  %v10770_v12 = vld [vmem:[%s11010_s15 + $0x78] sm:$0xff]   ;;  %10190 = vmatprep.subr.bf16.mxu0 %v10785_v2 }
  0x33   : > { %v620_v23 = vsel %vm11028_vm2, %v615_v15, %v619_v0  ;;  %v629_v28 = vrot.slane %v628_v19, 4  ;;  %v638_v29 = vor.u32 %v637_v20, %v633_v16  ;;  %v648_v31 = vrot.slane %v646_v22, 4  ;;  %v457_v13 = vld [vmem:[%s11010_s15 + $0x7c] sm:$0xf] }
  0x34   : > { %v9230_v27 = vcombine.low %v610_v14, %v620_v23  ;;  %v651_v34 = vrot.slane %v649_v24, 5  ;;  %v657_v35 = vrot.slane %v655_v25, 5  ;;  %v661_v36 = vrot.slane %v659_v26, 4  ;;  %v10786_v23 = vld [vmem:[%s13889_s1 + $0x20] sm:$0xff]  }
  0x35   : > { %1390 = vrot.lane.b32.xlu0 %v10767_v8, %s10941_s18  ;;  %v665_v37 = vshll.u32 %v449_v17, 16  ;;  %v634_v39 = vsel %vm11028_vm2, %v629_v28, %v633_v16  ;;  %v639_v40 = vrot.slane %v638_v29, 4  ;;  %v670_v41 = vshrl.u32 %v450_v18, 16  ;;  %v459_v28 = vld [vmem:[%s11010_s15 + $0x84] sm:$0xf]  ;;  %v10787_v29 = vld [vmem:[%s13889_s1 + $0x68] sm:$0xff]   ;;  %10191 = vmatpush3.bf16.msra.mxu0 %v10786_v23 }
  0x36   : > { %v673_v42 = vshll.u32 %v450_v18, 16  ;;  %919 = vrot.lane.b32.xlu1 %v9230_v27, %s10941_s18  ;;  %v652_v44 = vor.u32 %v651_v34, %v648_v31  ;;  %v662_v45 = vor.u32 %v661_v36, %v657_v35  ;;  %v679_v48 = vshll.u32 %v451_v33, 16  ;;  %v458_v18 = vld [vmem:[%s11010_s15 + $0x80] sm:$0x1]  ;;  %v10788_v36 = vld [vmem:[%s13889_s1 + $0x28] sm:$0xff]   ;;  %10192 = vmatprep.subr.bf16.mxu0 %v10787_v29 }
  0x37   : > { %v667_v46 = vrot.slane %v665_v37, 5  ;;  %v644_v50 = vsel %vm11028_vm2, %v639_v40, %v643_v21  ;;  %v672_v51 = vrot.slane %v670_v41, 4  ;;  %v683_v53 = vshrl.u32 %v451_v33, 16  ;;  %v10771_v33 = vld [vmem:[%s11010_s15 + $0x84] sm:$0xff]  }
  0x38   : > { %v675_v52 = vrot.slane %v673_v42, 5  ;;  %v9231_v56 = vcombine.low %v634_v39, %v644_v50  ;;  %v653_v57 = vrot.slane %v652_v44, 4  ;;  %v663_v58 = vrot.slane %v662_v45, 4  ;;  %v460_v41 = vld [vmem:[%s11010_s15 + $0x88] sm:$0xf] }
  0x39   : > { %1392 = vrot.lane.b32.xlu0 %v10768_v30, %s10941_s18  ;;  %v681_v59 = vrot.slane %v679_v48, 5  ;;  %v685_v63 = vrot.slane %v683_v53, 4  ;;  %v689_v0 = vshll.u32 %v452_v38, 16  ;;  %v694_v1 = vshrl.u32 %v453_v49, 16  ;;  %v461_v50 = vld [vmem:[%s11010_s15 + $0x8c] sm:$0x1]  ;;  %10193 = vmatpush3.bf16.msra.mxu0 %v10788_v36 }
  0x3a   : > { %v676_v62 = vor.u32 %v675_v52, %v672_v51  ;;  %921 = vrot.lane.b32.xlu1 %v9231_v56, %s10941_s18  ;;  %v658_v3 = vsel %vm11028_vm2, %v653_v57, %v657_v35  ;;  %v668_v4 = vsel %vm11028_vm2, %v663_v58, %v667_v46  ;;  %v697_v5 = vshll.u32 %v453_v49, 16  ;;  %v10772_v49 = vld [vmem:[%s11010_s15 + $0x90] sm:$0xff]   ;;  %v467_v29 = vld [vmem:[%s11010_s15 + $0xa4] sm:$0x1] }
  0x3b   : > { %v703_v6 = vshll.u32 %v454_v54, 16  ;;  %v9232_v8 = vcombine.low %v658_v3, %v668_v4  ;;  %v686_v10 = vor.u32 %v685_v63, %v681_v59  ;;  %v691_v11 = vrot.slane %v689_v0, 5  ;;  %v462_v52 = vld [vmem:[%s11010_s15 + $0x90] sm:$0xf]  ;;  %v463_v57 = vld [vmem:[%s11010_s15 + $0x94] sm:$0xf] }
  0x3c   : > { %v677_v9 = vrot.slane %v676_v62, 4  ;;  %v696_v14 = vrot.slane %v694_v1, 4  ;;  %v699_v15 = vrot.slane %v697_v5, 5  ;;  %v707_v17 = vshrl.u32 %v454_v54, 16  ;;  %v10789_v58 = vld [vmem:[%s13889_s1 + $0x70] sm:$0xff]   ;;  %v10790_v63 = vld [vmem:[%s11010_s15] sm:$0xff]  }
  0x3d   : > { %1394 = vrot.lane.b32.xlu0 %v10769_v47, %s10941_s18  ;;  %v705_v16 = vrot.slane %v703_v6, 5  ;;  %v687_v20 = vrot.slane %v686_v10, 4  ;;  %v713_v21 = vshll.u32 %v455_v60, 16  ;;  %v718_v22 = vshrl.u32 %v456_v7, 16  ;;  %10194 = vmatprep.subr.bf16.mxu0 %v10789_v58  ;;  %v10791_v4 = vld [vmem:[%s13889_s1 + $0x30] sm:$0xff]   ;;  %410 = vst.msk [vmem:[#allocation2] sm:$0xff] %vm409_vm3, %v10790_v63 }
  0x3e   : > { %v682_v19 = vsel %vm11028_vm2, %v677_v9, %v681_v59  ;;  %923 = vrot.lane.b32.xlu1 %v9232_v8, %s10941_s18  ;;  %v700_v24 = vor.u32 %v699_v15, %v696_v14  ;;  %v709_v25 = vrot.slane %v707_v17, 4  ;;  %v721_v26 = vshll.u32 %v456_v7, 16  ;;  %v10773_v8 = vld [vmem:[%s11010_s15 + $0x9c] sm:$0xff]   ;;  %v464_v9 = vld [vmem:[%s11010_s15 + $0x98] sm:$0x1]  ;;  %10195 = vmatpush3.bf16.msra.mxu0 %v10791_v4  ;;  %v10792_v17 = vld [vmem:[%s11010_s15 + $0xc] sm:$0xff]  }
  0x3f   : > { %v727_v27 = vshll.u32 %v457_v13, 16  ;;  %v692_v30 = vsel %vm11028_vm2, %v687_v20, %v691_v11  ;;  %v715_v31 = vrot.slane %v713_v21, 5  ;;  %v720_v34 = vrot.slane %v718_v22, 4  ;;  %v465_v11 = vld [vmem:[%s11010_s15 + $0x9c] sm:$0xf]  ;;  %411 = vst.msk [vmem:[#allocation2 + $0x28] sm:$0xff] %vm409_vm3, %v10792_v17 }
  0x40   : > { %v731_v35 = vshrl.u32 %v457_v13, 16  ;;  %v9233_v37 = vcombine.low %v682_v19, %v692_v30  ;;  %v701_v38 = vrot.slane %v700_v24, 4  ;;  %v710_v39 = vor.u32 %v709_v25, %v705_v16  ;;  %v470_v58 = vld [vmem:[%s11010_s15 + $0xb0] sm:$0x1]  ;;  %v473_v17 = vld [vmem:[%s11010_s15 + $0xbc] sm:$0x1] }
  0x41   : > { %1396 = vrot.lane.b32.xlu0 %v10770_v12, %s10941_s18  ;;  %v723_v40 = vrot.slane %v721_v26, 5  ;;  %v729_v42 = vrot.slane %v727_v27, 5  ;;  %v737_v44 = vshll.u32 %v458_v18, 16  ;;  %v742_v45 = vshrl.u32 %v459_v28, 16 }
  0x42   : > { %v733_v43 = vrot.slane %v731_v35, 4  ;;  %925 = vrot.lane.b32.xlu1 %v9233_v37, %s10941_s18  ;;  %v706_v46 = vsel %vm11028_vm2, %v701_v38, %v705_v16  ;;  %v711_v47 = vrot.slane %v710_v39, 4  ;;  %v745_v51 = vshll.u32 %v459_v28, 16  ;;  %v466_v16 = vld [vmem:[%s11010_s15 + $0xa0] sm:$0xf]  ;;  %v10774_v28 = vld [vmem:[%s11010_s15 + $0xa8] sm:$0xff]  }
  0x43   : > { %v724_v48 = vor.u32 %v723_v40, %v720_v34  ;;  %v739_v54 = vrot.slane %v737_v44, 5  ;;  %v744_v55 = vrot.slane %v742_v45, 4  ;;  %v751_v56 = vshll.u32 %v460_v41, 16  ;;  %v468_v38 = vld [vmem:[%s11010_s15 + $0xa8] sm:$0xf]  ;;  %v10794_v39 = vld [vmem:[%s13889_s1 + $0x38] sm:$0xff]  }
  0x44   : > { %v734_v53 = vor.u32 %v733_v43, %v729_v42  ;;  %v716_v59 = vsel %vm11028_vm2, %v711_v47, %v715_v31  ;;  %v747_v61 = vrot.slane %v745_v51, 5  ;;  %v755_v62 = vshrl.u32 %v460_v41, 16  ;;  %v469_v44 = vld [vmem:[%s11010_s15 + $0xac] sm:$0xf]  ;;  %v10795_v45 = vld [vmem:[%s11010_s15 + $0x18] sm:$0xff]  }
  0x45   : > { %1398 = vrot.lane.b32.xlu0 %v10771_v33, %s10941_s18  ;;  %v725_v60 = vrot.slane %v724_v48, 4  ;;  %v9234_v0 = vcombine.low %v706_v46, %v716_v59  ;;  %v753_v2 = vrot.slane %v751_v56, 5  ;;  %v761_v3 = vshll.u32 %v461_v50, 16  ;;  %v10793_v33 = vld [vmem:[%s13889_s1 + $0x78] sm:$0xff]   ;;  %412 = vst.msk [vmem:[#allocation2 + $0x50] sm:$0xff] %vm409_vm3, %v10795_v45 }
  0x46   : > { %v735_v1 = vrot.slane %v734_v53, 4  ;;  %v748_v6 = vor.u32 %v747_v61, %v744_v55  ;;  %v757_v7 = vrot.slane %v755_v62, 4  ;;  %v766_v10 = vshrl.u32 %v462_v52, 16  ;;  %10196 = vmatprep.subr.bf16.mxu0 %v10793_v33  ;;  %v10775_v53 = vld [vmem:[%s11010_s15 + $0xb4] sm:$0xff]   ;;  %v10796_v55 = vld [vmem:[%s13889_s1 + $0x100] sm:$0xff]  }
  0x47   : > { %v730_v5 = vsel %vm11028_vm2, %v725_v60, %v729_v42  ;;  %927 = vrot.lane.b32.xlu1 %v9234_v0, %s10941_s18  ;;  %v763_v13 = vrot.slane %v761_v3, 5  ;;  %v769_v14 = vshll.u32 %v462_v52, 16  ;;  %v775_v15 = vshll.u32 %v463_v57, 16  ;;  %10197 = vmatpush3.bf16.msra.mxu0 %v10794_v39  ;;  %v10797_v61 = vld [vmem:[%s11010_s15 + $0x24] sm:$0xff]   ;;  %v10798_v3 = vld [vmem:[%s11010_s15 + $0x30] sm:$0xff]  }
  0x48   : > { %v740_v12 = vsel %vm11028_vm2, %v735_v1, %v739_v54  ;;  %v749_v19 = vrot.slane %v748_v6, 4  ;;  %v758_v20 = vor.u32 %v757_v7, %v753_v2  ;;  %v768_v21 = vrot.slane %v766_v10, 4  ;;  %10670 = vmatprep.subr.bf16.mxu0 %v10796_v55  ;;  %413 = vst.msk [vmem:[#allocation2 + $0x78] sm:$0xff] %vm409_vm3, %v10797_v61  ;;  %414 = vst.msk [vmem:[#allocation2 + $0xa0] sm:$0xff] %vm409_vm3, %v10798_v3  ;;  %v9515_v39 = vld [vmem:[%s11010_s15 + $0x20] sm:$0x1] }
  0x49   : > { %v9235_v18 = vcombine.low %v730_v5, %v740_v12  ;;  %1400 = vrot.lane.b32.xlu0 %v10772_v49, %s10941_s18  ;;  %v771_v22 = vrot.slane %v769_v14, 5  ;;  %v11171_v23 = vrot.slane %v775_v15, 5  ;;  %v779_v24 = vshrl.u32 %v463_v57, 16  ;;  %v10776_v14 = vld [vmem:[%s11010_s15 + $0xc0] sm:$0xff]  }
  0x4a   : > { %v785_v25 = vshll.u32 %v464_v9, 16  ;;  %v754_v26 = vsel %vm11028_vm2, %v749_v19, %v753_v2  ;;  %v759_v27 = vrot.slane %v758_v20, 4  ;;  %v790_v30 = vshrl.u32 %v465_v11, 16  ;;  %v471_v2 = vld [vmem:[%s11010_s15 + $0xb4] sm:$0xf]  ;;  %v10799_v9 = vld [vmem:[%s11010_s15 + $0x3c] sm:$0xff]  }
  0x4b   : > { %v793_v31 = vshll.u32 %v465_v11, 16  ;;  %929 = vrot.lane.b32.xlu1 %v9235_v18, %s10941_s18  ;;  %v772_v34 = vor.u32 %v771_v22, %v768_v21  ;;  %v781_v35 = vrot.slane %v779_v24, 4  ;;  %v799_v37 = vshll.u32 %v466_v16, 16  ;;  %415 = vst.msk [vmem:[#allocation2 + $0xc8] sm:$0xff] %vm409_vm3, %v10799_v9  ;;  %v10800_v20 = vld [vmem:[%s11010_s15 + $0x48] sm:$0xff]  }
  0x4c   : > { %v787_v36 = vrot.slane %v785_v25, 5  ;;  %v764_v40 = vsel %vm11028_vm2, %v759_v27, %v763_v13  ;;  %v792_v41 = vrot.slane %v790_v30, 4  ;;  %v803_v43 = vshrl.u32 %v466_v16, 16  ;;  %v9513_v25 = vld [vmem:[%s11010_s15 + $0x18] sm:$0xf]  ;;  %416 = vst.msk [vmem:[#allocation2 + $0xf0] sm:$0xff] %vm409_vm3, %v10800_v20 }
  0x4d   : > { %1402 = vrot.lane.b32.xlu0 %v10773_v8, %s10941_s18  ;;  %v795_v42 = vrot.slane %v793_v31, 5  ;;  %v9236_v46 = vcombine.low %v754_v26, %v764_v40  ;;  %v773_v47 = vrot.slane %v772_v34, 4  ;;  %v782_v48 = vor.u32 %v781_v35, %v11171_v23  ;;  %v472_v8 = vld [vmem:[%s11010_s15 + $0xb8] sm:$0xf]  ;;  %v9514_v31 = vld [vmem:[%s11010_s15 + $0x1c] sm:$0xf] }
  0x4e   : > { %v801_v49 = vrot.slane %v799_v37, 5  ;;  %v805_v51 = vrot.slane %v803_v43, 4  ;;  %v809_v52 = vshll.u32 %v467_v29, 16  ;;  %v814_v54 = vshrl.u32 %v468_v38, 16  ;;  %v10801_v26 = vld [vmem:[%s11010_s15 + $0x54] sm:$0xff]  }
  0x4f   : > { %v796_v50 = vor.u32 %v795_v42, %v792_v41  ;;  %931 = vrot.lane.b32.xlu1 %v9236_v46, %s10941_s18  ;;  %v778_v56 = vsel %vm11028_vm2, %v773_v47, %v11171_v23  ;;  %v783_v57 = vrot.slane %v782_v48, 4  ;;  %v817_v59 = vshll.u32 %v468_v38, 16  ;;  %417 = vst.msk [vmem:[#allocation2 + $0x118] sm:$0xff] %vm409_vm3, %v10801_v26  ;;  %v10802_v42 = vld [vmem:[%s11010_s15 + $0x60] sm:$0xff]   ;;  %v9385_v47 = vld [vmem:[%s11010_s15 + $0xc] sm:$0xe] }
  0x50   : > { %v823_v60 = vshll.u32 %v469_v44, 16  ;;  %v806_v63 = vor.u32 %v805_v51, %v801_v49  ;;  %v811_v0 = vrot.slane %v809_v52, 5  ;;  %v816_v1 = vrot.slane %v814_v54, 4  ;;  %v9386_v48 = vld [vmem:[%s11010_s15 + $0x10] sm:$0xf]  ;;  %418 = vst.msk [vmem:[#allocation2 + $0x140] sm:$0xff] %vm409_vm3, %v10802_v42 }
  0x51   : > { %1404 = vrot.lane.b32.xlu0 %v10774_v28, %s10941_s18  ;;  %v797_v62 = vrot.slane %v796_v50, 4  ;;  %v788_v4 = vsel %vm11028_vm2, %v783_v57, %v787_v36  ;;  %v819_v5 = vrot.slane %v817_v59, 5  ;;  %v827_v7 = vshrl.u32 %v469_v44, 16  ;;  %v10803_v54 = vld [vmem:[%s11010_s15 + $0x6c] sm:$0xff]   ;;  %v10804_v59 = vld [vmem:[%s11010_s15 + $0x78] sm:$0xff]  }
  0x52   : > { %v825_v6 = vrot.slane %v823_v60, 5  ;;  %v9237_v10 = vcombine.low %v778_v56, %v788_v4  ;;  %v807_v12 = vrot.slane %v806_v63, 4  ;;  %v833_v13 = vshll.u32 %v470_v58, 16  ;;  %419 = vst.msk [vmem:[#allocation2 + $0x168] sm:$0xff] %vm409_vm3, %v10803_v54  ;;  %420 = vst.msk [vmem:[#allocation2 + $0x190] sm:$0xff] %vm409_vm3, %v10804_v59 }
  0x53   : > { %v802_v11 = vsel %vm11028_vm2, %v797_v62, %v801_v49  ;;  %v820_v15 = vor.u32 %v819_v5, %v816_v1  ;;  %v829_v16 = vrot.slane %v827_v7, 4  ;;  %v838_v18 = vshrl.u32 %v471_v2, 16  ;;  %v9516_v1 = vld [vmem:[%s11010_s15 + $0x24] sm:$0xf]  ;;  %v9517_v7 = vld [vmem:[%s11010_s15 + $0x28] sm:$0xf] }
  0x54   : > { %v841_v19 = vshll.u32 %v471_v2, 16  ;;  %933 = vrot.lane.b32.xlu1 %v9237_v10, %s10941_s18  ;;  %v812_v21 = vsel %vm11028_vm2, %v807_v12, %v811_v0  ;;  %v835_v22 = vrot.slane %v833_v13, 5  ;;  %v847_v23 = vshll.u32 %v472_v8, 16  ;;  %v10805_v2 = vld [vmem:[%s13889_s1 + $0xc0] sm:$0xff]   ;;  %v9518_v12 = vld [vmem:[%s11010_s15 + $0x2c] sm:$0x1] }
  0x55   : > { %1406 = vrot.lane.b32.xlu0 %v10775_v53, %s10941_s18  ;;  %v851_v24 = vshrl.u32 %v472_v8, 16  ;;  %v9238_v27 = vcombine.low %v802_v11, %v812_v21  ;;  %v821_v28 = vrot.slane %v820_v15, 4  ;;  %v830_v29 = vor.u32 %v829_v16, %v825_v6  ;;  %v9387_v53 = vld [vmem:[%s11010_s15 + $0x14] sm:$0x1]  ;;  %v9388_v13 = vld [vmem:[%s11010_s15 + $0x18] sm:$0xe]  ;;  %10294 = vmatprep.subr.bf16.mxu1 %v10805_v2 }
  0x56   : > { %v840_v30 = vrot.slane %v838_v18, 4  ;;  %v843_v33 = vrot.slane %v841_v19, 5  ;;  %v849_v34 = vrot.slane %v847_v23, 5  ;;  %v857_v36 = vshll.u32 %v473_v17, 16  ;;  %v9389_v18 = vld [vmem:[%s11010_s15 + $0x1c] sm:$0xf] }
  0x57   : > { %v853_v35 = vrot.slane %v851_v24, 4  ;;  %v826_v37 = vsel %vm11028_vm2, %v821_v28, %v825_v6  ;;  %v831_v38 = vrot.slane %v830_v29, 4  ;;  %v2468_v40 = vshrl.u32 %v9513_v25, 16  ;;  %v10806_v19 = vld [vmem:[%s13889_s1 + $0x80] sm:$0xff]   ;;  %v9519_v29 = vld [vmem:[%s11010_s15 + $0x30] sm:$0xf] }
  0x58   : > { %v2471_v41 = vshll.u32 %v9513_v25, 16  ;;  %935 = vrot.lane.b32.xlu1 %v9238_v27, %s10941_s18  ;;  %v844_v43 = vor.u32 %v843_v33, %v840_v30  ;;  %v859_v45 = vrot.slane %v857_v36, 5  ;;  %v2477_v46 = vshll.u32 %v9514_v31, 16  ;;  %v9390_v24 = vld [vmem:[%s11010_s15 + $0x20] sm:$0x1]  ;;  %10295 = vmatpush3.bf16.msra.mxu1 %v10806_v19  ;;  %v10808_v30 = vld [vmem:[%s11010_s15 + $0x84] sm:$0xff]  }
  0x59   : > { %1408 = vrot.lane.b32.xlu0 %v10776_v14, %s10941_s18  ;;  %v854_v44 = vor.u32 %v853_v35, %v849_v34  ;;  %v836_v49 = vsel %vm11028_vm2, %v831_v38, %v835_v22  ;;  %v2470_v50 = vrot.slane %v2468_v40, 4  ;;  %v2481_v52 = vshrl.u32 %v9514_v31, 16  ;;  %v9520_v36 = vld [vmem:[%s11010_s15 + $0x34] sm:$0xf]  ;;  %421 = vst.msk [vmem:[#allocation2 + $0x1b8] sm:$0xff] %vm409_vm3, %v10808_v30 }
  0x5a   : > { %v2473_v51 = vrot.slane %v2471_v41, 5  ;;  %v9239_v55 = vcombine.low %v826_v37, %v836_v49  ;;  %v845_v56 = vrot.slane %v844_v43, 4  ;;  %v2479_v58 = vrot.slane %v2477_v46, 5  ;;  %v9521_v41 = vld [vmem:[%s11010_s15 + $0x38] sm:$0x1] }
  0x5b   : > { %v855_v57 = vrot.slane %v854_v44, 4  ;;  %v2483_v61 = vrot.slane %v2481_v52, 4  ;;  %v2487_v62 = vshll.u32 %v9515_v39, 16  ;;  %v13900_v63 = vmov 0  ;;  %v9391_v46 = vld [vmem:[%s11010_s15 + $0x24] sm:$0xe] }
  0x5c   : > { %v2474_v60 = vor.u32 %v2473_v51, %v2470_v50  ;;  %v13901_v63 = vsel %vm11243_vm6, 4294967295, %v13900_v63  ;;  %v9433_v0 = vrot.slane %v9385_v47, 9  ;;  %937 = vrot.lane.b32.xlu1 %v9239_v55, %s10941_s18  ;;  %v850_v3 = vsel %vm11028_vm2, %v845_v56, %v849_v34  ;;  %v10809_v47 = vld [vmem:[%s13889_s1 + $0xc8] sm:$0xff]  }
  0x5d   : > { %13902 = vst [vmem:[#allocation5_spill] sm:$0xff] %v13901_v63  ;;  %v860_v4 = vsel %vm11028_vm2, %v855_v57, %v859_v45  ;;  %v2052_v5 = vrot.slane %v9386_v48, 5  ;;  %v2055_v6 = vrot.slane %v9387_v53, 5  ;;  %v2484_v10 = vor.u32 %v2483_v61, %v2479_v58  ;;  %v9392_v52 = vld [vmem:[%s11010_s15 + $0x28] sm:$0xf]  ;;  %10296 = vmatprep.subr.bf16.mxu1 %v10809_v47 }
  0x5e   : > { %v9240_v8 = vcombine.low %v850_v3, %v860_v4  ;;  %v2475_v9 = vrot.slane %v2474_v60, 4  ;;  %v2489_v11 = vrot.slane %v2487_v62, 5  ;;  %v2492_v16 = vshrl.u32 %v9516_v1, 16  ;;  %v9393_v57 = vld [vmem:[%s11010_s15 + $0x2c] sm:$0x1] }
  0x5f   : > { %v2053_v14 = vsel %vm11243_vm6, %v9433_v0, %v2052_v5  ;;  %v2054_v15 = vrot.slane %v2052_v5, 4  ;;  %v2495_v17 = vshll.u32 %v9516_v1, 16  ;;  %v2485_v21 = vrot.slane %v2484_v10, 4  ;;  %v9522_v0 = vld [vmem:[%s11010_s15 + $0x3c] sm:$0xf]  ;;  %v10811_v1 = vld [vmem:[%s11010_s15 + $0x90] sm:$0xff]  }
  0x60   : > { %v2480_v20 = vsel %vm11028_vm2, %v2475_v9, %v2479_v58  ;;  %v2501_v22 = vshll.u32 %v9517_v7, 16  ;;  %v2505_v23 = vshrl.u32 %v9517_v7, 16  ;;  %939 = vrot.lane.b32.xlu1 %v9240_v8, %s10941_s18  ;;  %v2494_v26 = vrot.slane %v2492_v16, 4  ;;  %v10810_v58 = vld [vmem:[%s13889_s1 + $0x88] sm:$0xff]   ;;  %422 = vst.msk [vmem:[#allocation2 + $0x1e0] sm:$0xff] %vm409_vm3, %v10811_v1 }
  0x61   : > { %v2056_v25 = vsel %vm11243_vm6, %v2054_v15, %v2055_v6  ;;  %v2497_v27 = vrot.slane %v2495_v17, 5  ;;  %v2511_v28 = vshll.u32 %v9518_v12, 16  ;;  %v2490_v31 = vsel %vm11028_vm2, %v2485_v21, %v2489_v11  ;;  %v9523_v6 = vld [vmem:[%s11010_s15 + $0x40] sm:$0xf]  ;;  %10297 = vmatpush3.bf16.msra.mxu1 %v10810_v58  ;;  %v9524_v11 = vld [vmem:[%s11010_s15 + $0x44] sm:$0x1] }
  0x62   : > { %v9449_v33 = vcombine.low %v2053_v14, %v2056_v25  ;;  %v2503_v34 = vrot.slane %v2501_v22, 5  ;;  %v2507_v35 = vrot.slane %v2505_v23, 4  ;;  %v9561_v37 = vcombine.low %v2480_v20, %v2490_v31  ;;  %v9394_v16 = vld [vmem:[%s11010_s15 + $0x30] sm:$0xe]  ;;  %v9395_v17 = vld [vmem:[%s11010_s15 + $0x34] sm:$0xf] }
  0x63   : > { %v2498_v38 = vor.u32 %v2497_v27, %v2494_v26  ;;  %v2513_v39 = vrot.slane %v2511_v28, 5  ;;  %v9434_v40 = vrot.slane %v9388_v13, 9  ;;  %v2059_v43 = vrot.slane %v9389_v18, 5  ;;  %v9396_v22 = vld [vmem:[%s11010_s15 + $0x38] sm:$0x1]  ;;  %v10812_v28 = vld [vmem:[%s13889_s1 + $0xd0] sm:$0xff]  }
  0x64   : > { %v2508_v42 = vor.u32 %v2507_v35, %v2503_v34  ;;  %v2062_v44 = vrot.slane %v9390_v24, 5  ;;  %v2516_v45 = vshrl.u32 %v9519_v29, 16  ;;  %2899 = vrot.lane.b32.xlu0 %v9561_v37, %s10941_s18  ;;  %2210 = vrot.lane.b32.xlu1 %v9449_v33, %s10941_s18  ;;  %v2519_v49 = vshll.u32 %v9519_v29, 16  ;;  %v9525_v23 = vld [vmem:[%s11010_s15 + $0x48] sm:$0xf] }
  0x65   : > { %v2499_v48 = vrot.slane %v2498_v38, 4  ;;  %v2525_v50 = vshll.u32 %v9520_v36, 16  ;;  %v2529_v51 = vshrl.u32 %v9520_v36, 16  ;;  %v2060_v54 = vsel %vm11243_vm6, %v9434_v40, %v2059_v43  ;;  %10298 = vmatprep.subr.bf16.mxu1 %v10812_v28 }
  0x66   : > { %v2509_v53 = vrot.slane %v2508_v42, 4  ;;  %v2061_v55 = vrot.slane %v2059_v43, 4  ;;  %v2518_v56 = vrot.slane %v2516_v45, 4  ;;  %v2521_v60 = vrot.slane %v2519_v49, 5  ;;  %v9526_v42 = vld [vmem:[%s11010_s15 + $0x4c] sm:$0xf] }
  0x67   : > { %v2504_v59 = vsel %vm11028_vm2, %v2499_v48, %v2503_v34  ;;  %v2527_v61 = vrot.slane %v2525_v50, 5  ;;  %v2531_v62 = vrot.slane %v2529_v51, 4  ;;  %v2535_v4 = vshll.u32 %v9521_v41, 16  ;;  %v9527_v43 = vld [vmem:[%s11010_s15 + $0x50] sm:$0x1] }
  0x68   : > { %v2514_v2 = vsel %vm11028_vm2, %v2509_v53, %v2513_v39  ;;  %v2063_v3 = vsel %vm11243_vm6, %v2061_v55, %v2062_v44  ;;  %v9435_v5 = vrot.slane %v9391_v46, 9  ;;  %v2522_v9 = vor.u32 %v2521_v60, %v2518_v56  ;;  %v9397_v48 = vld [vmem:[%s11010_s15 + $0x3c] sm:$0xe]  ;;  %v10813_v49 = vld [vmem:[%s13889_s1 + $0x90] sm:$0xff]   ;;  %v9399_v55 = vld [vmem:[%s11010_s15 + $0x44] sm:$0x1] }
  0x69   : > { %v9562_v7 = vcombine.low %v2504_v59, %v2514_v2  ;;  %v9450_v8 = vcombine.low %v2060_v54, %v2063_v3  ;;  %v2532_v10 = vor.u32 %v2531_v62, %v2527_v61  ;;  %v2537_v12 = vrot.slane %v2535_v4, 5  ;;  %v9398_v54 = vld [vmem:[%s11010_s15 + $0x40] sm:$0xf]  ;;  %10299 = vmatpush3.bf16.msra.mxu1 %v10813_v49  ;;  %v9528_v2 = vld [vmem:[%s11010_s15 + $0x54] sm:$0xf] }
  0x6a   : > { %v2066_v13 = vrot.slane %v9392_v52, 5  ;;  %v2069_v14 = vrot.slane %v9393_v57, 5  ;;  %v2540_v15 = vshrl.u32 %v9522_v0, 16  ;;  %v2523_v18 = vrot.slane %v2522_v9, 4  ;;  %v10814_v56 = vld [vmem:[%s11010_s15 + $0x9c] sm:$0xff]  }
  0x6b   : > { %2901 = vrot.lane.b32.xlu0 %v9562_v7, %s10941_s18  ;;  %2212 = vrot.lane.b32.xlu1 %v9450_v8, %s10941_s18  ;;  %v2533_v19 = vrot.slane %v2532_v10, 4  ;;  %v2543_v20 = vshll.u32 %v9522_v0, 16  ;;  %v2549_v21 = vshll.u32 %v9523_v6, 16  ;;  %v2553_v27 = vshrl.u32 %v9523_v6, 16  ;;  %423 = vst.msk [vmem:[#allocation2 + $0x208] sm:$0xff] %vm409_vm3, %v10814_v56 }
  0x6c   : > { %v2067_v24 = vsel %vm11243_vm6, %v9435_v5, %v2066_v13  ;;  %v2068_v25 = vrot.slane %v2066_v13, 4  ;;  %v2542_v26 = vrot.slane %v2540_v15, 4  ;;  %v2528_v29 = vsel %vm11028_vm2, %v2523_v18, %v2527_v61  ;;  %v9529_v7 = vld [vmem:[%s11010_s15 + $0x58] sm:$0xf] }
  0x6d   : > { %v2538_v30 = vsel %vm11028_vm2, %v2533_v19, %v2537_v12  ;;  %v2545_v31 = vrot.slane %v2543_v20, 5  ;;  %v2551_v33 = vrot.slane %v2549_v21, 5  ;;  %v2555_v36 = vrot.slane %v2553_v27, 4  ;;  %v9530_v12 = vld [vmem:[%s11010_s15 + $0x5c] sm:$0x1] }
  0x6e   : > { %v9563_v34 = vcombine.low %v2528_v29, %v2538_v30  ;;  %v2070_v35 = vsel %vm11243_vm6, %v2068_v25, %v2069_v14  ;;  %v2559_v37 = vshll.u32 %v9524_v11, 16  ;;  %v9436_v40 = vrot.slane %v9394_v16, 9  ;;  %v10815_v18 = vld [vmem:[%s13889_s1 + $0xd8] sm:$0xff]   ;;  %v9531_v25 = vld [vmem:[%s11010_s15 + $0x60] sm:$0xf] }
  0x6f   : > { %v9451_v38 = vcombine.low %v2067_v24, %v2070_v35  ;;  %v2546_v39 = vor.u32 %v2545_v31, %v2542_v26  ;;  %v2073_v41 = vrot.slane %v9395_v17, 5  ;;  %v2556_v44 = vor.u32 %v2555_v36, %v2551_v33  ;;  %v9400_v17 = vld [vmem:[%s11010_s15 + $0x48] sm:$0xe]  ;;  %v9402_v24 = vld [vmem:[%s11010_s15 + $0x50] sm:$0x1]  ;;  %10300 = vmatprep.subr.bf16.mxu1 %v10815_v18  ;;  %v10816_v31 = vld [vmem:[%s13889_s1 + $0x98] sm:$0xff]  }
  0x70   : > { %2903 = vrot.lane.b32.xlu0 %v9563_v34, %s10941_s18  ;;  %v2561_v45 = vrot.slane %v2559_v37, 5  ;;  %v2076_v46 = vrot.slane %v9396_v22, 5  ;;  %v2564_v47 = vshrl.u32 %v9525_v23, 16  ;;  %v2567_v53 = vshll.u32 %v9525_v23, 16  ;;  %v9401_v23 = vld [vmem:[%s11010_s15 + $0x4c] sm:$0xf]  ;;  %10301 = vmatpush3.bf16.msra.mxu1 %v10816_v31 }
  0x71   : > { %2214 = vrot.lane.b32.xlu1 %v9451_v38, %s10941_s18  ;;  %v2547_v50 = vrot.slane %v2546_v39, 4  ;;  %v2074_v51 = vsel %vm11243_vm6, %v9436_v40, %v2073_v41  ;;  %v2075_v52 = vrot.slane %v2073_v41, 4  ;;  %v2557_v57 = vrot.slane %v2556_v44, 4  ;;  %v9532_v30 = vld [vmem:[%s11010_s15 + $0x64] sm:$0xf]  ;;  %v10817_v37 = vld [vmem:[%s11010_s15 + $0xa8] sm:$0xff]  }
  0x72   : > { %v2566_v58 = vrot.slane %v2564_v47, 4  ;;  %v2573_v59 = vshll.u32 %v9526_v42, 16  ;;  %v2577_v60 = vshrl.u32 %v9526_v42, 16  ;;  %v2569_v0 = vrot.slane %v2567_v53, 5  ;;  %424 = vst.msk [vmem:[#allocation2 + $0x230] sm:$0xff] %vm409_vm3, %v10817_v37 }
  0x73   : > { %v2552_v61 = vsel %vm11028_vm2, %v2547_v50, %v2551_v33  ;;  %v2077_v62 = vsel %vm11243_vm6, %v2075_v52, %v2076_v46  ;;  %v2583_v1 = vshll.u32 %v9527_v43, 16  ;;  %v2562_v3 = vsel %vm11028_vm2, %v2557_v57, %v2561_v45  ;;  %v9533_v46 = vld [vmem:[%s11010_s15 + $0x68] sm:$0x1]  ;;  %v9404_v52 = vld [vmem:[%s11010_s15 + $0x58] sm:$0xf] }
  0x74   : > { %v9452_v4 = vcombine.low %v2074_v51, %v2077_v62  ;;  %v2575_v5 = vrot.slane %v2573_v59, 5  ;;  %v2579_v6 = vrot.slane %v2577_v60, 4  ;;  %v9564_v8 = vcombine.low %v2552_v61, %v2562_v3  ;;  %v9403_v51 = vld [vmem:[%s11010_s15 + $0x54] sm:$0xe]  ;;  %v9405_v61 = vld [vmem:[%s11010_s15 + $0x5c] sm:$0x1] }
  0x75   : > { %v2570_v9 = vor.u32 %v2569_v0, %v2566_v58  ;;  %v2585_v10 = vrot.slane %v2583_v1, 5  ;;  %v9437_v11 = vrot.slane %v9397_v48, 9  ;;  %v2080_v14 = vrot.slane %v9398_v54, 5  ;;  %v10818_v62 = vld [vmem:[%s13889_s1 + $0xe0] sm:$0xff]  }
  0x76   : > { %2216 = vrot.lane.b32.xlu1 %v9452_v4, %s10941_s18  ;;  %v2580_v13 = vor.u32 %v2579_v6, %v2575_v5  ;;  %v2083_v15 = vrot.slane %v9399_v55, 5  ;;  %v2588_v16 = vshrl.u32 %v9528_v2, 16  ;;  %2905 = vrot.lane.b32.xlu0 %v9564_v8, %s10941_s18  ;;  %v2591_v20 = vshll.u32 %v9528_v2, 16  ;;  %v974_v4 = vld [vmem:[%s11010_s15] sm:$0xe] }
  0x77   : > { %v2571_v19 = vrot.slane %v2570_v9, 4  ;;  %v2597_v21 = vshll.u32 %v9529_v7, 16  ;;  %v2601_v22 = vshrl.u32 %v9529_v7, 16  ;;  %v2081_v27 = vsel %vm11243_vm6, %v9437_v11, %v2080_v14  ;;  %v977_v11 = vld [vmem:[%s11010_s15 + $0xc] sm:$0xe]  ;;  %10302 = vmatprep.subr.bf16.mxu1 %v10818_v62 }
  0x78   : > { %v2581_v26 = vrot.slane %v2580_v13, 4  ;;  %v2082_v28 = vrot.slane %v2080_v14, 4  ;;  %v2590_v29 = vrot.slane %v2588_v16, 4  ;;  %v2593_v34 = vrot.slane %v2591_v20, 5  ;;  %v978_v16 = vld [vmem:[%s11010_s15 + $0x10] sm:$0xf] }
  0x79   : > { %v2576_v33 = vsel %vm11028_vm2, %v2571_v19, %v2575_v5  ;;  %v2599_v35 = vrot.slane %v2597_v21, 5  ;;  %v2603_v36 = vrot.slane %v2601_v22, 4  ;;  %v2607_v40 = vshll.u32 %v9530_v12, 16  ;;  %v975_v5 = vld [vmem:[%s11010_s15 + $0x4] sm:$0xf] }
  0x7a   : > { %v2586_v38 = vsel %vm11028_vm2, %v2581_v26, %v2585_v10  ;;  %v2084_v39 = vsel %vm11243_vm6, %v2082_v28, %v2083_v15  ;;  %v9438_v41 = vrot.slane %v9400_v17, 9  ;;  %v2594_v44 = vor.u32 %v2593_v34, %v2590_v29  ;;  %v976_v10 = vld [vmem:[%s11010_s15 + $0x8] sm:$0x1]  ;;  %v979_v21 = vld [vmem:[%s11010_s15 + $0x14] sm:$0x1] }
  0x7b   : > { %v9565_v42 = vcombine.low %v2576_v33, %v2586_v38  ;;  %v9453_v43 = vcombine.low %v2081_v27, %v2084_v39  ;;  %v2604_v45 = vor.u32 %v2603_v36, %v2599_v35  ;;  %v2609_v47 = vrot.slane %v2607_v40, 5  ;;  %v9534_v22 = vld [vmem:[%s11010_s15 + $0x6c] sm:$0xf]  ;;  %v9535_v28 = vld [vmem:[%s11010_s15 + $0x70] sm:$0xf]  ;;  %v10820_v29 = vld [vmem:[%s11010_s15 + $0xb4] sm:$0xff]  }
  0x7c   : > { %v2087_v48 = vrot.slane %v9401_v23, 5  ;;  %v2090_v49 = vrot.slane %v9402_v24, 5  ;;  %v2612_v50 = vshrl.u32 %v9531_v25, 16  ;;  %v2595_v53 = vrot.slane %v2594_v44, 4  ;;  %v10819_v23 = vld [vmem:[%s13889_s1 + $0xa0] sm:$0xff]   ;;  %425 = vst.msk [vmem:[#allocation2 + $0x258] sm:$0xff] %vm409_vm3, %v10820_v29 }
  0x7d   : > { %2907 = vrot.lane.b32.xlu0 %v9565_v42, %s10941_s18  ;;  %2218 = vrot.lane.b32.xlu1 %v9453_v43, %s10941_s18  ;;  %v2605_v54 = vrot.slane %v2604_v45, 4  ;;  %v2615_v55 = vshll.u32 %v9531_v25, 16  ;;  %v2621_v56 = vshll.u32 %v9532_v30, 16  ;;  %v2625_v60 = vshrl.u32 %v9532_v30, 16  ;;  %v9406_v40 = vld [vmem:[%s11010_s15 + $0x60] sm:$0xe] }
  0x7e   : > { %v2088_v57 = vsel %vm11243_vm6, %v9438_v41, %v2087_v48  ;;  %v2089_v58 = vrot.slane %v2087_v48, 4  ;;  %v2614_v59 = vrot.slane %v2612_v50, 4  ;;  %v2600_v0 = vsel %vm11028_vm2, %v2595_v53, %v2599_v35  ;;  %v9536_v35 = vld [vmem:[%s11010_s15 + $0x74] sm:$0x1]  ;;  %10303 = vmatpush3.bf16.msra.mxu1 %v10819_v23  ;;  %v10821_v41 = vld [vmem:[%s13889_s1 + $0xe8] sm:$0xff]  }
  0x7f   : > { %v2610_v1 = vsel %vm11028_vm2, %v2605_v54, %v2609_v47  ;;  %v2617_v2 = vrot.slane %v2615_v55, 5  ;;  %v2623_v3 = vrot.slane %v2621_v56, 5  ;;  %v2627_v8 = vrot.slane %v2625_v60, 4  ;;  %v9408_v47 = vld [vmem:[%s11010_s15 + $0x68] sm:$0x1]  ;;  %10304 = vmatprep.subr.bf16.mxu1 %v10821_v41 }
  0x80   : > { %v9566_v6 = vcombine.low %v2600_v0, %v2610_v1  ;;  %v2091_v7 = vsel %vm11243_vm6, %v2089_v58, %v2090_v49  ;;  %v2631_v9 = vshll.u32 %v9533_v46, 16  ;;  %v9439_v14 = vrot.slane %v9403_v51, 9  ;;  %v9407_v46 = vld [vmem:[%s11010_s15 + $0x64] sm:$0xf]  ;;  %v980_v48 = vld [vmem:[%s11010_s15 + $0x18] sm:$0xe] }
  0x81   : > { %v9454_v12 = vcombine.low %v2088_v57, %v2091_v7  ;;  %v2618_v13 = vor.u32 %v2617_v2, %v2614_v59  ;;  %v2094_v15 = vrot.slane %v9404_v52, 5  ;;  %v2628_v17 = vor.u32 %v2627_v8, %v2623_v3  ;;  %v10822_v49 = vld [vmem:[%s13889_s1 + $0xa8] sm:$0xff]   ;;  %v981_v54 = vld [vmem:[%s11010_s15 + $0x1c] sm:$0xf]  ;;  %v11426_v55 = vld [vmem:[%s11010_s15 + $0x20] sm:$0x1] }
  0x82   : > { %2909 = vrot.lane.b32.xlu0 %v9566_v6, %s10941_s18  ;;  %v2633_v18 = vrot.slane %v2631_v9, 5  ;;  %v2097_v19 = vrot.slane %v9405_v61, 5  ;;  %v9241_v20 = vrot.slane %v974_v4, 9  ;;  %v1075_v27 = vrot.slane %v975_v5, 5  ;;  %10305 = vmatpush3.bf16.msra.mxu1 %v10822_v49  ;;  %v10823_v61 = vld [vmem:[%s11010_s15 + $0x18] sm:$0xff]   ;;  %v10824_v4 = vld [vmem:[%s13889_s1 + $0xf0] sm:$0xff]  }
  0x83   : > { %2220 = vrot.lane.b32.xlu1 %v9454_v12, %s10941_s18  ;;  %v2619_v24 = vrot.slane %v2618_v13, 4  ;;  %v2095_v25 = vsel %vm11243_vm6, %v9439_v14, %v2094_v15  ;;  %v2096_v26 = vrot.slane %v2094_v15, 4  ;;  %v2629_v30 = vrot.slane %v2628_v17, 4  ;;  %v984_v9 = vld [vmem:[%s11010_s15 + $0x28] sm:$0xf]  ;;  %2403 = vst.msk [vmem:[#allocation2 + $0x18] sm:$0xff] %vm409_vm3, %v10823_v61  ;;  %10306 = vmatprep.subr.bf16.mxu1 %v10824_v4 }
  0x84   : > { %v1078_v31 = vrot.slane %v976_v10, 5  ;;  %v9242_v33 = vrot.slane %v977_v11, 9  ;;  %v1082_v34 = vrot.slane %v978_v16, 5  ;;  %v1076_v38 = vsel %vm11243_vm6, %v9241_v20, %v1075_v27  ;;  %v10825_v10 = vld [vmem:[%s13889_s1 + $0xb0] sm:$0xff]   ;;  %v985_v15 = vld [vmem:[%s11010_s15 + $0x2c] sm:$0x1] }
  0x85   : > { %v2624_v36 = vsel %vm11028_vm2, %v2619_v24, %v2623_v3  ;;  %v2098_v37 = vsel %vm11243_vm6, %v2096_v26, %v2097_v19  ;;  %v1077_v39 = vrot.slane %v1075_v27, 4  ;;  %v2634_v42 = vsel %vm11028_vm2, %v2629_v30, %v2633_v18  ;;  %v983_v3 = vld [vmem:[%s11010_s15 + $0x24] sm:$0xe]  ;;  %v10826_v26 = vld [vmem:[%s13889_s1 + $0xf8] sm:$0xff]  }
  0x86   : > { %v9455_v43 = vcombine.low %v2095_v25, %v2098_v37  ;;  %v1083_v44 = vsel %vm11243_vm6, %v9242_v33, %v1082_v34  ;;  %v1084_v45 = vrot.slane %v1082_v34, 4  ;;  %v9567_v50 = vcombine.low %v2624_v36, %v2634_v42  ;;  %10307 = vmatpush3.bf16.msra.mxu1 %v10825_v10  ;;  %v9537_v25 = vld [vmem:[%s11010_s15 + $0x78] sm:$0xf]  ;;  %v10830_v10 = vld [vmem:[%s11010_s15 + $0x30] sm:$0xff]  }
  0x87   : > { %v1079_v51 = vsel %vm11243_vm6, %v1077_v39, %v1078_v31  ;;  %v1085_v52 = vrot.slane %v979_v21, 5  ;;  %v2636_v53 = vshrl.u32 %v9534_v22, 16  ;;  %v1379_v56 = vpop.permute.xlu0 %1378  ;;  %v2639_v58 = vshll.u32 %v9534_v22, 16  ;;  %v1381_v16 = vpop.permute.xlu1 %1380  ;;  %v9538_v31 = vld [vmem:[%s11010_s15 + $0x7c] sm:$0xf]  ;;  %10308 = vmatprep.subr.bf16.mxu1 %v10826_v26  ;;  %2405 = vst.msk [vmem:[#allocation2 + $0x68] sm:$0xff] %vm409_vm3, %v10830_v10 }
  0x88   : > { %2222 = vrot.lane.b32.xlu1 %v9455_v43, %s10941_s18  ;;  %v9257_v57 = vcombine.low %v1076_v38, %v1079_v51  ;;  %v2645_v59 = vshll.u32 %v9535_v28, 16  ;;  %v2649_v60 = vshrl.u32 %v9535_v28, 16  ;;  %2911 = vrot.lane.b32.xlu0 %v9567_v50, %s10941_s18  ;;  %v2655_v1 = vshll.u32 %v9536_v35, 16  ;;  %v10827_v33 = vld [vmem:[%s13889_s1 + $0xb8] sm:$0xff]   ;;  %v9539_v38 = vld [vmem:[%s11010_s15 + $0x80] sm:$0x1] }
  0x89   : > { %v1086_v62 = vsel %vm11243_vm6, %v1084_v45, %v1085_v52  ;;  %v2638_v0 = vrot.slane %v2636_v53, 4  ;;  %v9440_v2 = vrot.slane %v9406_v40, 9  ;;  %v2641_v6 = vrot.slane %v2639_v58, 5  ;;  %v9409_v39 = vld [vmem:[%s11010_s15 + $0x6c] sm:$0xe]  ;;  %v10828_v53 = vld [vmem:[%s11010_s15 + $0x24] sm:$0xff]  }
  0x8a   : > { %1249 = vst.msk [vmem:[#allocation2 + $0x8] sm:$0xff] %vm409_vm3, %v9257_v57  ;;  %v9258_v5 = vcombine.low %v1083_v44, %v1086_v62  ;;  %v2647_v7 = vrot.slane %v2645_v59, 5  ;;  %v2651_v8 = vrot.slane %v2649_v60, 4  ;;  %v2657_v11 = vrot.slane %v2655_v1, 5  ;;  %v9410_v44 = vld [vmem:[%s11010_s15 + $0x70] sm:$0xf]  ;;  %10309 = vmatpush3.bf16.msra.mxu1 %v10827_v33 }
  0x8b   : > { %1426 = vst.msk [vmem:[#allocation2 + $0x8] sm:$0xff] %vm957_vm7, %v1379_v56  ;;  %v2101_v12 = vrot.slane %v9407_v46, 5  ;;  %v2104_v13 = vrot.slane %v9408_v47, 5  ;;  %v9243_v14 = vrot.slane %v980_v48, 9  ;;  %v2642_v17 = vor.u32 %v2641_v6, %v2638_v0  ;;  %v9411_v45 = vld [vmem:[%s11010_s15 + $0x74] sm:$0x1] }
  0x8c   : > { %1250 = vst.msk [vmem:[#allocation2 + $0x30] sm:$0xff] %vm409_vm3, %v9258_v5  ;;  %v2652_v18 = vor.u32 %v2651_v8, %v2647_v7  ;;  %v1089_v19 = vrot.slane %v981_v54, 5  ;;  %v1092_v20 = vrot.slane %v11426_v55, 5  ;;  %v9244_v23 = vrot.slane %v983_v3, 9  ;;  %v986_v46 = vld [vmem:[%s11010_s15 + $0x30] sm:$0xe] }
  0x8d   : > { %1427 = vst.msk [vmem:[#allocation2 + $0x30] sm:$0xff] %vm957_vm7, %v1381_v16  ;;  %v2102_v21 = vsel %vm11243_vm6, %v9440_v2, %v2101_v12  ;;  %v2103_v22 = vrot.slane %v2101_v12, 4  ;;  %v1096_v24 = vrot.slane %v984_v9, 5  ;;  %v2643_v27 = vrot.slane %v2642_v17, 4  ;;  %v987_v51 = vld [vmem:[%s11010_s15 + $0x34] sm:$0xf] }
  0x8e   : > { %v2653_v28 = vrot.slane %v2652_v18, 4  ;;  %v1090_v29 = vsel %vm11243_vm6, %v9243_v14, %v1089_v19  ;;  %v1091_v30 = vrot.slane %v1089_v19, 4  ;;  %v1099_v37 = vrot.slane %v985_v15, 5  ;;  %v11479_v52 = vld [vmem:[%s11010_s15 + $0x38] sm:$0x1]  ;;  %2404 = vst.msk [vmem:[#allocation2 + $0x40] sm:$0xff] %vm409_vm3, %v10828_v53 }
  0x8f   : > { %v2105_v34 = vsel %vm11243_vm6, %v2103_v22, %v2104_v13  ;;  %v1097_v35 = vsel %vm11243_vm6, %v9244_v23, %v1096_v24  ;;  %v1098_v36 = vrot.slane %v1096_v24, 4  ;;  %v2648_v40 = vsel %vm11028_vm2, %v2643_v27, %v2647_v7  ;;  %v989_v9 = vld [vmem:[%s11010_s15 + $0x3c] sm:$0xe]  ;;  %v990_v15 = vld [vmem:[%s11010_s15 + $0x40] sm:$0xf] }
  0x90   : > { %v2658_v41 = vsel %vm11028_vm2, %v2653_v28, %v2657_v11  ;;  %v9456_v42 = vcombine.low %v2102_v21, %v2105_v34  ;;  %v1093_v43 = vsel %vm11243_vm6, %v1091_v30, %v1092_v20  ;;  %v2660_v50 = vshrl.u32 %v9537_v25, 16  ;;  %v991_v16 = vld [vmem:[%s11010_s15 + $0x44] sm:$0x1]  ;;  %v10831_v23 = vld [vmem:[%s11010_s15 + $0x3c] sm:$0xff]   ;;  %v11505_v28 = vld [vmem:[%s13889_s1 + $0x108] sm:$0xff]  }
  0x91   : > { %v9568_v47 = vcombine.low %v2648_v40, %v2658_v41  ;;  %v9259_v48 = vcombine.low %v1090_v29, %v1093_v43  ;;  %v1100_v49 = vsel %vm11243_vm6, %v1098_v36, %v1099_v37  ;;  %v2663_v56 = vshll.u32 %v9537_v25, 16  ;;  %v9540_v27 = vld [vmem:[%s11010_s15 + $0x84] sm:$0xf]  ;;  %v9542_v36 = vld [vmem:[%s11010_s15 + $0x8c] sm:$0x1]  ;;  %2406 = vst.msk [vmem:[#allocation2 + $0x90] sm:$0xff] %vm409_vm3, %v10831_v23 }
  0x92   : > { %2224 = vrot.lane.b32.xlu1 %v9456_v42, %s10941_s18  ;;  %v3252_v54 = vld [vmem:[#allocation2 + $0x8] sm:$0xff]  ;;  %v9260_v55 = vcombine.low %v1097_v35, %v1100_v49  ;;  %v2669_v57 = vshll.u32 %v9538_v31, 16  ;;  %v2673_v58 = vshrl.u32 %v9538_v31, 16  ;;  %v2662_v60 = vrot.slane %v2660_v50, 4  ;;  %v9412_v41 = vld [vmem:[%s11010_s15 + $0x78] sm:$0xe] }
  0x93   : > { %v910_v59 = vpop.permute.xlu0 %909  ;;  %2913 = vrot.lane.b32.xlu0 %v9568_v47, %s10941_s18  ;;  %1251 = vst.msk [vmem:[#allocation2 + $0x58] sm:$0xff] %vm409_vm3, %v9259_v48  ;;  %3699 = vmatprep.mubr.bf16.mxu0 %v3252_v54  ;;  %v2679_v61 = vshll.u32 %v9539_v38, 16  ;;  %v9441_v62 = vrot.slane %v9409_v39, 9  ;;  %v2108_v0 = vrot.slane %v9410_v44, 5  ;;  %v2665_v1 = vrot.slane %v2663_v56, 5 }
  0x94   : > { %958 = vst.msk [vmem:[#allocation2] sm:$0xff] %vm957_vm7, %v910_v59  ;;  %v2671_v2 = vrot.slane %v2669_v57, 5  ;;  %v2675_v3 = vrot.slane %v2673_v58, 4  ;;  %v2111_v4 = vrot.slane %v9411_v45, 5  ;;  %v9245_v8 = vrot.slane %v986_v46, 9  ;;  %v3257_v31 = vld [vmem:[#allocation2 + $0x30] sm:$0xff] }
  0x95   : > { %1252 = vst.msk [vmem:[#allocation2 + $0x80] sm:$0xff] %vm409_vm3, %v9260_v55  ;;  %v2681_v5 = vrot.slane %v2679_v61, 5  ;;  %v2109_v6 = vsel %vm11243_vm6, %v9441_v62, %v2108_v0  ;;  %v2110_v7 = vrot.slane %v2108_v0, 4  ;;  %v2666_v11 = vor.u32 %v2665_v1, %v2662_v60  ;;  %v9541_v35 = vld [vmem:[%s11010_s15 + $0x88] sm:$0xf]  ;;  %v11534_v58 = vld [vmem:[%s13889_s1 + $0x110] sm:$0xff]  }
  0x96   : > { %v2676_v12 = vor.u32 %v2675_v3, %v2671_v2  ;;  %v1103_v13 = vrot.slane %v987_v51, 5  ;;  %v1106_v14 = vrot.slane %v11479_v52, 5  ;;  %v912_v17 = vpop.permute.xlu1 %911  ;;  %v9246_v20 = vrot.slane %v989_v9, 9  ;;  %v9413_v42 = vld [vmem:[%s11010_s15 + $0x7c] sm:$0xf]  ;;  %v10929_v59 = vld [vmem:[%s13889_s1 + $0x100] sm:$0xff]  }
  0x97   : > { %v1383_v18 = vpop.permute.xlu0 %1382  ;;  %v2112_v19 = vsel %vm11243_vm6, %v2110_v7, %v2111_v4  ;;  %v1110_v21 = vrot.slane %v990_v15, 5  ;;  %v1113_v22 = vrot.slane %v991_v16, 5  ;;  %959 = vst.msk [vmem:[#allocation2 + $0x28] sm:$0xff] %vm957_vm7, %v912_v17  ;;  %v2667_v24 = vrot.slane %v2666_v11, 4  ;;  %v9414_v50 = vld [vmem:[%s11010_s15 + $0x80] sm:$0x1] }
  0x98   : > { %1428 = vst.msk [vmem:[#allocation2 + $0x58] sm:$0xff] %vm957_vm7, %v1383_v18  ;;  %v2677_v25 = vrot.slane %v2676_v12, 4  ;;  %v9457_v26 = vcombine.low %v2109_v6, %v2112_v19  ;;  %v1104_v29 = vsel %vm11243_vm6, %v9245_v8, %v1103_v13  ;;  %v1105_v30 = vrot.slane %v1103_v13, 4  ;;  %v992_v51 = vld [vmem:[%s11010_s15 + $0x48] sm:$0xe] }
  0x99   : > { %v1111_v33 = vsel %vm11243_vm6, %v9246_v20, %v1110_v21  ;;  %v1112_v34 = vrot.slane %v1110_v21, 4  ;;  %v2672_v37 = vsel %vm11028_vm2, %v2667_v24, %v2671_v2  ;;  %v2684_v39 = vshrl.u32 %v9540_v27, 16  ;;  %v993_v56 = vld [vmem:[%s11010_s15 + $0x4c] sm:$0xf]  ;;  %v994_v57 = vld [vmem:[%s11010_s15 + $0x50] sm:$0x1] }
  0x9a   : > { %v2682_v38 = vsel %vm11028_vm2, %v2677_v25, %v2681_v5  ;;  %2226 = vrot.lane.b32.xlu1 %v9457_v26, %s10941_s18  ;;  %v2687_v40 = vshll.u32 %v9540_v27, 16  ;;  %v914_v43 = vpop.permute.xlu1 %913  ;;  %v1107_v47 = vsel %vm11243_vm6, %v1105_v30, %v1106_v14  ;;  %v2693_v49 = vshll.u32 %v9541_v35, 16  ;;  %v10832_v5 = vld [vmem:[%s11010_s15 + $0x48] sm:$0xff]   ;;  %v995_v15 = vld [vmem:[%s11010_s15 + $0x54] sm:$0xe] }
  0x9b   : > { %v1385_v44 = vpop.permute.xlu0 %1384  ;;  %v3251_v45 = vld [vmem:[#allocation2] sm:$0xff]  ;;  %v9569_v46 = vcombine.low %v2672_v37, %v2682_v38  ;;  %v1114_v48 = vsel %vm11243_vm6, %v1112_v34, %v1113_v22  ;;  %960 = vst.msk [vmem:[#allocation2 + $0x50] sm:$0xff] %vm957_vm7, %v914_v43  ;;  %v9261_v52 = vcombine.low %v1104_v29, %v1107_v47  ;;  %v2686_v54 = vrot.slane %v2684_v39, 4  ;;  %v996_v16 = vld [vmem:[%s11010_s15 + $0x58] sm:$0xf] }
  0x9c   : > { %1429 = vst.msk [vmem:[#allocation2 + $0x80] sm:$0xff] %vm957_vm7, %v1385_v44  ;;  %3700 = vmatmul.mubr.bf16.vlgmr.msra.gmra.mrb[0].mxu0 %v3251_v45  ;;  %v9262_v53 = vcombine.low %v1111_v33, %v1114_v48  ;;  %v2689_v55 = vrot.slane %v2687_v40, 5  ;;  %v11540_v60 = vrot.slane %v2693_v49, 5  ;;  %v2697_v61 = vshrl.u32 %v9541_v35, 16  ;;  %v997_v22 = vld [vmem:[%s11010_s15 + $0x5c] sm:$0x1] }
  0x9d   : > { %10671 = vmatpush3.bf16.msra.mxu0 %v10929_v59  ;;  %2915 = vrot.lane.b32.xlu0 %v9569_v46, %s10941_s18  ;;  %v2703_v62 = vshll.u32 %v9542_v36, 16  ;;  %v9442_v0 = vrot.slane %v9412_v41, 9  ;;  %1253 = vst.msk [vmem:[#allocation2 + $0xa8] sm:$0xff] %vm409_vm3, %v9261_v52  ;;  %v2115_v2 = vrot.slane %v9413_v42, 5  ;;  %v2118_v3 = vrot.slane %v9414_v50, 5  ;;  %2407 = vst.msk [vmem:[#allocation2 + $0xb8] sm:$0xff] %vm409_vm3, %v10832_v5 }
  0x9e   : > { %3707 = vmatprep.mubr.bf16.mxu0 %v3257_v31  ;;  %1254 = vst.msk [vmem:[#allocation2 + $0xd0] sm:$0xff] %vm409_vm3, %v9262_v53  ;;  %v2690_v1 = vor.u32 %v2689_v55, %v2686_v54  ;;  %v9247_v4 = vrot.slane %v992_v51, 9  ;;  %10672 = vmatprep.subr.bf16.mxu0 %v11505_v28  ;;  %v3256_v7 = vld [vmem:[#allocation2 + $0x28] sm:$0xff]  ;;  %v2699_v8 = vrot.slane %v2697_v61, 4  ;;  %v1117_v10 = vrot.slane %v993_v56, 5 }
  0x9f   : > { %v1387_v6 = vpop.permute.xlu0 %1386  ;;  %v2705_v9 = vrot.slane %v2703_v62, 5  ;;  %v1120_v11 = vrot.slane %v994_v57, 5  ;;  %v2116_v13 = vsel %vm11243_vm6, %v9442_v0, %v2115_v2  ;;  %v2117_v14 = vrot.slane %v2115_v2, 4  ;;  %v3262_v17 = vld [vmem:[#allocation2 + $0x58] sm:$0xff]  ;;  %v9543_v27 = vld [vmem:[%s11010_s15 + $0x90] sm:$0xf] }
  0xa0   : > { %1430 = vst.msk [vmem:[#allocation2 + $0xa8] sm:$0xff] %vm957_vm7, %v1387_v6  ;;  %v2691_v12 = vrot.slane %v2690_v1, 4  ;;  %v916_v18 = vpop.permute.xlu1 %915  ;;  %v2700_v19 = vor.u32 %v2699_v8, %v11540_v60  ;;  %v1118_v20 = vsel %vm11243_vm6, %v9247_v4, %v1117_v10  ;;  %v1119_v21 = vrot.slane %v1117_v10, 4  ;;  %v9544_v34 = vld [vmem:[%s11010_s15 + $0x94] sm:$0xf] }
  0xa1   : > { %v9248_v23 = vrot.slane %v995_v15, 9  ;;  %10673 = vmatpush3.bf16.msra.mxu0 %v11505_v28  ;;  %961 = vst.msk [vmem:[#allocation2 + $0x78] sm:$0xff] %vm957_vm7, %v916_v18  ;;  %v2119_v24 = vsel %vm11243_vm6, %v2117_v14, %v2118_v3  ;;  %v1124_v25 = vrot.slane %v996_v16, 5  ;;  %v1127_v26 = vrot.slane %v997_v22, 5  ;;  %v9545_v35 = vld [vmem:[%s11010_s15 + $0x98] sm:$0x1] }
  0xa2   : > { %10674 = vmatprep.subr.bf16.mxu0 %v11534_v58  ;;  %v2696_v30 = vsel %vm11028_vm2, %v2691_v12, %v11540_v60  ;;  %v2701_v31 = vrot.slane %v2700_v19, 4  ;;  %v9458_v33 = vcombine.low %v2116_v13, %v2119_v24  ;;  %v1121_v28 = vsel %vm11243_vm6, %v1119_v21, %v1120_v11  ;;  %v9415_v40 = vld [vmem:[%s11010_s15 + $0x84] sm:$0xe]  ;;  %v9416_v41 = vld [vmem:[%s11010_s15 + $0x88] sm:$0xf]  ;;  %v3261_v56 = vld [vmem:[#allocation2 + $0x50] sm:$0xff] }
  0xa3   : > { %v1389_v29 = vpop.permute.xlu0 %1388  ;;  %v9263_v36 = vcombine.low %v1118_v20, %v1121_v28  ;;  %v1125_v37 = vsel %vm11243_vm6, %v9248_v23, %v1124_v25  ;;  %v1126_v38 = vrot.slane %v1124_v25, 4  ;;  %v2708_v39 = vshrl.u32 %v9543_v27, 16  ;;  %v9417_v47 = vld [vmem:[%s11010_s15 + $0x8c] sm:$0x1]  ;;  %v998_v52 = vld [vmem:[%s11010_s15 + $0x60] sm:$0xe] }
  0xa4   : > { %1431 = vst.msk [vmem:[#allocation2 + $0xd0] sm:$0xff] %vm957_vm7, %v1389_v29  ;;  %3708 = vmatmul.mubr.bf16.gmra.mrb[4].mxu0 %v3256_v7  ;;  %v918_v42 = vpop.permute.xlu1 %917  ;;  %v2706_v43 = vsel %vm11028_vm2, %v2701_v31, %v2705_v9  ;;  %2228 = vrot.lane.b32.xlu1 %v9458_v33, %s10941_s18  ;;  %v2711_v44 = vshll.u32 %v9543_v27, 16  ;;  %v2717_v45 = vshll.u32 %v9544_v34, 16  ;;  %v2721_v46 = vshrl.u32 %v9544_v34, 16  ;;  %v999_v53 = vld [vmem:[%s11010_s15 + $0x64] sm:$0xf] }
  0xa5   : > { %3715 = vmatprep.mubr.bf16.mxu0 %v3262_v17  ;;  %962 = vst.msk [vmem:[#allocation2 + $0xa0] sm:$0xff] %vm957_vm7, %v918_v42  ;;  %v9570_v48 = vcombine.low %v2696_v30, %v2706_v43  ;;  %v1128_v49 = vsel %vm11243_vm6, %v1126_v38, %v1127_v26  ;;  %v2710_v50 = vrot.slane %v2708_v39, 4  ;;  %v2727_v51 = vshll.u32 %v9545_v35, 16  ;;  %10675 = vmatpush3.bf16.msra.mxu0 %v11534_v58  ;;  %v1000_v61 = vld [vmem:[%s11010_s15 + $0x68] sm:$0x1]  ;;  %v3267_v3 = vld [vmem:[#allocation2 + $0x80] sm:$0xff] }
  0xa6   : > { %1255 = vst.msk [vmem:[#allocation2 + $0xf8] sm:$0xff] %vm409_vm3, %v9263_v36  ;;  %v9264_v55 = vcombine.low %v1125_v37, %v1128_v49  ;;  %v2713_v57 = vrot.slane %v2711_v44, 5  ;;  %v2719_v59 = vrot.slane %v2717_v45, 5  ;;  %v2723_v60 = vrot.slane %v2721_v46, 4  ;;  %v1001_v8 = vld [vmem:[%s11010_s15 + $0x6c] sm:$0xe] }
  0xa7   : > { %v1391_v54 = vpop.permute.xlu0 %1390  ;;  %2917 = vrot.lane.b32.xlu0 %v9570_v48, %s10941_s18  ;;  %v2729_v62 = vrot.slane %v2727_v51, 5  ;;  %v9443_v0 = vrot.slane %v9415_v40, 9  ;;  %v2122_v1 = vrot.slane %v9416_v41, 5  ;;  %v2125_v2 = vrot.slane %v9417_v47, 5  ;;  %v1002_v12 = vld [vmem:[%s11010_s15 + $0x70] sm:$0xf] }
  0xa8   : > { %1432 = vst.msk [vmem:[#allocation2 + $0xf8] sm:$0xff] %vm957_vm7, %v1391_v54  ;;  %v920_v58 = vpop.permute.xlu1 %919  ;;  %v2714_v4 = vor.u32 %v2713_v57, %v2710_v50  ;;  %v2724_v5 = vor.u32 %v2723_v60, %v2719_v59  ;;  %v9249_v6 = vrot.slane %v998_v52, 9  ;;  %v1131_v7 = vrot.slane %v999_v53, 5  ;;  %v1003_v13 = vld [vmem:[%s11010_s15 + $0x74] sm:$0x1]  ;;  %v3272_v49 = vld [vmem:[#allocation2 + $0xa8] sm:$0xff] }
  0xa9   : > { %1256 = vst.msk [vmem:[#allocation2 + $0x120] sm:$0xff] %vm409_vm3, %v9264_v55  ;;  %v2123_v9 = vsel %vm11243_vm6, %v9443_v0, %v2122_v1  ;;  %v2124_v10 = vrot.slane %v2122_v1, 4  ;;  %v1134_v11 = vrot.slane %v1000_v61, 5  ;;  %v9250_v20 = vrot.slane %v1001_v8, 9  ;;  %v9546_v29 = vld [vmem:[%s11010_s15 + $0x9c] sm:$0xf] }
  0xaa   : > { %963 = vst.msk [vmem:[#allocation2 + $0xc8] sm:$0xff] %vm957_vm7, %v920_v58  ;;  %v2715_v15 = vrot.slane %v2714_v4, 4  ;;  %v2725_v16 = vrot.slane %v2724_v5, 4  ;;  %v1132_v17 = vsel %vm11243_vm6, %v9249_v6, %v1131_v7  ;;  %v1133_v18 = vrot.slane %v1131_v7, 4  ;;  %v9547_v30 = vld [vmem:[%s11010_s15 + $0xa0] sm:$0xf] }
  0xab   : > { %v1393_v14 = vpop.permute.xlu0 %1392  ;;  %v2126_v19 = vsel %vm11243_vm6, %v2124_v10, %v2125_v2  ;;  %v1138_v21 = vrot.slane %v1002_v12, 5  ;;  %v1141_v22 = vrot.slane %v1003_v13, 5  ;;  %v9548_v31 = vld [vmem:[%s11010_s15 + $0xa4] sm:$0x1]  ;;  %v9418_v36 = vld [vmem:[%s11010_s15 + $0x90] sm:$0xe] }
  0xac   : > { %1433 = vst.msk [vmem:[#allocation2 + $0x120] sm:$0xff] %vm957_vm7, %v1393_v14  ;;  %3716 = vmatmul.mubr.bf16.gmra.mrb[8].mxu0 %v3261_v56  ;;  %v922_v23 = vpop.permute.xlu1 %921  ;;  %v2720_v24 = vsel %vm11028_vm2, %v2715_v15, %v2719_v59  ;;  %v2730_v25 = vsel %vm11028_vm2, %v2725_v16, %v2729_v62  ;;  %v9459_v26 = vcombine.low %v2123_v9, %v2126_v19  ;;  %v9419_v37 = vld [vmem:[%s11010_s15 + $0x94] sm:$0xf]  ;;  %v2732_v39 = vshrl.u32 %v9546_v29, 16  ;;  %v9420_v43 = vld [vmem:[%s11010_s15 + $0x98] sm:$0x1] }
  0xad   : > { %v1135_v27 = vsel %vm11243_vm6, %v1133_v18, %v1134_v11  ;;  %3723 = vmatprep.mubr.bf16.mxu0 %v3267_v3  ;;  %964 = vst.msk [vmem:[#allocation2 + $0xf0] sm:$0xff] %vm957_vm7, %v922_v23  ;;  %v9571_v33 = vcombine.low %v2720_v24, %v2730_v25  ;;  %v1139_v34 = vsel %vm11243_vm6, %v9250_v20, %v1138_v21  ;;  %v1140_v35 = vrot.slane %v1138_v21, 4  ;;  %v1004_v48 = vld [vmem:[%s11010_s15 + $0x78] sm:$0xe]  ;;  %v1005_v56 = vld [vmem:[%s11010_s15 + $0x7c] sm:$0xf] }
  0xae   : > { %v9265_v28 = vcombine.low %v1132_v17, %v1135_v27  ;;  %2230 = vrot.lane.b32.xlu1 %v9459_v26, %s10941_s18  ;;  %v2735_v40 = vshll.u32 %v9546_v29, 16  ;;  %v2741_v41 = vshll.u32 %v9547_v30, 16  ;;  %v2745_v42 = vshrl.u32 %v9547_v30, 16  ;;  %v3266_v52 = vld [vmem:[#allocation2 + $0x78] sm:$0xff]  ;;  %v1006_v62 = vld [vmem:[%s11010_s15 + $0x80] sm:$0x1] }
  0xaf   : > { %v1395_v38 = vpop.permute.xlu0 %1394  ;;  %2919 = vrot.lane.b32.xlu0 %v9571_v33, %s10941_s18  ;;  %v1142_v44 = vsel %vm11243_vm6, %v1140_v35, %v1141_v22  ;;  %v2751_v45 = vshll.u32 %v9548_v31, 16  ;;  %v9444_v46 = vrot.slane %v9418_v36, 9  ;;  %v2129_v47 = vrot.slane %v9419_v37, 5  ;;  %v10833_v0 = vld [vmem:[%s11010_s15 + $0x54] sm:$0xff]   ;;  %v1007_v15 = vld [vmem:[%s11010_s15 + $0x84] sm:$0xe] }
  0xb0   : > { %1257 = vst.msk [vmem:[#allocation2 + $0x148] sm:$0xff] %vm409_vm3, %v9265_v28  ;;  %v924_v50 = vpop.permute.xlu1 %923  ;;  %v9266_v51 = vcombine.low %v1139_v34, %v1142_v44  ;;  %v2734_v53 = vrot.slane %v2732_v39, 4  ;;  %v2737_v54 = vrot.slane %v2735_v40, 5  ;;  %v2743_v55 = vrot.slane %v2741_v41, 5  ;;  %2408 = vst.msk [vmem:[#allocation2 + $0xe0] sm:$0xff] %vm409_vm3, %v10833_v0  ;;  %v10834_v7 = vld [vmem:[%s13889_s1 + $0x118] sm:$0xff]  }
  0xb1   : > { %1434 = vst.msk [vmem:[#allocation2 + $0x148] sm:$0xff] %vm957_vm7, %v1395_v38  ;;  %965 = vst.msk [vmem:[#allocation2 + $0x118] sm:$0xff] %vm957_vm7, %v924_v50  ;;  %v2747_v57 = vrot.slane %v2745_v42, 4  ;;  %v2753_v59 = vrot.slane %v2751_v45, 5  ;;  %v2130_v60 = vsel %vm11243_vm6, %v9444_v46, %v2129_v47  ;;  %v2131_v61 = vrot.slane %v2129_v47, 4  ;;  %10676 = vmatprep.subr.bf16.mxu0 %v10834_v7  ;;  %v3271_v22 = vld [vmem:[#allocation2 + $0xa0] sm:$0xff] }
  0xb2   : > { %1258 = vst.msk [vmem:[#allocation2 + $0x170] sm:$0xff] %vm409_vm3, %v9266_v51  ;;  %v2738_v2 = vor.u32 %v2737_v54, %v2734_v53  ;;  %v2132_v3 = vrot.slane %v9420_v43, 5  ;;  %v9251_v58 = vrot.slane %v1004_v48, 9  ;;  %v1145_v4 = vrot.slane %v1005_v56, 5  ;;  %v1008_v19 = vld [vmem:[%s11010_s15 + $0x88] sm:$0xf]  ;;  %10677 = vmatpush3.bf16.msra.mxu0 %v10834_v7 }
  0xb3   : > { %v1397_v1 = vpop.permute.xlu0 %1396  ;;  %v2748_v5 = vor.u32 %v2747_v57, %v2743_v55  ;;  %v1148_v6 = vrot.slane %v1006_v62, 5  ;;  %v1009_v20 = vld [vmem:[%s11010_s15 + $0x8c] sm:$0x1]  ;;  %v9252_v21 = vrot.slane %v1007_v15, 9  ;;  %v10835_v23 = vld [vmem:[%s11010_s15 + $0x60] sm:$0xff]   ;;  %v1152_v26 = vrot.slane %v1008_v19, 5 }
  0xb4   : > { %1435 = vst.msk [vmem:[#allocation2 + $0x170] sm:$0xff] %vm957_vm7, %v1397_v1  ;;  %3724 = vmatmul.mubr.bf16.gmra.mrb[12].mxu0 %v3266_v52  ;;  %v926_v8 = vpop.permute.xlu1 %925  ;;  %v2739_v9 = vrot.slane %v2738_v2, 4  ;;  %v2133_v10 = vsel %vm11243_vm6, %v2131_v61, %v2132_v3  ;;  %v1146_v11 = vsel %vm11243_vm6, %v9251_v58, %v1145_v4  ;;  %v1147_v12 = vrot.slane %v1145_v4, 4  ;;  %v9549_v28 = vld [vmem:[%s11010_s15 + $0xa8] sm:$0xf]  ;;  %v3277_v34 = vld [vmem:[#allocation2 + $0xd0] sm:$0xff] }
  0xb5   : > { %3731 = vmatprep.mubr.bf16.mxu0 %v3272_v49  ;;  %966 = vst.msk [vmem:[#allocation2 + $0x140] sm:$0xff] %vm957_vm7, %v926_v8  ;;  %v2749_v13 = vrot.slane %v2748_v5, 4  ;;  %v9460_v14 = vcombine.low %v2130_v60, %v2133_v10  ;;  %v1155_v27 = vrot.slane %v1009_v20, 5  ;;  %v1153_v31 = vsel %vm11243_vm6, %v9252_v21, %v1152_v26  ;;  %v9550_v36 = vld [vmem:[%s11010_s15 + $0xac] sm:$0xf]  ;;  %v3282_v2 = vld [vmem:[#allocation2 + $0xf8] sm:$0xff] }
  0xb6   : > { %v2744_v16 = vsel %vm11028_vm2, %v2739_v9, %v2743_v55  ;;  %v1149_v17 = vsel %vm11243_vm6, %v1147_v12, %v1148_v6  ;;  %2409 = vst.msk [vmem:[#allocation2 + $0x108] sm:$0xff] %vm409_vm3, %v10835_v23  ;;  %v1154_v33 = vrot.slane %v1152_v26, 4  ;;  %v9551_v37 = vld [vmem:[%s11010_s15 + $0xb0] sm:$0x1]  ;;  %v2756_v38 = vshrl.u32 %v9549_v28, 16  ;;  %v3276_v6 = vld [vmem:[#allocation2 + $0xc8] sm:$0xff] }
  0xb7   : > { %v1399_v18 = vpop.permute.xlu0 %1398  ;;  %v2754_v24 = vsel %vm11028_vm2, %v2749_v13, %v2753_v59  ;;  %2232 = vrot.lane.b32.xlu1 %v9460_v14, %s10941_s18  ;;  %v9267_v25 = vcombine.low %v1146_v11, %v1149_v17  ;;  %v2759_v39 = vshll.u32 %v9549_v28, 16  ;;  %v2765_v41 = vshll.u32 %v9550_v36, 16  ;;  %v9421_v47 = vld [vmem:[%s11010_s15 + $0x9c] sm:$0xe]  ;;  %v9422_v51 = vld [vmem:[%s11010_s15 + $0xa0] sm:$0xf] }
  0xb8   : > { %v9572_v29 = vcombine.low %v2744_v16, %v2754_v24  ;;  %v1156_v40 = vsel %vm11243_vm6, %v1154_v33, %v1155_v27  ;;  %v2769_v42 = vshrl.u32 %v9550_v36, 16  ;;  %v2775_v43 = vshll.u32 %v9551_v37, 16  ;;  %v9423_v55 = vld [vmem:[%s11010_s15 + $0xa4] sm:$0x1]  ;;  %v1010_v57 = vld [vmem:[%s11010_s15 + $0x90] sm:$0xe] }
  0xb9   : > { %v928_v30 = vpop.permute.xlu1 %927  ;;  %1259 = vst.msk [vmem:[#allocation2 + $0x198] sm:$0xff] %vm409_vm3, %v9267_v25  ;;  %v9268_v44 = vcombine.low %v1153_v31, %v1156_v40  ;;  %v2758_v45 = vrot.slane %v2756_v38, 4  ;;  %v2761_v46 = vrot.slane %v2759_v39, 5  ;;  %v2767_v49 = vrot.slane %v2765_v41, 5  ;;  %v1011_v62 = vld [vmem:[%s11010_s15 + $0x94] sm:$0xf] }
  0xba   : > { %967 = vst.msk [vmem:[#allocation2 + $0x168] sm:$0xff] %vm957_vm7, %v928_v30  ;;  %2921 = vrot.lane.b32.xlu0 %v9572_v29, %s10941_s18  ;;  %1436 = vst.msk [vmem:[#allocation2 + $0x198] sm:$0xff] %vm957_vm7, %v1399_v18  ;;  %v2771_v50 = vrot.slane %v2769_v42, 4  ;;  %v9445_v52 = vrot.slane %v9421_v47, 9  ;;  %v2777_v54 = vrot.slane %v2775_v43, 5  ;;  %v2136_v56 = vrot.slane %v9422_v51, 5 }
  0xbb   : > { %v1401_v35 = vpop.permute.xlu0 %1400  ;;  %1260 = vst.msk [vmem:[#allocation2 + $0x1c0] sm:$0xff] %vm409_vm3, %v9268_v44  ;;  %v2762_v53 = vor.u32 %v2761_v46, %v2758_v45  ;;  %v2139_v61 = vrot.slane %v9423_v55, 5  ;;  %v1012_v0 = vld [vmem:[%s11010_s15 + $0x98] sm:$0x1]  ;;  %v9253_v1 = vrot.slane %v1010_v57, 9  ;;  %v1159_v5 = vrot.slane %v1011_v62, 5 }
  0xbc   : > { %3732 = vmatmul.mubr.bf16.gmra.mrb[16].mxu0 %v3271_v22  ;;  %1437 = vst.msk [vmem:[#allocation2 + $0x1c0] sm:$0xff] %vm957_vm7, %v1401_v35  ;;  %v2772_v60 = vor.u32 %v2771_v50, %v2767_v49  ;;  %v2137_v58 = vsel %vm11243_vm6, %v9445_v52, %v2136_v56  ;;  %v2138_v4 = vrot.slane %v2136_v56, 4  ;;  %v1162_v9 = vrot.slane %v1012_v0, 5  ;;  %v1013_v16 = vld [vmem:[%s11010_s15 + $0x9c] sm:$0xe]  ;;  %v3287_v35 = vld [vmem:[#allocation2 + $0x120] sm:$0xff] }
  0xbd   : > { %3739 = vmatprep.mubr.bf16.mxu0 %v3277_v34  ;;  %v930_v48 = vpop.permute.xlu1 %929  ;;  %v2763_v3 = vrot.slane %v2762_v53, 4  ;;  %v1160_v12 = vsel %vm11243_vm6, %v9253_v1, %v1159_v5  ;;  %v1161_v13 = vrot.slane %v1159_v5, 4  ;;  %v1014_v17 = vld [vmem:[%s11010_s15 + $0xa0] sm:$0xf]  ;;  %v1015_v20 = vld [vmem:[%s11010_s15 + $0xa4] sm:$0x1] }
  0xbe   : > { %968 = vst.msk [vmem:[#allocation2 + $0x190] sm:$0xff] %vm957_vm7, %v930_v48  ;;  %v2773_v8 = vrot.slane %v2772_v60, 4  ;;  %v2140_v11 = vsel %vm11243_vm6, %v2138_v4, %v2139_v61  ;;  %v9254_v21 = vrot.slane %v1013_v16, 9  ;;  %v1166_v22 = vrot.slane %v1014_v17, 5  ;;  %v9552_v30 = vld [vmem:[%s11010_s15 + $0xb4] sm:$0xf] }
  0xbf   : > { %v1403_v59 = vpop.permute.xlu0 %1402  ;;  %v2768_v10 = vsel %vm11028_vm2, %v2763_v3, %v2767_v49  ;;  %v9461_v15 = vcombine.low %v2137_v58, %v2140_v11  ;;  %v1163_v19 = vsel %vm11243_vm6, %v1161_v13, %v1162_v9  ;;  %v1169_v25 = vrot.slane %v1015_v20, 5  ;;  %v9553_v31 = vld [vmem:[%s11010_s15 + $0xb8] sm:$0xf]  ;;  %v9554_v33 = vld [vmem:[%s11010_s15 + $0xbc] sm:$0x1]  ;;  %v3281_v40 = vld [vmem:[#allocation2 + $0xf0] sm:$0xff] }
  0xc0   : > { %v2778_v14 = vsel %vm11028_vm2, %v2773_v8, %v2777_v54  ;;  %v9269_v24 = vcombine.low %v1160_v12, %v1163_v19  ;;  %v1167_v27 = vsel %vm11243_vm6, %v9254_v21, %v1166_v22  ;;  %v1168_v29 = vrot.slane %v1166_v22, 4  ;;  %v9424_v44 = vld [vmem:[%s11010_s15 + $0xa8] sm:$0xe]  ;;  %v9425_v48 = vld [vmem:[%s11010_s15 + $0xac] sm:$0xf] }
  0xc1   : > { %v932_v7 = vpop.permute.xlu1 %931  ;;  %v9573_v18 = vcombine.low %v2768_v10, %v2778_v14  ;;  %2234 = vrot.lane.b32.xlu1 %v9461_v15, %s10941_s18  ;;  %v2780_v28 = vshrl.u32 %v9552_v30, 16  ;;  %v2783_v34 = vshll.u32 %v9552_v30, 16  ;;  %v2789_v37 = vshll.u32 %v9553_v31, 16  ;;  %v9426_v53 = vld [vmem:[%s11010_s15 + $0xb0] sm:$0x1]  ;;  %v3292_v11 = vld [vmem:[#allocation2 + $0x148] sm:$0xff] }
  0xc2   : > { %969 = vst.msk [vmem:[#allocation2 + $0x1b8] sm:$0xff] %vm957_vm7, %v932_v7  ;;  %v1170_v36 = vsel %vm11243_vm6, %v1168_v29, %v1169_v25  ;;  %v2793_v38 = vshrl.u32 %v9553_v31, 16  ;;  %v2799_v39 = vshll.u32 %v9554_v33, 16  ;;  %v9446_v49 = vrot.slane %v9424_v44, 9  ;;  %v1016_v55 = vld [vmem:[%s11010_s15 + $0xa8] sm:$0xe] }
  0xc3   : > { %v1405_v23 = vpop.permute.xlu0 %1404  ;;  %2923 = vrot.lane.b32.xlu0 %v9573_v18, %s10941_s18  ;;  %1261 = vst.msk [vmem:[#allocation2 + $0x1e8] sm:$0xff] %vm409_vm3, %v9269_v24  ;;  %v9270_v41 = vcombine.low %v1167_v27, %v1170_v36  ;;  %v2782_v42 = vrot.slane %v2780_v28, 4  ;;  %v2785_v43 = vrot.slane %v2783_v34, 5  ;;  %v2791_v46 = vrot.slane %v2789_v37, 5  ;;  %v1018_v60 = vld [vmem:[%s11010_s15 + $0xb0] sm:$0x1] }
  0xc4   : > { %3740 = vmatmul.mubr.bf16.gmra.mrb[20].mxu0 %v3276_v6  ;;  %1438 = vst.msk [vmem:[#allocation2 + $0x1e8] sm:$0xff] %vm957_vm7, %v1403_v59  ;;  %v2795_v47 = vrot.slane %v2793_v38, 4  ;;  %v2801_v52 = vrot.slane %v2799_v39, 5  ;;  %v2143_v54 = vrot.slane %v9425_v48, 5  ;;  %v2146_v57 = vrot.slane %v9426_v53, 5  ;;  %v10836_v3 = vld [vmem:[%s11010_s15 + $0x6c] sm:$0xff]  }
  0xc5   : > { %3747 = vmatprep.mubr.bf16.mxu0 %v3282_v2  ;;  %1262 = vst.msk [vmem:[#allocation2 + $0x210] sm:$0xff] %vm409_vm3, %v9270_v41  ;;  %v2786_v51 = vor.u32 %v2785_v43, %v2782_v42  ;;  %v1017_v59 = vld [vmem:[%s11010_s15 + $0xac] sm:$0xf]  ;;  %v9255_v61 = vrot.slane %v1016_v55, 9  ;;  %v1176_v4 = vrot.slane %v1018_v60, 5  ;;  %v3286_v6 = vld [vmem:[#allocation2 + $0x118] sm:$0xff] }
  0xc6   : > { %v934_v26 = vpop.permute.xlu1 %933  ;;  %1439 = vst.msk [vmem:[#allocation2 + $0x210] sm:$0xff] %vm957_vm7, %v1405_v23  ;;  %v2796_v56 = vor.u32 %v2795_v47, %v2791_v46  ;;  %v2144_v0 = vsel %vm11243_vm6, %v9446_v49, %v2143_v54  ;;  %v2145_v1 = vrot.slane %v2143_v54, 4  ;;  %v1173_v2 = vrot.slane %v1017_v59, 5  ;;  %v1019_v14 = vld [vmem:[%s11010_s15 + $0xb4] sm:$0xe]  ;;  %v3291_v42 = vld [vmem:[#allocation2 + $0x140] sm:$0xff] }
  0xc7   : > { %970 = vst.msk [vmem:[#allocation2 + $0x1e0] sm:$0xff] %vm957_vm7, %v934_v26  ;;  %v1407_v50 = vpop.permute.xlu0 %1406  ;;  %v2787_v62 = vrot.slane %v2786_v51, 4  ;;  %v1020_v15 = vld [vmem:[%s11010_s15 + $0xb8] sm:$0xf]  ;;  %v1021_v19 = vld [vmem:[%s11010_s15 + $0xbc] sm:$0x1] }
  0xc8   : > { %v2797_v58 = vrot.slane %v2796_v56, 4  ;;  %v2147_v8 = vsel %vm11243_vm6, %v2145_v1, %v2146_v57  ;;  %v1174_v9 = vsel %vm11243_vm6, %v9255_v61, %v1173_v2  ;;  %v1175_v10 = vrot.slane %v1173_v2, 4  ;;  %2410 = vst.msk [vmem:[#allocation2 + $0x130] sm:$0xff] %vm409_vm3, %v10836_v3  ;;  %v9555_v27 = vld [vmem:[%s11010_s15 + $0xc0] sm:$0xf]  ;;  %v3297_v47 = vld [vmem:[#allocation2 + $0x170] sm:$0xff] }
  0xc9   : > { %v2792_v7 = vsel %vm11028_vm2, %v2787_v62, %v2791_v46  ;;  %v9462_v13 = vcombine.low %v2144_v0, %v2147_v8  ;;  %v9256_v20 = vrot.slane %v1019_v14, 9  ;;  %v1180_v21 = vrot.slane %v1020_v15, 5  ;;  %v9556_v29 = vld [vmem:[%s11010_s15 + $0xc4] sm:$0xf]  ;;  %v9557_v30 = vld [vmem:[%s11010_s15 + $0xc8] sm:$0x1] }
  0xca   : > { %v936_v45 = vpop.permute.xlu1 %935  ;;  %v2802_v12 = vsel %vm11028_vm2, %v2797_v58, %v2801_v52  ;;  %v1177_v18 = vsel %vm11243_vm6, %v1175_v10, %v1176_v4  ;;  %v1183_v23 = vrot.slane %v1021_v19, 5  ;;  %v2804_v31 = vshrl.u32 %v9555_v27, 16  ;;  %v9321_v54 = vld [vmem:[%s11010_s15 + $0xc] sm:$0xf]  ;;  %v10837_v55 = vld [vmem:[%s11010_s15 + $0x78] sm:$0xff]  }
  0xcb   : > { %971 = vst.msk [vmem:[#allocation2 + $0x208] sm:$0xff] %vm957_vm7, %v936_v45  ;;  %v1409_v16 = vpop.permute.xlu0 %1408  ;;  %v9574_v17 = vcombine.low %v2792_v7, %v2802_v12  ;;  %2236 = vrot.lane.b32.xlu1 %v9462_v13, %s10941_s18  ;;  %v9271_v22 = vcombine.low %v1174_v9, %v1177_v18  ;;  %v1181_v25 = vsel %vm11243_vm6, %v9256_v20, %v1180_v21  ;;  %v1182_v26 = vrot.slane %v1180_v21, 4  ;;  %v9428_v45 = vld [vmem:[%s11010_s15 + $0xb8] sm:$0xf]  ;;  %v9322_v60 = vld [vmem:[%s11010_s15 + $0x10] sm:$0xf] }
  0xcc   : > { %3748 = vmatmul.mubr.bf16.gmra.mrb[24].mxu0 %v3281_v40  ;;  %v2807_v33 = vshll.u32 %v9555_v27, 16  ;;  %v2813_v34 = vshll.u32 %v9556_v29, 16  ;;  %v2823_v36 = vshll.u32 %v9557_v30, 16  ;;  %v2806_v38 = vrot.slane %v2804_v31, 4  ;;  %v9427_v40 = vld [vmem:[%s11010_s15 + $0xb4] sm:$0xe] }
  0xcd   : > { %3755 = vmatprep.mubr.bf16.mxu0 %v3287_v35  ;;  %2925 = vrot.lane.b32.xlu0 %v9574_v17, %s10941_s18  ;;  %1263 = vst.msk [vmem:[#allocation2 + $0x238] sm:$0xff] %vm409_vm3, %v9271_v22  ;;  %v1184_v28 = vsel %vm11243_vm6, %v1182_v26, %v1183_v23  ;;  %v2817_v35 = vshrl.u32 %v9556_v29, 16  ;;  %v9447_v46 = vrot.slane %v9427_v40, 9  ;;  %v2150_v51 = vrot.slane %v9428_v45, 5  ;;  %v9323_v61 = vld [vmem:[%s11010_s15 + $0x14] sm:$0x1] }
  0xce   : > { %v938_v5 = vpop.permute.xlu1 %937  ;;  %1440 = vst.msk [vmem:[#allocation2 + $0x238] sm:$0xff] %vm957_vm7, %v1407_v50  ;;  %v9272_v37 = vcombine.low %v1181_v25, %v1184_v28  ;;  %v2809_v39 = vrot.slane %v2807_v33, 5  ;;  %v2815_v43 = vrot.slane %v2813_v34, 5  ;;  %v2825_v49 = vrot.slane %v2823_v36, 5  ;;  %v9429_v50 = vld [vmem:[%s11010_s15 + $0xbc] sm:$0x1] }
  0xcf   : > { %972 = vst.msk [vmem:[#allocation2 + $0x230] sm:$0xff] %vm957_vm7, %v938_v5  ;;  %v2819_v44 = vrot.slane %v2817_v35, 4  ;;  %v2153_v53 = vrot.slane %v9429_v50, 5  ;;  %v2151_v57 = vsel %vm11243_vm6, %v9447_v46, %v2150_v51  ;;  %v2152_v59 = vrot.slane %v2150_v51, 4  ;;  %v9558_v17 = vld [vmem:[%s11010_s15 + $0xcc] sm:$0xf] }
  0xd0   : > { %1264 = vst.msk [vmem:[#allocation2 + $0x260] sm:$0xff] %vm409_vm3, %v9272_v37  ;;  %v2810_v48 = vor.u32 %v2809_v39, %v2806_v38  ;;  %v1491_v0 = vshrl.u32 %v9321_v54, 16  ;;  %v1494_v1 = vshll.u32 %v9321_v54, 16  ;;  %v1500_v2 = vshll.u32 %v9322_v60, 16  ;;  %2411 = vst.msk [vmem:[#allocation2 + $0x158] sm:$0xff] %vm409_vm3, %v10837_v55  ;;  %v3302_v30 = vld [vmem:[#allocation2 + $0x198] sm:$0xff] }
  0xd1   : > { %1441 = vst.msk [vmem:[#allocation2 + $0x260] sm:$0xff] %vm957_vm7, %v1409_v16  ;;  %v2820_v52 = vor.u32 %v2819_v44, %v2815_v43  ;;  %v2154_v58 = vsel %vm11243_vm6, %v2152_v59, %v2153_v53  ;;  %v1504_v4 = vshrl.u32 %v9322_v60, 16  ;;  %v1510_v5 = vshll.u32 %v9323_v61, 16  ;;  %v9559_v18 = vld [vmem:[%s11010_s15 + $0xd0] sm:$0xf] }
  0xd2   : > { %v940_v24 = vpop.permute.xlu1 %939  ;;  %v2811_v56 = vrot.slane %v2810_v48, 4  ;;  %v9463_v8 = vcombine.low %v2151_v57, %v2154_v58  ;;  %v1493_v9 = vrot.slane %v1491_v0, 4  ;;  %v1496_v10 = vrot.slane %v1494_v1, 5  ;;  %v9560_v19 = vld [vmem:[%s11010_s15 + $0xd4] sm:$0x1] }
  0xd3   : > { %973 = vst.msk [vmem:[#allocation2 + $0x258] sm:$0xff] %vm957_vm7, %v940_v24  ;;  %v2821_v62 = vrot.slane %v2820_v52, 4  ;;  %v1502_v12 = vrot.slane %v1500_v2, 5  ;;  %v1506_v13 = vrot.slane %v1504_v4, 4  ;;  %v1512_v14 = vrot.slane %v1510_v5, 5  ;;  %v3296_v24 = vld [vmem:[#allocation2 + $0x168] sm:$0xff] }
  0xd4   : > { %3756 = vmatmul.mubr.bf16.gmra.mrb[28].mxu0 %v3286_v6  ;;  %v2816_v3 = vsel %vm11028_vm2, %v2811_v56, %v2815_v43  ;;  %2238 = vrot.lane.b32.xlu1 %v9463_v8, %s10941_s18  ;;  %v1497_v16 = vor.u32 %v1496_v10, %v1493_v9  ;;  %v2828_v21 = vshrl.u32 %v9558_v17, 16  ;;  %v2831_v22 = vshll.u32 %v9558_v17, 16  ;;  %v9430_v35 = vld [vmem:[%s11010_s15 + $0xc0] sm:$0xe]  ;;  %v9431_v38 = vld [vmem:[%s11010_s15 + $0xc4] sm:$0xf] }
  0xd5   : > { %3763 = vmatprep.mubr.bf16.mxu0 %v3292_v11  ;;  %v2826_v7 = vsel %vm11028_vm2, %v2821_v62, %v2825_v49  ;;  %v1507_v20 = vor.u32 %v1506_v13, %v1502_v12  ;;  %v2837_v23 = vshll.u32 %v9559_v18, 16  ;;  %v2841_v26 = vshrl.u32 %v9559_v18, 16  ;;  %v9432_v39 = vld [vmem:[%s11010_s15 + $0xc8] sm:$0x1]  ;;  %v9324_v49 = vld [vmem:[%s11010_s15 + $0x18] sm:$0xf] }
  0xd6   : > { %v2900_v41 = vpop.permute.xlu0 %2899  ;;  %v9575_v11 = vcombine.low %v2816_v3, %v2826_v7  ;;  %v1498_v25 = vrot.slane %v1497_v16, 4  ;;  %v2847_v27 = vshll.u32 %v9560_v19, 16  ;;  %v2830_v33 = vrot.slane %v2828_v21, 4  ;;  %v2211_v45 = vpop.permute.xlu1 %2210  ;;  %v9325_v50 = vld [vmem:[%s11010_s15 + $0x1c] sm:$0xf]  ;;  %v3301_v56 = vld [vmem:[#allocation2 + $0x190] sm:$0xff] }
  0xd7   : > { %2947 = vst.msk [vmem:[#allocation2 + $0x18] sm:$0xff] %vm957_vm7, %v2900_v41  ;;  %v1508_v31 = vrot.slane %v1507_v20, 4  ;;  %v2833_v28 = vrot.slane %v2831_v22, 5  ;;  %v2839_v34 = vrot.slane %v2837_v23, 5  ;;  %v2843_v37 = vrot.slane %v2841_v26, 4  ;;  %v3307_v62 = vld [vmem:[#allocation2 + $0x1c0] sm:$0xff] }
  0xd8   : > { %2927 = vrot.lane.b32.xlu0 %v9575_v11, %s10941_s18  ;;  %v1503_v36 = vsel %vm11028_vm2, %v1498_v25, %v1502_v12  ;;  %v2157_v43 = vrot.slane %v9431_v38, 5  ;;  %v2160_v48 = vrot.slane %v9432_v39, 5  ;;  %v9326_v54 = vld [vmem:[%s11010_s15 + $0x20] sm:$0x1]  ;;  %v1515_v55 = vshrl.u32 %v9324_v49, 16 }
  0xd9   : > { %v1513_v40 = vsel %vm11028_vm2, %v1508_v31, %v1512_v14  ;;  %v2834_v41 = vor.u32 %v2833_v28, %v2830_v33  ;;  %v2844_v46 = vor.u32 %v2843_v37, %v2839_v34  ;;  %v1518_v59 = vshll.u32 %v9324_v49, 16  ;;  %v9327_v8 = vld [vmem:[%s11010_s15 + $0x24] sm:$0xf]  ;;  %v9328_v12 = vld [vmem:[%s11010_s15 + $0x28] sm:$0xf] }
  0xda   : > { %v9369_v44 = vcombine.low %v1503_v36, %v1513_v40  ;;  %v2159_v53 = vrot.slane %v2157_v43, 4  ;;  %v1524_v60 = vshll.u32 %v9325_v50, 16  ;;  %v1528_v61 = vshrl.u32 %v9325_v50, 16  ;;  %v9329_v13 = vld [vmem:[%s11010_s15 + $0x2c] sm:$0x1] }
  0xdb   : > { %v2835_v51 = vrot.slane %v2834_v41, 4  ;;  %v2845_v57 = vrot.slane %v2844_v46, 4  ;;  %v1517_v2 = vrot.slane %v1515_v55, 4  ;;  %v1534_v3 = vshll.u32 %v9326_v54, 16  ;;  %v9330_v22 = vld [vmem:[%s11010_s15 + $0x30] sm:$0xf] }
  0xdc   : > { %3764 = vmatmul.mubr.bf16.gmra.mrb[32].mxu0 %v3291_v42  ;;  %v9448_v42 = vrot.slane %v9430_v35, 9  ;;  %1938 = vst.msk [vmem:[#allocation2 + $0x10] sm:$0xff] %vm409_vm3, %v9369_v44  ;;  %v2161_v1 = vsel %vm11243_vm6, %v2159_v53, %v2160_v48  ;;  %v1526_v7 = vrot.slane %v1524_v60, 5  ;;  %v1530_v10 = vrot.slane %v1528_v61, 4  ;;  %v9332_v33 = vld [vmem:[%s11010_s15 + $0x38] sm:$0x1] }
  0xdd   : > { %v2902_v6 = vpop.permute.xlu0 %2901  ;;  %3771 = vmatprep.mubr.bf16.mxu0 %v3297_v47  ;;  %v2849_v47 = vrot.slane %v2847_v27, 5  ;;  %2258 = vst.msk [vmem:[#allocation2 + $0x10] sm:$0xff] %vm957_vm7, %v2211_v45  ;;  %v2840_v0 = vsel %vm11028_vm2, %v2835_v51, %v2839_v34  ;;  %v1536_v11 = vrot.slane %v1534_v3, 5  ;;  %v1542_v16 = vshll.u32 %v9327_v8, 16  ;;  %v9331_v27 = vld [vmem:[%s11010_s15 + $0x34] sm:$0xf]  ;;  %v2213_v48 = vpop.permute.xlu1 %2212 }
  0xde   : > { %2948 = vst.msk [vmem:[#allocation2 + $0x40] sm:$0xff] %vm957_vm7, %v2902_v6  ;;  %v3254_v15 = vld [vmem:[#allocation2 + $0x18] sm:$0xff]  ;;  %v2158_v52 = vsel %vm11243_vm6, %v9448_v42, %v2157_v43  ;;  %v1520_v6 = vrot.slane %v1518_v59, 5  ;;  %v1548_v17 = vshll.u32 %v9328_v12, 16  ;;  %v1531_v18 = vor.u32 %v1530_v10, %v1526_v7  ;;  %v10838_v41 = vld [vmem:[%s11010_s15 + $0x84] sm:$0xff]  }
  0xdf   : > { %3860 = vmatprep.mubr.bf16.mxu1 %v3254_v15  ;;  %v2850_v4 = vsel %vm11028_vm2, %v2845_v57, %v2849_v47  ;;  %v9464_v5 = vcombine.low %v2158_v52, %v2161_v1  ;;  %v1539_v15 = vshrl.u32 %v9327_v8, 16  ;;  %v1552_v19 = vshrl.u32 %v9328_v12, 16  ;;  %v3306_v35 = vld [vmem:[#allocation2 + $0x1b8] sm:$0xff]  ;;  %v9334_v52 = vld [vmem:[%s11010_s15 + $0x40] sm:$0xf]  ;;  %v3312_v53 = vld [vmem:[#allocation2 + $0x1e8] sm:$0xff] }
  0xe0   : > { %v9576_v9 = vcombine.low %v2840_v0, %v2850_v4  ;;  %v1521_v14 = vor.u32 %v1520_v6, %v1517_v2  ;;  %v1558_v20 = vshll.u32 %v9329_v13, 16  ;;  %v1544_v25 = vrot.slane %v1542_v16, 5  ;;  %v9333_v46 = vld [vmem:[%s11010_s15 + $0x3c] sm:$0xf]  ;;  %2412 = vst.msk [vmem:[#allocation2 + $0x180] sm:$0xff] %vm409_vm3, %v10838_v41  ;;  %v10839_v13 = vld [vmem:[%s11010_s15 + $0x90] sm:$0xff]  }
  0xe1   : > { %2240 = vrot.lane.b32.xlu1 %v9464_v5, %s10941_s18  ;;  %v1550_v26 = vrot.slane %v1548_v17, 5  ;;  %v1563_v28 = vshrl.u32 %v9330_v22, 16  ;;  %v1566_v39 = vshll.u32 %v9330_v22, 16  ;;  %v1572_v40 = vshll.u32 %v9331_v27, 16  ;;  %v9335_v57 = vld [vmem:[%s11010_s15 + $0x44] sm:$0x1] }
  0xe2   : > { %v2904_v29 = vpop.permute.xlu0 %2903  ;;  %2929 = vrot.lane.b32.xlu0 %v9576_v9, %s10941_s18  ;;  %v1522_v23 = vrot.slane %v1521_v14, 4  ;;  %v1560_v31 = vrot.slane %v1558_v20, 5  ;;  %v1576_v45 = vshrl.u32 %v9331_v27, 16  ;;  %v1587_v59 = vshrl.u32 %v9333_v46, 16  ;;  %v9336_v5 = vld [vmem:[%s11010_s15 + $0x48] sm:$0xf] }
  0xe3   : > { %2949 = vst.msk [vmem:[#allocation2 + $0x68] sm:$0xff] %vm957_vm7, %v2904_v29  ;;  %v1532_v29 = vrot.slane %v1531_v18, 4  ;;  %v1565_v44 = vrot.slane %v1563_v28, 4  ;;  %v1568_v50 = vrot.slane %v1566_v39, 5  ;;  %v1574_v51 = vrot.slane %v1572_v40, 5  ;;  %v2215_v8 = vpop.permute.xlu1 %2214  ;;  %v3311_v18 = vld [vmem:[#allocation2 + $0x1e0] sm:$0xff] }
  0xe4   : > { %3772 = vmatmul.mubr.bf16.gmra.mrb[36].mxu0 %v3296_v24  ;;  %v1541_v24 = vrot.slane %v1539_v15, 4  ;;  %v1527_v36 = vsel %vm11028_vm2, %v1522_v23, %v1526_v7  ;;  %v3253_v37 = vld [vmem:[#allocation2 + $0x10] sm:$0xff]  ;;  %v1578_v55 = vrot.slane %v1576_v45, 4  ;;  %v1596_v0 = vshll.u32 %v9334_v52, 16  ;;  %v9337_v6 = vld [vmem:[%s11010_s15 + $0x4c] sm:$0xf] }
  0xe5   : > { %3779 = vmatprep.mubr.bf16.mxu0 %v3302_v30  ;;  %v3259_v21 = vld [vmem:[#allocation2 + $0x40] sm:$0xff]  ;;  %v1554_v30 = vrot.slane %v1552_v19, 4  ;;  %v1537_v42 = vsel %vm11028_vm2, %v1532_v29, %v1536_v11  ;;  %3861 = vmatmul.mubr.bf16.vlgmr.msra.gmra.mrb[0].mxu1 %v3253_v37  ;;  %v1569_v61 = vor.u32 %v1568_v50, %v1565_v44  ;;  %v1589_v4 = vrot.slane %v1587_v59, 4  ;;  %v9338_v12 = vld [vmem:[%s11010_s15 + $0x50] sm:$0x1]  ;;  %2413 = vst.msk [vmem:[#allocation2 + $0x1a8] sm:$0xff] %vm409_vm3, %v10839_v13 }
  0xe6   : > { %v1545_v38 = vor.u32 %v1544_v25, %v1541_v24  ;;  %v9370_v47 = vcombine.low %v1527_v36, %v1537_v42  ;;  %3868 = vmatprep.mubr.bf16.mxu1 %v3259_v21  ;;  %v1579_v3 = vor.u32 %v1578_v55, %v1574_v51  ;;  %v11812_v11 = vrot.slane %v1596_v0, 5  ;;  %v10840_v19 = vld [vmem:[%s11010_s15 + $0x9c] sm:$0xff]   ;;  %v3317_v24 = vld [vmem:[#allocation2 + $0x210] sm:$0xff] }
  0xe7   : > { %v1555_v43 = vor.u32 %v1554_v30, %v1550_v26  ;;  %v1570_v9 = vrot.slane %v1569_v61, 4  ;;  %v1600_v15 = vshrl.u32 %v9334_v52, 16  ;;  %v1606_v16 = vshll.u32 %v9335_v57, 16  ;;  %2414 = vst.msk [vmem:[#allocation2 + $0x1d0] sm:$0xff] %vm409_vm3, %v10840_v19  ;;  %v10842_v37 = vld [vmem:[%s11010_s15 + $0xb4] sm:$0xff]   ;;  %v10843_v19 = vld [vmem:[%s11010_s15 + $0xc0] sm:$0xff]  }
  0xe8   : > { %v2906_v58 = vpop.permute.xlu0 %2905  ;;  %v1546_v49 = vrot.slane %v1545_v38, 4  ;;  %1939 = vst.msk [vmem:[#allocation2 + $0x38] sm:$0xff] %vm409_vm3, %v9370_v47  ;;  %v1580_v14 = vrot.slane %v1579_v3, 4  ;;  %v1611_v17 = vshrl.u32 %v9336_v5, 16  ;;  %v1614_v22 = vshll.u32 %v9336_v5, 16  ;;  %v2217_v28 = vpop.permute.xlu1 %2216  ;;  %2416 = vst.msk [vmem:[#allocation2 + $0x220] sm:$0xff] %vm409_vm3, %v10842_v37 }
  0xe9   : > { %2950 = vst.msk [vmem:[#allocation2 + $0x90] sm:$0xff] %vm957_vm7, %v2906_v58  ;;  %v1556_v54 = vrot.slane %v1555_v43, 4  ;;  %2259 = vst.msk [vmem:[#allocation2 + $0x38] sm:$0xff] %vm957_vm7, %v2213_v48  ;;  %v1575_v20 = vsel %vm11028_vm2, %v1570_v9, %v1574_v51  ;;  %v1620_v23 = vshll.u32 %v9337_v6, 16  ;;  %v1602_v27 = vrot.slane %v1600_v15, 4  ;;  %v3322_v9 = vld [vmem:[#allocation2 + $0x238] sm:$0xff] }
  0xea   : > { %v1551_v60 = vsel %vm11028_vm2, %v1546_v49, %v1550_v26  ;;  %v3264_v26 = vld [vmem:[#allocation2 + $0x68] sm:$0xff]  ;;  %v1608_v29 = vrot.slane %v1606_v16, 5  ;;  %v1613_v30 = vrot.slane %v1611_v17, 4  ;;  %v1624_v39 = vshrl.u32 %v9337_v6, 16  ;;  %v9339_v42 = vld [vmem:[%s11010_s15 + $0x54] sm:$0xf] }
  0xeb   : > { %v1561_v2 = vsel %vm11028_vm2, %v1556_v54, %v1560_v31  ;;  %v10841_v31 = vld [vmem:[%s11010_s15 + $0xa8] sm:$0xff]   ;;  %v11826_v36 = vrot.slane %v1620_v23, 5  ;;  %v1603_v38 = vor.u32 %v1602_v27, %v11812_v11  ;;  %v1630_v40 = vshll.u32 %v9338_v12, 16  ;;  %v9340_v43 = vld [vmem:[%s11010_s15 + $0x58] sm:$0xf]  ;;  %2417 = vst.msk [vmem:[#allocation2 + $0x248] sm:$0xff] %vm409_vm3, %v10843_v19 }
  0xec   : > { %3780 = vmatmul.mubr.bf16.gmra.mrb[40].mxu0 %v3301_v56  ;;  %v1582_v56 = vshll.u32 %v9332_v33, 16  ;;  %v9371_v7 = vcombine.low %v1551_v60, %v1561_v2  ;;  %2415 = vst.msk [vmem:[#allocation2 + $0x1f8] sm:$0xff] %vm409_vm3, %v10841_v31  ;;  %v9341_v47 = vld [vmem:[%s11010_s15 + $0x5c] sm:$0x1]  ;;  %v1635_v48 = vshrl.u32 %v9339_v42, 16  ;;  %v1638_v49 = vshll.u32 %v9339_v42, 16 }
  0xed   : > { %3787 = vmatprep.mubr.bf16.mxu0 %v3307_v62  ;;  %v1590_v62 = vshll.u32 %v9333_v46, 16  ;;  %v1604_v50 = vrot.slane %v1603_v38, 4  ;;  %v1626_v51 = vrot.slane %v1624_v39, 4  ;;  %v1632_v52 = vrot.slane %v1630_v40, 5  ;;  %v9342_v2 = vld [vmem:[%s11010_s15 + $0x60] sm:$0xf] }
  0xee   : > { %v1584_v58 = vrot.slane %v1582_v56, 5  ;;  %1940 = vst.msk [vmem:[#allocation2 + $0x60] sm:$0xff] %vm409_vm3, %v9371_v7  ;;  %v1637_v55 = vrot.slane %v1635_v48, 4  ;;  %v1640_v56 = vrot.slane %v1638_v49, 5  ;;  %v1648_v57 = vshrl.u32 %v9340_v43, 16 }
  0xef   : > { %v2908_v34 = vpop.permute.xlu0 %2907  ;;  %v1592_v10 = vrot.slane %v1590_v62, 5  ;;  %2260 = vst.msk [vmem:[#allocation2 + $0x60] sm:$0xff] %vm957_vm7, %v2215_v8  ;;  %v1609_v59 = vsel %vm11028_vm2, %v1604_v50, %v1608_v29  ;;  %v2219_v60 = vpop.permute.xlu1 %2218  ;;  %v1627_v61 = vor.u32 %v1626_v51, %v11826_v36  ;;  %v1654_v0 = vshll.u32 %v9341_v47, 16  ;;  %v9343_v3 = vld [vmem:[%s11010_s15 + $0x64] sm:$0xf]  ;;  %v3321_v50 = vld [vmem:[#allocation2 + $0x230] sm:$0xff] }
  0xf0   : > { %2951 = vst.msk [vmem:[#allocation2 + $0xb8] sm:$0xff] %vm957_vm7, %v2908_v34  ;;  %v1585_v25 = vsel %vm11028_vm2, %v1580_v14, %v1584_v58  ;;  %v3258_v44 = vld [vmem:[#allocation2 + $0x38] sm:$0xff]  ;;  %v1641_v6 = vor.u32 %v1640_v56, %v1637_v55  ;;  %v1650_v7 = vrot.slane %v1648_v57, 4  ;;  %v9344_v8 = vld [vmem:[%s11010_s15 + $0x68] sm:$0x1]  ;;  %v1659_v12 = vshrl.u32 %v9342_v2, 16 }
  0xf1   : > { %v1593_v21 = vor.u32 %v1592_v10, %v1589_v4  ;;  %v9372_v33 = vcombine.low %v1575_v20, %v1585_v25  ;;  %3869 = vmatmul.mubr.bf16.gmra.mrb[4].mxu1 %v3258_v44  ;;  %v1628_v10 = vrot.slane %v1627_v61, 4  ;;  %v1662_v13 = vshll.u32 %v9342_v2, 16  ;;  %v3269_v20 = vld [vmem:[#allocation2 + $0x90] sm:$0xff]  ;;  %v9348_v48 = vld [vmem:[%s11010_s15 + $0x78] sm:$0xf]  ;;  %v3327_v55 = vld [vmem:[#allocation2 + $0x260] sm:$0xff] }
  0xf2   : > { %3876 = vmatprep.mubr.bf16.mxu1 %v3264_v26  ;;  %v1642_v14 = vrot.slane %v1641_v6, 4  ;;  %v1668_v16 = vshll.u32 %v9343_v3, 16  ;;  %v1672_v17 = vshrl.u32 %v9343_v3, 16  ;;  %v1661_v23 = vrot.slane %v1659_v12, 4  ;;  %v9346_v26 = vld [vmem:[%s11010_s15 + $0x70] sm:$0xf] }
  0xf3   : > { %v1594_v34 = vrot.slane %v1593_v21, 4  ;;  %1941 = vst.msk [vmem:[#allocation2 + $0x88] sm:$0xff] %vm409_vm3, %v9372_v33  ;;  %v1633_v21 = vsel %vm11028_vm2, %v1628_v10, %v1632_v52  ;;  %v1678_v25 = vshll.u32 %v9344_v8, 16  ;;  %v9347_v33 = vld [vmem:[%s11010_s15 + $0x74] sm:$0x1]  ;;  %v1696_v42 = vshrl.u32 %v9346_v26, 16 }
  0xf4   : > { %3788 = vmatmul.mubr.bf16.gmra.mrb[44].mxu0 %v3306_v35  ;;  %v2910_v1 = vpop.permute.xlu0 %2909  ;;  %v1616_v35 = vrot.slane %v1614_v22, 5  ;;  %2261 = vst.msk [vmem:[#allocation2 + $0x88] sm:$0xff] %vm957_vm7, %v2217_v28  ;;  %v1670_v31 = vrot.slane %v1668_v16, 5  ;;  %v10844_v28 = vld [vmem:[%s11010_s15 + $0xcc] sm:$0xff]   ;;  %v9349_v49 = vld [vmem:[%s11010_s15 + $0x7c] sm:$0xf] }
  0xf5   : > { %2952 = vst.msk [vmem:[#allocation2 + $0xe0] sm:$0xff] %vm957_vm7, %v2910_v1  ;;  %3795 = vmatprep.mubr.bf16.mxu0 %v3312_v53  ;;  %v1599_v45 = vsel %vm11028_vm2, %v1594_v34, %v11812_v11  ;;  %v1644_v53 = vshll.u32 %v9340_v43, 16  ;;  %v3316_v1 = vld [vmem:[#allocation2 + $0x208] sm:$0xff]  ;;  %v1656_v11 = vrot.slane %v1654_v0, 5  ;;  %v2221_v22 = vpop.permute.xlu1 %2220  ;;  %v1680_v37 = vrot.slane %v1678_v25, 5 }
  0xf6   : > { %v1617_v46 = vor.u32 %v1616_v35, %v1613_v30  ;;  %v3263_v58 = vld [vmem:[#allocation2 + $0x60] sm:$0xff]  ;;  %v9373_v4 = vcombine.low %v1599_v45, %v1609_v59  ;;  %2418 = vst.msk [vmem:[#allocation2 + $0x270] sm:$0xff] %vm409_vm3, %v10844_v28  ;;  %v1707_v61 = vshrl.u32 %v9348_v48, 16  ;;  %v1716_v3 = vshll.u32 %v9349_v49, 16 }
  0xf7   : > { %v1646_v62 = vrot.slane %v1644_v53, 5  ;;  %v1698_v53 = vrot.slane %v1696_v42, 4  ;;  %v1720_v10 = vshrl.u32 %v9349_v49, 16  ;;  %v9580_v16 = vld [vmem:[%s11010_s15 + $0x24] sm:$0xe] }
  0xf8   : > { %v1618_v54 = vrot.slane %v1617_v46, 4  ;;  %1942 = vst.msk [vmem:[#allocation2 + $0xb0] sm:$0xff] %vm409_vm3, %v9373_v4  ;;  %v9578_v4 = vld [vmem:[%s11010_s15 + $0x1c] sm:$0xf]  ;;  %v1709_v8 = vrot.slane %v1707_v61, 4 }
  0xf9   : > { %v1651_v15 = vor.u32 %v1650_v7, %v1646_v62  ;;  %2262 = vst.msk [vmem:[#allocation2 + $0xb0] sm:$0xff] %vm957_vm7, %v2219_v60  ;;  %v1647_v29 = vsel %vm11028_vm2, %v1642_v14, %v1646_v62  ;;  %3877 = vmatmul.mubr.bf16.gmra.mrb[8].mxu1 %v3263_v58  ;;  %v9350_v60 = vld [vmem:[%s11010_s15 + $0x80] sm:$0x1]  ;;  %v1710_v62 = vshll.u32 %v9348_v48, 16  ;;  %v9577_v58 = vld [vmem:[%s11010_s15 + $0x18] sm:$0xe] }
  0xfa   : > { %v2912_v41 = vpop.permute.xlu0 %2911  ;;  %v1623_v5 = vsel %vm11028_vm2, %v1618_v54, %v11826_v36  ;;  %v1674_v36 = vrot.slane %v1672_v17, 4  ;;  %3884 = vmatprep.mubr.bf16.mxu1 %v3269_v20  ;;  %v2223_v44 = vpop.permute.xlu1 %2222  ;;  %v1702_v54 = vshll.u32 %v9347_v33, 16  ;;  %v1726_v19 = vshll.u32 %v9350_v60, 16 }
  0xfb   : > { %2953 = vst.msk [vmem:[#allocation2 + $0x108] sm:$0xff] %vm957_vm7, %v2912_v41  ;;  %v9374_v27 = vcombine.low %v1623_v5, %v1633_v21  ;;  %v1652_v30 = vrot.slane %v1651_v15, 4  ;;  %v1692_v41 = vshll.u32 %v9346_v26, 16  ;;  %v3268_v56 = vld [vmem:[#allocation2 + $0x88] sm:$0xff]  ;;  %v3274_v5 = vld [vmem:[#allocation2 + $0xb8] sm:$0xff]  ;;  %v1718_v15 = vrot.slane %v1716_v3, 5 }
  0xfc   : > { %3796 = vmatmul.mubr.bf16.gmra.mrb[48].mxu0 %v3311_v18  ;;  %v9345_v18 = vld [vmem:[%s11010_s15 + $0x6c] sm:$0xf]  ;;  %v1675_v46 = vor.u32 %v1674_v36, %v1670_v31  ;;  %v1704_v2 = vrot.slane %v1702_v54, 5  ;;  %v9625_v20 = vrot.slane %v9577_v58, 9  ;;  %v9581_v21 = vld [vmem:[%s11010_s15 + $0x28] sm:$0xf] }
  0xfd   : > { %3803 = vmatprep.mubr.bf16.mxu0 %v3317_v24  ;;  %v1664_v24 = vrot.slane %v1662_v13, 5  ;;  %v1683_v38 = vshrl.u32 %v9345_v18, 16  ;;  %1943 = vst.msk [vmem:[#allocation2 + $0xd8] sm:$0xff] %vm409_vm3, %v9374_v27  ;;  %v1657_v39 = vsel %vm11028_vm2, %v1652_v30, %v1656_v11  ;;  %v1686_v40 = vshll.u32 %v9345_v18, 16  ;;  %v9579_v11 = vld [vmem:[%s11010_s15 + $0x20] sm:$0x1] }
  0xfe   : > { %2263 = vst.msk [vmem:[#allocation2 + $0xd8] sm:$0xff] %vm957_vm7, %v2221_v22  ;;  %v9375_v43 = vcombine.low %v1647_v29, %v1657_v39  ;;  %v1694_v52 = vrot.slane %v1692_v41, 5  ;;  %v1676_v59 = vrot.slane %v1675_v46, 4  ;;  %v1722_v18 = vrot.slane %v1720_v10, 4  ;;  %v9582_v26 = vld [vmem:[%s11010_s15 + $0x2c] sm:$0x1] }
  0xff   : > { %v1665_v35 = vor.u32 %v1664_v24, %v1661_v23  ;;  %v1685_v47 = vrot.slane %v1683_v38, 4  ;;  %v1688_v51 = vrot.slane %v1686_v40, 5  ;;  %v3061_v24 = vrot.slane %v9578_v4, 5  ;;  %v9351_v39 = vld [vmem:[%s11010_s15 + $0x84] sm:$0xf] }
 0x100   : > { %1944 = vst.msk [vmem:[#allocation2 + $0x100] sm:$0xff] %vm409_vm3, %v9375_v43  ;;  %v1681_v6 = vsel %vm11028_vm2, %v1676_v59, %v1680_v37  ;;  %v3064_v25 = vrot.slane %v9579_v11, 5  ;;  %v1723_v33 = vor.u32 %v1722_v18, %v1718_v15  ;;  %v1728_v28 = vrot.slane %v1726_v19, 5  ;;  %v3273_v40 = vld [vmem:[#allocation2 + $0xb0] sm:$0xff]  ;;  %v3279_v41 = vld [vmem:[#allocation2 + $0xe0] sm:$0xff] }
 0x101   : > { %v1666_v45 = vrot.slane %v1665_v35, 4  ;;  %2264 = vst.msk [vmem:[#allocation2 + $0x100] sm:$0xff] %vm957_vm7, %v2223_v44  ;;  %v1689_v0 = vor.u32 %v1688_v51, %v1685_v47  ;;  %3885 = vmatmul.mubr.bf16.gmra.mrb[12].mxu1 %v3268_v56  ;;  %v3062_v35 = vsel %vm11243_vm6, %v9625_v20, %v3061_v24  ;;  %v3063_v36 = vrot.slane %v3061_v24, 4  ;;  %v9585_v59 = vld [vmem:[%s11010_s15 + $0x38] sm:$0x1] }
 0x102   : > { %3892 = vmatprep.mubr.bf16.mxu1 %v3274_v5  ;;  %v9626_v37 = vrot.slane %v9580_v16, 9  ;;  %v3068_v38 = vrot.slane %v9581_v21, 5  ;;  %v1724_v43 = vrot.slane %v1723_v33, 4  ;;  %v3071_v44 = vrot.slane %v9582_v26, 5  ;;  %v9354_v20 = vld [vmem:[%s11010_s15 + $0x90] sm:$0xf] }
 0x103   : > { %v1671_v57 = vsel %vm11028_vm2, %v1666_v45, %v1670_v31  ;;  %v1690_v13 = vrot.slane %v1689_v0, 4  ;;  %v9352_v45 = vld [vmem:[%s11010_s15 + $0x88] sm:$0xf]  ;;  %v1731_v46 = vshrl.u32 %v9351_v39, 16  ;;  %v3065_v47 = vsel %vm11243_vm6, %v3063_v36, %v3064_v25  ;;  %v9355_v25 = vld [vmem:[%s11010_s15 + $0x94] sm:$0xf] }
 0x104   : > { %3804 = vmatmul.mubr.bf16.gmra.mrb[52].mxu0 %v3316_v1  ;;  %v1699_v1 = vor.u32 %v1698_v53, %v1694_v52  ;;  %v2225_v7 = vpop.permute.xlu1 %2224  ;;  %v9376_v12 = vcombine.low %v1671_v57, %v1681_v6  ;;  %v3069_v48 = vsel %vm11243_vm6, %v9626_v37, %v3068_v38  ;;  %v3070_v49 = vrot.slane %v3068_v38, 4  ;;  %v9584_v57 = vld [vmem:[%s11010_s15 + $0x34] sm:$0xf]  ;;  %v9588_v6 = vld [vmem:[%s11010_s15 + $0x44] sm:$0x1] }
 0x105   : > { %v2914_v34 = vpop.permute.xlu0 %2913  ;;  %3811 = vmatprep.mubr.bf16.mxu0 %v3322_v9  ;;  %v1712_v9 = vrot.slane %v1710_v62, 5  ;;  %v1695_v22 = vsel %vm11028_vm2, %v1690_v13, %v1694_v52  ;;  %v1734_v51 = vshll.u32 %v9351_v39, 16  ;;  %v9583_v52 = vld [vmem:[%s11010_s15 + $0x30] sm:$0xe]  ;;  %v1729_v53 = vsel %vm11028_vm2, %v1724_v43, %v1728_v28  ;;  %v3278_v21 = vld [vmem:[#allocation2 + $0xd8] sm:$0xff] }
 0x106   : > { %2954 = vst.msk [vmem:[#allocation2 + $0x130] sm:$0xff] %vm957_vm7, %v2914_v34  ;;  %v1700_v14 = vrot.slane %v1699_v1, 4  ;;  %v3326_v34 = vld [vmem:[#allocation2 + $0x258] sm:$0xff]  ;;  %v9641_v54 = vcombine.low %v3062_v35, %v3065_v47  ;;  %v1740_v56 = vshll.u32 %v9352_v45, 16  ;;  %v3072_v61 = vsel %vm11243_vm6, %v3070_v49, %v3071_v44  ;;  %v9589_v28 = vld [vmem:[%s11010_s15 + $0x48] sm:$0xe] }
 0x107   : > { %v1713_v17 = vor.u32 %v1712_v9, %v1709_v8  ;;  %1945 = vst.msk [vmem:[#allocation2 + $0x128] sm:$0xff] %vm409_vm3, %v9376_v12  ;;  %v1736_v62 = vrot.slane %v1734_v51, 5  ;;  %v1744_v0 = vshrl.u32 %v9352_v45, 16  ;;  %v9586_v1 = vld [vmem:[%s11010_s15 + $0x3c] sm:$0xe]  ;;  %v9642_v3 = vcombine.low %v3069_v48, %v3072_v61 }
 0x108   : > { %v1705_v23 = vsel %vm11028_vm2, %v1700_v14, %v1704_v2  ;;  %2265 = vst.msk [vmem:[#allocation2 + $0x128] sm:$0xff] %vm957_vm7, %v2225_v7  ;;  %v9587_v2 = vld [vmem:[%s11010_s15 + $0x40] sm:$0xf]  ;;  %v1742_v58 = vrot.slane %v1740_v56, 5  ;;  %v9627_v5 = vrot.slane %v9583_v52, 9  ;;  %v3075_v9 = vrot.slane %v9584_v57, 5 }
 0x109   : > { %v9377_v29 = vcombine.low %v1695_v22, %v1705_v23  ;;  %v1714_v31 = vrot.slane %v1713_v17, 4  ;;  %3893 = vmatmul.mubr.bf16.gmra.mrb[16].mxu1 %v3273_v40  ;;  %3235 = vst.msk [vmem:[#allocation2 + $0x20] sm:$0xff] %vm409_vm3, %v9641_v54  ;;  %v1746_v8 = vrot.slane %v1744_v0, 4  ;;  %v3078_v10 = vrot.slane %v9585_v59, 5  ;;  %3236 = vst.msk [vmem:[#allocation2 + $0x48] sm:$0xff] %vm409_vm3, %v9642_v3  ;;  %v3284_v22 = vld [vmem:[#allocation2 + $0x108] sm:$0xff] }
 0x10a   : > { %3900 = vmatprep.mubr.bf16.mxu1 %v3279_v41  ;;  %v9628_v13 = vrot.slane %v9586_v1, 9  ;;  %v3082_v14 = vrot.slane %v9587_v2, 5  ;;  %v3076_v18 = vsel %vm11243_vm6, %v9627_v5, %v3075_v9  ;;  %v3077_v19 = vrot.slane %v3075_v9, 4  ;;  %v9356_v26 = vld [vmem:[%s11010_s15 + $0x98] sm:$0x1]  ;;  %v3283_v9 = vld [vmem:[#allocation2 + $0x100] sm:$0xff] }
 0x10b   : > { %1946 = vst.msk [vmem:[#allocation2 + $0x150] sm:$0xff] %vm409_vm3, %v9377_v29  ;;  %v1719_v42 = vsel %vm11028_vm2, %v1714_v31, %v1718_v15  ;;  %v3085_v15 = vrot.slane %v9588_v6, 5  ;;  %v1747_v17 = vor.u32 %v1746_v8, %v1742_v58  ;;  %v1755_v33 = vshrl.u32 %v9354_v20, 16  ;;  %v9591_v39 = vld [vmem:[%s11010_s15 + $0x50] sm:$0x1] }
 0x10c   : > { %3812 = vmatmul.mubr.bf16.gmra.mrb[56].mxu0 %v3321_v50  ;;  %v2227_v30 = vpop.permute.xlu1 %2226  ;;  %v9353_v50 = vld [vmem:[%s11010_s15 + $0x8c] sm:$0x1]  ;;  %v9378_v60 = vcombine.low %v1719_v42, %v1729_v53  ;;  %v3083_v23 = vsel %vm11243_vm6, %v9628_v13, %v3082_v14  ;;  %v3084_v24 = vrot.slane %v3082_v14, 4  ;;  %v3079_v31 = vsel %vm11243_vm6, %v3077_v19, %v3078_v10  ;;  %v9592_v40 = vld [vmem:[%s11010_s15 + $0x54] sm:$0xe] }
 0x10d   : > { %3819 = vmatprep.mubr.bf16.mxu0 %v3327_v55  ;;  %2266 = vst.msk [vmem:[#allocation2 + $0x150] sm:$0xff] %vm957_vm7, %v2227_v30  ;;  %v1733_v55 = vrot.slane %v1731_v46, 4  ;;  %v1750_v4 = vshll.u32 %v9353_v50, 16  ;;  %v1748_v30 = vrot.slane %v1747_v17, 4  ;;  %v9643_v35 = vcombine.low %v3076_v18, %v3079_v31  ;;  %v9593_v46 = vld [vmem:[%s11010_s15 + $0x58] sm:$0xf] }
 0x10e   : > { %1947 = vst.msk [vmem:[#allocation2 + $0x178] sm:$0xff] %vm409_vm3, %v9378_v60  ;;  %v3086_v36 = vsel %vm11243_vm6, %v3084_v24, %v3085_v15  ;;  %v1758_v37 = vshll.u32 %v9354_v20, 16  ;;  %v1764_v38 = vshll.u32 %v9355_v25, 16  ;;  %v1757_v44 = vrot.slane %v1755_v33, 4  ;;  %v9594_v51 = vld [vmem:[%s11010_s15 + $0x5c] sm:$0x1] }
 0x10f   : > { %v2916_v27 = vpop.permute.xlu0 %2915  ;;  %v1737_v7 = vor.u32 %v1736_v62, %v1733_v55  ;;  %v1752_v12 = vrot.slane %v1750_v4, 5  ;;  %v9644_v43 = vcombine.low %v3083_v23, %v3086_v36  ;;  %v1768_v45 = vshrl.u32 %v9355_v25, 16  ;;  %3237 = vst.msk [vmem:[#allocation2 + $0x70] sm:$0xff] %vm409_vm3, %v9643_v35  ;;  %v9357_v3 = vld [vmem:[%s11010_s15 + $0x9c] sm:$0xf] }
 0x110   : > { %2955 = vst.msk [vmem:[#allocation2 + $0x158] sm:$0xff] %vm957_vm7, %v2916_v27  ;;  %v3255_v41 = vld [vmem:[#allocation2 + $0x20] sm:$0xff]  ;;  %v1760_v48 = vrot.slane %v1758_v37, 5  ;;  %v1766_v49 = vrot.slane %v1764_v38, 5  ;;  %v1774_v50 = vshll.u32 %v9356_v26, 16  ;;  %v3260_v52 = vld [vmem:[#allocation2 + $0x48] sm:$0xff] }
 0x111   : > { %v1738_v16 = vrot.slane %v1737_v7, 4  ;;  %v1753_v42 = vsel %vm11028_vm2, %v1748_v30, %v1752_v12  ;;  %3901 = vmatmul.mubr.bf16.gmra.mrb[20].mxu1 %v3278_v21  ;;  %3238 = vst.msk [vmem:[#allocation2 + $0x98] sm:$0xff] %vm409_vm3, %v9644_v43  ;;  %v1770_v53 = vrot.slane %v1768_v45, 4  ;;  %v9629_v54 = vrot.slane %v9589_v28, 9  ;;  %v9358_v7 = vld [vmem:[%s11010_s15 + $0xa0] sm:$0xf] }
 0x112   : > { %3908 = vmatprep.mubr.bf16.mxu1 %v3284_v22  ;;  %v3092_v56 = vrot.slane %v9591_v39, 5  ;;  %v1761_v57 = vor.u32 %v1760_v48, %v1757_v44  ;;  %v1776_v59 = vrot.slane %v1774_v50, 5  ;;  %v9630_v60 = vrot.slane %v9592_v40, 9  ;;  %v9359_v8 = vld [vmem:[%s11010_s15 + $0xa4] sm:$0x1] }
 0x113   : > { %v1743_v29 = vsel %vm11028_vm2, %v1738_v16, %v1742_v58  ;;  %v3096_v61 = vrot.slane %v9593_v46, 5  ;;  %v1771_v62 = vor.u32 %v1770_v53, %v1766_v49  ;;  %v3099_v2 = vrot.slane %v9594_v51, 5  ;;  %v9595_v15 = vld [vmem:[%s11010_s15 + $0x60] sm:$0xe]  ;;  %v3289_v16 = vld [vmem:[#allocation2 + $0x130] sm:$0xff] }
 0x114   : > { %3820 = vmatmul.mubr.bf16.gmra.mrb[60].mxu0 %v3326_v34  ;;  %v9590_v34 = vld [vmem:[%s11010_s15 + $0x4c] sm:$0xf]  ;;  %v9379_v47 = vcombine.low %v1743_v29, %v1753_v42  ;;  %v1762_v4 = vrot.slane %v1761_v57, 4  ;;  %v1779_v13 = vshrl.u32 %v9357_v3, 16  ;;  %v1782_v14 = vshll.u32 %v9357_v3, 16 }
 0x115   : > { %10678 = vmatprep.mubr.msk.bf16.mxu0 %vm409_vm3, %v3255_v41  ;;  %v3089_v55 = vrot.slane %v9590_v34, 5  ;;  %v3097_v5 = vsel %vm11243_vm6, %v9630_v60, %v3096_v61  ;;  %v3098_v6 = vrot.slane %v3096_v61, 4  ;;  %v1788_v20 = vshll.u32 %v9358_v7, 16  ;;  %v9596_v21 = vld [vmem:[%s11010_s15 + $0x64] sm:$0xf] }
 0x116   : > { %v2229_v11 = vpop.permute.xlu1 %2228  ;;  %1948 = vst.msk [vmem:[#allocation2 + $0x1a0] sm:$0xff] %vm409_vm3, %v9379_v47  ;;  %v1767_v17 = vsel %vm11028_vm2, %v1762_v4, %v1766_v49  ;;  %v9597_v22 = vld [vmem:[%s11010_s15 + $0x68] sm:$0x1]  ;;  %v3265_v23 = vld [vmem:[#allocation2 + $0x70] sm:$0xff]  ;;  %v1781_v26 = vrot.slane %v1779_v13, 4  ;;  %v1792_v28 = vshrl.u32 %v9358_v7, 16 }
 0x117   : > { %2267 = vst.msk [vmem:[#allocation2 + $0x178] sm:$0xff] %vm957_vm7, %v2229_v11  ;;  %v3090_v0 = vsel %vm11243_vm6, %v9629_v54, %v3089_v55  ;;  %v3091_v1 = vrot.slane %v3089_v55, 4  ;;  %v1772_v11 = vrot.slane %v1771_v62, 4  ;;  %v3100_v19 = vsel %vm11243_vm6, %v3098_v6, %v3099_v2  ;;  %v9598_v29 = vld [vmem:[%s11010_s15 + $0x6c] sm:$0xe]  ;;  %v3294_v55 = vld [vmem:[#allocation2 + $0x158] sm:$0xff] }
 0x118   : > { %v9646_v25 = vcombine.low %v3097_v5, %v3100_v19  ;;  %v3270_v30 = vld [vmem:[#allocation2 + $0x98] sm:$0xff]  ;;  %v1790_v33 = vrot.slane %v1788_v20, 5  ;;  %v1798_v34 = vshll.u32 %v9359_v8, 16  ;;  %v9599_v35 = vld [vmem:[%s11010_s15 + $0x70] sm:$0xf]  ;;  %v9631_v37 = vrot.slane %v9595_v15, 9 }
 0x119   : > { %v2918_v27 = vpop.permute.xlu0 %2917  ;;  %v3093_v12 = vsel %vm11243_vm6, %v3091_v1, %v3092_v56  ;;  %v1777_v24 = vsel %vm11028_vm2, %v1772_v11, %v1776_v59  ;;  %3909 = vmatmul.mubr.bf16.gmra.mrb[24].mxu1 %v3283_v9  ;;  %v3103_v38 = vrot.slane %v9596_v21, 5  ;;  %v3106_v39 = vrot.slane %v9597_v22, 5  ;;  %v9600_v40 = vld [vmem:[%s11010_s15 + $0x74] sm:$0x1]  ;;  %v9361_v53 = vld [vmem:[%s11010_s15 + $0xac] sm:$0xf] }
 0x11a   : > { %2956 = vst.msk [vmem:[#allocation2 + $0x180] sm:$0xff] %vm957_vm7, %v2918_v27  ;;  %v9645_v18 = vcombine.low %v3090_v0, %v3093_v12  ;;  %v1784_v27 = vrot.slane %v1782_v14, 5  ;;  %v9380_v31 = vcombine.low %v1767_v17, %v1777_v24  ;;  %3916 = vmatprep.mubr.bf16.mxu1 %v3289_v16  ;;  %v1794_v41 = vrot.slane %v1792_v28, 4  ;;  %v3288_v54 = vld [vmem:[#allocation2 + $0x128] sm:$0xff]  ;;  %v9362_v60 = vld [vmem:[%s11010_s15 + $0xb0] sm:$0x1] }
 0x11b   : > { %3240 = vst.msk [vmem:[#allocation2 + $0xe8] sm:$0xff] %vm409_vm3, %v9646_v25  ;;  %v9632_v42 = vrot.slane %v9598_v29, 9  ;;  %v3110_v43 = vrot.slane %v9599_v35, 5  ;;  %v3104_v45 = vsel %vm11243_vm6, %v9631_v37, %v3103_v38  ;;  %v3105_v46 = vrot.slane %v3103_v38, 4  ;;  %v9602_v4 = vld [vmem:[%s11010_s15 + $0x7c] sm:$0xf] }
 0x11c   : > { %10679 = vmatmul.mubr.msk.bf16.vlgmr.msra.gmra.mrb[64].mxu0 %vm409_vm3, %v3260_v52  ;;  %3239 = vst.msk [vmem:[#allocation2 + $0xc0] sm:$0xff] %vm409_vm3, %v9645_v18  ;;  %v1785_v36 = vor.u32 %v1784_v27, %v1781_v26  ;;  %1949 = vst.msk [vmem:[#allocation2 + $0x1c8] sm:$0xff] %vm409_vm3, %v9380_v31  ;;  %v3113_v47 = vrot.slane %v9600_v40, 5  ;;  %v1795_v48 = vor.u32 %v1794_v41, %v1790_v33  ;;  %v1800_v49 = vrot.slane %v1798_v34, 5  ;;  %v9360_v52 = vld [vmem:[%s11010_s15 + $0xa8] sm:$0xf] }
 0x11d   : > { %10682 = vmatprep.mubr.msk.bf16.mxu0 %vm409_vm3, %v3265_v23  ;;  %v3111_v50 = vsel %vm11243_vm6, %v9632_v42, %v3110_v43  ;;  %v3112_v51 = vrot.slane %v3110_v43, 4  ;;  %v3107_v59 = vsel %vm11243_vm6, %v3105_v46, %v3106_v39  ;;  %v1803_v61 = vshrl.u32 %v9360_v52, 16  ;;  %v9604_v17 = vld [vmem:[%s11010_s15 + $0x84] sm:$0xe]  ;;  %v9605_v22 = vld [vmem:[%s11010_s15 + $0x88] sm:$0xf] }
 0x11e   : > { %v1786_v44 = vrot.slane %v1785_v36, 4  ;;  %v1806_v62 = vshll.u32 %v9360_v52, 16  ;;  %v1796_v0 = vrot.slane %v1795_v48, 4  ;;  %v9647_v1 = vcombine.low %v3104_v45, %v3107_v59  ;;  %v9606_v23 = vld [vmem:[%s11010_s15 + $0x8c] sm:$0x1]  ;;  %v3293_v34 = vld [vmem:[#allocation2 + $0x150] sm:$0xff] }
 0x11f   : > { %v3114_v2 = vsel %vm11243_vm6, %v3112_v51, %v3113_v47  ;;  %v1812_v3 = vshll.u32 %v9361_v53, 16  ;;  %v1805_v7 = vrot.slane %v1803_v61, 4  ;;  %v1816_v9 = vshrl.u32 %v9361_v53, 16  ;;  %v9363_v28 = vld [vmem:[%s11010_s15 + $0xb4] sm:$0xf] }
 0x120   : > { %v2231_v58 = vpop.permute.xlu1 %2230  ;;  %v1791_v57 = vsel %vm11028_vm2, %v1786_v44, %v1790_v33  ;;  %v9648_v6 = vcombine.low %v3111_v50, %v3114_v2  ;;  %v1808_v8 = vrot.slane %v1806_v62, 5  ;;  %v1801_v13 = vsel %vm11028_vm2, %v1796_v0, %v1800_v49  ;;  %3241 = vst.msk [vmem:[#allocation2 + $0x110] sm:$0xff] %vm409_vm3, %v9647_v1  ;;  %v9364_v39 = vld [vmem:[%s11010_s15 + $0xb8] sm:$0xf]  ;;  %v9365_v43 = vld [vmem:[%s11010_s15 + $0xbc] sm:$0x1] }
 0x121   : > { %v2920_v10 = vpop.permute.xlu0 %2919  ;;  %2268 = vst.msk [vmem:[#allocation2 + $0x1a0] sm:$0xff] %vm957_vm7, %v2231_v58  ;;  %v9601_v58 = vld [vmem:[%s11010_s15 + $0x78] sm:$0xe]  ;;  %3917 = vmatmul.mubr.bf16.gmra.mrb[28].mxu1 %v3288_v54  ;;  %v1814_v14 = vrot.slane %v1812_v3, 5  ;;  %v1822_v15 = vshll.u32 %v9362_v60, 16  ;;  %v9381_v18 = vcombine.low %v1791_v57, %v1801_v13  ;;  %v1818_v20 = vrot.slane %v1816_v9, 4 }
 0x122   : > { %2957 = vst.msk [vmem:[#allocation2 + $0x1a8] sm:$0xff] %vm957_vm7, %v2920_v10  ;;  %v9603_v10 = vld [vmem:[%s11010_s15 + $0x80] sm:$0x1]  ;;  %v3280_v12 = vld [vmem:[#allocation2 + $0xe8] sm:$0xff]  ;;  %v9633_v16 = vrot.slane %v9601_v58, 9  ;;  %3924 = vmatprep.mubr.bf16.mxu1 %v3294_v55  ;;  %v1809_v19 = vor.u32 %v1808_v8, %v1805_v7  ;;  %v3117_v21 = vrot.slane %v9602_v4, 5 }
 0x123   : > { %v3275_v5 = vld [vmem:[#allocation2 + $0xc0] sm:$0xff]  ;;  %3242 = vst.msk [vmem:[#allocation2 + $0x138] sm:$0xff] %vm409_vm3, %v9648_v6  ;;  %v1824_v24 = vrot.slane %v1822_v15, 5  ;;  %v3120_v25 = vrot.slane %v9603_v10, 5  ;;  %v9634_v26 = vrot.slane %v9604_v17, 9  ;;  %v3124_v27 = vrot.slane %v9605_v22, 5 }
 0x124   : > { %10683 = vmatmul.mubr.msk.bf16.gmra.mrb[68].mxu0 %vm409_vm3, %v3270_v30  ;;  %1950 = vst.msk [vmem:[#allocation2 + $0x1f0] sm:$0xff] %vm409_vm3, %v9381_v18  ;;  %v1810_v29 = vrot.slane %v1809_v19, 4  ;;  %v1819_v30 = vor.u32 %v1818_v20, %v1814_v14  ;;  %v3118_v31 = vsel %vm11243_vm6, %v9633_v16, %v3117_v21  ;;  %v3119_v33 = vrot.slane %v3117_v21, 4  ;;  %v3299_v35 = vld [vmem:[#allocation2 + $0x180] sm:$0xff]  ;;  %v9607_v45 = vld [vmem:[%s11010_s15 + $0x90] sm:$0xe] }
 0x125   : > { %10686 = vmatprep.mubr.msk.bf16.mxu0 %vm409_vm3, %v3275_v5  ;;  %v3125_v36 = vsel %vm11243_vm6, %v9634_v26, %v3124_v27  ;;  %v3126_v37 = vrot.slane %v3124_v27, 4  ;;  %v3127_v38 = vrot.slane %v9606_v23, 5  ;;  %v1827_v44 = vshrl.u32 %v9363_v28, 16  ;;  %v9608_v50 = vld [vmem:[%s11010_s15 + $0x94] sm:$0xf]  ;;  %v3298_v21 = vld [vmem:[#allocation2 + $0x178] sm:$0xff] }
 0x126   : > { %v1815_v40 = vsel %vm11028_vm2, %v1810_v29, %v1814_v14  ;;  %v1820_v41 = vrot.slane %v1819_v30, 4  ;;  %v3121_v42 = vsel %vm11243_vm6, %v3119_v33, %v3120_v25  ;;  %v1830_v48 = vshll.u32 %v9363_v28, 16  ;;  %v9609_v51 = vld [vmem:[%s11010_s15 + $0x98] sm:$0x1]  ;;  %v9610_v57 = vld [vmem:[%s11010_s15 + $0x9c] sm:$0xe] }
 0x127   : > { %v9649_v46 = vcombine.low %v3118_v31, %v3121_v42  ;;  %v3128_v47 = vsel %vm11243_vm6, %v3126_v37, %v3127_v38  ;;  %v1836_v49 = vshll.u32 %v9364_v39, 16  ;;  %v3285_v52 = vld [vmem:[#allocation2 + $0x110] sm:$0xff]  ;;  %v1829_v55 = vrot.slane %v1827_v44, 4  ;;  %v9611_v4 = vld [vmem:[%s11010_s15 + $0xa0] sm:$0xf] }
 0x128   : > { %v1825_v53 = vsel %vm11028_vm2, %v1820_v41, %v1824_v24  ;;  %v9650_v54 = vcombine.low %v3125_v36, %v3128_v47  ;;  %v1832_v61 = vrot.slane %v1830_v48, 5  ;;  %v1846_v0 = vshll.u32 %v9365_v43, 16  ;;  %v9612_v7 = vld [vmem:[%s11010_s15 + $0xa4] sm:$0x1]  ;;  %v9366_v19 = vld [vmem:[%s11010_s15 + $0xc0] sm:$0xf] }
 0x129   : > { %v2233_v56 = vpop.permute.xlu1 %2232  ;;  %3925 = vmatmul.mubr.bf16.gmra.mrb[32].mxu1 %v3293_v34  ;;  %v9382_v60 = vcombine.low %v1815_v40, %v1825_v53  ;;  %3243 = vst.msk [vmem:[#allocation2 + $0x160] sm:$0xff] %vm409_vm3, %v9649_v46  ;;  %v1838_v62 = vrot.slane %v1836_v49, 5  ;;  %v9635_v2 = vrot.slane %v9607_v45, 9  ;;  %v3131_v3 = vrot.slane %v9608_v50, 5  ;;  %v9367_v20 = vld [vmem:[%s11010_s15 + $0xc4] sm:$0xf] }
 0x12a   : > { %2269 = vst.msk [vmem:[#allocation2 + $0x1c8] sm:$0xff] %vm957_vm7, %v2233_v56  ;;  %v1840_v56 = vshrl.u32 %v9364_v39, 16  ;;  %v3290_v59 = vld [vmem:[#allocation2 + $0x138] sm:$0xff]  ;;  %3932 = vmatprep.mubr.bf16.mxu1 %v3299_v35  ;;  %v3134_v58 = vrot.slane %v9609_v51, 5  ;;  %v1833_v5 = vor.u32 %v1832_v61, %v1829_v55  ;;  %v1848_v6 = vrot.slane %v1846_v0, 5  ;;  %v3304_v27 = vld [vmem:[#allocation2 + $0x1a8] sm:$0xff] }
 0x12b   : > { %3244 = vst.msk [vmem:[#allocation2 + $0x188] sm:$0xff] %vm409_vm3, %v9650_v54  ;;  %1951 = vst.msk [vmem:[#allocation2 + $0x218] sm:$0xff] %vm409_vm3, %v9382_v60  ;;  %v9636_v8 = vrot.slane %v9610_v57, 9  ;;  %v3138_v9 = vrot.slane %v9611_v4, 5  ;;  %v3133_v13 = vrot.slane %v3131_v3, 4  ;;  %v3141_v14 = vrot.slane %v9612_v7, 5 }
 0x12c   : > { %v2922_v11 = vpop.permute.xlu0 %2921  ;;  %10687 = vmatmul.mubr.msk.bf16.gmra.mrb[72].mxu0 %vm409_vm3, %v3280_v12  ;;  %v1842_v1 = vrot.slane %v1840_v56, 4  ;;  %v3132_v12 = vsel %vm11243_vm6, %v9635_v2, %v3131_v3  ;;  %v1834_v16 = vrot.slane %v1833_v5, 4  ;;  %v9368_v24 = vld [vmem:[%s11010_s15 + $0xc8] sm:$0x1]  ;;  %v1851_v25 = vshrl.u32 %v9366_v19, 16  ;;  %v3303_v56 = vld [vmem:[#allocation2 + $0x1a0] sm:$0xff] }
 0x12d   : > { %2958 = vst.msk [vmem:[#allocation2 + $0x1d0] sm:$0xff] %vm957_vm7, %v2922_v11  ;;  %10690 = vmatprep.mubr.msk.bf16.mxu0 %vm409_vm3, %v3285_v52  ;;  %v3139_v17 = vsel %vm11243_vm6, %v9636_v8, %v3138_v9  ;;  %v3140_v18 = vrot.slane %v3138_v9, 4  ;;  %v3135_v23 = vsel %vm11243_vm6, %v3133_v13, %v3134_v58  ;;  %v1854_v26 = vshll.u32 %v9366_v19, 16  ;;  %v9613_v28 = vld [vmem:[%s11010_s15 + $0xa8] sm:$0xe] }
 0x12e   : > { %v1843_v11 = vor.u32 %v1842_v1, %v1838_v62  ;;  %v1839_v29 = vsel %vm11028_vm2, %v1834_v16, %v1838_v62  ;;  %v9651_v30 = vcombine.low %v3132_v12, %v3135_v23  ;;  %v1860_v33 = vshll.u32 %v9367_v20, 16  ;;  %v9614_v34 = vld [vmem:[%s11010_s15 + $0xac] sm:$0xf]  ;;  %v9615_v40 = vld [vmem:[%s11010_s15 + $0xb0] sm:$0x1] }
 0x12f   : > { %v3142_v31 = vsel %vm11243_vm6, %v3140_v18, %v3141_v14  ;;  %v1853_v38 = vrot.slane %v1851_v25, 4  ;;  %v1856_v39 = vrot.slane %v1854_v26, 5  ;;  %v1864_v44 = vshrl.u32 %v9367_v20, 16  ;;  %v9616_v46 = vld [vmem:[%s11010_s15 + $0xb4] sm:$0xe] }
 0x130   : > { %v1844_v22 = vrot.slane %v1843_v11, 4  ;;  %v3295_v35 = vld [vmem:[#allocation2 + $0x160] sm:$0xff]  ;;  %v9652_v37 = vcombine.low %v3139_v17, %v3142_v31  ;;  %3245 = vst.msk [vmem:[#allocation2 + $0x1b0] sm:$0xff] %vm409_vm3, %v9651_v30  ;;  %v1862_v43 = vrot.slane %v1860_v33, 5  ;;  %v1870_v45 = vshll.u32 %v9368_v24, 16 }
 0x131   : > { %3933 = vmatmul.mubr.bf16.gmra.mrb[36].mxu1 %v3298_v21  ;;  %v1857_v47 = vor.u32 %v1856_v39, %v1853_v38  ;;  %v9637_v48 = vrot.slane %v9613_v28, 9  ;;  %v3145_v49 = vrot.slane %v9614_v34, 5  ;;  %v3148_v50 = vrot.slane %v9615_v40, 5  ;;  %v9617_v51 = vld [vmem:[%s11010_s15 + $0xb8] sm:$0xf]  ;;  %v3308_v34 = vld [vmem:[#allocation2 + $0x1c8] sm:$0xff] }
 0x132   : > { %v1849_v36 = vsel %vm11028_vm2, %v1844_v22, %v1848_v6  ;;  %v3300_v41 = vld [vmem:[#allocation2 + $0x188] sm:$0xff]  ;;  %3940 = vmatprep.mubr.bf16.mxu1 %v3304_v27  ;;  %3246 = vst.msk [vmem:[#allocation2 + $0x1d8] sm:$0xff] %vm409_vm3, %v9652_v37  ;;  %v1866_v52 = vrot.slane %v1864_v44, 4  ;;  %v9618_v53 = vld [vmem:[%s11010_s15 + $0xbc] sm:$0x1]  ;;  %v9638_v54 = vrot.slane %v9616_v46, 9 }
 0x133   : > { %v2235_v10 = vpop.permute.xlu1 %2234  ;;  %v9383_v42 = vcombine.low %v1839_v29, %v1849_v36  ;;  %v3152_v55 = vrot.slane %v9617_v51, 5  ;;  %v1858_v57 = vrot.slane %v1857_v47, 4  ;;  %v3147_v60 = vrot.slane %v3145_v49, 4  ;;  %v9619_v62 = vld [vmem:[%s11010_s15 + $0xc0] sm:$0xe] }
 0x134   : > { %10691 = vmatmul.mubr.msk.bf16.gmra.mrb[76].mxu0 %vm409_vm3, %v3290_v59  ;;  %2270 = vst.msk [vmem:[#allocation2 + $0x1f0] sm:$0xff] %vm957_vm7, %v2235_v10  ;;  %v3146_v59 = vsel %vm11243_vm6, %v9637_v48, %v3145_v49  ;;  %v3155_v61 = vrot.slane %v9618_v53, 5  ;;  %v3309_v0 = vld [vmem:[#allocation2 + $0x1d0] sm:$0xff]  ;;  %v1867_v1 = vor.u32 %v1866_v52, %v1862_v43  ;;  %v1872_v2 = vrot.slane %v1870_v45, 5  ;;  %v9620_v4 = vld [vmem:[%s11010_s15 + $0xc4] sm:$0xf] }
 0x135   : > { %v2924_v15 = vpop.permute.xlu0 %2923  ;;  %10694 = vmatprep.mubr.msk.bf16.mxu0 %vm409_vm3, %v3295_v35  ;;  %1952 = vst.msk [vmem:[#allocation2 + $0x240] sm:$0xff] %vm409_vm3, %v9383_v42  ;;  %v3153_v3 = vsel %vm11243_vm6, %v9638_v54, %v3152_v55  ;;  %v3154_v58 = vrot.slane %v3152_v55, 4  ;;  %v9621_v5 = vld [vmem:[%s11010_s15 + $0xc8] sm:$0x1]  ;;  %v1863_v6 = vsel %vm11028_vm2, %v1858_v57, %v1862_v43  ;;  %v3149_v7 = vsel %vm11243_vm6, %v3147_v60, %v3148_v50  ;;  %v9622_v10 = vld [vmem:[%s11010_s15 + $0xcc] sm:$0xe] }
 0x136   : > { %2959 = vst.msk [vmem:[#allocation2 + $0x1f8] sm:$0xff] %vm957_vm7, %v2924_v15  ;;  %v9639_v8 = vrot.slane %v9619_v62, 9  ;;  %v3159_v9 = vrot.slane %v9620_v4, 5  ;;  %v9623_v11 = vld [vmem:[%s11010_s15 + $0xd0] sm:$0xf]  ;;  %v1868_v12 = vrot.slane %v1867_v1, 4  ;;  %v9653_v13 = vcombine.low %v3146_v59, %v3149_v7 }
 0x137   : > { %v3156_v14 = vsel %vm11243_vm6, %v3154_v58, %v3155_v61  ;;  %v3162_v15 = vrot.slane %v9621_v5, 5  ;;  %v9624_v16 = vld [vmem:[%s11010_s15 + $0xd4] sm:$0x1]  ;;  %v9640_v21 = vrot.slane %v9622_v10, 9  ;;  %v3166_v25 = vrot.slane %v9623_v11, 5 }
 0x138   : > { %v3305_v17 = vld [vmem:[#allocation2 + $0x1b0] sm:$0xff]  ;;  %v9654_v18 = vcombine.low %v3153_v3, %v3156_v14  ;;  %v3160_v19 = vsel %vm11243_vm6, %v9639_v8, %v3159_v9  ;;  %v3161_v20 = vrot.slane %v3159_v9, 4  ;;  %v1873_v24 = vsel %vm11028_vm2, %v1868_v12, %v1872_v2  ;;  %3247 = vst.msk [vmem:[#allocation2 + $0x200] sm:$0xff] %vm409_vm3, %v9653_v13  ;;  %v4292_v14 = vld [vmem:[#allocation3 + $0x18] sm:$0x1] }
 0x139   : > { %3941 = vmatmul.mubr.bf16.gmra.mrb[40].mxu1 %v3303_v56  ;;  %v3310_v23 = vld [vmem:[#allocation2 + $0x1d8] sm:$0xff]  ;;  %v3169_v26 = vrot.slane %v9624_v16, 5  ;;  %v9384_v29 = vcombine.low %v1863_v6, %v1873_v24  ;;  %v3167_v33 = vsel %vm11243_vm6, %v9640_v21, %v3166_v25  ;;  %v3168_v28 = vrot.slane %v3166_v25, 4  ;;  %v4289_v16 = vld [vmem:[#allocation3 + $0xc] sm:$0x1] }
 0x13a   : > { %3948 = vmatprep.mubr.bf16.mxu1 %v3309_v0  ;;  %3248 = vst.msk [vmem:[#allocation2 + $0x228] sm:$0xff] %vm409_vm3, %v9654_v18  ;;  %v3163_v30 = vsel %vm11243_vm6, %v3161_v20, %v3162_v15  ;;  %v4290_v21 = vsel %vm12115_vm11, 0, %v4289_v16 }
 0x13b   : > { %v9655_v31 = vcombine.low %v3160_v19, %v3163_v30  ;;  %1953 = vst.msk [vmem:[#allocation2 + $0x268] sm:$0xff] %vm409_vm3, %v9384_v29  ;;  %v3170_v36 = vsel %vm11243_vm6, %v3168_v28, %v3169_v26  ;;  %v3313_v40 = vld [vmem:[#allocation2 + $0x1f0] sm:$0xff]  ;;  %v4293_v19 = vsel %vm12115_vm11, 0, %v4292_v14  ;;  %4291 = vst [vmem:[#allocation3 + $0xc] sm:$0x1] %v4290_v21 }
 0x13c   : > { %10695 = vmatmul.mubr.msk.bf16.gmra.mrb[80].mxu0 %vm409_vm3, %v3300_v41  ;;  %v9656_v37 = vcombine.low %v3167_v33, %v3170_v36  ;;  %4294 = vst [vmem:[#allocation3 + $0x18] sm:$0x1] %v4293_v19  ;;  %v4295_v33 = vld [vmem:[#allocation3 + $0x24] sm:$0x1]  ;;  %v4348_v28 = vld [vmem:[#allocation3 + $0x38] sm:$0x1] }
 0x13d   : > { %v2237_v22 = vpop.permute.xlu1 %2236  ;;  %10698 = vmatprep.mubr.msk.bf16.mxu0 %vm409_vm3, %v3305_v17  ;;  %v3314_v35 = vld [vmem:[#allocation2 + $0x1f8] sm:$0xff]  ;;  %3249 = vst.msk [vmem:[#allocation2 + $0x250] sm:$0xff] %vm409_vm3, %v9655_v31  ;;  %v4342_v17 = vld [vmem:[#allocation3 + $0x20] sm:$0x1]  ;;  %v4298_v31 = vld [vmem:[#allocation3 + $0x30] sm:$0x1] }
 0x13e   : > { %2271 = vst.msk [vmem:[#allocation2 + $0x218] sm:$0xff] %vm957_vm7, %v2237_v22  ;;  %v4339_v22 = vld [vmem:[#allocation3 + $0x14] sm:$0x1]  ;;  %v4343_v24 = vsel %vm12123_vm12, 0, %v4342_v17  ;;  %v4349_v36 = vsel %vm12123_vm12, 0, %v4348_v28  ;;  %v10845_v17 = vld [vmem:[%s13892_s4 + $0x40] sm:$0xff]  }
 0x13f   : > { %v2926_v27 = vpop.permute.xlu0 %2925  ;;  %v3315_v38 = vld [vmem:[#allocation2 + $0x200] sm:$0xff]  ;;  %3250 = vst.msk [vmem:[#allocation2 + $0x278] sm:$0xff] %vm409_vm3, %v9656_v37  ;;  %v4340_v25 = vsel %vm12123_vm12, 0, %v4339_v22  ;;  %4344 = vst [vmem:[#allocation3 + $0x20] sm:$0x1] %v4343_v24  ;;  %10426 = vmatprep.subr.bf16.mxu1 %v10845_v17 }
 0x140   : > { %2960 = vst.msk [vmem:[#allocation2 + $0x220] sm:$0xff] %vm957_vm7, %v2926_v27  ;;  %4341 = vst [vmem:[#allocation3 + $0x14] sm:$0x1] %v4340_v25  ;;  %v4360_v14 = vld [vmem:[#allocation3 + $0x68] sm:$0x1] }
 0x141   : > { %3949 = vmatmul.mubr.bf16.gmra.mrb[44].mxu1 %v3308_v34  ;;  %v3320_v39 = vld [vmem:[#allocation2 + $0x228] sm:$0xff]  ;;  %v4299_v34 = vsel %vm12115_vm11, 0, %v4298_v31  ;;  %4350 = vst [vmem:[#allocation3 + $0x38] sm:$0x1] %v4349_v36  ;;  %v4361_v16 = vsel %vm12123_vm12, 0, %v4360_v14 }
 0x142   : > { %3956 = vmatprep.mubr.bf16.mxu1 %v3314_v35  ;;  %v4296_v35 = vsel %vm12115_vm11, 0, %v4295_v33  ;;  %4300 = vst [vmem:[#allocation3 + $0x30] sm:$0x1] %v4299_v34  ;;  %4362 = vst [vmem:[#allocation3 + $0x68] sm:$0x1] %v4361_v16 }
 0x143   : > { %4297 = vst [vmem:[#allocation3 + $0x24] sm:$0x1] %v4296_v35  ;;  %v4316_v24 = vld [vmem:[#allocation3 + $0x78] sm:$0x1]  ;;  %v4313_v34 = vld [vmem:[#allocation3 + $0x6c] sm:$0x1] }
 0x144   : > { %10699 = vmatmul.mubr.msk.bf16.gmra.mrb[84].mxu0 %vm409_vm3, %v3310_v23  ;;  %v3325_v41 = vld [vmem:[#allocation2 + $0x250] sm:$0xff]  ;;  %v4317_v31 = vsel %vm12115_vm11, 0, %v4316_v24  ;;  %v4314_v35 = vsel %vm12115_vm11, 0, %v4313_v34  ;;  %v4366_v36 = vld [vmem:[#allocation3 + $0x80] sm:$0x1] }
 0x145   : > { %10702 = vmatprep.mubr.msk.bf16.mxu0 %vm409_vm3, %v3315_v38  ;;  %v3318_v46 = vld [vmem:[#allocation2 + $0x218] sm:$0xff]  ;;  %4318 = vst [vmem:[#allocation3 + $0x78] sm:$0x1] %v4317_v31  ;;  %4315 = vst [vmem:[#allocation3 + $0x6c] sm:$0x1] %v4314_v35 }
 0x146   : > { %v2239_v43 = vpop.permute.xlu1 %2238  ;;  %v3330_v45 = vld [vmem:[#allocation2 + $0x278] sm:$0xff] }
 0x147   : > { %v3319_v42 = vld [vmem:[#allocation2 + $0x220] sm:$0xff]  ;;  %2272 = vst.msk [vmem:[#allocation2 + $0x240] sm:$0xff] %vm957_vm7, %v2239_v43 }
 0x149   : > { %3957 = vmatmul.mubr.bf16.gmra.mrb[48].mxu1 %v3313_v40 }
 0x14a   : > { %v2928_v44 = vpop.permute.xlu0 %2927  ;;  %3964 = vmatprep.mubr.bf16.mxu1 %v3319_v42 }
 0x14b   : > { %2961 = vst.msk [vmem:[#allocation2 + $0x248] sm:$0xff] %vm957_vm7, %v2928_v44 }
 0x14c   : > { %10703 = vmatmul.mubr.msk.bf16.gmra.mrb[88].mxu0 %vm409_vm3, %v3320_v39 }
 0x14d   : > { %10706 = vmatprep.mubr.msk.bf16.mxu0 %vm409_vm3, %v3325_v41  ;;  %v4345_v41 = vld [vmem:[#allocation3 + $0x2c] sm:$0x1] }
 0x14e   : > { %v3323_v50 = vld [vmem:[#allocation2 + $0x240] sm:$0xff]  ;;  %v4346_v43 = vsel %vm12123_vm12, 0, %v4345_v41 }
 0x14f   : > { %4347 = vst [vmem:[#allocation3 + $0x2c] sm:$0x1] %v4346_v43 }
 0x151   : > { %3965 = vmatmul.mubr.bf16.gmra.mrb[52].mxu1 %v3318_v46 }
 0x152   : > { %v3324_v47 = vld [vmem:[#allocation2 + $0x248] sm:$0xff] }
 0x153   : > { %v2241_v48 = vpop.permute.xlu1 %2240  ;;  %3972 = vmatprep.mubr.bf16.mxu1 %v3324_v47  ;;  %v4304_v47 = vld [vmem:[#allocation3 + $0x48] sm:$0x1] }
 0x154   : > { %10707 = vmatmul.mubr.msk.bf16.gmra.mrb[92].mxu0 %vm409_vm3, %v3330_v45  ;;  %v2930_v49 = vpop.permute.xlu0 %2929  ;;  %2273 = vst.msk [vmem:[#allocation2 + $0x268] sm:$0xff] %vm957_vm7, %v2241_v48  ;;  %v4301_v48 = vld [vmem:[#allocation3 + $0x3c] sm:$0x1] }
 0x155   : > { %2962 = vst.msk [vmem:[#allocation2 + $0x270] sm:$0xff] %vm957_vm7, %v2930_v49 }
 0x159   : > { %3973 = vmatmul.mubr.bf16.gmra.mrb[56].mxu1 %v3323_v50 }
 0x15b   : > { %v3328_v52 = vld [vmem:[#allocation2 + $0x268] sm:$0xff] }
 0x15c   : > { %v3329_v51 = vld [vmem:[#allocation2 + $0x270] sm:$0xff] }
 0x15d   : > { %3980 = vmatprep.mubr.bf16.mxu1 %v3329_v51  ;;  %v4305_v51 = vsel %vm12115_vm11, 0, %v4304_v47 }
 0x15e   : > { %4306 = vst [vmem:[#allocation3 + $0x48] sm:$0x1] %v4305_v51 }
 0x161   : > { %3981 = vmatmul.mubr.bf16.gmra.mrb[60].mxu1 %v3328_v52  ;;  %v4302_v52 = vsel %vm12115_vm11, 0, %v4301_v48 }
 0x162   : > { %4303 = vst [vmem:[#allocation3 + $0x3c] sm:$0x1] %v4302_v52 }
 0x16f   : > { %v10198_v53 = vpop.f32.mrb[0].mxu0 }
 0x170   : > { %v10199_v54 = vpop.f32.mrb[1].mxu0 }
 0x171   : > { %v12097_v55 = vadd.f32 %v10199_v54, %v10198_v53  ;;  %v10201_v56 = vpop.f32.mrb[2].mxu0  ;;  %v4354_v53 = vld [vmem:[#allocation3 + $0x50] sm:$0x1] }
 0x172   : > { %v10202_v57 = vpop.f32.mrb[3].mxu0 }
 0x173   : > { %v12099_v59 = vadd.f32 %v10202_v57, %v10201_v56  ;;  %v4355_v56 = vsel %vm12123_vm12, 0, %v4354_v53  ;;  %v4351_v57 = vld [vmem:[#allocation3 + $0x44] sm:$0x1] }
 0x174   : > { %4356 = vst [vmem:[#allocation3 + $0x50] sm:$0x1] %v4355_v56 }
 0x177   : > { %v10204_v60 = vpop.f32.mrb[4].mxu0 }
 0x178   : > { %v10205_v61 = vpop.f32.mrb[5].mxu0 }
 0x179   : > { %v12101_v62 = vadd.f32 %v10205_v61, %v10204_v60  ;;  %v10207_v0 = vpop.f32.mrb[6].mxu0  ;;  %v4352_v61 = vsel %vm12123_vm12, 0, %v4351_v57 }
 0x17a   : > { %v10208_v1 = vpop.f32.mrb[7].mxu0  ;;  %4353 = vst [vmem:[#allocation3 + $0x44] sm:$0x1] %v4352_v61 }
 0x17b   : > { %v12103_v2 = vadd.f32 %v10208_v1, %v10207_v0  ;;  %v4310_v0 = vld [vmem:[#allocation3 + $0x60] sm:$0x1] }
 0x17c   : > { %v4311_v1 = vsel %vm12115_vm11, 0, %v4310_v0  ;;  %v4363_v0 = vld [vmem:[#allocation3 + $0x74] sm:$0x1] }
 0x17d   : > { %4312 = vst [vmem:[#allocation3 + $0x60] sm:$0x1] %v4311_v1 }
 0x17f   : > { %v10210_v3 = vpop.f32.mrb[8].mxu0 }
 0x180   : > { %v10211_v58 = vpop.f32.mrb[9].mxu0 }
 0x181   : > { %v12105_v4 = vadd.f32 %v10211_v58, %v10210_v3  ;;  %v10213_v5 = vpop.f32.mrb[10].mxu0 }
 0x182   : > { %v10214_v6 = vpop.f32.mrb[11].mxu0 }
 0x183   : > { %v12107_v7 = vadd.f32 %v10214_v6, %v10213_v5 }
 0x187   : > { %v10216_v8 = vpop.f32.mrb[12].mxu0 }
 0x188   : > { %v10217_v9 = vpop.f32.mrb[13].mxu0 }
 0x189   : > { %v12109_v10 = vadd.f32 %v10217_v9, %v10216_v8  ;;  %v10219_v11 = vpop.f32.mrb[14].mxu0  ;;  %v4307_v9 = vld [vmem:[#allocation3 + $0x54] sm:$0x1] }
 0x18a   : > { %v10220_v12 = vpop.f32.mrb[15].mxu0 }
 0x18b   : > { %v12111_v13 = vadd.f32 %v10220_v12, %v10219_v11  ;;  %v4308_v12 = vsel %vm12115_vm11, 0, %v4307_v9 }
 0x18c   : > { %4309 = vst [vmem:[#allocation3 + $0x54] sm:$0x1] %v4308_v12 }
 0x18f   : > { %v10222_v18 = vpop.f32.mrb[16].mxu0 }
 0x190   : > { %v10223_v23 = vpop.f32.mrb[17].mxu0 }
 0x191   : > { %v12133_v26 = vadd.f32 %v10223_v23, %v10222_v18  ;;  %v10225_v27 = vpop.f32.mrb[18].mxu0  ;;  %v4357_v18 = vld [vmem:[#allocation3 + $0x5c] sm:$0x1]  ;;  %v10846_v23 = vld [vmem:[%s13892_s4] sm:$0xff]  }
 0x192   : > { %v10226_v29 = vpop.f32.mrb[19].mxu0  ;;  %v4358_v19 = vsel %vm12123_vm12, 0, %v4357_v18  ;;  %10427 = vmatpush3.bf16.msra.mxu1 %v10846_v23 }
 0x193   : > { %v12135_v30 = vadd.f32 %v10226_v29, %v10225_v27  ;;  %4359 = vst [vmem:[#allocation3 + $0x5c] sm:$0x1] %v4358_v19  ;;  %v10942_v29 = vmov 0  }
 0x194   : > { %4277 = vst.msk [vmem:[#allocation3] sm:$0xf] %vm4276_vm13, %v10942_v29  ;;  %4278 = vst.msk [vmem:[#allocation3 + $0x4] sm:$0xf] %vm4276_vm13, %v10942_v29 }
 0x195   : > { %4280 = vst.msk [vmem:[#allocation3 + $0x8] sm:$0x1] %vm4279_vm8, %v10942_v29  ;;  %4284 = vst.msk [vmem:[#allocation3 + $0xd4] sm:$0x1] %vm4279_vm8, %v10942_v29 }
 0x196   : > { %4282 = vst.msk [vmem:[#allocation3 + $0xcc] sm:$0xf] %vm4276_vm13, %v10942_v29  ;;  %4283 = vst.msk [vmem:[#allocation3 + $0xd0] sm:$0xf] %vm4276_vm13, %v10942_v29 }
 0x197   : > { %v10228_v37 = vpop.f32.mrb[20].mxu0 }
 0x198   : > { %v10229_v38 = vpop.f32.mrb[21].mxu0 }
 0x199   : > { %v12143_v39 = vadd.f32 %v10229_v38, %v10228_v37  ;;  %v10231_v40 = vpop.f32.mrb[22].mxu0  ;;  %v4367_v37 = vsel %vm12123_vm12, 0, %v4366_v36 }
 0x19a   : > { %v10232_v42 = vpop.f32.mrb[23].mxu0  ;;  %4368 = vst [vmem:[#allocation3 + $0x80] sm:$0x1] %v4367_v37 }
 0x19b   : > { %v12147_v44 = vadd.f32 %v10232_v42, %v10231_v40  ;;  %v5047_v41 = vld [vmem:[#allocation3] sm:$0xf]  ;;  %v5048_v42 = vld [vmem:[#allocation3 + $0x4] sm:$0xf] }
 0x19c   : > { %v5096_v47 = vshrl.u32 %v5047_v41, 16  ;;  %v5099_v48 = vshll.u32 %v5047_v41, 16  ;;  %v5109_v52 = vshrl.u32 %v5048_v42, 16 }
 0x19e   : > { %v5098_v56 = vrot.slane %v5096_v47, 4  ;;  %v5101_v57 = vrot.slane %v5099_v48, 5  ;;  %v5111_v1 = vrot.slane %v5109_v52, 4  ;;  %v4372_v52 = vld [vmem:[#allocation3 + $0x98] sm:$0x1] }
 0x19f   : > { %v10234_v45 = vpop.f32.mrb[24].mxu0 }
 0x1a0   : > { %v10235_v46 = vpop.f32.mrb[25].mxu0 }
 0x1a1   : > { %v12149_v49 = vadd.f32 %v10235_v46, %v10234_v45  ;;  %v10237_v50 = vpop.f32.mrb[26].mxu0  ;;  %v5049_v46 = vld [vmem:[#allocation3 + $0x8] sm:$0x1] }
 0x1a2   : > { %v10238_v54 = vpop.f32.mrb[27].mxu0  ;;  %v5115_v53 = vshll.u32 %v5049_v46, 16 }
 0x1a3   : > { %v12157_v60 = vadd.f32 %v10238_v54, %v10237_v50  ;;  %v5105_v50 = vshll.u32 %v5048_v42, 16 }
 0x1a5   : > { %v5107_v61 = vrot.slane %v5105_v50, 5 }
 0x1a7   : > { %v10240_v3 = vpop.f32.mrb[28].mxu0 }
 0x1a8   : > { %v10241_v58 = vpop.f32.mrb[29].mxu0 }
 0x1a9   : > { %v12163_v5 = vadd.f32 %v10241_v58, %v10240_v3  ;;  %v10243_v6 = vpop.f32.mrb[30].mxu0  ;;  %v4364_v3 = vsel %vm12123_vm12, 0, %v4363_v0  ;;  %v5102_v58 = vor.u32 %v5101_v57, %v5098_v56  ;;  %v4369_v0 = vld [vmem:[#allocation3 + $0x8c] sm:$0x1] }
 0x1aa   : > { %v10244_v8 = vpop.f32.mrb[31].mxu0  ;;  %4365 = vst [vmem:[#allocation3 + $0x74] sm:$0x1] %v4364_v3 }
 0x1ab   : > { %v12165_v11 = vadd.f32 %v10244_v8, %v10243_v6  ;;  %v5112_v6 = vor.u32 %v5111_v1, %v5107_v61  ;;  %v5117_v8 = vrot.slane %v5115_v53, 5  ;;  %v5103_v12 = vrot.slane %v5102_v58, 4 }
 0x1ac   : > { %v4373_v53 = vsel %vm12123_vm12, 0, %v4372_v52 }
 0x1ad   : > { %v5113_v16 = vrot.slane %v5112_v6, 4  ;;  %v5108_v19 = vsel %vm11028_vm2, %v5103_v12, %v5107_v61  ;;  %4374 = vst [vmem:[#allocation3 + $0x98] sm:$0x1] %v4373_v53  ;;  %v4370_v6 = vsel %vm12123_vm12, 0, %v4369_v0 }
 0x1ae   : > { %4371 = vst [vmem:[#allocation3 + $0x8c] sm:$0x1] %v4370_v6 }
 0x1af   : > { %v10246_v21 = vpop.f32.mrb[32].mxu0  ;;  %v5118_v23 = vsel %vm11028_vm2, %v5113_v16, %v5117_v8  ;;  %v4328_v8 = vld [vmem:[#allocation3 + $0xa8] sm:$0x1] }
 0x1b0   : > { %v10247_v22 = vpop.f32.mrb[33].mxu0  ;;  %v9759_v31 = vcombine.low %v5108_v19, %v5118_v23  ;;  %v4329_v16 = vsel %vm12115_vm11, 0, %v4328_v8 }
 0x1b1   : > { %v12179_v25 = vadd.f32 %v10247_v22, %v10246_v21  ;;  %v10249_v27 = vpop.f32.mrb[34].mxu0  ;;  %v4322_v21 = vld [vmem:[#allocation3 + $0x90] sm:$0x1]  ;;  %4330 = vst [vmem:[#allocation3 + $0xa8] sm:$0x1] %v4329_v16 }
 0x1b2   : > { %v10250_v33 = vpop.f32.mrb[35].mxu0  ;;  %v4323_v24 = vsel %vm12115_vm11, 0, %v4322_v21  ;;  %5527 = vrot.lane.b32.xlu1 %v9759_v31, %s10941_s18  ;;  %v4334_v16 = vld [vmem:[#allocation3 + $0xc0] sm:$0x1] }
 0x1b3   : > { %v12189_v28 = vadd.f32 %v10250_v33, %v10249_v27  ;;  %v4319_v27 = vld [vmem:[#allocation3 + $0x84] sm:$0x1]  ;;  %4324 = vst [vmem:[#allocation3 + $0x90] sm:$0x1] %v4323_v24 }
 0x1b4   : > { %v4320_v33 = vsel %vm12115_vm11, 0, %v4319_v27 }
 0x1b5   : > { %4321 = vst [vmem:[#allocation3 + $0x84] sm:$0x1] %v4320_v33 }
 0x1b7   : > { %v10252_v38 = vpop.f32.mrb[36].mxu0 }
 0x1b8   : > { %v10253_v40 = vpop.f32.mrb[37].mxu0  ;;  %v10310_v34 = vpop.f32.mrb[0].mxu1 }
 0x1b9   : > { %v12195_v43 = vadd.f32 %v10253_v40, %v10252_v38  ;;  %v10255_v45 = vpop.f32.mrb[38].mxu0  ;;  %v10311_v35 = vpop.f32.mrb[1].mxu1 }
 0x1ba   : > { %v10256_v51 = vpop.f32.mrb[39].mxu0  ;;  %v10312_v36 = vadd.f32 %v10311_v35, %v10310_v34  ;;  %v10313_v37 = vpop.f32.mrb[2].mxu1 }
 0x1bb   : > { %v12197_v54 = vadd.f32 %v10256_v51, %v10255_v45  ;;  %v10314_v38 = vpop.f32.mrb[3].mxu1 }
 0x1bc   : > { %v10315_v41 = vadd.f32 %v10314_v38, %v10313_v37  ;;  %v12215_v45 = vadd.f32 %v10312_v36, %v12097_v55  ;;  %v10850_v55 = vld [vmem:[%s13892_s4 + $0x48] sm:$0xff]   ;;  %v4325_v36 = vld [vmem:[#allocation3 + $0x9c] sm:$0x1] }
 0x1bd   : > { %10428 = vmatprep.subr.bf16.mxu1 %v10850_v55 }
 0x1be   : > { %v12220_v50 = vadd.f32 %v10315_v41, %v12099_v59  ;;  %v10851_v59 = vld [vmem:[%s13892_s4 + $0x8] sm:$0xff]   ;;  %v4326_v41 = vsel %vm12115_vm11, 0, %v4325_v36 }
 0x1bf   : > { %v10258_v9 = vpop.f32.mrb[40].mxu0  ;;  %10429 = vmatpush3.bf16.msra.mxu1 %v10851_v59  ;;  %4327 = vst [vmem:[#allocation3 + $0x9c] sm:$0x1] %v4326_v41 }
 0x1c0   : > { %v10259_v14 = vpop.f32.mrb[41].mxu0 }
 0x1c1   : > { %v12201_v17 = vadd.f32 %v10259_v14, %v10258_v9  ;;  %v10261_v18 = vpop.f32.mrb[42].mxu0 }
 0x1c2   : > { %v10262_v22 = vpop.f32.mrb[43].mxu0 }
 0x1c3   : > { %v12209_v29 = vadd.f32 %v10262_v22, %v10261_v18 }
 0x1c4   : > { %v10316_v57 = vpop.f32.mrb[4].mxu1 }
 0x1c5   : > { %v10317_v1 = vpop.f32.mrb[5].mxu1 }
 0x1c6   : > { %v10318_v9 = vadd.f32 %v10317_v1, %v10316_v57  ;;  %v10319_v12 = vpop.f32.mrb[6].mxu1 }
 0x1c7   : > { %v10264_v40 = vpop.f32.mrb[44].mxu0  ;;  %v10320_v18 = vpop.f32.mrb[7].mxu1 }
 0x1c8   : > { %v10265_v42 = vpop.f32.mrb[45].mxu0  ;;  %v10321_v21 = vadd.f32 %v10320_v18, %v10319_v12  ;;  %v12241_v22 = vadd.f32 %v10318_v9, %v12101_v62  ;;  %v4378_v9 = vld [vmem:[#allocation3 + $0xb0] sm:$0x1] }
 0x1c9   : > { %v12217_v46 = vadd.f32 %v10265_v42, %v10264_v40  ;;  %v10267_v47 = vpop.f32.mrb[46].mxu0  ;;  %v4379_v12 = vsel %vm12123_vm12, 0, %v4378_v9  ;;  %v12295_v9 = vld [vmem:[%s13891_s3] ss:$0 sm:$0xff] }
 0x1ca   : > { %v10268_v48 = vpop.f32.mrb[47].mxu0  ;;  %v12244_v23 = vadd.f32 %v10321_v21, %v12103_v2  ;;  %4380 = vst [vmem:[#allocation3 + $0xb0] sm:$0x1] %v4379_v12  ;;  %v4335_v21 = vsel %vm12115_vm11, 0, %v4334_v16 }
 0x1cb   : > { %v12222_v51 = vadd.f32 %v10268_v48, %v10267_v47  ;;  %4336 = vst [vmem:[#allocation3 + $0xc0] sm:$0x1] %v4335_v21 }
 0x1cc   : > { %v10322_v27 = vpop.f32.mrb[8].mxu1 }
 0x1cd   : > { %v10323_v33 = vpop.f32.mrb[9].mxu1 }
 0x1ce   : > { %v10324_v37 = vadd.f32 %v10323_v33, %v10322_v27  ;;  %v10325_v38 = vpop.f32.mrb[10].mxu1 }
 0x1cf   : > { %v10270_v56 = vpop.f32.mrb[48].mxu0  ;;  %v10326_v42 = vpop.f32.mrb[11].mxu1 }
 0x1d0   : > { %v10271_v61 = vpop.f32.mrb[49].mxu0  ;;  %v10327_v2 = vadd.f32 %v10326_v42, %v10325_v38  ;;  %v12253_v47 = vadd.f32 %v10324_v37, %v12105_v4 }
 0x1d1   : > { %v12232_v3 = vadd.f32 %v10271_v61, %v10270_v56  ;;  %v10273_v58 = vpop.f32.mrb[50].mxu0 }
 0x1d2   : > { %v10274_v14 = vpop.f32.mrb[51].mxu0  ;;  %v12256_v48 = vadd.f32 %v10327_v2, %v12107_v7  ;;  %v4375_v7 = vld [vmem:[#allocation3 + $0xa4] sm:$0x1] }
 0x1d3   : > { %v12238_v19 = vadd.f32 %v10274_v14, %v10273_v58  ;;  %v4376_v14 = vsel %vm12123_vm12, 0, %v4375_v7 }
 0x1d4   : > { %v10328_v53 = vpop.f32.mrb[12].mxu1  ;;  %4377 = vst [vmem:[#allocation3 + $0xa4] sm:$0x1] %v4376_v14 }
 0x1d5   : > { %v10329_v57 = vpop.f32.mrb[13].mxu1 }
 0x1d6   : > { %v10330_v0 = vadd.f32 %v10329_v57, %v10328_v53  ;;  %v10331_v59 = vpop.f32.mrb[14].mxu1  ;;  %v4331_v53 = vld [vmem:[#allocation3 + $0xb4] sm:$0x1] }
 0x1d7   : > { %v10276_v24 = vpop.f32.mrb[52].mxu0  ;;  %v10332_v58 = vpop.f32.mrb[15].mxu1  ;;  %v4332_v57 = vsel %vm12115_vm11, 0, %v4331_v53 }
 0x1d8   : > { %v10277_v31 = vpop.f32.mrb[53].mxu0  ;;  %v10333_v8 = vadd.f32 %v10332_v58, %v10331_v59  ;;  %v12263_v4 = vadd.f32 %v10330_v0, %v12109_v10  ;;  %4333 = vst [vmem:[#allocation3 + $0xb4] sm:$0x1] %v4332_v57 }
 0x1d9   : > { %v12246_v34 = vadd.f32 %v10277_v31, %v10276_v24  ;;  %v10279_v35 = vpop.f32.mrb[54].mxu0 }
 0x1da   : > { %v10280_v40 = vpop.f32.mrb[55].mxu0  ;;  %v12270_v18 = vadd.f32 %v10333_v8, %v12111_v13 }
 0x1db   : > { %v12250_v62 = vadd.f32 %v10280_v40, %v10279_v35 }
 0x1dc   : > { %v10334_v10 = vpop.f32.mrb[16].mxu1 }
 0x1dd   : > { %v10335_v31 = vpop.f32.mrb[17].mxu1 }
 0x1de   : > { %v10336_v36 = vadd.f32 %v10335_v31, %v10334_v10  ;;  %v10337_v37 = vpop.f32.mrb[18].mxu1 }
 0x1df   : > { %v10282_v52 = vpop.f32.mrb[56].mxu0  ;;  %v10338_v40 = vpop.f32.mrb[19].mxu1 }
 0x1e0   : > { %v10283_v56 = vpop.f32.mrb[57].mxu0  ;;  %v10339_v13 = vadd.f32 %v10338_v40, %v10337_v37  ;;  %v12279_v42 = vadd.f32 %v10336_v36, %v12133_v26  ;;  %v4384_v37 = vld [vmem:[#allocation3 + $0xc8] sm:$0x1] }
 0x1e1   : > { %v12258_v61 = vadd.f32 %v10283_v56, %v10282_v52  ;;  %v10285_v55 = vpop.f32.mrb[58].mxu0 }
 0x1e2   : > { %v10286_v1 = vpop.f32.mrb[59].mxu0  ;;  %v12282_v2 = vadd.f32 %v10339_v13, %v12135_v30 }
 0x1e3   : > { %13907 = vst [vmem:[#allocation6_spill] sm:$0xff] %v12258_v61  ;;  %v12260_v6 = vadd.f32 %v10286_v1, %v10285_v55  ;;  %v12289_v1 = vld [vmem:[%s13890_s2] ss:$0 sm:$0xff] }
 0x1e4   : > { %v10340_v52 = vpop.f32.mrb[20].mxu1 }
 0x1e5   : > { %13908 = vst [vmem:[#allocation7_spill] sm:$0xff] %v12260_v6  ;;  %v10341_v56 = vpop.f32.mrb[21].mxu1 }
 0x1e6   : > { %v10342_v55 = vadd.f32 %v10341_v56, %v10340_v52  ;;  %v10343_v0 = vpop.f32.mrb[22].mxu1 }
 0x1e7   : > { %v10288_v24 = vpop.f32.mrb[60].mxu0  ;;  %v10344_v26 = vpop.f32.mrb[23].mxu1 }
 0x1e8   : > { %v10289_v27 = vpop.f32.mrb[61].mxu0  ;;  %v10345_v8 = vadd.f32 %v10344_v26, %v10343_v0  ;;  %v12299_v14 = vadd.f32 %v10342_v55, %v12143_v39  ;;  %v4381_v55 = vld [vmem:[#allocation3 + $0xbc] sm:$0x1]  ;;  %v10857_v0 = vld [vmem:[%s13892_s4 + $0x10] sm:$0xff]  }
 0x1e9   : > { %v12274_v33 = vadd.f32 %v10289_v27, %v10288_v24  ;;  %v10291_v35 = vpop.f32.mrb[62].mxu0 }
 0x1ea   : > { %v10292_v38 = vpop.f32.mrb[63].mxu0  ;;  %v12306_v27 = vadd.f32 %v10345_v8, %v12147_v44  ;;  %v10856_v44 = vld [vmem:[%s13892_s4 + $0x50] sm:$0xff]  }
 0x1eb   : > { %13909 = vst [vmem:[#allocation8_spill] sm:$0xff] %v12274_v33  ;;  %v12276_v41 = vadd.f32 %v10292_v38, %v10291_v35  ;;  %10430 = vmatprep.subr.bf16.mxu1 %v10856_v44 }
 0x1ec   : > { %v10346_v35 = vpop.f32.mrb[24].mxu1  ;;  %10431 = vmatpush3.bf16.msra.mxu1 %v10857_v0 }
 0x1ed   : > { %13910 = vst [vmem:[#allocation9_spill] sm:$0xff] %v12276_v41  ;;  %v10347_v38 = vpop.f32.mrb[25].mxu1 }
 0x1ee   : > { %v12318_v13 = vadd.f32 %v10347_v38, %v10346_v35  ;;  %v10349_v52 = vpop.f32.mrb[26].mxu1 }
 0x1ef   : > { %v10680_v59 = vpop.f32.mrb[64].mxu0 }
 0x1f0   : > { %v4032_v58 = vadd.f32 %v10680_v59, %v12241_v22  ;;  %v4023_v30 = vpop.f32.mrb[65].mxu0  ;;  %v10350_v59 = vpop.f32.mrb[27].mxu1 }
 0x1f1   : > { %v4024_v7 = vadd.f32 %v4023_v30, %v12215_v45  ;;  %v10681_v12 = vpop.f32.mrb[66].mxu0 }
 0x1f2   : > { %v4159_v16 = vmul.f32 %v12289_v1, %v4032_v58  ;;  %v4035_v21 = vadd.f32 %v10681_v12, %v12244_v23  ;;  %v4026_v24 = vpop.f32.mrb[67].mxu0  ;;  %v12327_v12 = vadd.f32 %v10350_v59, %v10349_v52  ;;  %v4798_v52 = vld [vmem:[#allocation3 + $0x18] sm:$0xf] }
 0x1f3   : > { %v4157_v22 = vmul.f32 %v12289_v1, %v4024_v7  ;;  %v4027_v10 = vadd.f32 %v4026_v24, %v12220_v50  ;;  %v4385_v50 = vsel %vm12123_vm12, 0, %v4384_v37  ;;  %v4382_v7 = vsel %vm12123_vm12, 0, %v4381_v55 }
 0x1f4   : > { %v4198_v31 = vadd.f32 %v12295_v9, %v4159_v16  ;;  %v4160_v45 = vmul.f32 %v12289_v1, %v4035_v21  ;;  %4386 = vst [vmem:[#allocation3 + $0xc8] sm:$0x1] %v4385_v50  ;;  %4383 = vst [vmem:[#allocation3 + $0xbc] sm:$0x1] %v4382_v7 }
 0x1f5   : > { %v4196_v39 = vadd.f32 %v12295_v9, %v4157_v22  ;;  %v4158_v36 = vmul.f32 %v12289_v1, %v4027_v10 }
 0x1f6   : > { %v4230_v23 = vmax.f32 %v4198_v31, 0.0  ;;  %v4199_v40 = vadd.f32 %v12295_v9, %v4160_v45 }
 0x1f7   : > { %v4228_v53 = vmax.f32 %v4196_v39, 0.0  ;;  %v4197_v56 = vadd.f32 %v12295_v9, %v4158_v36  ;;  %v10684_v57 = vpop.f32.mrb[68].mxu0 }
 0x1f8   : > { %v10025_v26 = vpack.c.bf16 %v4230_v23, %v4230_v23  ;;  %v4231_v58 = vmax.f32 %v4199_v40, 0.0  ;;  %v4048_v30 = vadd.f32 %v10684_v57, %v12263_v4  ;;  %v4039_v8 = vpop.f32.mrb[69].mxu0 }
 0x1f9   : > { %v10023_v16 = vpack.c.bf16 %v4228_v53, %v4228_v53  ;;  %v4229_v21 = vmax.f32 %v4197_v56, 0.0  ;;  %v4040_v24 = vadd.f32 %v4039_v8, %v12253_v47  ;;  %v10685_v22 = vpop.f32.mrb[70].mxu0  ;;  %v10352_v47 = vpop.f32.mrb[28].mxu1 }
 0x1fa   : > { %v4487_v10 = vshrl.u32 %v10025_v26, 16  ;;  %v4490_v31 = vshll.u32 %v10025_v26, 16  ;;  %v10026_v45 = vpack.c.bf16 %v4231_v58, %v4231_v58  ;;  %v4163_v35 = vmul.f32 %v12289_v1, %v4048_v30  ;;  %v4042_v4 = vpop.f32.mrb[71].mxu0  ;;  %v10353_v0 = vpop.f32.mrb[29].mxu1  ;;  %v4791_v58 = vld [vmem:[#allocation3 + $0xc] sm:$0xf] }
 0x1fb   : > { %v4470_v39 = vshrl.u32 %v10023_v16, 16  ;;  %v4473_v36 = vshll.u32 %v10023_v16, 16  ;;  %v10024_v37 = vpack.c.bf16 %v4229_v21, %v4229_v21  ;;  %v4161_v20 = vmul.f32 %v12289_v1, %v4040_v24  ;;  %v10355_v16 = vpop.f32.mrb[30].mxu1 }
 0x1fc   : > { %v4489_v38 = vrot.slane %v4487_v10, 7  ;;  %v4495_v23 = vshrl.u32 %v10026_v45, 16  ;;  %v4498_v40 = vshll.u32 %v10026_v45, 16  ;;  %v4202_v50 = vadd.f32 %v12295_v9, %v4163_v35  ;;  %v4802_v45 = vld [vmem:[#allocation3 + $0x20] sm:$0x1] }
 0x1fd   : > { %v4472_v53 = vrot.slane %v4470_v39, 7  ;;  %v4478_v56 = vshrl.u32 %v10024_v37, 16  ;;  %v4481_v57 = vshll.u32 %v10024_v37, 16  ;;  %v4200_v55 = vadd.f32 %v12295_v9, %v4161_v20  ;;  %v10356_v37 = vpop.f32.mrb[31].mxu1 }
 0x1fe   : > { %v4492_v59 = vor.u32 %v4490_v31, %v4489_v38  ;;  %v4493_v26 = vrot.slane %v4489_v38, 4  ;;  %v4497_v30 = vrot.slane %v4495_v23, 7  ;;  %v4234_v8 = vmax.f32 %v4202_v50, 0.0  ;;  %v4795_v23 = vld [vmem:[#allocation3 + $0x14] sm:$0x1] }
 0x1ff   : > { %v12340_v7 = vadd.f32 %v10353_v0, %v10352_v47  ;;  %v4475_v21 = vor.u32 %v4473_v36, %v4472_v53  ;;  %v4476_v24 = vrot.slane %v4472_v53, 4  ;;  %v4480_v35 = vrot.slane %v4478_v56, 7  ;;  %v10688_v39 = vpop.f32.mrb[72].mxu0 }
 0x200   : > { %v4799_v31 = vsel %vm12335_vm15, %v4492_v59, %v4798_v52  ;;  %v4500_v20 = vor.u32 %v4498_v40, %v4497_v30  ;;  %v4502_v38 = vrot.slane %v4497_v30, 4  ;;  %v10029_v50 = vpack.c.bf16 %v4234_v8, %v4234_v8  ;;  %v4055_v47 = vpop.f32.mrb[73].mxu0 }
 0x201   : > { %v12350_v36 = vadd.f32 %v10356_v37, %v10355_v16  ;;  %4800 = vst [vmem:[#allocation3 + $0x18] sm:$0xf] %v4799_v31  ;;  %v4792_v53 = vsel %vm12335_vm15, %v4475_v21, %v4791_v58  ;;  %v4483_v0 = vor.u32 %v4481_v57, %v4480_v35  ;;  %v4485_v63 = vrot.slane %v4480_v35, 4  ;;  %v10689_v6 = vpop.f32.mrb[74].mxu0  ;;  %v10358_v37 = vpop.f32.mrb[32].mxu1 }
 0x202   : > { %4793 = vst [vmem:[#allocation3 + $0xc] sm:$0xf] %v4792_v53  ;;  %v4501_v56 = vsel %vm12344_vm0, %v4493_v26, %v4500_v20  ;;  %v4803_v40 = vsel %vm12115_vm11, %v4502_v38, %v4802_v45  ;;  %v4521_v52 = vshrl.u32 %v10029_v50, 16  ;;  %v4524_v59 = vshll.u32 %v10029_v50, 16  ;;  %v4058_v30 = vpop.f32.mrb[75].mxu0 }
 0x203   : > { %4801 = vst.msk [vmem:[#allocation3 + $0x1c] sm:$0xf] %vm4276_vm13, %v4501_v56  ;;  %4804 = vst [vmem:[#allocation3 + $0x20] sm:$0x1] %v4803_v40  ;;  %v4484_v8 = vsel %vm12344_vm0, %v4476_v24, %v4483_v0  ;;  %v4796_v57 = vsel %vm12115_vm11, %v4485_v63, %v4795_v23  ;;  %v4232_v58 = vmax.f32 %v4200_v55, 0.0  ;;  %v4051_v16 = vadd.f32 %v10685_v22, %v12270_v18  ;;  %v10359_v22 = vpop.f32.mrb[33].mxu1 }
 0x204   : > { %4794 = vst.msk [vmem:[#allocation3 + $0x10] sm:$0xf] %vm4276_vm13, %v4484_v8  ;;  %4797 = vst [vmem:[#allocation3 + $0x14] sm:$0x1] %v4796_v57  ;;  %v12365_v26 = vrot.slane %v4521_v52, 7  ;;  %v4043_v21 = vadd.f32 %v4042_v4, %v12256_v48  ;;  %v4064_v45 = vadd.f32 %v10688_v39, %v12299_v14  ;;  %v4056_v35 = vadd.f32 %v4055_v47, %v12279_v42  ;;  %v10361_v42 = vpop.f32.mrb[34].mxu1 }
 0x205   : > { %v4812_v31 = vld [vmem:[#allocation3 + $0x30] sm:$0xf]  ;;  %v10027_v24 = vpack.c.bf16 %v4232_v58, %v4232_v58  ;;  %v4164_v20 = vmul.f32 %v12289_v1, %v4051_v16  ;;  %v4067_v63 = vadd.f32 %v10689_v6, %v12306_v27  ;;  %v4059_v18 = vadd.f32 %v4058_v30, %v12282_v2  ;;  %v10362_v6 = vpop.f32.mrb[35].mxu1  ;;  %v4805_v27 = vld [vmem:[#allocation3 + $0x24] sm:$0xf] }
 0x206   : > { %v4526_v55 = vor.u32 %v4524_v59, %v12365_v26  ;;  %v4162_v48 = vmul.f32 %v12289_v1, %v4043_v21  ;;  %v4167_v14 = vmul.f32 %v12289_v1, %v4064_v45  ;;  %v12377_v4 = vadd.f32 %v10359_v22, %v10358_v37 }
 0x207   : > { %v4504_v39 = vshrl.u32 %v10027_v24, 16  ;;  %v4507_v23 = vshll.u32 %v10027_v24, 16  ;;  %v4203_v50 = vadd.f32 %v12295_v9, %v4164_v20  ;;  %v12380_v47 = vpop.f32.mrb[76].mxu0  ;;  %v4165_v56 = vmul.f32 %v12289_v1, %v4056_v35 }
 0x208   : > { %v4813_v2 = vsel %vm12335_vm15, %v4526_v55, %v4812_v31  ;;  %v4201_v53 = vadd.f32 %v12295_v9, %v4162_v48  ;;  %v4206_v0 = vadd.f32 %v12295_v9, %v4167_v14  ;;  %v12387_v40 = vpop.f32.mrb[77].mxu0  ;;  %v12389_v52 = vadd.f32 %v10362_v6, %v10361_v42  ;;  %v10364_v42 = vpop.f32.mrb[36].mxu1 }
 0x209   : > { %4814 = vst [vmem:[#allocation3 + $0x30] sm:$0xf] %v4813_v2  ;;  %v12391_v59 = vrot.slane %v4504_v39, 7  ;;  %v4235_v30 = vmax.f32 %v4203_v50, 0.0  ;;  %v4168_v8 = vmul.f32 %v12289_v1, %v4067_v63  ;;  %v12394_v57 = vpop.f32.mrb[78].mxu0  ;;  %v4204_v21 = vadd.f32 %v12295_v9, %v4165_v56  ;;  %v10365_v2 = vpop.f32.mrb[37].mxu1 }
 0x20a   : > { %v4233_v58 = vmax.f32 %v4201_v53, 0.0  ;;  %v4238_v16 = vmax.f32 %v4206_v0, 0.0  ;;  %v4166_v45 = vmul.f32 %v12289_v1, %v4059_v18  ;;  %v12398_v37 = vpop.f32.mrb[79].mxu0  ;;  %v10860_v18 = vld [vmem:[%s13892_s4 + $0x58] sm:$0xff]  }
 0x20b   : > { %v4509_v35 = vor.u32 %v4507_v23, %v12391_v59  ;;  %v4510_v31 = vrot.slane %v12391_v59, 4  ;;  %v10030_v24 = vpack.c.bf16 %v4235_v30, %v4235_v30  ;;  %v4207_v20 = vadd.f32 %v12295_v9, %v4168_v8  ;;  %v10847_v22 = vld [vmem:[#allocation3 + $0xc] sm:$0xff]   ;;  %v4816_v53 = vld [vmem:[#allocation3 + $0x38] sm:$0x1]  ;;  %10432 = vmatprep.subr.bf16.mxu1 %v10860_v18 }
 0x20c   : > { %v10028_v55 = vpack.c.bf16 %v4233_v58, %v4233_v58  ;;  %v10033_v63 = vpack.c.bf16 %v4238_v16, %v4238_v16  ;;  %v4236_v48 = vmax.f32 %v4204_v21, 0.0  ;;  %v12404_v14 = vadd.f32 %v12295_v9, %v4166_v45  ;;  %5991 = vrot.lane.b32.xlu0 %v10847_v22, %s10941_s18  ;;  %v10861_v8 = vld [vmem:[%s13892_s4 + $0x18] sm:$0xff]   ;;  %v4809_v21 = vld [vmem:[#allocation3 + $0x2c] sm:$0x1]  ;;  %v4826_v45 = vld [vmem:[#allocation3 + $0x48] sm:$0xf] }
 0x20d   : > { %v4806_v39 = vsel %vm12335_vm15, %v4509_v35, %v4805_v27  ;;  %v4529_v23 = vshrl.u32 %v10030_v24, 16  ;;  %v4532_v50 = vshll.u32 %v10030_v24, 16  ;;  %v4239_v6 = vmax.f32 %v4207_v20, 0.0  ;;  %v10367_v27 = vpop.f32.mrb[38].mxu1  ;;  %v10848_v22 = vld [vmem:[#allocation3 + $0x18] sm:$0xff]   ;;  %10433 = vmatpush3.bf16.msra.mxu1 %v10861_v8 }
 0x20e   : > { %4807 = vst [vmem:[#allocation3 + $0x24] sm:$0xf] %v4806_v39  ;;  %v4512_v0 = vshrl.u32 %v10028_v55, 16  ;;  %v4515_v56 = vshll.u32 %v10028_v55, 16  ;;  %v4555_v59 = vshrl.u32 %v10033_v63, 16  ;;  %v4558_v30 = vshll.u32 %v10033_v63, 16 }
 0x20f   : > { %v12415_v58 = vadd.f32 %v10365_v2, %v10364_v42  ;;  %v4531_v16 = vrot.slane %v4529_v23, 7  ;;  %v10031_v35 = vpack.c.bf16 %v4236_v48, %v4236_v48  ;;  %v10034_v24 = vpack.c.bf16 %v4239_v6, %v4239_v6  ;;  %v12417_v20 = vpop.f32.mrb[80].mxu0  ;;  %v10368_v39 = vpop.f32.mrb[39].mxu1 }
 0x210   : > { %v4514_v55 = vrot.slane %v4512_v0, 7  ;;  %v4557_v38 = vrot.slane %v4555_v59, 7  ;;  %v4237_v63 = vmax.f32 %v12404_v14, 0.0  ;;  %v3919_v18 = vadd.f32 %v12340_v7, %v12163_v5  ;;  %v12422_v41 = vpop.f32.mrb[81].mxu0  ;;  %5993 = vrot.lane.b32.xlu0 %v10848_v22, %s10941_s18 }
 0x211   : > { %v12424_v42 = vadd.f32 %v10368_v39, %v10367_v27  ;;  %v4534_v23 = vor.u32 %v4532_v50, %v4531_v16  ;;  %v4536_v2 = vrot.slane %v4531_v16, 4  ;;  %v4538_v48 = vshrl.u32 %v10031_v35, 16  ;;  %v12426_v6 = vpop.f32.mrb[82].mxu0 }
 0x212   : > { %v4517_v61 = vor.u32 %v4515_v56, %v4514_v55  ;;  %v4519_v0 = vrot.slane %v4514_v55, 4  ;;  %v4560_v59 = vor.u32 %v4558_v30, %v4557_v38  ;;  %v4561_v33 = vrot.slane %v4557_v38, 4  ;;  %v12429_v14 = vpop.f32.mrb[83].mxu0  ;;  %v4819_v30 = vld [vmem:[#allocation3 + $0x3c] sm:$0xf] }
 0x213   : > { %v13915_v5 = vrot.slane %v12365_v26, 4  ;;  %v4817_v50 = vsel %vm12115_vm11, %v4536_v2, %v4816_v53  ;;  %v4540_v8 = vrot.slane %v4538_v48, 7  ;;  %v4541_v27 = vshll.u32 %v10031_v35, 16  ;;  %v10370_v53 = vpop.f32.mrb[40].mxu1 }
 0x214   : > { %4818 = vst [vmem:[#allocation3 + $0x38] sm:$0x1] %v4817_v50  ;;  %v4518_v56 = vsel %vm12344_vm0, %v4510_v31, %v4517_v61  ;;  %v4810_v38 = vsel %vm12115_vm11, %v4519_v0, %v4809_v21  ;;  %v4827_v26 = vsel %vm12335_vm15, %v4560_v59, %v4826_v45  ;;  %v4563_v16 = vshrl.u32 %v10034_v24, 16  ;;  %v4830_v59 = vld [vmem:[#allocation3 + $0x50] sm:$0x1] }
 0x215   : > { %v4535_v7 = vsel %vm12344_vm0, %v13915_v5, %v4534_v23  ;;  %4808 = vst.msk [vmem:[#allocation3 + $0x28] sm:$0xf] %vm4276_vm13, %v4518_v56  ;;  %4811 = vst [vmem:[#allocation3 + $0x2c] sm:$0x1] %v4810_v38  ;;  %v4543_v35 = vor.u32 %v4541_v27, %v4540_v8  ;;  %v4544_v22 = vrot.slane %v4540_v8, 4  ;;  %v4566_v39 = vshll.u32 %v10034_v24, 16 }
 0x216   : > { %4815 = vst.msk [vmem:[#allocation3 + $0x34] sm:$0xf] %vm4276_vm13, %v4535_v7  ;;  %4828 = vst [vmem:[#allocation3 + $0x48] sm:$0xf] %v4827_v26  ;;  %v10032_v55 = vpack.c.bf16 %v4237_v63, %v4237_v63  ;;  %v10371_v23 = vpop.f32.mrb[41].mxu1  ;;  %v4565_v2 = vrot.slane %v4563_v16, 7  ;;  %v4080_v61 = vadd.f32 %v12380_v47, %v3919_v18  ;;  %v3911_v31 = vadd.f32 %v12318_v13, %v12149_v49 }
 0x217   : > { %v3922_v21 = vadd.f32 %v12350_v36, %v12165_v11  ;;  %v12450_v45 = vadd.f32 %v10371_v23, %v10370_v53  ;;  %v10373_v48 = vpop.f32.mrb[42].mxu1  ;;  %v4820_v0 = vsel %vm12335_vm15, %v4543_v35, %v4819_v30  ;;  %v12454_v63 = vpop.f32.mrb[84].mxu0  ;;  %v3914_v27 = vadd.f32 %v12327_v12, %v12157_v60  ;;  %v4823_v30 = vld [vmem:[#allocation3 + $0x44] sm:$0x1] }
 0x218   : > { %v4546_v5 = vshrl.u32 %v10032_v55, 16  ;;  %v4549_v24 = vshll.u32 %v10032_v55, 16  ;;  %v10374_v7 = vpop.f32.mrb[43].mxu1  ;;  %4821 = vst [vmem:[#allocation3 + $0x3c] sm:$0xf] %v4820_v0  ;;  %v4568_v47 = vor.u32 %v4566_v39, %v4565_v2  ;;  %v4570_v18 = vrot.slane %v4565_v2, 4 }
 0x219   : > { %v4171_v49 = vmul.f32 %v12289_v1, %v4080_v61  ;;  %v4072_v13 = vadd.f32 %v12387_v40, %v3911_v31  ;;  %v12458_v11 = vpop.f32.mrb[85].mxu0  ;;  %v12460_v36 = vadd.f32 %v10374_v7, %v10373_v48  ;;  %v4083_v8 = vadd.f32 %v12394_v57, %v3922_v21  ;;  %v10376_v21 = vpop.f32.mrb[44].mxu1 }
 0x21a   : > { %v4548_v50 = vrot.slane %v4546_v5, 7  ;;  %v12465_v56 = vpop.f32.mrb[86].mxu0  ;;  %v4569_v38 = vsel %vm12344_vm0, %v4561_v33, %v4568_v47  ;;  %v4831_v26 = vsel %vm12115_vm11, %v4570_v18, %v4830_v59  ;;  %v4075_v35 = vadd.f32 %v12398_v37, %v3914_v27  ;;  %v10377_v37 = vpop.f32.mrb[45].mxu1 }
 0x21b   : > { %v4210_v40 = vadd.f32 %v12295_v9, %v4171_v49  ;;  %v4169_v16 = vmul.f32 %v12289_v1, %v4072_v13  ;;  %v12473_v53 = vpop.f32.mrb[87].mxu0  ;;  %4829 = vst.msk [vmem:[#allocation3 + $0x4c] sm:$0xf] %vm4276_vm13, %v4569_v38  ;;  %4832 = vst [vmem:[#allocation3 + $0x50] sm:$0x1] %v4831_v26  ;;  %v4172_v12 = vmul.f32 %v12289_v1, %v4083_v8 }
 0x21c   : > { %v4551_v57 = vor.u32 %v4549_v24, %v4548_v50  ;;  %v4553_v60 = vrot.slane %v4548_v50, 4  ;;  %v3935_v55 = vadd.f32 %v12415_v58, %v12195_v43  ;;  %v3927_v23 = vadd.f32 %v12377_v4, %v12179_v25  ;;  %v10849_v2 = vld [vmem:[#allocation3 + $0x24] sm:$0xff]   ;;  %v10379_v58 = vpop.f32.mrb[46].mxu1 }
 0x21d   : > { %v4242_v33 = vmax.f32 %v4210_v40, 0.0  ;;  %v4208_v39 = vadd.f32 %v12295_v9, %v4169_v16  ;;  %v4211_v48 = vadd.f32 %v12295_v9, %v4172_v12  ;;  %v4170_v43 = vmul.f32 %v12289_v1, %v4075_v35  ;;  %5995 = vrot.lane.b32.xlu0 %v10849_v2, %s10941_s18  ;;  %v10380_v47 = vpop.f32.mrb[47].mxu1  ;;  %v4840_v12 = vld [vmem:[#allocation3 + $0x60] sm:$0xf] }
 0x21e   : > { %v4552_v61 = vsel %vm12344_vm0, %v4544_v22, %v4551_v57  ;;  %v4824_v31 = vsel %vm12115_vm11, %v4553_v60, %v4823_v30  ;;  %v4096_v25 = vadd.f32 %v12417_v20, %v3935_v55  ;;  %v12492_v4 = vadd.f32 %v10377_v37, %v10376_v21  ;;  %v10852_v20 = vld [vmem:[#allocation3 + $0x30] sm:$0xff]   ;;  %v10382_v37 = vpop.f32.mrb[48].mxu1 }
 0x21f   : > { %4822 = vst.msk [vmem:[#allocation3 + $0x40] sm:$0xf] %vm4276_vm13, %v4552_v61  ;;  %4825 = vst [vmem:[#allocation3 + $0x44] sm:$0x1] %v4824_v31  ;;  %v10037_v0 = vpack.c.bf16 %v4242_v33, %v4242_v33  ;;  %v4240_v59 = vmax.f32 %v4208_v39, 0.0  ;;  %v4243_v22 = vmax.f32 %v4211_v48, 0.0  ;;  %v4088_v5 = vadd.f32 %v12422_v41, %v3927_v23 }
 0x220   : > { %v3938_v24 = vadd.f32 %v12424_v42, %v12197_v54  ;;  %v12497_v7 = vpop.f32.mrb[88].mxu0  ;;  %v4209_v50 = vadd.f32 %v12295_v9, %v4170_v43  ;;  %v12502_v27 = vadd.f32 %v10380_v47, %v10379_v58  ;;  %v4175_v26 = vmul.f32 %v12289_v1, %v4096_v25  ;;  %v10864_v54 = vld [vmem:[%s13892_s4 + $0x60] sm:$0xff]   ;;  %v4833_v31 = vld [vmem:[#allocation3 + $0x54] sm:$0xf] }
 0x221   : > { %v4589_v18 = vshrl.u32 %v10037_v0, 16  ;;  %v4592_v49 = vshll.u32 %v10037_v0, 16  ;;  %v10035_v13 = vpack.c.bf16 %v4240_v59, %v4240_v59  ;;  %v12500_v8 = vpop.f32.mrb[89].mxu0  ;;  %v10038_v38 = vpack.c.bf16 %v4243_v22, %v4243_v22  ;;  %5997 = vrot.lane.b32.xlu0 %v10852_v20, %s10941_s18  ;;  %10434 = vmatprep.subr.bf16.mxu1 %v10864_v54 }
 0x222   : > { %v4173_v41 = vmul.f32 %v12289_v1, %v4088_v5  ;;  %v12506_v30 = vpop.f32.mrb[90].mxu0  ;;  %v4241_v57 = vmax.f32 %v4209_v50, 0.0  ;;  %v4214_v39 = vadd.f32 %v12295_v9, %v4175_v26  ;;  %v4099_v43 = vadd.f32 %v12426_v6, %v3938_v24  ;;  %v4844_v5 = vld [vmem:[#allocation3 + $0x68] sm:$0x1] }
 0x223   : > { %v4591_v42 = vrot.slane %v4589_v18, 7  ;;  %v4572_v40 = vshrl.u32 %v10035_v13, 16  ;;  %v4575_v16 = vshll.u32 %v10035_v13, 16  ;;  %v12512_v60 = vpop.f32.mrb[91].mxu0  ;;  %v4597_v35 = vshrl.u32 %v10038_v38, 16  ;;  %v10383_v18 = vpop.f32.mrb[49].mxu1 }
 0x224   : > { %v4600_v33 = vshll.u32 %v10038_v38, 16  ;;  %v4212_v55 = vadd.f32 %v12295_v9, %v4173_v41  ;;  %v10036_v21 = vpack.c.bf16 %v4241_v57, %v4241_v57  ;;  %v4246_v0 = vmax.f32 %v4214_v39, 0.0  ;;  %v10385_v26 = vpop.f32.mrb[50].mxu1  ;;  %v10865_v57 = vld [vmem:[%s13892_s4 + $0x20] sm:$0xff]  }
 0x225   : > { %v4594_v23 = vor.u32 %v4592_v49, %v4591_v42  ;;  %v4595_v2 = vrot.slane %v4591_v42, 4  ;;  %v4574_v61 = vrot.slane %v4572_v40, 7  ;;  %v4599_v48 = vrot.slane %v4597_v35, 7  ;;  %v10386_v54 = vpop.f32.mrb[51].mxu1  ;;  %10435 = vmatpush3.bf16.msra.mxu1 %v10865_v57 }
 0x226   : > { %v4244_v59 = vmax.f32 %v4212_v55, 0.0  ;;  %v4580_v47 = vshrl.u32 %v10036_v21, 16  ;;  %v10853_v13 = vld [vmem:[#allocation3 + $0x3c] sm:$0xff]   ;;  %v4583_v20 = vshll.u32 %v10036_v21, 16  ;;  %v12519_v38 = vadd.f32 %v10383_v18, %v10382_v37 }
 0x227   : > { %v4841_v25 = vsel %vm12335_vm15, %v4594_v23, %v4840_v12  ;;  %v4577_v58 = vor.u32 %v4575_v16, %v4574_v61  ;;  %v4578_v22 = vrot.slane %v4574_v61, 4  ;;  %v4602_v49 = vor.u32 %v4600_v33, %v4599_v48  ;;  %v12521_v41 = vpop.f32.mrb[92].mxu0  ;;  %5999 = vrot.lane.b32.xlu0 %v10853_v13, %s10941_s18  ;;  %v4837_v33 = vld [vmem:[#allocation3 + $0x5c] sm:$0x1]  ;;  %v5050_v23 = vld [vmem:[#allocation3 + $0xc] sm:$0xf] }
 0x228   : > { %4842 = vst [vmem:[#allocation3 + $0x60] sm:$0xf] %v4841_v25  ;;  %v4604_v50 = vrot.slane %v4599_v48, 4  ;;  %v4582_v24 = vrot.slane %v4580_v47, 7  ;;  %v10041_v42 = vpack.c.bf16 %v4246_v0, %v4246_v0  ;;  %v10039_v40 = vpack.c.bf16 %v4244_v59, %v4244_v59  ;;  %v12526_v16 = vpop.f32.mrb[93].mxu0  ;;  %v10854_v0 = vld [vmem:[#allocation3 + $0x48] sm:$0xff]  }
 0x229   : > { %v4834_v6 = vsel %vm12335_vm15, %v4577_v58, %v4833_v31  ;;  %v4603_v12 = vsel %vm12344_vm0, %v4595_v2, %v4602_v49  ;;  %v12535_v39 = vadd.f32 %v10386_v54, %v10385_v26  ;;  %v4176_v55 = vmul.f32 %v12289_v1, %v4099_v43  ;;  %v12538_v61 = vpop.f32.mrb[94].mxu0  ;;  %v4854_v13 = vld [vmem:[#allocation3 + $0x78] sm:$0xf] }
 0x22a   : > { %4835 = vst [vmem:[#allocation3 + $0x54] sm:$0xf] %v4834_v6  ;;  %v4845_v35 = vsel %vm12115_vm11, %v4604_v50, %v4844_v5  ;;  %4843 = vst.msk [vmem:[#allocation3 + $0x64] sm:$0xf] %vm4276_vm13, %v4603_v12  ;;  %v4585_v31 = vor.u32 %v4583_v20, %v4582_v24  ;;  %v4587_v21 = vrot.slane %v4582_v24, 4  ;;  %v4623_v48 = vshrl.u32 %v10041_v42, 16 }
 0x22b   : > { %4846 = vst [vmem:[#allocation3 + $0x68] sm:$0x1] %v4845_v35  ;;  %v4626_v37 = vshll.u32 %v10041_v42, 16  ;;  %v12541_v2 = vpop.f32.mrb[95].mxu0  ;;  %v4606_v59 = vshrl.u32 %v10039_v40, 16  ;;  %v4609_v25 = vshll.u32 %v10039_v40, 16  ;;  %v4215_v58 = vadd.f32 %v12295_v9, %v4176_v55  ;;  %6001 = vrot.lane.b32.xlu0 %v10854_v0, %s10941_s18 }
 0x22c   : > { %v3930_v43 = vadd.f32 %v12389_v52, %v12189_v28  ;;  %v4586_v5 = vsel %vm12344_vm0, %v4578_v22, %v4585_v31  ;;  %v4838_v47 = vsel %vm12115_vm11, %v4587_v21, %v4837_v33  ;;  %v12550_v18 = vrot.slane %v4623_v48, 7  ;;  %v4847_v28 = vld [vmem:[#allocation3 + $0x6c] sm:$0xf]  ;;  %v10388_v20 = vpop.f32.mrb[52].mxu1  ;;  %v5051_v33 = vld [vmem:[#allocation3 + $0x10] sm:$0xf] }
 0x22d   : > { %v3951_v49 = vadd.f32 %v12492_v4, %v12217_v46  ;;  %4836 = vst.msk [vmem:[#allocation3 + $0x58] sm:$0xf] %vm4276_vm13, %v4586_v5  ;;  %4839 = vst [vmem:[#allocation3 + $0x5c] sm:$0x1] %v4838_v47  ;;  %v12556_v50 = vrot.slane %v4606_v59, 7  ;;  %v4247_v52 = vmax.f32 %v4215_v58, 0.0 }
 0x22e   : > { %v4091_v22 = vadd.f32 %v12429_v14, %v3930_v43  ;;  %v5120_v26 = vshrl.u32 %v5050_v23, 16  ;;  %v4628_v6 = vor.u32 %v4626_v37, %v12550_v18  ;;  %v4629_v24 = vrot.slane %v12550_v18, 4  ;;  %v10389_v54 = vpop.f32.mrb[53].mxu1  ;;  %v5052_v48 = vld [vmem:[#allocation3 + $0x14] sm:$0x1] }
 0x22f   : > { %v4112_v46 = vadd.f32 %v12454_v63, %v3951_v49  ;;  %v5123_v4 = vshll.u32 %v5050_v23, 16  ;;  %v4611_v42 = vor.u32 %v4609_v25, %v12556_v50  ;;  %v4612_v40 = vrot.slane %v12556_v50, 4  ;;  %v10391_v35 = vpop.f32.mrb[54].mxu1  ;;  %v4858_v18 = vld [vmem:[#allocation3 + $0x80] sm:$0x1] }
 0x230   : > { %v10042_v57 = vpack.c.bf16 %v4247_v52, %v4247_v52  ;;  %v4174_v12 = vmul.f32 %v12289_v1, %v4091_v22  ;;  %v4855_v14 = vsel %vm12335_vm15, %v4628_v6, %v4854_v13  ;;  %v12567_v55 = vadd.f32 %v10389_v54, %v10388_v20  ;;  %v10392_v31 = vpop.f32.mrb[55].mxu1 }
 0x231   : > { %v4179_v21 = vmul.f32 %v12289_v1, %v4112_v46  ;;  %v5122_v63 = vrot.slane %v5120_v26, 4  ;;  %4856 = vst [vmem:[#allocation3 + $0x78] sm:$0xf] %v4855_v14  ;;  %v4848_v23 = vsel %vm12335_vm15, %v4611_v42, %v4847_v28  ;;  %v12573_v25 = vadd.f32 %v10392_v31, %v10391_v35 }
 0x232   : > { %v4631_v37 = vshrl.u32 %v10042_v57, 16  ;;  %v4634_v0 = vshll.u32 %v10042_v57, 16  ;;  %v4213_v59 = vadd.f32 %v12295_v9, %v4174_v12  ;;  %4849 = vst [vmem:[#allocation3 + $0x6c] sm:$0xf] %v4848_v23  ;;  %v5125_v43 = vrot.slane %v5123_v4, 5  ;;  %v12578_v12 = vpop.f32.mrb[56].mxu1 }
 0x233   : > { %v4218_v58 = vadd.f32 %v12295_v9, %v4179_v21  ;;  %v5129_v5 = vshll.u32 %v5051_v33, 16  ;;  %v5133_v49 = vshrl.u32 %v5051_v33, 16  ;;  %v5139_v52 = vshll.u32 %v5052_v48, 16  ;;  %v12581_v33 = vpop.f32.mrb[57].mxu1  ;;  %v5053_v23 = vld [vmem:[#allocation3 + $0x18] sm:$0xf] }
 0x234   : > { %v4633_v47 = vrot.slane %v4631_v37, 7  ;;  %v4245_v13 = vmax.f32 %v4213_v59, 0.0  ;;  %v5126_v20 = vor.u32 %v5125_v43, %v5122_v63  ;;  %v3943_v28 = vadd.f32 %v12450_v45, %v12201_v17  ;;  %v10855_v6 = vld [vmem:[#allocation3 + $0x54] sm:$0xff]   ;;  %v10868_v17 = vld [vmem:[%s13892_s4 + $0x68] sm:$0xff]   ;;  %v12591_v37 = vpop.f32.mrb[58].mxu1 }
 0x235   : > { %v4250_v22 = vmax.f32 %v4218_v58, 0.0  ;;  %v5131_v26 = vrot.slane %v5129_v5, 5  ;;  %v5135_v57 = vrot.slane %v5133_v49, 4  ;;  %v5141_v14 = vrot.slane %v5139_v52, 5  ;;  %6003 = vrot.lane.b32.xlu0 %v10855_v6, %s10941_s18  ;;  %v10398_v43 = vpop.f32.mrb[59].mxu1  ;;  %v10858_v5 = vld [vmem:[#allocation3 + $0x60] sm:$0xff]   ;;  %10436 = vmatprep.subr.bf16.mxu1 %v10868_v17 }
 0x236   : > { %v4636_v54 = vor.u32 %v4634_v0, %v4633_v47  ;;  %v4638_v46 = vrot.slane %v4633_v47, 4  ;;  %v10040_v42 = vpack.c.bf16 %v4245_v13, %v4245_v13  ;;  %v5127_v35 = vrot.slane %v5126_v20, 4  ;;  %v4851_v52 = vld [vmem:[#allocation3 + $0x74] sm:$0x1] }
 0x237   : > { %v10045_v4 = vpack.c.bf16 %v4250_v22, %v4250_v22  ;;  %v4104_v31 = vadd.f32 %v12458_v11, %v3943_v28  ;;  %v10869_v11 = vld [vmem:[%s13892_s4 + $0x28] sm:$0xff]   ;;  %v5136_v58 = vor.u32 %v5135_v57, %v5131_v26  ;;  %v3954_v13 = vadd.f32 %v12502_v27, %v12222_v51 }
 0x238   : > { %v4637_v45 = vsel %vm12344_vm0, %v4629_v24, %v4636_v54  ;;  %v4859_v21 = vsel %vm12115_vm11, %v4638_v46, %v4858_v18  ;;  %v4614_v48 = vshrl.u32 %v10040_v42, 16  ;;  %v4617_v63 = vshll.u32 %v10040_v42, 16  ;;  %10437 = vmatpush3.bf16.msra.mxu1 %v10869_v11  ;;  %v4868_v46 = vld [vmem:[#allocation3 + $0x90] sm:$0xf] }
 0x239   : > { %4857 = vst.msk [vmem:[#allocation3 + $0x7c] sm:$0xf] %vm4276_vm13, %v4637_v45  ;;  %4860 = vst [vmem:[#allocation3 + $0x80] sm:$0x1] %v4859_v21  ;;  %v4657_v0 = vshrl.u32 %v10045_v4, 16  ;;  %v4660_v59 = vshll.u32 %v10045_v4, 16  ;;  %v5132_v24 = vsel %vm11028_vm2, %v5127_v35, %v5131_v26  ;;  %v4177_v18 = vmul.f32 %v12289_v1, %v4104_v31  ;;  %6005 = vrot.lane.b32.xlu0 %v10858_v5, %s10941_s18 }
 0x23a   : > { %v4616_v47 = vrot.slane %v4614_v48, 7  ;;  %v3946_v49 = vadd.f32 %v12460_v36, %v12209_v29  ;;  %v5137_v20 = vrot.slane %v5136_v58, 4  ;;  %v5144_v28 = vshrl.u32 %v5053_v23, 16  ;;  %v5054_v4 = vld [vmem:[#allocation3 + $0x1c] sm:$0xf]  ;;  %v12620_v21 = vpop.f32.mrb[60].mxu1 }
 0x23b   : > { %v12604_v22 = vrot.slane %v4657_v0, 7  ;;  %v5147_v6 = vshll.u32 %v5053_v23, 16  ;;  %v4216_v42 = vadd.f32 %v12295_v9, %v4177_v18  ;;  %v4115_v57 = vadd.f32 %v12465_v56, %v3954_v13  ;;  %v5055_v45 = vld [vmem:[#allocation3 + $0x20] sm:$0x1] }
 0x23c   : > { %v4619_v26 = vor.u32 %v4617_v63, %v4616_v47  ;;  %v4621_v54 = vrot.slane %v4616_v47, 4  ;;  %v5142_v36 = vsel %vm11028_vm2, %v5137_v20, %v5141_v14  ;;  %v4107_v27 = vadd.f32 %v12473_v53, %v3946_v49  ;;  %v5056_v20 = vld [vmem:[#allocation3 + $0x24] sm:$0xf] }
 0x23d   : > { %v4662_v51 = vor.u32 %v4660_v59, %v12604_v22  ;;  %v4663_v29 = vrot.slane %v12604_v22, 4  ;;  %v9760_v17 = vcombine.low %v5132_v24, %v5142_v36  ;;  %v4248_v56 = vmax.f32 %v4216_v42, 0.0 }
 0x23e   : > { %v4620_v35 = vsel %vm12344_vm0, %v4612_v40, %v4619_v26  ;;  %v4852_v31 = vsel %vm12115_vm11, %v4621_v54, %v4851_v52  ;;  %v4180_v14 = vmul.f32 %v12289_v1, %v4115_v57  ;;  %v4178_v50 = vmul.f32 %v12289_v1, %v4107_v27  ;;  %v12627_v40 = vpop.f32.mrb[61].mxu1 }
 0x23f   : > { %4850 = vst.msk [vmem:[#allocation3 + $0x70] sm:$0xf] %vm4276_vm13, %v4620_v35  ;;  %4853 = vst [vmem:[#allocation3 + $0x74] sm:$0x1] %v4852_v31  ;;  %v4869_v53 = vsel %vm12335_vm15, %v4662_v51, %v4868_v46  ;;  %v5146_v48 = vrot.slane %v5144_v28, 4  ;;  %5529 = vrot.lane.b32.xlu1 %v9760_v17, %s10941_s18  ;;  %v10043_v63 = vpack.c.bf16 %v4248_v56, %v4248_v56  ;;  %v5149_v23 = vrot.slane %v5147_v6, 5 }
 0x240   : > { %4870 = vst [vmem:[#allocation3 + $0x90] sm:$0xf] %v4869_v53  ;;  %v5153_v11 = vshll.u32 %v5054_v4, 16  ;;  %v5157_v0 = vshrl.u32 %v5054_v4, 16  ;;  %v12630_v59 = vpop.f32.mrb[62].mxu1  ;;  %v4219_v24 = vadd.f32 %v12295_v9, %v4180_v14  ;;  %v4217_v58 = vadd.f32 %v12295_v9, %v4178_v50 }
 0x241   : > { %v5163_v5 = vshll.u32 %v5055_v45, 16  ;;  %v12636_v1 = vadd.f32 %v12581_v33, %v12578_v12  ;;  %v12638_v47 = vpop.f32.mrb[63].mxu1  ;;  %v4640_v18 = vshrl.u32 %v10043_v63, 16  ;;  %v4643_v13 = vshll.u32 %v10043_v63, 16  ;;  %v4861_v33 = vld [vmem:[#allocation3 + $0x84] sm:$0xf] }
 0x242   : > { %v5150_v49 = vor.u32 %v5149_v23, %v5146_v48  ;;  %v5155_v52 = vrot.slane %v5153_v11, 5  ;;  %v4251_v28 = vmax.f32 %v4219_v24, 0.0  ;;  %v4249_v6 = vmax.f32 %v4217_v58, 0.0  ;;  %v5057_v56 = vld [vmem:[#allocation3 + $0x28] sm:$0xf] }
 0x243   : > { %v5159_v26 = vrot.slane %v5157_v0, 4  ;;  %v5165_v54 = vrot.slane %v5163_v5, 5  ;;  %v4642_v46 = vrot.slane %v4640_v18, 7  ;;  %v12641_v9 = vadd.f32 %v10398_v43, %v12591_v37  ;;  %v5058_v14 = vld [vmem:[#allocation3 + $0x2c] sm:$0x1] }
 0x244   : > { %v5151_v42 = vrot.slane %v5150_v49, 4  ;;  %v3967_v12 = vadd.f32 %v12567_v55, %v12246_v34  ;;  %v10046_v57 = vpack.c.bf16 %v4251_v28, %v4251_v28  ;;  %v10044_v51 = vpack.c.bf16 %v4249_v6, %v4249_v6  ;;  %v12653_v50 = vld [vmem:[%s13890_s2] ss:$0 sm:$0xff]  ;;  %v4872_v24 = vld [vmem:[#allocation3 + $0x98] sm:$0x1] }
 0x245   : > { %v5160_v36 = vor.u32 %v5159_v26, %v5155_v52  ;;  %v5168_v27 = vshrl.u32 %v5056_v20, 16  ;;  %v4645_v4 = vor.u32 %v4643_v13, %v4642_v46  ;;  %v4646_v35 = vrot.slane %v4642_v46, 4  ;;  %v4865_v58 = vld [vmem:[#allocation3 + $0x8c] sm:$0x1]  ;;  %v12661_v18 = vld [vmem:[%s13891_s3] ss:$0 sm:$0xff] }
 0x246   : > { %v5156_v31 = vsel %vm11028_vm2, %v5151_v42, %v5155_v52  ;;  %v4128_v17 = vadd.f32 %v12497_v7, %v3967_v12  ;;  %v4665_v45 = vshrl.u32 %v10046_v57, 16  ;;  %v4668_v53 = vshll.u32 %v10046_v57, 16  ;;  %v5059_v57 = vld [vmem:[#allocation3 + $0x30] sm:$0xf] }
 0x247   : > { %v4648_v37 = vshrl.u32 %v10044_v51, 16  ;;  %v4651_v43 = vshll.u32 %v10044_v51, 16  ;;  %v4862_v34 = vsel %vm12335_vm15, %v4645_v4, %v4861_v33  ;;  %v5161_v55 = vrot.slane %v5160_v36, 4 }
 0x248   : > { %v4183_v48 = vmul.f32 %v12653_v50, %v4128_v17  ;;  %v5170_v63 = vrot.slane %v5168_v27, 4  ;;  %4863 = vst [vmem:[#allocation3 + $0x84] sm:$0xf] %v4862_v34  ;;  %v4667_v7 = vrot.slane %v4665_v45, 7  ;;  %v5171_v11 = vshll.u32 %v5056_v20, 16 }
 0x249   : > { %v4650_v23 = vrot.slane %v4648_v37, 7  ;;  %v5177_v0 = vshll.u32 %v5057_v56, 16  ;;  %v5166_v5 = vsel %vm11028_vm2, %v5161_v55, %v5165_v54  ;;  %v5181_v49 = vshrl.u32 %v5057_v56, 16  ;;  %v10872_v54 = vld [vmem:[%s13892_s4 + $0x70] sm:$0xff]  }
 0x24a   : > { %v4222_v13 = vadd.f32 %v12661_v18, %v4183_v48  ;;  %v5187_v52 = vshll.u32 %v5058_v14, 16  ;;  %v4670_v28 = vor.u32 %v4668_v53, %v4667_v7  ;;  %v4672_v6 = vrot.slane %v4667_v7, 4  ;;  %10438 = vmatprep.subr.bf16.mxu1 %v10872_v54  ;;  %v5060_v37 = vld [vmem:[#allocation3 + $0x34] sm:$0xf] }
 0x24b   : > { %v4653_v26 = vor.u32 %v4651_v43, %v4650_v23  ;;  %v4655_v46 = vrot.slane %v4650_v23, 4  ;;  %v9761_v20 = vcombine.low %v5156_v31, %v5166_v5  ;;  %v5173_v12 = vrot.slane %v5171_v11, 5  ;;  %v10873_v31 = vld [vmem:[%s13892_s4 + $0x30] sm:$0xff]   ;;  %v5061_v5 = vld [vmem:[#allocation3 + $0x38] sm:$0x1] }
 0x24c   : > { %v4254_v42 = vmax.f32 %v4222_v13, 0.0  ;;  %v5179_v33 = vrot.slane %v5177_v0, 5  ;;  %v4671_v51 = vsel %vm12344_vm0, %v4663_v29, %v4670_v28  ;;  %v4873_v36 = vsel %vm12115_vm11, %v4672_v6, %v4872_v24  ;;  %10439 = vmatpush3.bf16.msra.mxu1 %v10873_v31 }
 0x24d   : > { %v4654_v27 = vsel %vm12344_vm0, %v4646_v35, %v4653_v26  ;;  %v4866_v4 = vsel %vm12115_vm11, %v4655_v46, %v4865_v58  ;;  %4871 = vst.msk [vmem:[#allocation3 + $0x94] sm:$0xf] %vm4276_vm13, %v4671_v51  ;;  %4874 = vst [vmem:[#allocation3 + $0x98] sm:$0x1] %v4873_v36  ;;  %5531 = vrot.lane.b32.xlu1 %v9761_v20, %s10941_s18  ;;  %v5174_v29 = vor.u32 %v5173_v12, %v5170_v63  ;;  %v5062_v51 = vld [vmem:[#allocation3 + $0x3c] sm:$0xf] }
 0x24e   : > { %4864 = vst.msk [vmem:[#allocation3 + $0x88] sm:$0xf] %vm4276_vm13, %v4654_v27  ;;  %4867 = vst [vmem:[#allocation3 + $0x8c] sm:$0x1] %v4866_v4  ;;  %v10049_v22 = vpack.c.bf16 %v4254_v42, %v4254_v42  ;;  %v5183_v17 = vrot.slane %v5181_v49, 4  ;;  %v5189_v56 = vrot.slane %v5187_v52, 5  ;;  %v3959_v35 = vadd.f32 %v12519_v38, %v12232_v3 }
 0x24f   : > { %v3970_v45 = vadd.f32 %v12573_v25, %v12250_v62  ;;  %v3962_v53 = vadd.f32 %v12535_v39, %v12238_v19  ;;  %v5192_v43 = vshrl.u32 %v5059_v57, 16  ;;  %v5175_v55 = vrot.slane %v5174_v29, 4  ;;  %v4882_v25 = vld [vmem:[#allocation3 + $0xa8] sm:$0xf] }
 0x250   : > { %v4691_v14 = vshrl.u32 %v10049_v22, 16  ;;  %v4694_v34 = vshll.u32 %v10049_v22, 16  ;;  %v5184_v48 = vor.u32 %v5183_v17, %v5179_v33  ;;  %v4120_v63 = vadd.f32 %v12500_v8, %v3959_v35 }
 0x251   : > { %v4131_v7 = vadd.f32 %v12506_v30, %v3970_v45  ;;  %v4123_v23 = vadd.f32 %v12512_v60, %v3962_v53  ;;  %v5194_v3 = vrot.slane %v5192_v43, 4  ;;  %v5180_v62 = vsel %vm11028_vm2, %v5175_v55, %v5179_v33  ;;  %v13916_v53 = vld [vmem:[#allocation8_spill] sm:$0xff] }
 0x252   : > { %v12692_v38 = vrot.slane %v4691_v14, 7  ;;  %v5185_v19 = vrot.slane %v5184_v48, 4  ;;  %v5195_v39 = vshll.u32 %v5059_v57, 16  ;;  %v4181_v11 = vmul.f32 %v12653_v50, %v4120_v63  ;;  %v5063_v63 = vld [vmem:[#allocation3 + $0x40] sm:$0xf] }
 0x253   : > { %v4184_v0 = vmul.f32 %v12653_v50, %v4131_v7  ;;  %v4182_v24 = vmul.f32 %v12653_v50, %v4123_v23  ;;  %v5201_v8 = vshll.u32 %v5060_v37, 16  ;;  %v5205_v42 = vshrl.u32 %v5060_v37, 16  ;;  %v4875_v23 = vld [vmem:[#allocation3 + $0x9c] sm:$0xf] }
 0x254   : > { %v4696_v30 = vor.u32 %v4694_v34, %v12692_v38  ;;  %v4697_v60 = vrot.slane %v12692_v38, 4  ;;  %v5190_v58 = vsel %vm11028_vm2, %v5185_v19, %v5189_v56  ;;  %v5197_v13 = vrot.slane %v5195_v39, 5  ;;  %v4886_v39 = vld [vmem:[#allocation3 + $0xb0] sm:$0x1] }
 0x255   : > { %v9762_v49 = vcombine.low %v5180_v62, %v5190_v58  ;;  %v4220_v52 = vadd.f32 %v12661_v18, %v4181_v11  ;;  %v4223_v28 = vadd.f32 %v12661_v18, %v4184_v0  ;;  %v4221_v6 = vadd.f32 %v12661_v18, %v4182_v24 }
 0x256   : > { %v4883_v26 = vsel %vm12335_vm15, %v4696_v30, %v4882_v25  ;;  %v5198_v46 = vor.u32 %v5197_v13, %v5194_v3  ;;  %v5203_v20 = vrot.slane %v5201_v8, 5  ;;  %v5211_v54 = vshll.u32 %v5061_v5, 16  ;;  %v4879_v13 = vld [vmem:[#allocation3 + $0xa4] sm:$0x1] }
 0x257   : > { %4884 = vst [vmem:[#allocation3 + $0xa8] sm:$0xf] %v4883_v26  ;;  %5533 = vrot.lane.b32.xlu1 %v9762_v49, %s10941_s18  ;;  %v4252_v12 = vmax.f32 %v4220_v52, 0.0  ;;  %v4255_v33 = vmax.f32 %v4223_v28, 0.0  ;;  %v4253_v57 = vmax.f32 %v4221_v6, 0.0  ;;  %v5207_v27 = vrot.slane %v5205_v42, 4 }
 0x258   : > { %v5199_v36 = vrot.slane %v5198_v46, 4  ;;  %v10402_v4 = vadd.f32 %v12627_v40, %v12620_v21  ;;  %v10405_v31 = vadd.f32 %v12638_v47, %v12630_v59  ;;  %v5213_v56 = vrot.slane %v5211_v54, 5  ;;  %v5064_v6 = vld [vmem:[#allocation3 + $0x44] sm:$0x1]  ;;  %v10875_v26 = vld [vmem:[%s13892_s4 + $0x78] sm:$0xff]  }
 0x259   : > { %v10047_v22 = vpack.c.bf16 %v4252_v12, %v4252_v12  ;;  %v10050_v29 = vpack.c.bf16 %v4255_v33, %v4255_v33  ;;  %v10048_v17 = vpack.c.bf16 %v4253_v57, %v4253_v57  ;;  %v5208_v45 = vor.u32 %v5207_v27, %v5203_v20  ;;  %v10876_v46 = vld [vmem:[%s13892_s4 + $0x38] sm:$0xff]   ;;  %v5065_v57 = vld [vmem:[#allocation3 + $0x48] sm:$0xf]  ;;  %10440 = vmatprep.subr.bf16.mxu1 %v10875_v26 }
 0x25a   : > { %v5204_v35 = vsel %vm11028_vm2, %v5199_v36, %v5203_v20  ;;  %v3983_v37 = vadd.f32 %v10402_v4, %v13916_v53  ;;  %v5216_v43 = vshrl.u32 %v5062_v51, 16  ;;  %v5219_v19 = vshll.u32 %v5062_v51, 16  ;;  %10441 = vmatpush3.bf16.msra.mxu1 %v10876_v46 }
 0x25b   : > { %v4674_v14 = vshrl.u32 %v10047_v22, 16  ;;  %v4677_v34 = vshll.u32 %v10047_v22, 16  ;;  %v4699_v55 = vshrl.u32 %v10050_v29, 16  ;;  %v4702_v48 = vshll.u32 %v10050_v29, 16  ;;  %v13917_v22 = vld [vmem:[#allocation6_spill] sm:$0xff] }
 0x25c   : > { %v4682_v21 = vshrl.u32 %v10048_v17, 16  ;;  %v4685_v40 = vshll.u32 %v10048_v17, 16  ;;  %v5209_v7 = vrot.slane %v5208_v45, 4  ;;  %v4144_v59 = vadd.f32 %v12521_v41, %v3983_v37  ;;  %v13919_v45 = vld [vmem:[#allocation7_spill] sm:$0xff] }
 0x25d   : > { %v4676_v47 = vrot.slane %v4674_v14, 7  ;;  %v4701_v3 = vrot.slane %v4699_v55, 7  ;;  %v5218_v62 = vrot.slane %v5216_v43, 4  ;;  %v5225_v24 = vshll.u32 %v5063_v63, 16 }
 0x25e   : > { %v4684_v25 = vrot.slane %v4682_v21, 7  ;;  %v5214_v11 = vsel %vm11028_vm2, %v5209_v7, %v5213_v56  ;;  %v4187_v0 = vmul.f32 %v12653_v50, %v4144_v59  ;;  %v5221_v33 = vrot.slane %v5219_v19, 5  ;;  %v13918_v56 = vld [vmem:[#allocation9_spill] sm:$0xff]  ;;  %v4896_v7 = vld [vmem:[#allocation3 + $0xc0] sm:$0xf] }
 0x25f   : > { %v4679_v8 = vor.u32 %v4677_v34, %v4676_v47  ;;  %v4680_v30 = vrot.slane %v4676_v47, 4  ;;  %v4704_v58 = vor.u32 %v4702_v48, %v4701_v3  ;;  %v4706_v5 = vrot.slane %v4701_v3, 4 }
 0x260   : > { %v4687_v49 = vor.u32 %v4685_v40, %v4684_v25  ;;  %v4689_v41 = vrot.slane %v4684_v25, 4  ;;  %v9763_v52 = vcombine.low %v5204_v35, %v5214_v11  ;;  %v4226_v28 = vadd.f32 %v12661_v18, %v4187_v0 }
 0x261   : > { %v4876_v20 = vsel %vm12335_vm15, %v4679_v8, %v4875_v23  ;;  %v4705_v42 = vsel %vm12344_vm0, %v4697_v60, %v4704_v58  ;;  %v4887_v12 = vsel %vm12115_vm11, %v4706_v5, %v4886_v39  ;;  %v5227_v36 = vrot.slane %v5225_v24, 5 }
 0x262   : > { %4877 = vst [vmem:[#allocation3 + $0x9c] sm:$0xf] %v4876_v20  ;;  %4885 = vst.msk [vmem:[#allocation3 + $0xac] sm:$0xf] %vm4276_vm13, %v4705_v42  ;;  %v4688_v54 = vsel %vm12344_vm0, %v4680_v30, %v4687_v49  ;;  %v4880_v51 = vsel %vm12115_vm11, %v4689_v41, %v4879_v13  ;;  %5535 = vrot.lane.b32.xlu1 %v9763_v52, %s10941_s18  ;;  %v4258_v38 = vmax.f32 %v4226_v28, 0.0  ;;  %v5229_v27 = vshrl.u32 %v5063_v63, 16 }
 0x263   : > { %4888 = vst [vmem:[#allocation3 + $0xb0] sm:$0x1] %v4887_v12  ;;  %4878 = vst.msk [vmem:[#allocation3 + $0xa0] sm:$0xf] %vm4276_vm13, %v4688_v54  ;;  %v5222_v60 = vor.u32 %v5221_v33, %v5218_v62  ;;  %v5235_v4 = vshll.u32 %v5064_v6, 16  ;;  %v3975_v29 = vadd.f32 %v12636_v1, %v13917_v22  ;;  %v3986_v35 = vadd.f32 %v10405_v31, %v13918_v56 }
 0x264   : > { %4881 = vst [vmem:[#allocation3 + $0xa4] sm:$0x1] %v4880_v51  ;;  %v10053_v17 = vpack.c.bf16 %v4258_v38, %v4258_v38  ;;  %v3978_v53 = vadd.f32 %v12641_v9, %v13919_v45  ;;  %v5240_v37 = vshrl.u32 %v5065_v57, 16  ;;  %v5231_v14 = vrot.slane %v5229_v27, 4  ;;  %v5066_v1 = vld [vmem:[#allocation3 + $0x4c] sm:$0xf] }
 0x265   : > { %v5223_v43 = vrot.slane %v5222_v60, 4  ;;  %v5237_v34 = vrot.slane %v5235_v4, 5  ;;  %v4136_v55 = vadd.f32 %v12526_v16, %v3975_v29  ;;  %v4147_v63 = vadd.f32 %v12538_v61, %v3986_v35  ;;  %v5067_v62 = vld [vmem:[#allocation3 + $0x50] sm:$0x1]  ;;  %v7032_v13 = vld [vmem:[#allocation3 + $0x18] sm:$0xf]  ;;  %v5528_v60 = vpop.permute.xlu1 %5527 }
 0x266   : > { %v4725_v48 = vshrl.u32 %v10053_v17, 16  ;;  %v4728_v21 = vshll.u32 %v10053_v17, 16  ;;  %v4139_v40 = vadd.f32 %v12541_v2, %v3978_v53  ;;  %v5232_v59 = vor.u32 %v5231_v14, %v5227_v36  ;;  %v7033_v17 = vld [vmem:[#allocation3 + $0x1c] sm:$0xf]  ;;  %v4889_v35 = vld [vmem:[#allocation3 + $0xb4] sm:$0xf] }
 0x267   : > { %v5228_v31 = vsel %vm11028_vm2, %v5223_v43, %v5227_v36  ;;  %v4185_v9 = vmul.f32 %v12653_v50, %v4136_v55  ;;  %v5242_v47 = vrot.slane %v5240_v37, 4  ;;  %v4188_v3 = vmul.f32 %v12653_v50, %v4147_v63  ;;  %v10877_v36 = vld [vmem:[#allocation3] sm:$0xff]   ;;  %v4900_v14 = vld [vmem:[#allocation3 + $0xc8] sm:$0x1] }
 0x268   : > { %v12753_v23 = vrot.slane %v4725_v48, 7  ;;  %v4186_v16 = vmul.f32 %v12653_v50, %v4139_v40  ;;  %v5243_v19 = vshll.u32 %v5065_v57, 16  ;;  %v5233_v61 = vrot.slane %v5232_v59, 4  ;;  %5031 = vst.msk [vmem:[#allocation4] sm:$0xff] %vm409_vm3, %v10877_v36  ;;  %v4893_v40 = vld [vmem:[#allocation3 + $0xbc] sm:$0x1] }
 0x269   : > { %v4224_v2 = vadd.f32 %v12661_v18, %v4185_v9  ;;  %v5249_v39 = vshll.u32 %v5066_v1, 16  ;;  %v5253_v25 = vshrl.u32 %v5066_v1, 16  ;;  %v4227_v24 = vadd.f32 %v12661_v18, %v4188_v3  ;;  %5575 = vst.msk [vmem:[#allocation4] sm:$0xff] %vm957_vm7, %v5528_v60 }
 0x26a   : > { %v4730_v11 = vor.u32 %v4728_v21, %v12753_v23  ;;  %v4731_v0 = vrot.slane %v12753_v23, 4  ;;  %v4225_v8 = vadd.f32 %v12661_v18, %v4186_v16  ;;  %v5238_v30 = vsel %vm11028_vm2, %v5233_v61, %v5237_v34  ;;  %v5068_v16 = vld [vmem:[#allocation3 + $0x54] sm:$0xf]  ;;  %v10879_v23 = vld [vmem:[%s13892_s4 + $0x80] sm:$0xff]  }
 0x26b   : > { %v4256_v58 = vmax.f32 %v4224_v2, 0.0  ;;  %v5245_v50 = vrot.slane %v5243_v19, 5  ;;  %v5251_v5 = vrot.slane %v5249_v39, 5  ;;  %v9764_v41 = vcombine.low %v5228_v31, %v5238_v30  ;;  %v5069_v39 = vld [vmem:[#allocation3 + $0x58] sm:$0xf] }
 0x26c   : > { %v4897_v49 = vsel %vm12335_vm15, %v4730_v11, %v4896_v7  ;;  %v4259_v52 = vmax.f32 %v4227_v24, 0.0  ;;  %v4257_v28 = vmax.f32 %v4225_v8, 0.0  ;;  %v5255_v46 = vrot.slane %v5253_v25, 4  ;;  %v7034_v7 = vld [vmem:[#allocation3 + $0x20] sm:$0x1]  ;;  %v10883_v11 = vld [vmem:[#allocation3 + $0x18] sm:$0xff]  }
 0x26d   : > { %4898 = vst [vmem:[#allocation3 + $0xc0] sm:$0xf] %v4897_v49  ;;  %v10051_v6 = vpack.c.bf16 %v4256_v58, %v4256_v58  ;;  %v5246_v26 = vor.u32 %v5245_v50, %v5242_v47  ;;  %v5259_v20 = vshll.u32 %v5067_v62, 16  ;;  %5537 = vrot.lane.b32.xlu1 %v9764_v41, %s10941_s18  ;;  %v7081_v12 = vshrl.u32 %v7032_v13, 16  ;;  %v5070_v25 = vld [vmem:[#allocation3 + $0x5c] sm:$0x1] }
 0x26e   : > { %v10054_v18 = vpack.c.bf16 %v4259_v52, %v4259_v52  ;;  %v10052_v42 = vpack.c.bf16 %v4257_v28, %v4257_v28  ;;  %v7084_v33 = vshll.u32 %v7032_v13, 16  ;;  %v5256_v38 = vor.u32 %v5255_v46, %v5251_v5  ;;  %v6567_v58 = vld [vmem:[#allocation3 + $0xc] sm:$0xe]  ;;  %v10878_v50 = vld [vmem:[%s13892_s4 + $0xc0] sm:$0xff]   ;;  %v6568_v13 = vld [vmem:[#allocation3 + $0x10] sm:$0xf] }
 0x26f   : > { %v4708_v57 = vshrl.u32 %v10051_v6, 16  ;;  %v4711_v54 = vshll.u32 %v10051_v6, 16  ;;  %v5247_v51 = vrot.slane %v5246_v26, 4  ;;  %v5261_v37 = vrot.slane %v5259_v20, 5  ;;  %5033 = vst.msk [vmem:[#allocation4 + $0x50] sm:$0xff] %vm409_vm3, %v10883_v11  ;;  %10538 = vmatprep.subr.bf16.mxu0 %v10878_v50 }
 0x270   : > { %v4733_v27 = vshrl.u32 %v10054_v18, 16  ;;  %v4736_v4 = vshll.u32 %v10054_v18, 16  ;;  %v4716_v22 = vshrl.u32 %v10052_v42, 16  ;;  %v4719_v29 = vshll.u32 %v10052_v42, 16  ;;  %v6569_v6 = vld [vmem:[#allocation3 + $0x14] sm:$0x1]  ;;  %10539 = vmatpush3.bf16.msra.mxu0 %v10879_v23 }
 0x271   : > { %v4710_v56 = vrot.slane %v4708_v57, 7  ;;  %v5252_v45 = vsel %vm11028_vm2, %v5247_v51, %v5251_v5  ;;  %v5257_v53 = vrot.slane %v5256_v38, 4  ;;  %v7083_v55 = vrot.slane %v7081_v12, 4  ;;  %v7035_v42 = vld [vmem:[#allocation3 + $0x24] sm:$0xf]  ;;  %v10881_v12 = vld [vmem:[#allocation3 + $0xc] sm:$0xff]  }
 0x272   : > { %v4735_v43 = vrot.slane %v4733_v27, 7  ;;  %v4718_v34 = vrot.slane %v4716_v22, 7  ;;  %v7086_v48 = vrot.slane %v7084_v33, 5  ;;  %v7090_v31 = vshll.u32 %v7033_v17, 16  ;;  %v7036_v38 = vld [vmem:[#allocation3 + $0x28] sm:$0xf] }
 0x273   : > { %v4713_v21 = vor.u32 %v4711_v54, %v4710_v56  ;;  %v4714_v63 = vrot.slane %v4710_v56, 4  ;;  %v5262_v1 = vsel %vm11028_vm2, %v5257_v53, %v5261_v37  ;;  %v7094_v15 = vshrl.u32 %v7033_v17, 16  ;;  %5032 = vst.msk [vmem:[#allocation4 + $0x28] sm:$0xff] %vm409_vm3, %v10881_v12  ;;  %v10895_v22 = vld [vmem:[#allocation3 + $0x18] sm:$0xff]   ;;  %v7037_v56 = vld [vmem:[#allocation3 + $0x2c] sm:$0x1] }
 0x274   : > { %v4738_v59 = vor.u32 %v4736_v4, %v4735_v43  ;;  %v4740_v9 = vrot.slane %v4735_v43, 4  ;;  %v4721_v47 = vor.u32 %v4719_v29, %v4718_v34  ;;  %v4723_v3 = vrot.slane %v4718_v34, 4  ;;  %7016 = vst.msk [vmem:[#allocation4 + $0x18] sm:$0xff] %vm409_vm3, %v10895_v22  ;;  %v10882_v12 = vld [vmem:[%s13892_s4 + $0xc8] sm:$0xff]  }
 0x275   : > { %v4890_v62 = vsel %vm12335_vm15, %v4713_v21, %v4889_v35  ;;  %v9765_v19 = vcombine.low %v5252_v45, %v5262_v1  ;;  %v7087_v61 = vor.u32 %v7086_v48, %v7083_v55  ;;  %v12775_v2 = vrot.slane %v7090_v31, 5  ;;  %v5071_v55 = vld [vmem:[#allocation3 + $0x60] sm:$0xf]  ;;  %10540 = vmatprep.subr.bf16.mxu0 %v10882_v12  ;;  %v10884_v22 = vld [vmem:[%s13892_s4 + $0x88] sm:$0xff]  }
 0x276   : > { %4891 = vst [vmem:[#allocation3 + $0xb4] sm:$0xf] %v4890_v62  ;;  %v4739_v24 = vsel %vm12344_vm0, %v4731_v0, %v4738_v59  ;;  %v4901_v8 = vsel %vm12115_vm11, %v4740_v9, %v4900_v14  ;;  %v4722_v44 = vsel %vm12344_vm0, %v4714_v63, %v4721_v47  ;;  %v4894_v30 = vsel %vm12115_vm11, %v4723_v3, %v4893_v40  ;;  %v10880_v48 = vld [vmem:[%s13892_s4 + $0x100] sm:$0xff]  }
 0x277   : > { %4899 = vst.msk [vmem:[#allocation3 + $0xc4] sm:$0xf] %vm4276_vm13, %v4739_v24  ;;  %4902 = vst [vmem:[#allocation3 + $0xc8] sm:$0x1] %v4901_v8  ;;  %5539 = vrot.lane.b32.xlu1 %v9765_v19, %s10941_s18  ;;  %v7088_v10 = vrot.slane %v7087_v61, 4  ;;  %v7100_v0 = vshll.u32 %v7034_v7, 16  ;;  %10710 = vmatprep.subr.bf16.mxu1 %v10880_v48 }
 0x278   : > { %4892 = vst.msk [vmem:[#allocation3 + $0xb8] sm:$0xf] %vm4276_vm13, %v4722_v44  ;;  %4895 = vst [vmem:[#allocation3 + $0xbc] sm:$0x1] %v4894_v30  ;;  %v5264_v5 = vshrl.u32 %v5068_v16, 16  ;;  %v5267_v49 = vshll.u32 %v5068_v16, 16  ;;  %10541 = vmatpush3.bf16.msra.mxu0 %v10884_v22 }
 0x279   : > { %v5273_v41 = vshll.u32 %v5069_v39, 16  ;;  %v5277_v52 = vshrl.u32 %v5069_v39, 16  ;;  %v5283_v28 = vshll.u32 %v5070_v25, 16  ;;  %v7093_v26 = vsel %vm11028_vm2, %v7088_v10, %v12775_v2  ;;  %v5072_v47 = vld [vmem:[#allocation3 + $0x64] sm:$0xf] }
 0x27a   : > { %v7096_v46 = vrot.slane %v7094_v15, 4  ;;  %v7102_v20 = vrot.slane %v7100_v0, 5  ;;  %v5266_v18 = vrot.slane %v5264_v5, 4  ;;  %v5269_v33 = vrot.slane %v5267_v49, 5  ;;  %v5073_v61 = vld [vmem:[#allocation3 + $0x68] sm:$0x1] }
 0x27b   : > { %v5275_v57 = vrot.slane %v5273_v41, 5  ;;  %v5279_v54 = vrot.slane %v5277_v52, 4  ;;  %v5285_v51 = vrot.slane %v5283_v28, 5  ;;  %v9839_v60 = vrot.slane %v6567_v58, 9  ;;  %v6571_v8 = vld [vmem:[#allocation3 + $0x1c] sm:$0xf] }
 0x27c   : > { %v7097_v36 = vor.u32 %v7096_v46, %v12775_v2  ;;  %v6665_v27 = vrot.slane %v6568_v13, 5  ;;  %v6668_v4 = vrot.slane %v6569_v6, 5  ;;  %v5270_v29 = vor.u32 %v5269_v33, %v5266_v18  ;;  %v6570_v2 = vld [vmem:[#allocation3 + $0x18] sm:$0xe]  ;;  %v6572_v44 = vld [vmem:[#allocation3 + $0x20] sm:$0x1] }
 0x27d   : > { %v5280_v17 = vor.u32 %v5279_v54, %v5275_v57  ;;  %v7105_v35 = vshrl.u32 %v7035_v42, 16  ;;  %v7108_v45 = vshll.u32 %v7035_v42, 16  ;;  %v7114_v34 = vshll.u32 %v7036_v38, 16  ;;  %v7038_v10 = vld [vmem:[#allocation3 + $0x30] sm:$0xf] }
 0x27e   : > { %v7098_v53 = vrot.slane %v7097_v36, 4  ;;  %v6666_v43 = vsel %vm11243_vm6, %v9839_v60, %v6665_v27  ;;  %v6667_v14 = vrot.slane %v6665_v27, 4  ;;  %v5271_v21 = vrot.slane %v5270_v29, 4  ;;  %v7039_v49 = vld [vmem:[#allocation3 + $0x34] sm:$0xf]  ;;  %v10859_v41 = vld [vmem:[#allocation3 + $0x6c] sm:$0xff]  }
 0x27f   : > { %v5281_v63 = vrot.slane %v5280_v17, 4  ;;  %v7107_v40 = vrot.slane %v7105_v35, 4  ;;  %v7110_v1 = vrot.slane %v7108_v45, 5  ;;  %v7116_v59 = vrot.slane %v7114_v34, 5  ;;  %v7040_v36 = vld [vmem:[#allocation3 + $0x38] sm:$0x1] }
 0x280   : > { %v7103_v7 = vsel %vm11028_vm2, %v7098_v53, %v7102_v20  ;;  %v6669_v31 = vsel %vm11243_vm6, %v6667_v14, %v6668_v4  ;;  %v7118_v9 = vshrl.u32 %v7036_v38, 16  ;;  %v5276_v16 = vsel %vm11028_vm2, %v5271_v21, %v5275_v57  ;;  %v5074_v45 = vld [vmem:[#allocation3 + $0x6c] sm:$0xf] }
 0x281   : > { %v9887_v3 = vcombine.low %v7093_v26, %v7103_v7  ;;  %v5286_v62 = vsel %vm11028_vm2, %v5281_v63, %v5285_v51  ;;  %v9855_v19 = vcombine.low %v6666_v43, %v6669_v31  ;;  %v7111_v25 = vor.u32 %v7110_v1, %v7107_v40  ;;  %v5075_v40 = vld [vmem:[#allocation3 + $0x70] sm:$0xf]  ;;  %v6573_v1 = vld [vmem:[#allocation3 + $0x24] sm:$0xe] }
 0x282   : > { %v9766_v39 = vcombine.low %v5276_v16, %v5286_v62  ;;  %v7120_v11 = vrot.slane %v7118_v9, 4  ;;  %v7124_v24 = vshll.u32 %v7037_v56, 16  ;;  %v5288_v30 = vshrl.u32 %v5071_v55, 16  ;;  %v5076_v9 = vld [vmem:[#allocation3 + $0x74] sm:$0x1]  ;;  %v10885_v16 = vld [vmem:[#allocation3 + $0x24] sm:$0xff]  }
 0x283   : > { %7512 = vrot.lane.b32.xlu0 %v9887_v3, %s10941_s18  ;;  %v5291_v58 = vshll.u32 %v5071_v55, 16  ;;  %v5297_v50 = vshll.u32 %v5072_v47, 16  ;;  %v5301_v23 = vshrl.u32 %v5072_v47, 16  ;;  %v7112_v15 = vrot.slane %v7111_v25, 4  ;;  %v6574_v3 = vld [vmem:[#allocation3 + $0x28] sm:$0xf] }
 0x284   : > { %5541 = vrot.lane.b32.xlu1 %v9766_v39, %s10941_s18  ;;  %v7121_v0 = vor.u32 %v7120_v11, %v7116_v59  ;;  %v7126_v5 = vrot.slane %v7124_v24, 5  ;;  %v5307_v13 = vshll.u32 %v5073_v61, 16  ;;  %v5290_v52 = vrot.slane %v5288_v30, 4  ;;  %v10862_v62 = vld [vmem:[#allocation3 + $0x78] sm:$0xff]   ;;  %v10886_v25 = vld [vmem:[%s13892_s4 + $0xd0] sm:$0xff]   ;;  %5034 = vst.msk [vmem:[#allocation4 + $0x78] sm:$0xff] %vm409_vm3, %v10885_v16 }
 0x285   : > { %v5293_v28 = vrot.slane %v5291_v58, 5  ;;  %v5299_v6 = vrot.slane %v5297_v50, 5  ;;  %v5303_v26 = vrot.slane %v5301_v23, 4  ;;  %v7117_v46 = vsel %vm11028_vm2, %v7112_v15, %v7116_v59  ;;  %v6575_v30 = vld [vmem:[#allocation3 + $0x2c] sm:$0x1]  ;;  %10542 = vmatprep.subr.bf16.mxu0 %v10886_v25 }
 0x286   : > { %v7122_v20 = vrot.slane %v7121_v0, 4  ;;  %v5309_v18 = vrot.slane %v5307_v13, 5  ;;  %v9840_v42 = vrot.slane %v6570_v2, 9  ;;  %v6672_v54 = vrot.slane %v6571_v8, 5  ;;  %v7041_v15 = vld [vmem:[#allocation3 + $0x3c] sm:$0xf] }
 0x287   : > { %6007 = vrot.lane.b32.xlu0 %v10859_v41, %s10941_s18  ;;  %v5294_v33 = vor.u32 %v5293_v28, %v5290_v52  ;;  %v5304_v57 = vor.u32 %v5303_v26, %v5299_v6  ;;  %v6675_v51 = vrot.slane %v6572_v44, 5  ;;  %v7129_v60 = vshrl.u32 %v7038_v10, 16  ;;  %v10887_v0 = vld [vmem:[#allocation3 + $0x30] sm:$0xff]   ;;  %v7042_v52 = vld [vmem:[#allocation3 + $0x40] sm:$0xf] }
 0x288   : > { %6823 = vrot.lane.b32.xlu1 %v9855_v19, %s10941_s18  ;;  %v7127_v38 = vsel %vm11028_vm2, %v7122_v20, %v7126_v5  ;;  %v7132_v27 = vshll.u32 %v7038_v10, 16  ;;  %v7138_v4 = vshll.u32 %v7039_v49, 16  ;;  %v6673_v35 = vsel %vm11243_vm6, %v9840_v42, %v6672_v54  ;;  %v10888_v28 = vld [vmem:[%s13892_s4 + $0x90] sm:$0xff]   ;;  %5035 = vst.msk [vmem:[#allocation4 + $0xa0] sm:$0xff] %vm409_vm3, %v10887_v0 }
 0x289   : > { %v9888_v29 = vcombine.low %v7117_v46, %v7127_v38  ;;  %v5295_v17 = vrot.slane %v5294_v33, 4  ;;  %v5305_v56 = vrot.slane %v5304_v57, 4  ;;  %v6674_v53 = vrot.slane %v6672_v54, 4  ;;  %v7043_v57 = vld [vmem:[#allocation3 + $0x44] sm:$0x1]  ;;  %10543 = vmatpush3.bf16.msra.mxu0 %v10888_v28 }
 0x28a   : > { %v7131_v43 = vrot.slane %v7129_v60, 4  ;;  %v7134_v14 = vrot.slane %v7132_v27, 5  ;;  %v12832_v34 = vrot.slane %v7138_v4, 5  ;;  %v7142_v21 = vshrl.u32 %v7039_v49, 16  ;;  %v5077_v27 = vld [vmem:[#allocation3 + $0x78] sm:$0xf] }
 0x28b   : > { %7514 = vrot.lane.b32.xlu0 %v9888_v29, %s10941_s18  ;;  %v5300_v55 = vsel %vm11028_vm2, %v5295_v17, %v5299_v6  ;;  %v5310_v48 = vsel %vm11028_vm2, %v5305_v56, %v5309_v18  ;;  %v7148_v63 = vshll.u32 %v7040_v36, 16  ;;  %v6676_v31 = vsel %vm11243_vm6, %v6674_v53, %v6675_v51  ;;  %v10889_v18 = vld [vmem:[#allocation3 + $0x3c] sm:$0xff]   ;;  %v10892_v53 = vld [vmem:[#allocation3 + $0x48] sm:$0xff]  }
 0x28c   : > { %v9767_v7 = vcombine.low %v5300_v55, %v5310_v48  ;;  %v7135_v59 = vor.u32 %v7134_v14, %v7131_v43  ;;  %v5312_v47 = vshrl.u32 %v5074_v45, 16  ;;  %v9856_v19 = vcombine.low %v6673_v35, %v6676_v31  ;;  %5036 = vst.msk [vmem:[#allocation4 + $0xc8] sm:$0xff] %vm409_vm3, %v10889_v18  ;;  %v10890_v4 = vld [vmem:[%s13892_s4 + $0xd8] sm:$0xff]   ;;  %v5079_v48 = vld [vmem:[#allocation3 + $0x80] sm:$0x1]  ;;  %5037 = vst.msk [vmem:[#allocation4 + $0xf0] sm:$0xff] %vm409_vm3, %v10892_v53 }
 0x28d   : > { %v7144_v61 = vrot.slane %v7142_v21, 4  ;;  %v7150_v2 = vrot.slane %v7148_v63, 5  ;;  %v5315_v39 = vshll.u32 %v5074_v45, 16  ;;  %v5321_v8 = vshll.u32 %v5075_v40, 16  ;;  %v5078_v35 = vld [vmem:[#allocation3 + $0x7c] sm:$0xf]  ;;  %10544 = vmatprep.subr.bf16.mxu0 %v10890_v4 }
 0x28e   : > { %5543 = vrot.lane.b32.xlu1 %v9767_v7, %s10941_s18  ;;  %v7136_v11 = vrot.slane %v7135_v59, 4  ;;  %v5314_v24 = vrot.slane %v5312_v47, 4  ;;  %v5325_v44 = vshrl.u32 %v5075_v40, 16  ;;  %v5331_v23 = vshll.u32 %v5076_v9, 16  ;;  %v10891_v45 = vld [vmem:[%s13892_s4 + $0x98] sm:$0xff]   ;;  %v10893_v47 = vld [vmem:[%s13892_s4 + $0xe0] sm:$0xff]  }
 0x28f   : > { %6009 = vrot.lane.b32.xlu0 %v10862_v62, %s10941_s18  ;;  %v7145_v58 = vor.u32 %v7144_v61, %v12832_v34  ;;  %v5317_v50 = vrot.slane %v5315_v39, 5  ;;  %v9841_v10 = vrot.slane %v6573_v1, 9  ;;  %v5323_v13 = vrot.slane %v5321_v8, 5  ;;  %v6576_v21 = vld [vmem:[#allocation3 + $0x30] sm:$0xe]  ;;  %v10863_v1 = vld [vmem:[#allocation3 + $0x84] sm:$0xff]   ;;  %10545 = vmatpush3.bf16.msra.mxu0 %v10891_v45 }
 0x290   : > { %v7141_v5 = vsel %vm11028_vm2, %v7136_v11, %v12832_v34  ;;  %v5327_v49 = vrot.slane %v5325_v44, 4  ;;  %v6679_v41 = vrot.slane %v6574_v3, 5  ;;  %v5333_v46 = vrot.slane %v5331_v23, 5  ;;  %v6577_v63 = vld [vmem:[#allocation3 + $0x34] sm:$0xf]  ;;  %v10894_v61 = vld [vmem:[%s13892_s4 + $0xa0] sm:$0xff]   ;;  %10546 = vmatprep.subr.bf16.mxu0 %v10893_v47 }
 0x291   : > { %v7146_v6 = vrot.slane %v7145_v58, 4  ;;  %v5318_v26 = vor.u32 %v5317_v50, %v5314_v24  ;;  %v6682_v20 = vrot.slane %v6575_v30, 5  ;;  %v7153_v54 = vshrl.u32 %v7041_v15, 16  ;;  %v6578_v9 = vld [vmem:[#allocation3 + $0x38] sm:$0x1]  ;;  %v10900_v53 = vld [vmem:[%s13892_s4 + $0xb0] sm:$0xff]  }
 0x292   : > { %6825 = vrot.lane.b32.xlu1 %v9856_v19, %s10941_s18  ;;  %v5328_v42 = vor.u32 %v5327_v49, %v5323_v13  ;;  %v12858_v12 = vsel %vm11243_vm6, %v9841_v10, %v6679_v41  ;;  %v6681_v33 = vrot.slane %v6679_v41, 4  ;;  %v7156_v36 = vshll.u32 %v7041_v15, 16  ;;  %v7044_v8 = vld [vmem:[#allocation3 + $0x48] sm:$0xf]  ;;  %v7045_v44 = vld [vmem:[#allocation3 + $0x4c] sm:$0xf] }
 0x293   : > { %v7151_v51 = vsel %vm11028_vm2, %v7146_v6, %v7150_v2  ;;  %v5319_v38 = vrot.slane %v5318_v26, 4  ;;  %v7162_v60 = vshll.u32 %v7042_v52, 16  ;;  %v7155_v56 = vrot.slane %v7153_v54, 4  ;;  %v10896_v2 = vld [vmem:[#allocation3 + $0x54] sm:$0xff]   ;;  %10547 = vmatpush3.bf16.msra.mxu0 %v10894_v61  ;;  %v10898_v6 = vld [vmem:[%s13892_s4 + $0xa8] sm:$0xff]  }
 0x294   : > { %v9889_v22 = vcombine.low %v7141_v5, %v7151_v51  ;;  %v5329_v29 = vrot.slane %v5328_v42, 4  ;;  %v6683_v17 = vsel %vm11243_vm6, %v6681_v33, %v6682_v20  ;;  %v7158_v34 = vrot.slane %v7156_v36, 5  ;;  %5038 = vst.msk [vmem:[#allocation4 + $0x118] sm:$0xff] %vm409_vm3, %v10896_v2  ;;  %v10899_v26 = vld [vmem:[%s13892_s4 + $0xf0] sm:$0xff]   ;;  %v5080_v4 = vld [vmem:[#allocation3 + $0x84] sm:$0xf] }
 0x295   : > { %v5324_v43 = vsel %vm11028_vm2, %v5319_v38, %v5323_v13  ;;  %v9857_v14 = vcombine.low %v12858_v12, %v6683_v17  ;;  %v12874_v55 = vrot.slane %v7162_v60, 5  ;;  %v7166_v7 = vshrl.u32 %v7042_v52, 16  ;;  %v10897_v13 = vld [vmem:[%s13892_s4 + $0xe8] sm:$0xff]   ;;  %v7046_v33 = vld [vmem:[#allocation3 + $0x50] sm:$0x1] }
 0x296   : > { %7516 = vrot.lane.b32.xlu0 %v9889_v22, %s10941_s18  ;;  %v5334_v40 = vsel %vm11028_vm2, %v5329_v29, %v5333_v46  ;;  %v7172_v31 = vshll.u32 %v7043_v57, 16  ;;  %v5336_v59 = vshrl.u32 %v5077_v27, 16  ;;  %v7159_v16 = vor.u32 %v7158_v34, %v7155_v56  ;;  %10548 = vmatprep.subr.bf16.mxu0 %v10897_v13  ;;  %v5081_v22 = vld [vmem:[#allocation3 + $0x88] sm:$0xf]  ;;  %v5082_v45 = vld [vmem:[#allocation3 + $0x8c] sm:$0x1] }
 0x297   : > { %v9768_v3 = vcombine.low %v5324_v43, %v5334_v40  ;;  %v5339_v62 = vshll.u32 %v5077_v27, 16  ;;  %v5345_v19 = vshll.u32 %v5078_v35, 16  ;;  %v7168_v39 = vrot.slane %v7166_v7, 4  ;;  %10549 = vmatpush3.bf16.msra.mxu0 %v10898_v6  ;;  %v10866_v61 = vld [vmem:[#allocation3 + $0x90] sm:$0xff]  }
 0x298   : > { %v7174_v25 = vrot.slane %v7172_v31, 5  ;;  %v5338_v11 = vrot.slane %v5336_v59, 4  ;;  %v5349_v24 = vshrl.u32 %v5078_v35, 16  ;;  %v7160_v30 = vrot.slane %v7159_v16, 4  ;;  %10550 = vmatprep.subr.bf16.mxu0 %v10899_v26  ;;  %v6581_v59 = vld [vmem:[#allocation3 + $0x44] sm:$0x1] }
 0x299   : > { %5545 = vrot.lane.b32.xlu1 %v9768_v3, %s10941_s18  ;;  %v5341_v58 = vrot.slane %v5339_v62, 5  ;;  %v5347_v50 = vrot.slane %v5345_v19, 5  ;;  %v5355_v23 = vshll.u32 %v5079_v48, 16  ;;  %v7169_v10 = vor.u32 %v7168_v39, %v12874_v55  ;;  %v6579_v48 = vld [vmem:[#allocation3 + $0x3c] sm:$0xe]  ;;  %v10903_v62 = vld [vmem:[#allocation3 + $0x60] sm:$0xff]  }
 0x29a   : > { %6011 = vrot.lane.b32.xlu0 %v10863_v1, %s10941_s18  ;;  %v5351_v15 = vrot.slane %v5349_v24, 4  ;;  %v9842_v0 = vrot.slane %v6576_v21, 9  ;;  %v6686_v5 = vrot.slane %v6577_v63, 5  ;;  %v7165_v49 = vsel %vm11028_vm2, %v7160_v30, %v12874_v55  ;;  %v6580_v21 = vld [vmem:[#allocation3 + $0x40] sm:$0xf]  ;;  %v10901_v63 = vld [vmem:[#allocation3 + $0x24] sm:$0xff]  }
 0x29b   : > { %v5342_v41 = vor.u32 %v5341_v58, %v5338_v11  ;;  %v5357_v52 = vrot.slane %v5355_v23, 5  ;;  %v6689_v28 = vrot.slane %v6578_v9, 5  ;;  %v7170_v46 = vrot.slane %v7169_v10, 4  ;;  %10551 = vmatpush3.bf16.msra.mxu0 %v10900_v53  ;;  %7017 = vst.msk [vmem:[#allocation4 + $0x40] sm:$0xff] %vm409_vm3, %v10901_v63  ;;  %v10904_v19 = vld [vmem:[%s13892_s4 + $0xf8] sm:$0xff]   ;;  %5039 = vst.msk [vmem:[#allocation4 + $0x140] sm:$0xff] %vm409_vm3, %v10903_v62 }
 0x29c   : > { %v5352_v20 = vor.u32 %v5351_v15, %v5347_v50  ;;  %v12904_v18 = vsel %vm11243_vm6, %v9842_v0, %v6686_v5  ;;  %v6688_v42 = vrot.slane %v6686_v5, 4  ;;  %v7177_v57 = vshrl.u32 %v7044_v8, 16  ;;  %v7047_v58 = vld [vmem:[#allocation3 + $0x54] sm:$0xf]  ;;  %10552 = vmatprep.subr.bf16.mxu0 %v10904_v19  ;;  %v7048_v0 = vld [vmem:[#allocation3 + $0x58] sm:$0xf] }
 0x29d   : > { %6827 = vrot.lane.b32.xlu1 %v9857_v14, %s10941_s18  ;;  %v5343_v12 = vrot.slane %v5342_v41, 4  ;;  %v7180_v54 = vshll.u32 %v7044_v8, 16  ;;  %v7186_v51 = vshll.u32 %v7045_v44, 16  ;;  %v7175_v38 = vsel %vm11028_vm2, %v7170_v46, %v7174_v25  ;;  %v10905_v5 = vld [vmem:[%s13892_s4 + $0xb8] sm:$0xff]   ;;  %v10906_v6 = vld [vmem:[#allocation3 + $0x30] sm:$0xff]  }
 0x29e   : > { %v5353_v36 = vrot.slane %v5352_v20, 4  ;;  %v6690_v60 = vsel %vm11243_vm6, %v6688_v42, %v6689_v28  ;;  %v7190_v27 = vshrl.u32 %v7045_v44, 16  ;;  %v9890_v29 = vcombine.low %v7165_v49, %v7175_v38  ;;  %v7049_v28 = vld [vmem:[#allocation3 + $0x5c] sm:$0x1]  ;;  %v5083_v42 = vld [vmem:[#allocation3 + $0x90] sm:$0xf] }
 0x29f   : > { %v5348_v17 = vsel %vm11028_vm2, %v5343_v12, %v5347_v50  ;;  %v9858_v56 = vcombine.low %v12904_v18, %v6690_v60  ;;  %v7179_v35 = vrot.slane %v7177_v57, 4  ;;  %v7182_v14 = vrot.slane %v7180_v54, 5  ;;  %v5084_v12 = vld [vmem:[#allocation3 + $0x94] sm:$0xf]  ;;  %10553 = vmatpush3.bf16.msra.mxu0 %v10905_v5  ;;  %v5085_v38 = vld [vmem:[#allocation3 + $0x98] sm:$0x1] }
 0x2a0   : > { %v5358_v43 = vsel %vm11028_vm2, %v5353_v36, %v5357_v52  ;;  %v7188_v34 = vrot.slane %v7186_v51, 5  ;;  %v7192_v55 = vrot.slane %v7190_v27, 4  ;;  %7518 = vrot.lane.b32.xlu0 %v9890_v29, %s10941_s18  ;;  %v7196_v1 = vshll.u32 %v7046_v33, 16  ;;  %v6582_v36 = vld [vmem:[#allocation3 + $0x48] sm:$0xe]  ;;  %7018 = vst.msk [vmem:[#allocation4 + $0x68] sm:$0xff] %vm409_vm3, %v10906_v6 }
 0x2a1   : > { %v9769_v40 = vcombine.low %v5348_v17, %v5358_v43  ;;  %v5360_v7 = vshrl.u32 %v5080_v4, 16  ;;  %v5363_v31 = vshll.u32 %v5080_v4, 16  ;;  %v7183_v9 = vor.u32 %v7182_v14, %v7179_v35  ;;  %v10867_v27 = vld [vmem:[#allocation3 + $0x9c] sm:$0xff]   ;;  %v6583_v53 = vld [vmem:[#allocation3 + $0x4c] sm:$0xf] }
 0x2a2   : > { %v7193_v47 = vor.u32 %v7192_v55, %v7188_v34  ;;  %v5369_v3 = vshll.u32 %v5081_v22, 16  ;;  %v5373_v16 = vshrl.u32 %v5081_v22, 16  ;;  %v7198_v2 = vrot.slane %v7196_v1, 5  ;;  %v10909_v62 = vld [vmem:[#allocation3 + $0x78] sm:$0xff]  }
 0x2a3   : > { %5547 = vrot.lane.b32.xlu1 %v9769_v40, %s10941_s18  ;;  %v5362_v39 = vrot.slane %v5360_v7, 4  ;;  %v5365_v25 = vrot.slane %v5363_v31, 5  ;;  %v5379_v11 = vshll.u32 %v5082_v45, 16  ;;  %v7184_v24 = vrot.slane %v7183_v9, 4  ;;  %v6584_v7 = vld [vmem:[#allocation3 + $0x50] sm:$0x1] }
 0x2a4   : > { %v7194_v8 = vrot.slane %v7193_v47, 4  ;;  %v5371_v44 = vrot.slane %v5369_v3, 5  ;;  %v5375_v30 = vrot.slane %v5373_v16, 4  ;;  %6013 = vrot.lane.b32.xlu0 %v10866_v61, %s10941_s18  ;;  %v9843_v10 = vrot.slane %v6579_v48, 9  ;;  %v10907_v48 = vld [vmem:[#allocation3 + $0x6c] sm:$0xff]   ;;  %v10908_v31 = vld [vmem:[#allocation3 + $0x3c] sm:$0xff]  }
 0x2a5   : > { %v5366_v50 = vor.u32 %v5365_v25, %v5362_v39  ;;  %v5381_v23 = vrot.slane %v5379_v11, 5  ;;  %v6693_v15 = vrot.slane %v6580_v21, 5  ;;  %v7189_v13 = vsel %vm11028_vm2, %v7184_v24, %v7188_v34  ;;  %v7050_v16 = vld [vmem:[#allocation3 + $0x60] sm:$0xf]  ;;  %5040 = vst.msk [vmem:[#allocation4 + $0x168] sm:$0xff] %vm409_vm3, %v10907_v48  ;;  %7019 = vst.msk [vmem:[#allocation4 + $0x90] sm:$0xff] %vm409_vm3, %v10908_v31 }
 0x2a6   : > { %v7199_v49 = vsel %vm11028_vm2, %v7194_v8, %v7198_v2  ;;  %v5376_v41 = vor.u32 %v5375_v30, %v5371_v44  ;;  %v6696_v52 = vrot.slane %v6581_v59, 5  ;;  %v7201_v57 = vshrl.u32 %v7047_v58, 16  ;;  %5041 = vst.msk [vmem:[#allocation4 + $0x190] sm:$0xff] %vm409_vm3, %v10909_v62  ;;  %v6587_v48 = vld [vmem:[#allocation3 + $0x5c] sm:$0x1] }
 0x2a7   : > { %6829 = vrot.lane.b32.xlu1 %v9858_v56, %s10941_s18  ;;  %v9891_v26 = vcombine.low %v7189_v13, %v7199_v49  ;;  %v5367_v46 = vrot.slane %v5366_v50, 4  ;;  %v6694_v20 = vsel %vm11243_vm6, %v9843_v10, %v6693_v15  ;;  %v6695_v18 = vrot.slane %v6693_v15, 4  ;;  %v5086_v15 = vld [vmem:[#allocation3 + $0x9c] sm:$0xf] }
 0x2a8   : > { %v5377_v33 = vrot.slane %v5376_v41, 4  ;;  %v7204_v54 = vshll.u32 %v7047_v58, 16  ;;  %v7210_v51 = vshll.u32 %v7048_v0, 16  ;;  %v7214_v22 = vshrl.u32 %v7048_v0, 16  ;;  %v10910_v41 = vld [vmem:[#allocation3 + $0x48] sm:$0xff]  }
 0x2a9   : > { %7520 = vrot.lane.b32.xlu0 %v9891_v26, %s10941_s18  ;;  %v5372_v60 = vsel %vm11028_vm2, %v5367_v46, %v5371_v44  ;;  %v6697_v4 = vsel %vm11243_vm6, %v6695_v18, %v6696_v52  ;;  %v7220_v29 = vshll.u32 %v7049_v28, 16  ;;  %v7203_v35 = vrot.slane %v7201_v57, 4  ;;  %v7051_v44 = vld [vmem:[#allocation3 + $0x64] sm:$0xf]  ;;  %7020 = vst.msk [vmem:[#allocation4 + $0xb8] sm:$0xff] %vm409_vm3, %v10910_v41 }
 0x2aa   : > { %v5382_v17 = vsel %vm11028_vm2, %v5377_v33, %v5381_v23  ;;  %v9859_v56 = vcombine.low %v6694_v20, %v6697_v4  ;;  %v7206_v45 = vrot.slane %v7204_v54, 5  ;;  %v7212_v14 = vrot.slane %v7210_v51, 5  ;;  %v7052_v23 = vld [vmem:[#allocation3 + $0x68] sm:$0x1]  ;;  %v6585_v33 = vld [vmem:[#allocation3 + $0x54] sm:$0xe] }
 0x2ab   : > { %v9770_v43 = vcombine.low %v5372_v60, %v5382_v17  ;;  %v7216_v34 = vrot.slane %v7214_v22, 4  ;;  %v7222_v55 = vrot.slane %v7220_v29, 5  ;;  %v5384_v63 = vshrl.u32 %v5083_v42, 16  ;;  %v10911_v46 = vld [vmem:[#allocation3 + $0x84] sm:$0xff]   ;;  %v10912_v54 = vld [vmem:[#allocation3 + $0x54] sm:$0xff]  }
 0x2ac   : > { %v7207_v21 = vor.u32 %v7206_v45, %v7203_v35  ;;  %v5387_v40 = vshll.u32 %v5083_v42, 16  ;;  %v5393_v1 = vshll.u32 %v5084_v12, 16  ;;  %v5397_v9 = vshrl.u32 %v5084_v12, 16  ;;  %v6586_v4 = vld [vmem:[#allocation3 + $0x58] sm:$0xf]  ;;  %5042 = vst.msk [vmem:[#allocation4 + $0x1b8] sm:$0xff] %vm409_vm3, %v10911_v46 }
 0x2ad   : > { %5549 = vrot.lane.b32.xlu1 %v9770_v43, %s10941_s18  ;;  %6015 = vrot.lane.b32.xlu0 %v10867_v27, %s10941_s18  ;;  %v7217_v59 = vor.u32 %v7216_v34, %v7212_v14  ;;  %v5403_v47 = vshll.u32 %v5085_v38, 16  ;;  %v9844_v3 = vrot.slane %v6582_v36, 9  ;;  %v5386_v61 = vrot.slane %v5384_v63, 4  ;;  %v5087_v27 = vld [vmem:[#allocation3 + $0xa0] sm:$0xf]  ;;  %7021 = vst.msk [vmem:[#allocation4 + $0xe0] sm:$0xff] %vm409_vm3, %v10912_v54 }
 0x2ae   : > { %v7208_v19 = vrot.slane %v7207_v21, 4  ;;  %v5389_v2 = vrot.slane %v5387_v40, 5  ;;  %v5395_v39 = vrot.slane %v5393_v1, 5  ;;  %v5399_v11 = vrot.slane %v5397_v9, 4  ;;  %v10915_v45 = vld [vmem:[#allocation3 + $0x60] sm:$0xff]   ;;  %v10870_v43 = vld [vmem:[#allocation3 + $0xa8] sm:$0xff]  }
 0x2af   : > { %v7218_v25 = vrot.slane %v7217_v59, 4  ;;  %v5405_v24 = vrot.slane %v5403_v47, 5  ;;  %v6700_v8 = vrot.slane %v6583_v53, 5  ;;  %v6703_v50 = vrot.slane %v6584_v7, 5  ;;  %v7053_v7 = vld [vmem:[#allocation3 + $0x6c] sm:$0xf] }
 0x2b0   : > { %v7213_v30 = vsel %vm11028_vm2, %v7208_v19, %v7212_v14  ;;  %v5390_v58 = vor.u32 %v5389_v2, %v5386_v61  ;;  %v7225_v10 = vshrl.u32 %v7050_v16, 16  ;;  %v5400_v5 = vor.u32 %v5399_v11, %v5395_v39  ;;  %7022 = vst.msk [vmem:[#allocation4 + $0x108] sm:$0xff] %vm409_vm3, %v10915_v45 }
 0x2b1   : > { %6831 = vrot.lane.b32.xlu1 %v9859_v56, %s10941_s18  ;;  %v7223_v0 = vsel %vm11028_vm2, %v7218_v25, %v7222_v55  ;;  %v12957_v13 = vsel %vm11243_vm6, %v9844_v3, %v6700_v8  ;;  %v6702_v49 = vrot.slane %v6700_v8, 4  ;;  %v7228_v26 = vshll.u32 %v7050_v16, 16  ;;  %v5530_v57 = vpop.permute.xlu1 %5529  ;;  %v5088_v56 = vld [vmem:[#allocation3 + $0xa4] sm:$0x1]  ;;  %v7054_v3 = vld [vmem:[#allocation3 + $0x70] sm:$0xf] }
 0x2b2   : > { %v9892_v52 = vcombine.low %v7213_v30, %v7223_v0  ;;  %v5391_v28 = vrot.slane %v5390_v58, 4  ;;  %v7227_v6 = vrot.slane %v7225_v10, 4  ;;  %v5401_v20 = vrot.slane %v5400_v5, 4  ;;  %5576 = vst.msk [vmem:[#allocation4 + $0x28] sm:$0xff] %vm957_vm7, %v5530_v57  ;;  %v7055_v58 = vld [vmem:[#allocation3 + $0x74] sm:$0x1] }
 0x2b3   : > { %v6704_v18 = vsel %vm11243_vm6, %v6702_v49, %v6703_v50  ;;  %v7234_v42 = vshll.u32 %v7051_v44, 16  ;;  %v7238_v12 = vshrl.u32 %v7051_v44, 16  ;;  %v7230_v36 = vrot.slane %v7228_v26, 5  ;;  %v5089_v0 = vld [vmem:[#allocation3 + $0xa8] sm:$0xf]  ;;  %v10871_v26 = vld [vmem:[#allocation3 + $0xb4] sm:$0xff]  }
 0x2b4   : > { %7522 = vrot.lane.b32.xlu0 %v9892_v52, %s10941_s18  ;;  %v5396_v51 = vsel %vm11028_vm2, %v5391_v28, %v5395_v39  ;;  %v9860_v38 = vcombine.low %v12957_v13, %v6704_v18  ;;  %v7244_v60 = vshll.u32 %v7052_v23, 16  ;;  %v5406_v22 = vsel %vm11028_vm2, %v5401_v20, %v5405_v24  ;;  %v5090_v52 = vld [vmem:[#allocation3 + $0xac] sm:$0xf]  ;;  %v10914_v28 = vld [vmem:[#allocation3 + $0x90] sm:$0xff]  }
 0x2b5   : > { %v7236_v29 = vrot.slane %v7234_v42, 5  ;;  %v7240_v17 = vrot.slane %v7238_v12, 4  ;;  %v5408_v35 = vshrl.u32 %v5086_v15, 16  ;;  %v9771_v53 = vcombine.low %v5396_v51, %v5406_v22  ;;  %v5091_v42 = vld [vmem:[#allocation3 + $0xb0] sm:$0x1]  ;;  %5043 = vst.msk [vmem:[#allocation4 + $0x1e0] sm:$0xff] %vm409_vm3, %v10914_v28 }
 0x2b6   : > { %v7231_v14 = vor.u32 %v7230_v36, %v7227_v6  ;;  %v7246_v34 = vrot.slane %v7244_v60, 5  ;;  %v5411_v55 = vshll.u32 %v5086_v15, 16  ;;  %v5417_v40 = vshll.u32 %v5087_v27, 16  ;;  %v6588_v12 = vld [vmem:[#allocation3 + $0x60] sm:$0xe]  ;;  %v10917_v36 = vld [vmem:[#allocation3 + $0x6c] sm:$0xff]  }
 0x2b7   : > { %v7241_v21 = vor.u32 %v7240_v17, %v7236_v29  ;;  %v5410_v63 = vrot.slane %v5408_v35, 4  ;;  %v5421_v1 = vshrl.u32 %v5087_v27, 16  ;;  %5551 = vrot.lane.b32.xlu1 %v9771_v53, %s10941_s18  ;;  %v5427_v9 = vshll.u32 %v5088_v56, 16  ;;  %7023 = vst.msk [vmem:[#allocation4 + $0x130] sm:$0xff] %vm409_vm3, %v10917_v36 }
 0x2b8   : > { %6017 = vrot.lane.b32.xlu0 %v10870_v43, %s10941_s18  ;;  %v7232_v31 = vrot.slane %v7231_v14, 4  ;;  %v5413_v59 = vrot.slane %v5411_v55, 5  ;;  %v9845_v47 = vrot.slane %v6585_v33, 9  ;;  %v5419_v62 = vrot.slane %v5417_v40, 5  ;;  %v10916_v43 = vld [vmem:[#allocation3 + $0x9c] sm:$0xff]  }
 0x2b9   : > { %v7242_v16 = vrot.slane %v7241_v21, 4  ;;  %v5423_v19 = vrot.slane %v5421_v1, 4  ;;  %v6707_v61 = vrot.slane %v6586_v4, 5  ;;  %v5429_v25 = vrot.slane %v5427_v9, 5  ;;  %v7056_v21 = vld [vmem:[#allocation3 + $0x78] sm:$0xf] }
 0x2ba   : > { %v7237_v2 = vsel %vm11028_vm2, %v7232_v31, %v7236_v29  ;;  %v5414_v39 = vor.u32 %v5413_v59, %v5410_v63  ;;  %v6710_v11 = vrot.slane %v6587_v48, 5  ;;  %v7249_v10 = vshrl.u32 %v7053_v7, 16  ;;  %v6590_v29 = vld [vmem:[#allocation3 + $0x68] sm:$0x1]  ;;  %5044 = vst.msk [vmem:[#allocation4 + $0x208] sm:$0xff] %vm409_vm3, %v10916_v43 }
 0x2bb   : > { %v7247_v24 = vsel %vm11028_vm2, %v7242_v16, %v7246_v34  ;;  %v5424_v8 = vor.u32 %v5423_v19, %v5419_v62  ;;  %v12980_v44 = vsel %vm11243_vm6, %v9845_v47, %v6707_v61  ;;  %v6709_v30 = vrot.slane %v6707_v61, 4  ;;  %6833 = vrot.lane.b32.xlu1 %v9860_v38, %s10941_s18  ;;  %v6589_v38 = vld [vmem:[#allocation3 + $0x64] sm:$0xf]  ;;  %v7058_v61 = vld [vmem:[#allocation3 + $0x80] sm:$0x1] }
 0x2bc   : > { %v9893_v50 = vcombine.low %v7237_v2, %v7247_v24  ;;  %v5415_v23 = vrot.slane %v5414_v39, 4  ;;  %v7252_v15 = vshll.u32 %v7053_v7, 16  ;;  %v7258_v49 = vshll.u32 %v7054_v3, 16  ;;  %v5092_v39 = vld [vmem:[#allocation3 + $0xb4] sm:$0xf] }
 0x2bd   : > { %v5425_v5 = vrot.slane %v5424_v8, 4  ;;  %v6711_v13 = vsel %vm11243_vm6, %v6709_v30, %v6710_v11  ;;  %v7262_v41 = vshrl.u32 %v7054_v3, 16  ;;  %v7251_v20 = vrot.slane %v7249_v10, 4  ;;  %v7057_v3 = vld [vmem:[#allocation3 + $0x7c] sm:$0xf] }
 0x2be   : > { %7524 = vrot.lane.b32.xlu0 %v9893_v50, %s10941_s18  ;;  %v5420_v6 = vsel %vm11028_vm2, %v5415_v23, %v5419_v62  ;;  %v9861_v46 = vcombine.low %v12980_v44, %v6711_v13  ;;  %v7254_v18 = vrot.slane %v7252_v15, 5  ;;  %v7260_v57 = vrot.slane %v7258_v49, 5  ;;  %v7059_v10 = vld [vmem:[#allocation3 + $0x84] sm:$0xf]  ;;  %v5093_v49 = vld [vmem:[#allocation3 + $0xb8] sm:$0xf] }
 0x2bf   : > { %v5430_v33 = vsel %vm11028_vm2, %v5425_v5, %v5429_v25  ;;  %v7264_v54 = vrot.slane %v7262_v41, 4  ;;  %v7268_v51 = vshll.u32 %v7055_v58, 16  ;;  %v5432_v4 = vshrl.u32 %v5089_v0, 16  ;;  %v5532_v53 = vpop.permute.xlu1 %5531  ;;  %v13001_v25 = vpop.permute.xlu0 %5991 }
 0x2c0   : > { %v9772_v60 = vcombine.low %v5420_v6, %v5430_v33  ;;  %v7255_v27 = vor.u32 %v7254_v18, %v7251_v20  ;;  %v5435_v22 = vshll.u32 %v5089_v0, 16  ;;  %v5441_v35 = vshll.u32 %v5090_v52, 16  ;;  %5577 = vst.msk [vmem:[#allocation4 + $0x50] sm:$0xff] %vm957_vm7, %v5532_v53  ;;  %v10874_v18 = vld [vmem:[#allocation3 + $0xc0] sm:$0xff]  }
 0x2c1   : > { %v7265_v17 = vor.u32 %v7264_v54, %v7260_v57  ;;  %v7270_v56 = vrot.slane %v7268_v51, 5  ;;  %v5445_v45 = vshrl.u32 %v5090_v52, 16  ;;  %v5434_v34 = vrot.slane %v5432_v4, 4  ;;  %v10919_v54 = vld [vmem:[#allocation3 + $0x78] sm:$0xff]   ;;  %v10921_v4 = vld [vmem:[#allocation3 + $0x84] sm:$0xff]  }
 0x2c2   : > { %5553 = vrot.lane.b32.xlu1 %v9772_v60, %s10941_s18  ;;  %6019 = vrot.lane.b32.xlu0 %v10871_v26, %s10941_s18  ;;  %v7256_v14 = vrot.slane %v7255_v27, 4  ;;  %v5437_v55 = vrot.slane %v5435_v22, 5  ;;  %v5451_v48 = vshll.u32 %v5091_v42, 16  ;;  %v5443_v40 = vrot.slane %v5441_v35, 5  ;;  %v5094_v26 = vld [vmem:[#allocation3 + $0xbc] sm:$0x1] }
 0x2c3   : > { %v7266_v63 = vrot.slane %v7265_v17, 4  ;;  %v5447_v1 = vrot.slane %v5445_v45, 4  ;;  %v9846_v7 = vrot.slane %v6588_v12, 9  ;;  %v6714_v47 = vrot.slane %v6589_v38, 5  ;;  %v13013_v27 = vpop.permute.xlu0 %5993  ;;  %7024 = vst.msk [vmem:[#allocation4 + $0x158] sm:$0xff] %vm409_vm3, %v10919_v54  ;;  %v10922_v45 = vld [vmem:[#allocation3 + $0x90] sm:$0xff]  }
 0x2c4   : > { %v7261_v31 = vsel %vm11028_vm2, %v7256_v14, %v7260_v57  ;;  %v5438_v59 = vor.u32 %v5437_v55, %v5434_v34  ;;  %v5453_v9 = vrot.slane %v5451_v48, 5  ;;  %v6717_v19 = vrot.slane %v6590_v29, 5  ;;  %v7061_v55 = vld [vmem:[#allocation3 + $0x8c] sm:$0x1]  ;;  %v6591_v48 = vld [vmem:[#allocation3 + $0x6c] sm:$0xe] }
 0x2c5   : > { %v7271_v16 = vsel %vm11028_vm2, %v7266_v63, %v7270_v56  ;;  %v5448_v62 = vor.u32 %v5447_v1, %v5443_v40  ;;  %v7273_v2 = vshrl.u32 %v7056_v21, 16  ;;  %v6715_v8 = vsel %vm11243_vm6, %v9846_v7, %v6714_v47  ;;  %v7060_v56 = vld [vmem:[#allocation3 + $0x88] sm:$0xf]  ;;  %7025 = vst.msk [vmem:[#allocation4 + $0x180] sm:$0xff] %vm409_vm3, %v10921_v4  ;;  %v6592_v7 = vld [vmem:[#allocation3 + $0x70] sm:$0xf] }
 0x2c6   : > { %6835 = vrot.lane.b32.xlu1 %v9861_v46, %s10941_s18  ;;  %v9894_v11 = vcombine.low %v7261_v31, %v7271_v16  ;;  %v5439_v24 = vrot.slane %v5438_v59, 4  ;;  %v6716_v44 = vrot.slane %v6714_v47, 4  ;;  %v7276_v50 = vshll.u32 %v7056_v21, 16  ;;  %v10918_v46 = vld [vmem:[#allocation3 + $0xa8] sm:$0xff]   ;;  %v6593_v31 = vld [vmem:[#allocation3 + $0x74] sm:$0x1] }
 0x2c7   : > { %v5449_v30 = vrot.slane %v5448_v62, 4  ;;  %v7275_v58 = vrot.slane %v7273_v2, 4  ;;  %v7282_v23 = vshll.u32 %v7057_v3, 16  ;;  %v7286_v5 = vshrl.u32 %v7057_v3, 16  ;;  %5045 = vst.msk [vmem:[#allocation4 + $0x230] sm:$0xff] %vm409_vm3, %v10918_v46  ;;  %7026 = vst.msk [vmem:[#allocation4 + $0x1a8] sm:$0xff] %vm409_vm3, %v10922_v45 }
 0x2c8   : > { %7526 = vrot.lane.b32.xlu0 %v9894_v11, %s10941_s18  ;;  %v5444_v15 = vsel %vm11028_vm2, %v5439_v24, %v5443_v40  ;;  %v6718_v0 = vsel %vm11243_vm6, %v6716_v44, %v6717_v19  ;;  %v7292_v13 = vshll.u32 %v7058_v61, 16  ;;  %v7278_v28 = vrot.slane %v7276_v50, 5  ;;  %v10924_v16 = vld [vmem:[#allocation3 + $0x9c] sm:$0xff]   ;;  %v10925_v50 = vld [vmem:[#allocation3 + $0xa8] sm:$0xff]  }
 0x2c9   : > { %v5454_v41 = vsel %vm11028_vm2, %v5449_v30, %v5453_v9  ;;  %v9862_v52 = vcombine.low %v6715_v8, %v6718_v0  ;;  %v7284_v6 = vrot.slane %v7282_v23, 5  ;;  %v7288_v42 = vrot.slane %v7286_v5, 4  ;;  %v5534_v57 = vpop.permute.xlu1 %5533  ;;  %v7062_v30 = vld [vmem:[#allocation3 + $0x90] sm:$0xf]  ;;  %7027 = vst.msk [vmem:[#allocation4 + $0x1d0] sm:$0xff] %vm409_vm3, %v10924_v16  ;;  %7028 = vst.msk [vmem:[#allocation4 + $0x1f8] sm:$0xff] %vm409_vm3, %v10925_v50 }
 0x2ca   : > { %v9773_v20 = vcombine.low %v5444_v15, %v5454_v41  ;;  %v7294_v12 = vrot.slane %v7292_v13, 5  ;;  %v5456_v33 = vshrl.u32 %v5092_v39, 16  ;;  %v7279_v51 = vor.u32 %v7278_v28, %v7275_v58  ;;  %5578 = vst.msk [vmem:[#allocation4 + $0x78] sm:$0xff] %vm957_vm7, %v5534_v57  ;;  %v13027_v58 = vpop.permute.xlu0 %5995  ;;  %v7063_v5 = vld [vmem:[#allocation3 + $0x94] sm:$0xf] }
 0x2cb   : > { %v5459_v38 = vshll.u32 %v5092_v39, 16  ;;  %v5465_v36 = vshll.u32 %v5093_v49, 16  ;;  %v5469_v60 = vshrl.u32 %v5093_v49, 16  ;;  %v7289_v22 = vor.u32 %v7288_v42, %v7284_v6  ;;  %v10920_v39 = vld [vmem:[#allocation3 + $0xb4] sm:$0xff]   ;;  %v6595_v42 = vld [vmem:[#allocation3 + $0x7c] sm:$0xf] }
 0x2cc   : > { %5555 = vrot.lane.b32.xlu1 %v9773_v20, %s10941_s18  ;;  %6021 = vrot.lane.b32.xlu0 %v10874_v18, %s10941_s18  ;;  %v5458_v29 = vrot.slane %v5456_v33, 4  ;;  %v5475_v17 = vshll.u32 %v5094_v26, 16  ;;  %v7297_v35 = vshrl.u32 %v7059_v10, 16  ;;  %v7280_v53 = vrot.slane %v7279_v51, 4  ;;  %5046 = vst.msk [vmem:[#allocation4 + $0x258] sm:$0xff] %vm409_vm3, %v10920_v39 }
 0x2cd   : > { %v5461_v43 = vrot.slane %v5459_v38, 5  ;;  %v5467_v14 = vrot.slane %v5465_v36, 5  ;;  %v5471_v34 = vrot.slane %v5469_v60, 4  ;;  %v7290_v21 = vrot.slane %v7289_v22, 4  ;;  %v6594_v28 = vld [vmem:[#allocation3 + $0x78] sm:$0xe] }
 0x2ce   : > { %v5477_v63 = vrot.slane %v5475_v17, 5  ;;  %v7299_v40 = vrot.slane %v7297_v35, 4  ;;  %v7300_v1 = vshll.u32 %v7059_v10, 16  ;;  %v7285_v59 = vsel %vm11028_vm2, %v7280_v53, %v7284_v6  ;;  %v7064_v20 = vld [vmem:[#allocation3 + $0x98] sm:$0x1] }
 0x2cf   : > { %v5462_v9 = vor.u32 %v5461_v43, %v5458_v29  ;;  %v5472_v47 = vor.u32 %v5471_v34, %v5467_v14  ;;  %v7306_v3 = vshll.u32 %v7060_v56, 16  ;;  %v7295_v62 = vsel %vm11028_vm2, %v7290_v21, %v7294_v12  ;;  %v6596_v51 = vld [vmem:[#allocation3 + $0x80] sm:$0x1]  ;;  %v7065_v38 = vld [vmem:[#allocation3 + $0x9c] sm:$0xf]  ;;  %v13045_v43 = vpop.permute.xlu0 %5997 }
 0x2d0   : > { %6837 = vrot.lane.b32.xlu1 %v9862_v52, %s10941_s18  ;;  %v7302_v19 = vrot.slane %v7300_v1, 5  ;;  %v7310_v61 = vshrl.u32 %v7060_v56, 16  ;;  %v7316_v2 = vshll.u32 %v7061_v55, 16  ;;  %v9895_v11 = vcombine.low %v7285_v59, %v7295_v62  ;;  %v7066_v17 = vld [vmem:[#allocation3 + $0xa0] sm:$0xf] }
 0x2d1   : > { %v5463_v24 = vrot.slane %v5462_v9, 4  ;;  %v5473_v8 = vrot.slane %v5472_v47, 4  ;;  %v7308_v44 = vrot.slane %v7306_v3, 5  ;;  %v9847_v0 = vrot.slane %v6591_v48, 9  ;;  %v7067_v9 = vld [vmem:[#allocation3 + $0xa4] sm:$0x1] }
 0x2d2   : > { %v7303_v23 = vor.u32 %v7302_v19, %v7299_v40  ;;  %v7312_v10 = vrot.slane %v7310_v61, 4  ;;  %v7318_v15 = vrot.slane %v7316_v2, 5  ;;  %7528 = vrot.lane.b32.xlu0 %v9895_v11, %s10941_s18  ;;  %v6721_v41 = vrot.slane %v6592_v7, 5  ;;  %v6597_v16 = vld [vmem:[#allocation3 + $0x84] sm:$0xe] }
 0x2d3   : > { %v5468_v13 = vsel %vm11028_vm2, %v5463_v24, %v5467_v14  ;;  %v5478_v49 = vsel %vm11028_vm2, %v5473_v8, %v5477_v63  ;;  %v6724_v52 = vrot.slane %v6593_v31, 5  ;;  %v7321_v18 = vshrl.u32 %v7062_v30, 16  ;;  %v10926_v14 = vld [vmem:[#allocation3 + $0xb4] sm:$0xff]   ;;  %v6598_v62 = vld [vmem:[#allocation3 + $0x88] sm:$0xf]  ;;  %v10927_v24 = vld [vmem:[#allocation3 + $0xc0] sm:$0xff]  }
 0x2d4   : > { %v9774_v6 = vcombine.low %v5468_v13, %v5478_v49  ;;  %v7304_v26 = vrot.slane %v7303_v23, 4  ;;  %v7313_v46 = vor.u32 %v7312_v10, %v7308_v44  ;;  %v6722_v12 = vsel %vm11243_vm6, %v9847_v0, %v6721_v41  ;;  %v5536_v36 = vpop.permute.xlu1 %5535  ;;  %7029 = vst.msk [vmem:[#allocation4 + $0x220] sm:$0xff] %vm409_vm3, %v10926_v14  ;;  %v6599_v11 = vld [vmem:[#allocation3 + $0x8c] sm:$0x1]  ;;  %v13058_v13 = vpop.permute.xlu0 %5999  ;;  %7030 = vst.msk [vmem:[#allocation4 + $0x248] sm:$0xff] %vm409_vm3, %v10927_v24 }
 0x2d5   : > { %v6723_v33 = vrot.slane %v6721_v41, 4  ;;  %v7324_v57 = vshll.u32 %v7062_v30, 16  ;;  %v7330_v54 = vshll.u32 %v7063_v5, 16  ;;  %v7323_v22 = vrot.slane %v7321_v18, 4  ;;  %5579 = vst.msk [vmem:[#allocation4 + $0xa0] sm:$0xff] %vm957_vm7, %v5536_v36 }
 0x2d6   : > { %5557 = vrot.lane.b32.xlu1 %v9774_v6, %s10941_s18  ;;  %v7309_v60 = vsel %vm11028_vm2, %v7304_v26, %v7308_v44  ;;  %v7314_v4 = vrot.slane %v7313_v46, 4  ;;  %v7334_v29 = vshrl.u32 %v7063_v5, 16  ;;  %v7340_v53 = vshll.u32 %v7064_v20, 16  ;;  %v7068_v5 = vld [vmem:[#allocation3 + $0xa8] sm:$0xf] }
 0x2d7   : > { %v6725_v56 = vsel %vm11243_vm6, %v6723_v33, %v6724_v52  ;;  %v7326_v35 = vrot.slane %v7324_v57, 5  ;;  %v7332_v45 = vrot.slane %v7330_v54, 5  ;;  %v9848_v21 = vrot.slane %v6594_v28, 9  ;;  %v7069_v6 = vld [vmem:[#allocation3 + $0xac] sm:$0xf] }
 0x2d8   : > { %v7319_v34 = vsel %vm11028_vm2, %v7314_v4, %v7318_v15  ;;  %v9863_v55 = vcombine.low %v6722_v12, %v6725_v56  ;;  %v7336_v48 = vrot.slane %v7334_v29, 4  ;;  %v7342_v1 = vrot.slane %v7340_v53, 5  ;;  %v6600_v12 = vld [vmem:[#allocation3 + $0x90] sm:$0xe]  ;;  %v6602_v29 = vld [vmem:[#allocation3 + $0x98] sm:$0x1] }
 0x2d9   : > { %v9896_v63 = vcombine.low %v7309_v60, %v7319_v34  ;;  %v7327_v40 = vor.u32 %v7326_v35, %v7323_v22  ;;  %v6728_v7 = vrot.slane %v6595_v42, 5  ;;  %v6731_v59 = vrot.slane %v6596_v51, 5  ;;  %v7070_v42 = vld [vmem:[#allocation3 + $0xb0] sm:$0x1]  ;;  %v5591_v14 = vld [vmem:[#allocation3] sm:$0xe] }
 0x2da   : > { %6839 = vrot.lane.b32.xlu1 %v9863_v55, %s10941_s18  ;;  %v7337_v31 = vor.u32 %v7336_v48, %v7332_v45  ;;  %v7345_v47 = vshrl.u32 %v7065_v38, 16  ;;  %v7348_v3 = vshll.u32 %v7065_v38, 16  ;;  %v7354_v39 = vshll.u32 %v7066_v17, 16  ;;  %v6601_v38 = vld [vmem:[#allocation3 + $0x94] sm:$0xf] }
 0x2db   : > { %7530 = vrot.lane.b32.xlu0 %v9896_v63, %s10941_s18  ;;  %v7328_v19 = vrot.slane %v7327_v40, 4  ;;  %v6729_v61 = vsel %vm11243_vm6, %v9848_v21, %v6728_v7  ;;  %v6730_v2 = vrot.slane %v6728_v7, 4  ;;  %v7358_v50 = vshrl.u32 %v7066_v17, 16  ;;  %v5592_v63 = vld [vmem:[#allocation3 + $0x4] sm:$0xf]  ;;  %v13072_v40 = vpop.permute.xlu0 %6001 }
 0x2dc   : > { %v7338_v8 = vrot.slane %v7337_v31, 4  ;;  %v7347_v44 = vrot.slane %v7345_v47, 4  ;;  %v7350_v30 = vrot.slane %v7348_v3, 5  ;;  %v7356_v15 = vrot.slane %v7354_v39, 5  ;;  %v7072_v24 = vld [vmem:[#allocation3 + $0xb8] sm:$0xf] }
 0x2dd   : > { %v7333_v23 = vsel %vm11028_vm2, %v7328_v19, %v7332_v45  ;;  %v6732_v10 = vsel %vm11243_vm6, %v6730_v2, %v6731_v59  ;;  %v7364_v0 = vshll.u32 %v7067_v9, 16  ;;  %v7360_v28 = vrot.slane %v7358_v50, 4  ;;  %v5593_v9 = vld [vmem:[#allocation3 + $0x8] sm:$0x1]  ;;  %v7071_v19 = vld [vmem:[#allocation3 + $0xb4] sm:$0xf] }
 0x2de   : > { %v7343_v49 = vsel %vm11028_vm2, %v7338_v8, %v7342_v1  ;;  %v9864_v41 = vcombine.low %v6729_v61, %v6732_v10  ;;  %v7351_v52 = vor.u32 %v7350_v30, %v7347_v44  ;;  %v9849_v20 = vrot.slane %v6597_v16, 9  ;;  %v6604_v10 = vld [vmem:[#allocation3 + $0xa0] sm:$0xf] }
 0x2df   : > { %v9897_v26 = vcombine.low %v7333_v23, %v7343_v49  ;;  %v7366_v46 = vrot.slane %v7364_v0, 5  ;;  %v6735_v18 = vrot.slane %v6598_v62, 5  ;;  %v7361_v57 = vor.u32 %v7360_v28, %v7356_v15  ;;  %v5538_v17 = vpop.permute.xlu1 %5537  ;;  %v6603_v23 = vld [vmem:[#allocation3 + $0x9c] sm:$0xe] }
 0x2e0   : > { %6841 = vrot.lane.b32.xlu1 %v9864_v41, %s10941_s18  ;;  %v7352_v33 = vrot.slane %v7351_v52, 4  ;;  %v6738_v54 = vrot.slane %v6599_v11, 5  ;;  %v7369_v51 = vshrl.u32 %v7068_v5, 16  ;;  %v7372_v4 = vshll.u32 %v7068_v5, 16  ;;  %5580 = vst.msk [vmem:[#allocation4 + $0xc8] sm:$0xff] %vm957_vm7, %v5538_v17 }
 0x2e1   : > { %7532 = vrot.lane.b32.xlu0 %v9897_v26, %s10941_s18  ;;  %v6736_v36 = vsel %vm11243_vm6, %v9849_v20, %v6735_v18  ;;  %v6737_v60 = vrot.slane %v6735_v18, 4  ;;  %v7378_v22 = vshll.u32 %v7069_v6, 16  ;;  %v7362_v35 = vrot.slane %v7361_v57, 4  ;;  %v5595_v41 = vld [vmem:[#allocation3 + $0x10] sm:$0xf]  ;;  %v13086_v18 = vpop.permute.xlu0 %6003 }
 0x2e2   : > { %v7357_v56 = vsel %vm11028_vm2, %v7352_v33, %v7356_v15  ;;  %v7371_v45 = vrot.slane %v7369_v51, 4  ;;  %v7382_v53 = vshrl.u32 %v7069_v6, 16  ;;  %v7374_v55 = vrot.slane %v7372_v4, 5  ;;  %v5596_v52 = vld [vmem:[#allocation3 + $0x14] sm:$0x1] }
 0x2e3   : > { %v6739_v34 = vsel %vm11243_vm6, %v6737_v60, %v6738_v54  ;;  %v7380_v48 = vrot.slane %v7378_v22, 5  ;;  %v7388_v21 = vshll.u32 %v7070_v42, 16  ;;  %v7367_v1 = vsel %vm11028_vm2, %v7362_v35, %v7366_v46  ;;  %v7073_v26 = vld [vmem:[#allocation3 + $0xbc] sm:$0x1]  ;;  %v6605_v54 = vld [vmem:[#allocation3 + $0xa4] sm:$0x1] }
 0x2e4   : > { %v9865_v7 = vcombine.low %v6736_v36, %v6739_v34  ;;  %v7384_v31 = vrot.slane %v7382_v53, 4  ;;  %v9850_v59 = vrot.slane %v6600_v12, 9  ;;  %v9898_v47 = vcombine.low %v7357_v56, %v7367_v1  ;;  %v5594_v51 = vld [vmem:[#allocation3 + $0xc] sm:$0xe] }
 0x2e5   : > { %v7375_v3 = vor.u32 %v7374_v55, %v7371_v45  ;;  %v7390_v16 = vrot.slane %v7388_v21, 5  ;;  %v6742_v62 = vrot.slane %v6601_v38, 5  ;;  %v6745_v2 = vrot.slane %v6602_v29, 5  ;;  %v7074_v29 = vld [vmem:[#allocation3 + $0xc0] sm:$0xf] }
 0x2e6   : > { %6843 = vrot.lane.b32.xlu1 %v9865_v7, %s10941_s18  ;;  %v7385_v61 = vor.u32 %v7384_v31, %v7380_v48  ;;  %v9775_v39 = vrot.slane %v5591_v14, 9  ;;  %v5689_v11 = vrot.slane %v5592_v63, 5  ;;  %7534 = vrot.lane.b32.xlu0 %v9898_v47, %s10941_s18  ;;  %v5692_v50 = vrot.slane %v5593_v9, 5 }
 0x2e7   : > { %v7376_v8 = vrot.slane %v7375_v3, 4  ;;  %v6743_v44 = vsel %vm11243_vm6, %v9850_v59, %v6742_v62  ;;  %v6744_v30 = vrot.slane %v6742_v62, 4  ;;  %v7393_v49 = vshrl.u32 %v7071_v19, 16  ;;  %v13100_v3 = vpop.permute.xlu0 %6005 }
 0x2e8   : > { %v7386_v15 = vrot.slane %v7385_v61, 4  ;;  %v5690_v0 = vsel %vm11243_vm6, %v9775_v39, %v5689_v11  ;;  %v5691_v5 = vrot.slane %v5689_v11, 4  ;;  %v7396_v46 = vshll.u32 %v7071_v19, 16  ;;  %v7076_v19 = vld [vmem:[#allocation3 + $0xc8] sm:$0x1] }
 0x2e9   : > { %v7381_v28 = vsel %vm11028_vm2, %v7376_v8, %v7380_v48  ;;  %v6746_v6 = vsel %vm11243_vm6, %v6744_v30, %v6745_v2  ;;  %v7402_v20 = vshll.u32 %v7072_v24, 16  ;;  %v7395_v57 = vrot.slane %v7393_v49, 4  ;;  %v5540_v38 = vpop.permute.xlu1 %5539  ;;  %v7075_v48 = vld [vmem:[#allocation3 + $0xc4] sm:$0xf]  ;;  %v5597_v39 = vld [vmem:[#allocation3 + $0x18] sm:$0xe] }
 0x2ea   : > { %v7391_v42 = vsel %vm11028_vm2, %v7386_v15, %v7390_v16  ;;  %v9866_v12 = vcombine.low %v6743_v44, %v6746_v6  ;;  %v5693_v33 = vsel %vm11243_vm6, %v5691_v5, %v5692_v50  ;;  %v7398_v4 = vrot.slane %v7396_v46, 5  ;;  %5581 = vst.msk [vmem:[#allocation4 + $0xf0] sm:$0xff] %vm957_vm7, %v5540_v38  ;;  %v6607_v30 = vld [vmem:[#allocation3 + $0xac] sm:$0xf]  ;;  %v6608_v50 = vld [vmem:[#allocation3 + $0xb0] sm:$0x1] }
 0x2eb   : > { %v9899_v36 = vcombine.low %v7381_v28, %v7391_v42  ;;  %v9791_v60 = vcombine.low %v5690_v0, %v5693_v33  ;;  %v7404_v22 = vrot.slane %v7402_v20, 5  ;;  %v7406_v17 = vshrl.u32 %v7072_v24, 16  ;;  %v5599_v49 = vld [vmem:[#allocation3 + $0x20] sm:$0x1]  ;;  %v6609_v33 = vld [vmem:[#allocation3 + $0xb4] sm:$0xe] }
 0x2ec   : > { %6845 = vrot.lane.b32.xlu1 %v9866_v12, %s10941_s18  ;;  %v7412_v56 = vshll.u32 %v7073_v26, 16  ;;  %v9851_v35 = vrot.slane %v6603_v23, 9  ;;  %v6749_v45 = vrot.slane %v6604_v10, 5  ;;  %v7399_v53 = vor.u32 %v7398_v4, %v7395_v57  ;;  %v5598_v23 = vld [vmem:[#allocation3 + $0x1c] sm:$0xf] }
 0x2ed   : > { %7536 = vrot.lane.b32.xlu0 %v9899_v36, %s10941_s18  ;;  %5863 = vst.msk [vmem:[#allocation4 + $0x8] sm:$0xff] %vm409_vm3, %v9791_v60  ;;  %v6752_v14 = vrot.slane %v6605_v54, 5  ;;  %v5696_v34 = vrot.slane %v5595_v41, 5  ;;  %v5699_v55 = vrot.slane %v5596_v52, 5  ;;  %v7408_v21 = vrot.slane %v7406_v17, 4  ;;  %v7864_v26 = vld [vmem:[#allocation4] sm:$0xff] }
 0x2ee   : > { %6039 = vst.msk [vmem:[#allocation4 + $0x8] sm:$0xff] %vm957_vm7, %v13001_v25  ;;  %v7414_v63 = vrot.slane %v7412_v56, 5  ;;  %v6750_v1 = vsel %vm11243_vm6, %v9851_v35, %v6749_v45  ;;  %v6751_v7 = vrot.slane %v6749_v45, 4  ;;  %v7400_v31 = vrot.slane %v7399_v53, 4  ;;  %v6606_v25 = vld [vmem:[#allocation3 + $0xa8] sm:$0xe] }
 0x2ef   : > { %v5698_v59 = vrot.slane %v5696_v34, 4  ;;  %v9776_v9 = vrot.slane %v5594_v51, 9  ;;  %v7417_v47 = vshrl.u32 %v7074_v29, 16  ;;  %v7409_v16 = vor.u32 %v7408_v21, %v7404_v22  ;;  %v6610_v57 = vld [vmem:[#allocation3 + $0xb8] sm:$0xf]  ;;  %v10902_v56 = vld [vmem:[%s13892_s4 + $0x108] sm:$0xff]  }
 0x2f0   : > { %v6753_v62 = vsel %vm11243_vm6, %v6751_v7, %v6752_v14  ;;  %v7420_v61 = vshll.u32 %v7074_v29, 16  ;;  %v7426_v2 = vshll.u32 %v7075_v48, 16  ;;  %v7405_v11 = vsel %vm11028_vm2, %v7400_v31, %v7404_v22  ;;  %v6611_v4 = vld [vmem:[#allocation3 + $0xbc] sm:$0x1]  ;;  %v5600_v22 = vld [vmem:[#allocation3 + $0x24] sm:$0xe] }
 0x2f1   : > { %v9867_v24 = vcombine.low %v6750_v1, %v6753_v62  ;;  %v5700_v8 = vsel %vm11243_vm6, %v5698_v59, %v5699_v55  ;;  %v5697_v44 = vsel %vm11243_vm6, %v9776_v9, %v5696_v34  ;;  %v7410_v10 = vrot.slane %v7409_v16, 4  ;;  %v5601_v29 = vld [vmem:[#allocation3 + $0x28] sm:$0xf]  ;;  %v13128_v1 = vld [vmem:[#allocation3 + $0xc0] sm:$0xe] }
 0x2f2   : > { %v9792_v15 = vcombine.low %v5697_v44, %v5700_v8  ;;  %v7419_v0 = vrot.slane %v7417_v47, 4  ;;  %v7422_v5 = vrot.slane %v7420_v61, 5  ;;  %v13111_v41 = vrot.slane %v7426_v2, 5  ;;  %v10932_v47 = vld [vmem:[%s13892_s4 + $0x100] sm:$0xff]   ;;  %v13141_v62 = vld [vmem:[#allocation3 + $0xc8] sm:$0x1] }
 0x2f3   : > { %6847 = vrot.lane.b32.xlu1 %v9867_v24, %s10941_s18  ;;  %v7430_v52 = vshrl.u32 %v7075_v48, 16  ;;  %v7436_v28 = vshll.u32 %v7076_v19, 16  ;;  %v9852_v6 = vrot.slane %v6606_v25, 9  ;;  %v7415_v46 = vsel %vm11028_vm2, %v7410_v10, %v7414_v63  ;;  %v6613_v16 = vld [vmem:[#allocation3 + $0xc4] sm:$0xf] }
 0x2f4   : > { %5864 = vst.msk [vmem:[#allocation4 + $0x30] sm:$0xff] %vm409_vm3, %v9792_v15  ;;  %v7423_v20 = vor.u32 %v7422_v5, %v7419_v0  ;;  %v6756_v42 = vrot.slane %v6607_v30, 5  ;;  %v6759_v12 = vrot.slane %v6608_v50, 5  ;;  %v9900_v54 = vcombine.low %v7405_v11, %v7415_v46  ;;  %v5603_v19 = vld [vmem:[#allocation3 + $0x30] sm:$0xe] }
 0x2f5   : > { %6040 = vst.msk [vmem:[#allocation4 + $0x30] sm:$0xff] %vm957_vm7, %v13013_v27  ;;  %v7432_v51 = vrot.slane %v7430_v52, 4  ;;  %v7438_v38 = vrot.slane %v7436_v28, 5  ;;  %v9777_v36 = vrot.slane %v5597_v39, 9  ;;  %v7865_v60 = vld [vmem:[#allocation4 + $0x8] sm:$0xff]  ;;  %v7513_v17 = vpop.permute.xlu0 %7512  ;;  %v5703_v14 = vrot.slane %v5598_v23, 5 }
 0x2f6   : > { %v7424_v35 = vrot.slane %v7423_v20, 4  ;;  %v6757_v45 = vsel %vm11243_vm6, %v9852_v6, %v6756_v42  ;;  %v6758_v53 = vrot.slane %v6756_v42, 4  ;;  %8312 = vmatprep.mubr.bf16.mxu1 %v7865_v60  ;;  %v13123_v27 = vld [vmem:[#allocation3 + $0x2c] sm:$0x1]  ;;  %7560 = vst.msk [vmem:[#allocation4 + $0x18] sm:$0xff] %vm957_vm7, %v7513_v17  ;;  %v5542_v34 = vpop.permute.xlu1 %5541  ;;  %7538 = vrot.lane.b32.xlu0 %v9900_v54, %s10941_s18  ;;  %v5706_v48 = vrot.slane %v5599_v49, 5 }
 0x2f7   : > { %v7433_v55 = vor.u32 %v7432_v51, %v13111_v41  ;;  %8313 = vmatmul.mubr.bf16.vlgmr.msra.gmra.mrb[64].mxu1 %v7864_v26  ;;  %v9853_v21 = vrot.slane %v6609_v33, 9  ;;  %v6763_v63 = vrot.slane %v6610_v57, 5  ;;  %5582 = vst.msk [vmem:[#allocation4 + $0x118] sm:$0xff] %vm957_vm7, %v5542_v34  ;;  %v5704_v59 = vsel %vm11243_vm6, %v9777_v36, %v5703_v14  ;;  %v5604_v11 = vld [vmem:[#allocation3 + $0x34] sm:$0xf]  ;;  %v7869_v57 = vld [vmem:[#allocation4 + $0x28] sm:$0xff] }
 0x2f8   : > { %v7429_v7 = vsel %vm11028_vm2, %v7424_v35, %v13111_v41  ;;  %v6760_v31 = vsel %vm11243_vm6, %v6758_v53, %v6759_v12  ;;  %v5705_v9 = vrot.slane %v5703_v14, 4  ;;  %10711 = vmatpush3.bf16.msra.mxu1 %v10932_v47  ;;  %v13145_v24 = vld [vmem:[#allocation3 + $0x38] sm:$0x1]  ;;  %v13147_v8 = vld [vmem:[#allocation3 + $0x3c] sm:$0xe]  ;;  %v10913_v30 = vld [vmem:[%s13892_s4 + $0x110] sm:$0xff]  }
 0x2f9   : > { %v7434_v61 = vrot.slane %v7433_v55, 4  ;;  %v9868_v2 = vcombine.low %v6757_v45, %v6760_v31  ;;  %v6764_v25 = vsel %vm11243_vm6, %v9853_v21, %v6763_v63  ;;  %v6765_v39 = vrot.slane %v6763_v63, 4  ;;  %v13149_v44 = vpop.permute.xlu0 %6007  ;;  %10712 = vmatprep.subr.bf16.mxu1 %v10902_v56  ;;  %v5607_v0 = vld [vmem:[#allocation3 + $0x40] sm:$0xf]  ;;  %v13163_v6 = vld [vmem:[#allocation3 + $0x44] sm:$0x1] }
 0x2fa   : > { %v5707_v50 = vsel %vm11243_vm6, %v5705_v9, %v5706_v48  ;;  %v6766_v23 = vrot.slane %v6611_v4, 5  ;;  %v9778_v10 = vrot.slane %v5600_v22, 9  ;;  %v5710_v15 = vrot.slane %v5601_v29, 5  ;;  %v13156_v5 = vpop.permute.xlu1 %6823  ;;  %v13165_v26 = vld [vmem:[#allocation3 + $0x48] sm:$0xe]  ;;  %v10923_v29 = vld [vmem:[%s13892_s4 + $0x118] sm:$0xff]  }
 0x2fb   : > { %v7439_v49 = vsel %vm11028_vm2, %v7434_v61, %v7438_v38  ;;  %6849 = vrot.lane.b32.xlu1 %v9868_v2, %s10941_s18  ;;  %v9793_v41 = vcombine.low %v5704_v59, %v5707_v50  ;;  %v5713_v52 = vrot.slane %v13123_v27, 5  ;;  %v9854_v28 = vrot.slane %v13128_v1, 9  ;;  %v5610_v54 = vld [vmem:[#allocation3 + $0x4c] sm:$0xf]  ;;  %v5611_v53 = vld [vmem:[#allocation3 + $0x50] sm:$0x1] }
 0x2fc   : > { %v9901_v46 = vcombine.low %v7429_v7, %v7439_v49  ;;  %v6767_v20 = vsel %vm11243_vm6, %v6765_v39, %v6766_v23  ;;  %v5711_v42 = vsel %vm11243_vm6, %v9778_v10, %v5710_v15  ;;  %v5712_v12 = vrot.slane %v5710_v15, 4  ;;  %v7870_v33 = vld [vmem:[#allocation4 + $0x30] sm:$0xff]  ;;  %10713 = vmatpush3.bf16.msra.mxu1 %v10902_v56  ;;  %v5612_v55 = vld [vmem:[#allocation3 + $0x54] sm:$0xe]  ;;  %v5613_v48 = vld [vmem:[#allocation3 + $0x58] sm:$0xf] }
 0x2fd   : > { %5865 = vst.msk [vmem:[#allocation4 + $0x58] sm:$0xff] %vm409_vm3, %v9793_v41  ;;  %v9869_v51 = vcombine.low %v6764_v25, %v6767_v20  ;;  %8320 = vmatprep.mubr.bf16.mxu1 %v7870_v33  ;;  %v6770_v38 = vrot.slane %v6613_v16, 5  ;;  %v6773_v36 = vrot.slane %v13141_v62, 5  ;;  %v9779_v60 = vrot.slane %v5603_v19, 9  ;;  %v7515_v4 = vpop.permute.xlu0 %7514  ;;  %v7867_v22 = vld [vmem:[#allocation4 + $0x18] sm:$0xff]  ;;  %10714 = vmatprep.subr.bf16.mxu1 %v10913_v30 }
 0x2fe   : > { %7540 = vrot.lane.b32.xlu0 %v9901_v46, %s10941_s18  ;;  %6041 = vst.msk [vmem:[#allocation4 + $0x58] sm:$0xff] %vm957_vm7, %v13027_v58  ;;  %v5714_v17 = vsel %vm11243_vm6, %v5712_v12, %v5713_v52  ;;  %v5717_v56 = vrot.slane %v5604_v11, 5  ;;  %v5720_v35 = vrot.slane %v13145_v24, 5  ;;  %v9780_v45 = vrot.slane %v13147_v8, 9  ;;  %7561 = vst.msk [vmem:[#allocation4 + $0x40] sm:$0xff] %vm957_vm7, %v7515_v4  ;;  %8473 = vmatprep.mubr.bf16.mxu0 %v7867_v22 }
 0x2ff   : > { %6851 = vrot.lane.b32.xlu1 %v9869_v51, %s10941_s18  ;;  %v9794_v14 = vcombine.low %v5711_v42, %v5714_v17  ;;  %v6771_v27 = vsel %vm11243_vm6, %v9854_v28, %v6770_v38  ;;  %v6772_v34 = vrot.slane %v6770_v38, 4  ;;  %8321 = vmatmul.mubr.bf16.gmra.mrb[68].mxu1 %v7869_v57  ;;  %v5724_v58 = vrot.slane %v5607_v0, 5  ;;  %v5614_v31 = vld [vmem:[#allocation3 + $0x5c] sm:$0x1]  ;;  %v5615_v19 = vld [vmem:[#allocation3 + $0x60] sm:$0xe] }
 0x300   : > { %v5718_v21 = vsel %vm11243_vm6, %v9779_v60, %v5717_v56  ;;  %v5719_v63 = vrot.slane %v5717_v56, 4  ;;  %v5727_v1 = vrot.slane %v13163_v6, 5  ;;  %v9781_v7 = vrot.slane %v13165_v26, 9  ;;  %v5544_v59 = vpop.permute.xlu1 %5543  ;;  %10715 = vmatpush3.bf16.msra.mxu1 %v10913_v30  ;;  %v5616_v61 = vld [vmem:[#allocation3 + $0x64] sm:$0xf]  ;;  %v7874_v57 = vld [vmem:[#allocation4 + $0x50] sm:$0xff] }
 0x301   : > { %5866 = vst.msk [vmem:[#allocation4 + $0x80] sm:$0xff] %vm409_vm3, %v9794_v14  ;;  %v6774_v9 = vsel %vm11243_vm6, %v6772_v34, %v6773_v36  ;;  %v5725_v47 = vsel %vm11243_vm6, %v9780_v45, %v5724_v58  ;;  %v5726_v16 = vrot.slane %v5724_v58, 4  ;;  %v5731_v62 = vrot.slane %v5610_v54, 5  ;;  %10716 = vmatprep.subr.bf16.mxu1 %v10923_v29  ;;  %v5617_v24 = vld [vmem:[#allocation3 + $0x68] sm:$0x1]  ;;  %v13201_v30 = vpop.permute.xlu0 %6009 }
 0x302   : > { %5583 = vst.msk [vmem:[#allocation4 + $0x140] sm:$0xff] %vm957_vm7, %v5544_v59  ;;  %6042 = vst.msk [vmem:[#allocation4 + $0x80] sm:$0xff] %vm957_vm7, %v13045_v43  ;;  %v9870_v2 = vcombine.low %v6771_v27, %v6774_v9  ;;  %v5721_v25 = vsel %vm11243_vm6, %v5719_v63, %v5720_v35  ;;  %v5734_v39 = vrot.slane %v5611_v53, 5  ;;  %v9782_v11 = vrot.slane %v5612_v55, 9  ;;  %v6055_v8 = vld [vmem:[#allocation3 + $0xc] sm:$0xf] }
 0x303   : > { %v9795_v50 = vcombine.low %v5718_v21, %v5721_v25  ;;  %v5728_v23 = vsel %vm11243_vm6, %v5726_v16, %v5727_v1  ;;  %v5732_v10 = vsel %vm11243_vm6, %v9781_v7, %v5731_v62  ;;  %v5733_v15 = vrot.slane %v5731_v62, 4  ;;  %v6056_v52 = vld [vmem:[#allocation3 + $0x10] sm:$0xf]  ;;  %v6057_v20 = vld [vmem:[#allocation3 + $0x14] sm:$0x1] }
 0x304   : > { %6853 = vrot.lane.b32.xlu1 %v9870_v2, %s10941_s18  ;;  %v9796_v43 = vcombine.low %v5725_v47, %v5728_v23  ;;  %v5738_v0 = vrot.slane %v5613_v48, 5  ;;  %v5741_v49 = vrot.slane %v5614_v31, 5  ;;  %v9783_v41 = vrot.slane %v5615_v19, 9  ;;  %10717 = vmatpush3.bf16.msra.mxu1 %v10923_v29  ;;  %v13211_v12 = vpop.permute.xlu1 %6825  ;;  %v7077_v36 = vld [vmem:[#allocation3 + $0xcc] sm:$0xf] }
 0x305   : > { %5867 = vst.msk [vmem:[#allocation4 + $0xa8] sm:$0xff] %vm409_vm3, %v9795_v50  ;;  %v7875_v28 = vld [vmem:[#allocation4 + $0x58] sm:$0xff]  ;;  %v5735_v6 = vsel %vm11243_vm6, %v5733_v15, %v5734_v39  ;;  %v5745_v26 = vrot.slane %v5616_v61, 5  ;;  %v5748_v46 = vrot.slane %v5617_v24, 5  ;;  %v6104_v42 = vshrl.u32 %v6055_v8, 16 }
 0x306   : > { %6043 = vst.msk [vmem:[#allocation4 + $0xa8] sm:$0xff] %vm957_vm7, %v13058_v13  ;;  %8328 = vmatprep.mubr.bf16.mxu1 %v7875_v28  ;;  %v9797_v33 = vcombine.low %v5732_v10, %v5735_v6  ;;  %v5739_v54 = vsel %vm11243_vm6, %v9782_v11, %v5738_v0  ;;  %v5740_v51 = vrot.slane %v5738_v0, 4  ;;  %v6107_v38 = vshll.u32 %v6055_v8, 16  ;;  %v7078_v29 = vld [vmem:[#allocation3 + $0xd0] sm:$0xf] }
 0x307   : > { %5868 = vst.msk [vmem:[#allocation4 + $0xd0] sm:$0xff] %vm409_vm3, %v9796_v43  ;;  %8329 = vmatmul.mubr.bf16.gmra.mrb[72].mxu1 %v7874_v57  ;;  %v5746_v60 = vsel %vm11243_vm6, %v9783_v41, %v5745_v26  ;;  %v5747_v4 = vrot.slane %v5745_v26, 4  ;;  %v6106_v13 = vrot.slane %v6104_v42, 4  ;;  %v6113_v22 = vshll.u32 %v6056_v52, 16  ;;  %v7079_v53 = vld [vmem:[#allocation3 + $0xd4] sm:$0x1] }
 0x308   : > { %6044 = vst.msk [vmem:[#allocation4 + $0xd0] sm:$0xff] %vm957_vm7, %v13072_v40  ;;  %v5742_v17 = vsel %vm11243_vm6, %v5740_v51, %v5741_v49  ;;  %v6109_v56 = vrot.slane %v6107_v38, 5  ;;  %v6117_v35 = vshrl.u32 %v6056_v52, 16  ;;  %v6123_v45 = vshll.u32 %v6057_v20, 16  ;;  %v7517_v14 = vpop.permute.xlu0 %7516  ;;  %v10928_v27 = vld [vmem:[#allocation3 + $0xcc] sm:$0xff]  }
 0x309   : > { %5869 = vst.msk [vmem:[#allocation4 + $0xf8] sm:$0xff] %vm409_vm3, %v9797_v33  ;;  %v7880_v40 = vld [vmem:[#allocation4 + $0x80] sm:$0xff]  ;;  %v9798_v34 = vcombine.low %v5739_v54, %v5742_v17  ;;  %v5749_v58 = vsel %vm11243_vm6, %v5747_v4, %v5748_v46  ;;  %v6115_v55 = vrot.slane %v6113_v22, 5  ;;  %v7441_v48 = vshrl.u32 %v7077_v36, 16  ;;  %v5618_v21 = vld [vmem:[#allocation3 + $0x6c] sm:$0xe] }
 0x30a   : > { %6045 = vst.msk [vmem:[#allocation4 + $0xf8] sm:$0xff] %vm957_vm7, %v13086_v18  ;;  %7562 = vst.msk [vmem:[#allocation4 + $0x68] sm:$0xff] %vm957_vm7, %v7517_v14  ;;  %8336 = vmatprep.mubr.bf16.mxu1 %v7880_v40  ;;  %v9799_v63 = vcombine.low %v5746_v60, %v5749_v58  ;;  %v6110_v1 = vor.u32 %v6109_v56, %v6106_v13  ;;  %v6119_v7 = vrot.slane %v6117_v35, 4  ;;  %v6125_v31 = vrot.slane %v6123_v45, 5  ;;  %v5619_v59 = vld [vmem:[#allocation3 + $0x70] sm:$0xf] }
 0x30b   : > { %7031 = vst.msk [vmem:[#allocation4 + $0x270] sm:$0xff] %vm409_vm3, %v10928_v27  ;;  %5870 = vst.msk [vmem:[#allocation4 + $0x120] sm:$0xff] %vm409_vm3, %v9798_v34  ;;  %v7443_v18 = vrot.slane %v7441_v48, 4  ;;  %v7444_v9 = vshll.u32 %v7077_v36, 16  ;;  %v7450_v47 = vshll.u32 %v7078_v29, 16  ;;  %v7454_v16 = vshrl.u32 %v7078_v29, 16  ;;  %v5546_v19 = vpop.permute.xlu1 %5545 }
 0x30c   : > { %v5620_v62 = vld [vmem:[#allocation3 + $0x74] sm:$0x1]  ;;  %6046 = vst.msk [vmem:[#allocation4 + $0x120] sm:$0xff] %vm957_vm7, %v13100_v3  ;;  %v6111_v61 = vrot.slane %v6110_v1, 4  ;;  %v6120_v2 = vor.u32 %v6119_v7, %v6115_v55  ;;  %v7460_v25 = vshll.u32 %v7079_v53, 16  ;;  %v9784_v39 = vrot.slane %v5618_v21, 9  ;;  %v13238_v15 = vpop.permute.xlu0 %6011 }
 0x30d   : > { %5871 = vst.msk [vmem:[#allocation4 + $0x148] sm:$0xff] %vm409_vm3, %v9799_v63  ;;  %v6058_v11 = vld [vmem:[#allocation3 + $0x18] sm:$0xf]  ;;  %v7446_v24 = vrot.slane %v7444_v9, 5  ;;  %v7452_v8 = vrot.slane %v7450_v47, 5  ;;  %v7456_v50 = vrot.slane %v7454_v16, 4 }
 0x30e   : > { %5584 = vst.msk [vmem:[#allocation4 + $0x168] sm:$0xff] %vm957_vm7, %v5546_v19  ;;  %6047 = vst.msk [vmem:[#allocation4 + $0x148] sm:$0xff] %vm957_vm7, %v13149_v44  ;;  %v5752_v23 = vrot.slane %v5619_v59, 5  ;;  %v6059_v10 = vld [vmem:[#allocation3 + $0x1c] sm:$0xf]  ;;  %v7879_v3 = vld [vmem:[#allocation4 + $0x78] sm:$0xff]  ;;  %v6116_v43 = vsel %vm11028_vm2, %v6111_v61, %v6115_v55 }
 0x30f   : > { %v6121_v0 = vrot.slane %v6120_v2, 4  ;;  %v7462_v49 = vrot.slane %v7460_v25, 5  ;;  %v5755_v41 = vrot.slane %v5620_v62, 5  ;;  %8337 = vmatmul.mubr.bf16.gmra.mrb[76].mxu1 %v7879_v3  ;;  %v7885_v52 = vld [vmem:[#allocation4 + $0xa8] sm:$0xff]  ;;  %v7447_v28 = vor.u32 %v7446_v24, %v7443_v18  ;;  %v13244_v20 = vpop.permute.xlu1 %6827  ;;  %v5621_v51 = vld [vmem:[#allocation3 + $0x78] sm:$0xe] }
 0x310   : > { %v7457_v6 = vor.u32 %v7456_v50, %v7452_v8  ;;  %v5753_v44 = vsel %vm11243_vm6, %v9784_v39, %v5752_v23  ;;  %v5754_v26 = vrot.slane %v5752_v23, 4  ;;  %v6060_v46 = vld [vmem:[#allocation3 + $0x20] sm:$0x1]  ;;  %8344 = vmatprep.mubr.bf16.mxu1 %v7885_v52  ;;  %v6128_v33 = vshrl.u32 %v6058_v11, 16  ;;  %v5622_v13 = vld [vmem:[#allocation3 + $0x7c] sm:$0xf] }
 0x311   : > { %v6126_v42 = vsel %vm11028_vm2, %v6121_v0, %v6125_v31  ;;  %v6131_v57 = vshll.u32 %v6058_v11, 16  ;;  %v6137_v54 = vshll.u32 %v6059_v10, 16  ;;  %v7448_v36 = vrot.slane %v7447_v28, 4  ;;  %v5623_v22 = vld [vmem:[#allocation3 + $0x80] sm:$0x1] }
 0x312   : > { %v9823_v38 = vcombine.low %v6116_v43, %v6126_v42  ;;  %v7458_v60 = vrot.slane %v7457_v6, 4  ;;  %v5756_v4 = vsel %vm11243_vm6, %v5754_v26, %v5755_v41  ;;  %v6130_v17 = vrot.slane %v6128_v33, 4  ;;  %v6061_v45 = vld [vmem:[#allocation3 + $0x24] sm:$0xf]  ;;  %v7519_v34 = vpop.permute.xlu0 %7518  ;;  %v6062_v63 = vld [vmem:[#allocation3 + $0x28] sm:$0xf] }
 0x313   : > { %v9800_v29 = vcombine.low %v5753_v44, %v5756_v4  ;;  %v6133_v56 = vrot.slane %v6131_v57, 5  ;;  %v13250_v35 = vrot.slane %v6137_v54, 5  ;;  %v7453_v53 = vsel %vm11028_vm2, %v7448_v36, %v7452_v8  ;;  %7563 = vst.msk [vmem:[#allocation4 + $0x90] sm:$0xff] %vm957_vm7, %v7519_v34  ;;  %v6063_v59 = vld [vmem:[#allocation3 + $0x2c] sm:$0x1]  ;;  %v7872_v44 = vld [vmem:[#allocation4 + $0x40] sm:$0xff] }
 0x314   : > { %6551 = vst.msk [vmem:[#allocation4 + $0x10] sm:$0xff] %vm409_vm3, %v9823_v38  ;;  %v7463_v14 = vsel %vm11028_vm2, %v7458_v60, %v7462_v49  ;;  %v6141_v27 = vshrl.u32 %v6059_v10, 16  ;;  %v6147_v40 = vshll.u32 %v6060_v46, 16  ;;  %v9785_v48 = vrot.slane %v5621_v51, 9  ;;  %v5624_v61 = vld [vmem:[#allocation3 + $0x84] sm:$0xe] }
 0x315   : > { %6871 = vst.msk [vmem:[#allocation4 + $0x10] sm:$0xff] %vm957_vm7, %v13156_v5  ;;  %v9902_v58 = vcombine.low %v7453_v53, %v7463_v14  ;;  %v6134_v55 = vor.u32 %v6133_v56, %v6130_v17  ;;  %v5759_v21 = vrot.slane %v5622_v13, 5  ;;  %v5762_v31 = vrot.slane %v5623_v22, 5  ;;  %v5548_v9 = vpop.permute.xlu1 %5547  ;;  %v7884_v5 = vld [vmem:[#allocation4 + $0xa0] sm:$0xff]  ;;  %v5625_v24 = vld [vmem:[#allocation3 + $0x88] sm:$0xf] }
 0x316   : > { %5872 = vst.msk [vmem:[#allocation4 + $0x170] sm:$0xff] %vm409_vm3, %v9800_v29  ;;  %v6143_v1 = vrot.slane %v6141_v27, 4  ;;  %v6149_v7 = vrot.slane %v6147_v40, 5  ;;  %v6152_v18 = vshrl.u32 %v6061_v45, 16  ;;  %v6155_v19 = vshll.u32 %v6061_v45, 16  ;;  %v13268_v8 = vpop.permute.xlu0 %6013 }
 0x317   : > { %6048 = vst.msk [vmem:[#allocation4 + $0x170] sm:$0xff] %vm957_vm7, %v13201_v30  ;;  %7542 = vrot.lane.b32.xlu0 %v9902_v58, %s10941_s18  ;;  %v6135_v47 = vrot.slane %v6134_v55, 4  ;;  %v5760_v16 = vsel %vm11243_vm6, %v9785_v48, %v5759_v21  ;;  %v5761_v62 = vrot.slane %v5759_v21, 4  ;;  %5585 = vst.msk [vmem:[#allocation4 + $0x190] sm:$0xff] %vm957_vm7, %v5548_v9  ;;  %8345 = vmatmul.mubr.bf16.gmra.mrb[80].mxu1 %v7884_v5  ;;  %v7890_v30 = vld [vmem:[#allocation4 + $0xd0] sm:$0xff]  ;;  %v6161_v39 = vshll.u32 %v6062_v63, 16 }
 0x318   : > { %v6144_v2 = vor.u32 %v6143_v1, %v13250_v35  ;;  %v6154_v25 = vrot.slane %v6152_v18, 4  ;;  %v6165_v11 = vshrl.u32 %v6062_v63, 16  ;;  %8352 = vmatprep.mubr.bf16.mxu1 %v7890_v30  ;;  %v6157_v10 = vrot.slane %v6155_v19, 5  ;;  %v5626_v43 = vld [vmem:[#allocation3 + $0x8c] sm:$0x1]  ;;  %v7889_v58 = vld [vmem:[#allocation4 + $0xc8] sm:$0xff] }
 0x319   : > { %v6140_v50 = vsel %vm11028_vm2, %v6135_v47, %v13250_v35  ;;  %v5763_v23 = vsel %vm11243_vm6, %v5761_v62, %v5762_v31  ;;  %v6171_v3 = vshll.u32 %v6063_v59, 16  ;;  %v6064_v0 = vld [vmem:[#allocation3 + $0x30] sm:$0xf]  ;;  %v6163_v52 = vrot.slane %v6161_v39, 5  ;;  %v13275_v6 = vpop.permute.xlu1 %6829  ;;  %v6065_v57 = vld [vmem:[#allocation3 + $0x34] sm:$0xf] }
 0x31a   : > { %v6145_v49 = vrot.slane %v6144_v2, 4  ;;  %v9801_v41 = vcombine.low %v5760_v16, %v5763_v23  ;;  %v6167_v28 = vrot.slane %v6165_v11, 4  ;;  %v6158_v26 = vor.u32 %v6157_v10, %v6154_v25  ;;  %v6066_v60 = vld [vmem:[#allocation3 + $0x38] sm:$0x1]  ;;  %v5627_v35 = vld [vmem:[#allocation3 + $0x90] sm:$0xe] }
 0x31b   : > { %v6173_v46 = vrot.slane %v6171_v3, 5  ;;  %v9786_v42 = vrot.slane %v5624_v61, 9  ;;  %v5766_v33 = vrot.slane %v5625_v24, 5  ;;  %v5769_v36 = vrot.slane %v5626_v43, 5  ;;  %v7521_v13 = vpop.permute.xlu0 %7520  ;;  %v5628_v45 = vld [vmem:[#allocation3 + $0x94] sm:$0xf] }
 0x31c   : > { %v6150_v54 = vsel %vm11028_vm2, %v6145_v49, %v6149_v7  ;;  %v7866_v51 = vld [vmem:[#allocation4 + $0x10] sm:$0xff]  ;;  %5873 = vst.msk [vmem:[#allocation4 + $0x198] sm:$0xff] %vm409_vm3, %v9801_v41  ;;  %v6168_v38 = vor.u32 %v6167_v28, %v6163_v52  ;;  %v6176_v4 = vshrl.u32 %v6064_v0, 16  ;;  %v6159_v29 = vrot.slane %v6158_v26, 4  ;;  %v5629_v34 = vld [vmem:[#allocation3 + $0x98] sm:$0x1] }
 0x31d   : > { %v9824_v22 = vcombine.low %v6140_v50, %v6150_v54  ;;  %8474 = vmatmul.mubr.bf16.vlgmr.msra.gmra.mrb[96].mxu0 %v7866_v51  ;;  %6049 = vst.msk [vmem:[#allocation4 + $0x198] sm:$0xff] %vm957_vm7, %v13238_v15  ;;  %v5767_v17 = vsel %vm11243_vm6, %v9786_v42, %v5766_v33  ;;  %v5768_v56 = vrot.slane %v5766_v33, 4  ;;  %7564 = vst.msk [vmem:[#allocation4 + $0xb8] sm:$0xff] %vm957_vm7, %v7521_v13  ;;  %v6179_v27 = vshll.u32 %v6064_v0, 16  ;;  %v6067_v63 = vld [vmem:[#allocation3 + $0x3c] sm:$0xf] }
 0x31e   : > { %8481 = vmatprep.mubr.bf16.mxu0 %v7872_v44  ;;  %v6169_v53 = vrot.slane %v6168_v38, 4  ;;  %v6178_v14 = vrot.slane %v6176_v4, 4  ;;  %v6185_v40 = vshll.u32 %v6065_v57, 16  ;;  %v6164_v15 = vsel %vm11028_vm2, %v6159_v29, %v6163_v52  ;;  %v7895_v1 = vld [vmem:[#allocation4 + $0xf8] sm:$0xff]  ;;  %v6068_v5 = vld [vmem:[#allocation3 + $0x40] sm:$0xf] }
 0x31f   : > { %6552 = vst.msk [vmem:[#allocation4 + $0x38] sm:$0xff] %vm409_vm3, %v9824_v22  ;;  %v5770_v55 = vsel %vm11243_vm6, %v5768_v56, %v5769_v36  ;;  %v6189_v48 = vshrl.u32 %v6065_v57, 16  ;;  %v6195_v21 = vshll.u32 %v6066_v60, 16  ;;  %8353 = vmatmul.mubr.bf16.gmra.mrb[84].mxu1 %v7889_v58  ;;  %v6181_v59 = vrot.slane %v6179_v27, 5  ;;  %v5550_v9 = vpop.permute.xlu1 %5549  ;;  %v6016_v61 = vpop.permute.xlu0 %6015  ;;  %v6069_v25 = vld [vmem:[#allocation3 + $0x44] sm:$0x1] }
 0x320   : > { %6872 = vst.msk [vmem:[#allocation4 + $0x38] sm:$0xff] %vm957_vm7, %v13211_v12  ;;  %v6174_v7 = vsel %vm11028_vm2, %v6169_v53, %v6173_v46  ;;  %v9802_v31 = vcombine.low %v5767_v17, %v5770_v55  ;;  %v6187_v18 = vrot.slane %v6185_v40, 5  ;;  %8360 = vmatprep.mubr.bf16.mxu1 %v7895_v1  ;;  %5586 = vst.msk [vmem:[#allocation4 + $0x1b8] sm:$0xff] %vm957_vm7, %v5550_v9  ;;  %v9787_v19 = vrot.slane %v5627_v35, 9  ;;  %v5630_v10 = vld [vmem:[#allocation3 + $0x9c] sm:$0xe] }
 0x321   : > { %v9825_v47 = vcombine.low %v6164_v15, %v6174_v7  ;;  %v6191_v16 = vrot.slane %v6189_v48, 4  ;;  %v6197_v62 = vrot.slane %v6195_v21, 5  ;;  %v6182_v12 = vor.u32 %v6181_v59, %v6178_v14  ;;  %v5631_v41 = vld [vmem:[#allocation3 + $0xa0] sm:$0xf]  ;;  %v5632_v46 = vld [vmem:[#allocation3 + $0xa4] sm:$0x1] }
 0x322   : > { %5874 = vst.msk [vmem:[#allocation4 + $0x1c0] sm:$0xff] %vm409_vm3, %v9802_v31  ;;  %v5773_v30 = vrot.slane %v5628_v45, 5  ;;  %v5776_v2 = vrot.slane %v5629_v34, 5  ;;  %v6200_v39 = vshrl.u32 %v6067_v63, 16  ;;  %v6203_v24 = vshll.u32 %v6067_v63, 16  ;;  %v7877_v42 = vld [vmem:[#allocation4 + $0x68] sm:$0xff] }
 0x323   : > { %6553 = vst.msk [vmem:[#allocation4 + $0x60] sm:$0xff] %vm409_vm3, %v9825_v47  ;;  %v6192_v11 = vor.u32 %v6191_v16, %v6187_v18  ;;  %v6209_v50 = vshll.u32 %v6068_v5, 16  ;;  %v6213_v23 = vshrl.u32 %v6068_v5, 16  ;;  %v6183_v3 = vrot.slane %v6182_v12, 4  ;;  %v6070_v51 = vld [vmem:[#allocation3 + $0x48] sm:$0xf] }
 0x324   : > { %6050 = vst.msk [vmem:[#allocation4 + $0x1c0] sm:$0xff] %vm957_vm7, %v13268_v8  ;;  %6873 = vst.msk [vmem:[#allocation4 + $0x60] sm:$0xff] %vm957_vm7, %v13244_v20  ;;  %v5774_v43 = vsel %vm11243_vm6, %v9787_v19, %v5773_v30  ;;  %v5775_v0 = vrot.slane %v5773_v30, 4  ;;  %v6202_v49 = vrot.slane %v6200_v39, 4  ;;  %v6205_v28 = vrot.slane %v6203_v24, 5  ;;  %v13303_v8 = vpop.permute.xlu1 %6831  ;;  %v7894_v36 = vld [vmem:[#allocation4 + $0xf0] sm:$0xff] }
 0x325   : > { %v6193_v52 = vrot.slane %v6192_v11, 4  ;;  %v6211_v44 = vrot.slane %v6209_v50, 5  ;;  %v6215_v26 = vrot.slane %v6213_v23, 4  ;;  %v6188_v33 = vsel %vm11028_vm2, %v6183_v3, %v6187_v18  ;;  %v6071_v17 = vld [vmem:[#allocation3 + $0x4c] sm:$0xf]  ;;  %v7900_v56 = vld [vmem:[#allocation4 + $0x120] sm:$0xff] }
 0x326   : > { %v5777_v20 = vsel %vm11243_vm6, %v5775_v0, %v5776_v2  ;;  %v6219_v57 = vshll.u32 %v6069_v25, 16  ;;  %v9788_v54 = vrot.slane %v5630_v10, 9  ;;  %v6206_v13 = vor.u32 %v6205_v28, %v6202_v49  ;;  %v7523_v29 = vpop.permute.xlu0 %7522  ;;  %v6072_v27 = vld [vmem:[#allocation3 + $0x50] sm:$0x1]  ;;  %v5633_v55 = vld [vmem:[#allocation3 + $0xa8] sm:$0xe] }
 0x327   : > { %v7871_v38 = vld [vmem:[#allocation4 + $0x38] sm:$0xff]  ;;  %v6198_v60 = vsel %vm11028_vm2, %v6193_v52, %v6197_v62  ;;  %v9803_v4 = vcombine.low %v5774_v43, %v5777_v20  ;;  %v6216_v22 = vor.u32 %v6215_v26, %v6211_v44  ;;  %8361 = vmatmul.mubr.bf16.gmra.mrb[88].mxu1 %v7894_v36  ;;  %7565 = vst.msk [vmem:[#allocation4 + $0xe0] sm:$0xff] %vm957_vm7, %v7523_v29  ;;  %v5780_v53 = vrot.slane %v5631_v41, 5  ;;  %v5634_v7 = vld [vmem:[#allocation3 + $0xac] sm:$0xf]  ;;  %s9207_s18 = sshll.u32 %s10989_s25, 5 }
 0x328   : > { %8482 = vmatmul.mubr.bf16.gmra.mrb[100].mxu0 %v7871_v38  ;;  %v9826_v35 = vcombine.low %v6188_v33, %v6198_v60  ;;  %v6221_v45 = vrot.slane %v6219_v57, 5  ;;  %v5783_v14 = vrot.slane %v5632_v46, 5  ;;  %8368 = vmatprep.mubr.bf16.mxu1 %v7900_v56  ;;  %v6207_v40 = vrot.slane %v6206_v13, 4  ;;  %v5635_v16 = vld [vmem:[#allocation3 + $0xb0] sm:$0x1]  ;;  %v7882_v23 = vld [vmem:[#allocation4 + $0x90] sm:$0xff] }
 0x329   : > { %8489 = vmatprep.mubr.bf16.mxu0 %v7877_v42  ;;  %5875 = vst.msk [vmem:[#allocation4 + $0x1e8] sm:$0xff] %vm409_vm3, %v9803_v4  ;;  %v6217_v34 = vrot.slane %v6216_v22, 4  ;;  %v6224_v58 = vshrl.u32 %v6070_v51, 16  ;;  %v6227_v15 = vshll.u32 %v6070_v51, 16  ;;  %v5781_v48 = vsel %vm11243_vm6, %v9788_v54, %v5780_v53  ;;  %v5552_v18 = vpop.permute.xlu1 %5551  ;;  %v6073_v62 = vld [vmem:[#allocation3 + $0x54] sm:$0xf] }
 0x32a   : > { %6554 = vst.msk [vmem:[#allocation4 + $0x88] sm:$0xff] %vm409_vm3, %v9826_v35  ;;  %v5782_v21 = vrot.slane %v5780_v53, 4  ;;  %v6233_v63 = vshll.u32 %v6071_v17, 16  ;;  %v6237_v1 = vshrl.u32 %v6071_v17, 16  ;;  %v6212_v31 = vsel %vm11028_vm2, %v6207_v40, %v6211_v44  ;;  %v6018_v9 = vpop.permute.xlu0 %6017  ;;  %v6074_v30 = vld [vmem:[#allocation3 + $0x58] sm:$0xf] }
 0x32b   : > { %6051 = vst.msk [vmem:[#allocation4 + $0x1e8] sm:$0xff] %vm957_vm7, %v6016_v61  ;;  %6874 = vst.msk [vmem:[#allocation4 + $0x88] sm:$0xff] %vm957_vm7, %v13275_v6  ;;  %v6222_v59 = vsel %vm11028_vm2, %v6217_v34, %v6221_v45  ;;  %v6226_v5 = vrot.slane %v6224_v58, 4  ;;  %v6229_v47 = vrot.slane %v6227_v15, 5  ;;  %v7876_v2 = vld [vmem:[#allocation4 + $0x60] sm:$0xff]  ;;  %v6243_v11 = vshll.u32 %v6072_v27, 16 }
 0x32c   : > { %v9827_v19 = vcombine.low %v6212_v31, %v6222_v59  ;;  %5587 = vst.msk [vmem:[#allocation4 + $0x1e0] sm:$0xff] %vm957_vm7, %v5552_v18  ;;  %v5784_v61 = vsel %vm11243_vm6, %v5782_v21, %v5783_v14  ;;  %v6235_v12 = vrot.slane %v6233_v63, 5  ;;  %v6239_v6 = vrot.slane %v6237_v1, 4  ;;  %v6075_v50 = vld [vmem:[#allocation3 + $0x5c] sm:$0x1]  ;;  %v7899_v41 = vld [vmem:[#allocation4 + $0x118] sm:$0xff] }
 0x32d   : > { %v9804_v25 = vcombine.low %v5781_v48, %v5784_v61  ;;  %v6230_v39 = vor.u32 %v6229_v47, %v6226_v5  ;;  %v9789_v24 = vrot.slane %v5633_v55, 9  ;;  %v5787_v3 = vrot.slane %v5634_v7, 5  ;;  %v5636_v49 = vld [vmem:[#allocation3 + $0xb4] sm:$0xe]  ;;  %v6834_v44 = vpop.permute.xlu1 %6833  ;;  %v5637_v42 = vld [vmem:[#allocation3 + $0xb8] sm:$0xf] }
 0x32e   : > { %6555 = vst.msk [vmem:[#allocation4 + $0xb0] sm:$0xff] %vm409_vm3, %v9827_v19  ;;  %v6240_v10 = vor.u32 %v6239_v6, %v6235_v12  ;;  %v5790_v43 = vrot.slane %v5635_v16, 5  ;;  %v6248_v0 = vshrl.u32 %v6073_v62, 16  ;;  %v6245_v28 = vrot.slane %v6243_v11, 5  ;;  %v7905_v33 = vld [vmem:[#allocation4 + $0x148] sm:$0xff]  ;;  %v7887_v5 = vld [vmem:[#allocation4 + $0xb8] sm:$0xff] }
 0x32f   : > { %6875 = vst.msk [vmem:[#allocation4 + $0xb0] sm:$0xff] %vm957_vm7, %v13303_v8  ;;  %v6231_v52 = vrot.slane %v6230_v39, 4  ;;  %v6251_v26 = vshll.u32 %v6073_v62, 16  ;;  %v6257_v46 = vshll.u32 %v6074_v30, 16  ;;  %8369 = vmatmul.mubr.bf16.gmra.mrb[92].mxu1 %v7899_v41  ;;  %v5788_v57 = vsel %vm11243_vm6, %v9789_v24, %v5787_v3  ;;  %v5638_v8 = vld [vmem:[#allocation3 + $0xbc] sm:$0x1] }
 0x330   : > { %5876 = vst.msk [vmem:[#allocation4 + $0x210] sm:$0xff] %vm409_vm3, %v9804_v25  ;;  %8490 = vmatmul.mubr.bf16.gmra.mrb[104].mxu0 %v7876_v2  ;;  %v6241_v20 = vrot.slane %v6240_v10, 4  ;;  %v5789_v54 = vrot.slane %v5787_v3, 4  ;;  %v6250_v51 = vrot.slane %v6248_v0, 4  ;;  %8376 = vmatprep.mubr.bf16.mxu1 %v7905_v33  ;;  %v7525_v36 = vpop.permute.xlu0 %7524  ;;  %v6261_v13 = vshrl.u32 %v6074_v30, 16  ;;  %v7904_v61 = vld [vmem:[#allocation4 + $0x140] sm:$0xff] }
 0x331   : > { %6052 = vst.msk [vmem:[#allocation4 + $0x210] sm:$0xff] %vm957_vm7, %v6018_v9  ;;  %8497 = vmatprep.mubr.bf16.mxu0 %v7882_v23  ;;  %v6236_v38 = vsel %vm11028_vm2, %v6231_v52, %v6235_v12  ;;  %v6253_v60 = vrot.slane %v6251_v26, 5  ;;  %v6259_v4 = vrot.slane %v6257_v46, 5  ;;  %v6076_v22 = vld [vmem:[#allocation3 + $0x60] sm:$0xf]  ;;  %7566 = vst.msk [vmem:[#allocation4 + $0x108] sm:$0xff] %vm957_vm7, %v7525_v36 }
 0x332   : > { %v6246_v29 = vsel %vm11028_vm2, %v6241_v20, %v6245_v28  ;;  %v5791_v17 = vsel %vm11243_vm6, %v5789_v54, %v5790_v43  ;;  %v6267_v56 = vshll.u32 %v6075_v50, 16  ;;  %v9790_v35 = vrot.slane %v5636_v49, 9  ;;  %v6077_v45 = vld [vmem:[#allocation3 + $0x64] sm:$0xf]  ;;  %v6078_v55 = vld [vmem:[#allocation3 + $0x68] sm:$0x1] }
 0x333   : > { %v9828_v53 = vcombine.low %v6236_v38, %v6246_v29  ;;  %v9805_v14 = vcombine.low %v5788_v57, %v5791_v17  ;;  %v6254_v27 = vor.u32 %v6253_v60, %v6250_v51  ;;  %v6263_v40 = vrot.slane %v6261_v13, 4  ;;  %v7881_v21 = vld [vmem:[#allocation4 + $0x88] sm:$0xff]  ;;  %v6079_v9 = vld [vmem:[#allocation3 + $0x6c] sm:$0xf]  ;;  %v6080_v50 = vld [vmem:[#allocation3 + $0x70] sm:$0xf] }
 0x334   : > { %v6269_v34 = vrot.slane %v6267_v56, 5  ;;  %v5794_v58 = vrot.slane %v5637_v42, 5  ;;  %v5797_v15 = vrot.slane %v5638_v8, 5  ;;  %v6272_v48 = vshrl.u32 %v6076_v22, 16  ;;  %v5554_v63 = vpop.permute.xlu1 %5553  ;;  %v6020_v1 = vpop.permute.xlu0 %6019  ;;  %v7910_v25 = vld [vmem:[#allocation4 + $0x170] sm:$0xff]  ;;  %p13668_p4 = scmp.lt.s32.totalorder %s9207_s18, 63 }
 0x335   : > { %6556 = vst.msk [vmem:[#allocation4 + $0xd8] sm:$0xff] %vm409_vm3, %v9828_v53  ;;  %5877 = vst.msk [vmem:[#allocation4 + $0x238] sm:$0xff] %vm409_vm3, %v9805_v14  ;;  %v6255_v7 = vrot.slane %v6254_v27, 4  ;;  %v6264_v31 = vor.u32 %v6263_v40, %v6259_v4  ;;  %v6275_v59 = vshll.u32 %v6076_v22, 16  ;;  %v6281_v18 = vshll.u32 %v6077_v45, 16 }
 0x336   : > { %6876 = vst.msk [vmem:[#allocation4 + $0xd8] sm:$0xff] %vm957_vm7, %v6834_v44  ;;  %5588 = vst.msk [vmem:[#allocation4 + $0x208] sm:$0xff] %vm957_vm7, %v5554_v63  ;;  %v5795_v47 = vsel %vm11243_vm6, %v9790_v35, %v5794_v58  ;;  %v5796_v16 = vrot.slane %v5794_v58, 4  ;;  %v6274_v62 = vrot.slane %v6272_v48, 4  ;;  %v6285_v19 = vshrl.u32 %v6077_v45, 16  ;;  %v7886_v13 = vld [vmem:[#allocation4 + $0xb0] sm:$0xff] }
 0x337   : > { %6053 = vst.msk [vmem:[#allocation4 + $0x238] sm:$0xff] %vm957_vm7, %v6020_v1  ;;  %v6260_v12 = vsel %vm11028_vm2, %v6255_v7, %v6259_v4  ;;  %v6265_v6 = vrot.slane %v6264_v31, 4  ;;  %v6277_v30 = vrot.slane %v6275_v59, 5  ;;  %v6283_v2 = vrot.slane %v6281_v18, 5  ;;  %8377 = vmatmul.mubr.bf16.gmra.mrb[96].mxu1 %v7904_v61  ;;  %v6081_v49 = vld [vmem:[#allocation3 + $0x74] sm:$0x1] }
 0x338   : > { %8498 = vmatmul.mubr.bf16.gmra.mrb[108].mxu0 %v7881_v21  ;;  %v5798_v39 = vsel %vm11243_vm6, %v5796_v16, %v5797_v15  ;;  %v6287_v11 = vrot.slane %v6285_v19, 4  ;;  %v6291_v24 = vshll.u32 %v6078_v55, 16  ;;  %v6296_v23 = vshrl.u32 %v6079_v9, 16  ;;  %8384 = vmatprep.mubr.bf16.mxu1 %v7910_v25  ;;  %v6836_v3 = vpop.permute.xlu1 %6835  ;;  %v6082_v52 = vld [vmem:[#allocation3 + $0x78] sm:$0xf]  ;;  %v7915_v1 = vld [vmem:[#allocation4 + $0x198] sm:$0xff] }
 0x339   : > { %8505 = vmatprep.mubr.bf16.mxu0 %v7887_v5  ;;  %v6270_v10 = vsel %vm11028_vm2, %v6265_v6, %v6269_v34  ;;  %v9806_v43 = vcombine.low %v5795_v47, %v5798_v39  ;;  %v6278_v0 = vor.u32 %v6277_v30, %v6274_v62  ;;  %v6299_v41 = vshll.u32 %v6079_v9, 16  ;;  %v6083_v51 = vld [vmem:[#allocation3 + $0x7c] sm:$0xf]  ;;  %v6084_v36 = vld [vmem:[#allocation3 + $0x80] sm:$0x1]  ;;  %s13923_s18 = smov (!%p13668_p4, %s9207_s18), 63 }
 0x33a   : > { %v9829_v28 = vcombine.low %v6260_v12, %v6270_v10  ;;  %v6288_v44 = vor.u32 %v6287_v11, %v6283_v2  ;;  %v6293_v26 = vrot.slane %v6291_v24, 5  ;;  %v6298_v46 = vrot.slane %v6296_v23, 4  ;;  %v7527_v42 = vpop.permute.xlu0 %7526  ;;  %v6085_v35 = vld [vmem:[#allocation3 + $0x84] sm:$0xf]  ;;  %v7892_v45 = vld [vmem:[#allocation4 + $0xe0] sm:$0xff]  ;;  %s9208_s25 = sshll.u32 %s13923_s18, 2 }
 0x33b   : > { %5878 = vst.msk [vmem:[#allocation4 + $0x260] sm:$0xff] %vm409_vm3, %v9806_v43  ;;  %v6279_v33 = vrot.slane %v6278_v0, 4  ;;  %v6301_v20 = vrot.slane %v6299_v41, 5  ;;  %v6305_v57 = vshll.u32 %v6080_v50, 16  ;;  %v6309_v54 = vshrl.u32 %v6080_v50, 16  ;;  %v7909_v34 = vld [vmem:[#allocation4 + $0x168] sm:$0xff]  ;;  %s13722_s13 = scalar_lea.vmem %s13895_s7, %s9208_s25 }
 0x33c   : > { %6557 = vst.msk [vmem:[#allocation4 + $0x100] sm:$0xff] %vm409_vm3, %v9829_v28  ;;  %v6289_v8 = vrot.slane %v6288_v44, 4  ;;  %v6315_v38 = vshll.u32 %v6081_v49, 16  ;;  %v6320_v60 = vshrl.u32 %v6082_v52, 16  ;;  %v6323_v4 = vshll.u32 %v6082_v52, 16 }
 0x33d   : > { %7567 = vst.msk [vmem:[#allocation4 + $0x130] sm:$0xff] %vm957_vm7, %v7527_v42  ;;  %6877 = vst.msk [vmem:[#allocation4 + $0x100] sm:$0xff] %vm957_vm7, %v6836_v3  ;;  %v6284_v22 = vsel %vm11028_vm2, %v6279_v33, %v6283_v2  ;;  %v6302_v29 = vor.u32 %v6301_v20, %v6298_v46  ;;  %v6307_v17 = vrot.slane %v6305_v57, 5  ;;  %v6311_v56 = vrot.slane %v6309_v54, 4  ;;  %v6086_v18 = vld [vmem:[#allocation3 + $0x88] sm:$0xf] }
 0x33e   : > { %v6294_v53 = vsel %vm11028_vm2, %v6289_v8, %v6293_v26  ;;  %v6317_v14 = vrot.slane %v6315_v38, 5  ;;  %v6322_v27 = vrot.slane %v6320_v60, 4  ;;  %v6325_v40 = vrot.slane %v6323_v4, 5  ;;  %v5556_v58 = vpop.permute.xlu1 %5555  ;;  %v6022_v15 = vpop.permute.xlu0 %6021  ;;  %v6087_v62 = vld [vmem:[#allocation3 + $0x8c] sm:$0x1]  ;;  %v7891_v49 = vld [vmem:[#allocation4 + $0xd8] sm:$0xff] }
 0x33f   : > { %v9830_v55 = vcombine.low %v6284_v22, %v6294_v53  ;;  %v6303_v48 = vrot.slane %v6302_v29, 4  ;;  %v6312_v21 = vor.u32 %v6311_v56, %v6307_v17  ;;  %v6329_v63 = vshll.u32 %v6083_v51, 16  ;;  %8385 = vmatmul.mubr.bf16.gmra.mrb[100].mxu1 %v7909_v34  ;;  %5589 = vst.msk [vmem:[#allocation4 + $0x230] sm:$0xff] %vm957_vm7, %v5556_v58  ;;  %6054 = vst.msk [vmem:[#allocation4 + $0x260] sm:$0xff] %vm957_vm7, %v6022_v15  ;;  %v6088_v2 = vld [vmem:[#allocation3 + $0x90] sm:$0xf] }
 0x340   : > { %8506 = vmatmul.mubr.bf16.gmra.mrb[112].mxu0 %v7886_v13  ;;  %v6326_v7 = vor.u32 %v6325_v40, %v6322_v27  ;;  %v6333_v31 = vshrl.u32 %v6083_v51, 16  ;;  %v6339_v59 = vshll.u32 %v6084_v36, 16  ;;  %v6344_v9 = vshrl.u32 %v6085_v35, 16  ;;  %8392 = vmatprep.mubr.bf16.mxu1 %v7915_v1  ;;  %v6089_v23 = vld [vmem:[#allocation3 + $0x94] sm:$0xf]  ;;  %v7897_v46 = vld [vmem:[#allocation4 + $0x108] sm:$0xff] }
 0x341   : > { %8513 = vmatprep.mubr.bf16.mxu0 %v7892_v45  ;;  %6558 = vst.msk [vmem:[#allocation4 + $0x128] sm:$0xff] %vm409_vm3, %v9830_v55  ;;  %v6308_v5 = vsel %vm11028_vm2, %v6303_v48, %v6307_v17  ;;  %v6313_v47 = vrot.slane %v6312_v21, 4  ;;  %v6331_v16 = vrot.slane %v6329_v63, 5  ;;  %v6347_v19 = vshll.u32 %v6085_v35, 16  ;;  %v6090_v44 = vld [vmem:[#allocation3 + $0x98] sm:$0x1] }
 0x342   : > { %v6327_v61 = vrot.slane %v6326_v7, 4  ;;  %v6335_v12 = vrot.slane %v6333_v31, 4  ;;  %v6341_v6 = vrot.slane %v6339_v59, 5  ;;  %v6346_v30 = vrot.slane %v6344_v9, 4  ;;  %v6838_v25 = vpop.permute.xlu1 %6837  ;;  %v7914_v51 = vld [vmem:[#allocation4 + $0x190] sm:$0xff]  ;;  %v7920_v13 = vld [vmem:[#allocation4 + $0x1c0] sm:$0xff] }
 0x343   : > { %v6318_v39 = vsel %vm11028_vm2, %v6313_v47, %v6317_v14  ;;  %v6349_v11 = vrot.slane %v6347_v19, 5  ;;  %v6353_v24 = vshll.u32 %v6086_v18, 16  ;;  %v6357_v50 = vshrl.u32 %v6086_v18, 16  ;;  %6878 = vst.msk [vmem:[#allocation4 + $0x128] sm:$0xff] %vm957_vm7, %v6838_v25  ;;  %v6091_v4 = vld [vmem:[#allocation3 + $0x9c] sm:$0xf] }
 0x344   : > { %v9831_v10 = vcombine.low %v6308_v5, %v6318_v39  ;;  %v6332_v3 = vsel %vm11028_vm2, %v6327_v61, %v6331_v16  ;;  %v6336_v43 = vor.u32 %v6335_v12, %v6331_v16  ;;  %v6363_v0 = vshll.u32 %v6087_v62, 16  ;;  %v7529_v42 = vpop.permute.xlu0 %7528  ;;  %v6092_v35 = vld [vmem:[#allocation3 + $0xa0] sm:$0xf]  ;;  %v6093_v15 = vld [vmem:[#allocation3 + $0xa4] sm:$0x1]  ;;  %v7896_v62 = vld [vmem:[#allocation4 + $0x100] sm:$0xff] }
 0x345   : > { %v6350_v41 = vor.u32 %v6349_v11, %v6346_v30  ;;  %v6355_v52 = vrot.slane %v6353_v24, 5  ;;  %v6359_v28 = vrot.slane %v6357_v50, 4  ;;  %v6368_v26 = vshrl.u32 %v6088_v2, 16  ;;  %7568 = vst.msk [vmem:[#allocation4 + $0x158] sm:$0xff] %vm957_vm7, %v7529_v42  ;;  %v6094_v31 = vld [vmem:[#allocation3 + $0xa8] sm:$0xf] }
 0x346   : > { %6559 = vst.msk [vmem:[#allocation4 + $0x150] sm:$0xff] %vm409_vm3, %v9831_v10  ;;  %v6337_v33 = vrot.slane %v6336_v43, 4  ;;  %v6365_v20 = vrot.slane %v6363_v0, 5  ;;  %v6371_v57 = vshll.u32 %v6088_v2, 16  ;;  %v6377_v54 = vshll.u32 %v6089_v23, 16  ;;  %v7902_v2 = vld [vmem:[#allocation4 + $0x130] sm:$0xff] }
 0x347   : > { %v6351_v8 = vrot.slane %v6350_v41, 4  ;;  %v6360_v38 = vor.u32 %v6359_v28, %v6355_v52  ;;  %v6370_v36 = vrot.slane %v6368_v26, 4  ;;  %v6381_v60 = vshrl.u32 %v6089_v23, 16  ;;  %8393 = vmatmul.mubr.bf16.gmra.mrb[104].mxu1 %v7914_v51  ;;  %v6095_v47 = vld [vmem:[#allocation3 + $0xac] sm:$0xf]  ;;  %v7919_v10 = vld [vmem:[#allocation4 + $0x1b8] sm:$0xff] }
 0x348   : > { %8514 = vmatmul.mubr.bf16.gmra.mrb[116].mxu0 %v7891_v49  ;;  %v6342_v22 = vsel %vm11028_vm2, %v6337_v33, %v6341_v6  ;;  %v6373_v29 = vrot.slane %v6371_v57, 5  ;;  %v6379_v17 = vrot.slane %v6377_v54, 5  ;;  %v6387_v56 = vshll.u32 %v6090_v44, 16  ;;  %8400 = vmatprep.mubr.bf16.mxu1 %v7920_v13  ;;  %v5558_v45 = vpop.permute.xlu1 %5557  ;;  %v13381_v16 = vld [vmem:[#allocation3 + $0x28] sm:$0xf] }
 0x349   : > { %8521 = vmatprep.mubr.bf16.mxu0 %v7897_v46  ;;  %v9832_v53 = vcombine.low %v6332_v3, %v6342_v22  ;;  %v6356_v14 = vsel %vm11028_vm2, %v6351_v8, %v6355_v52  ;;  %v6361_v27 = vrot.slane %v6360_v38, 4  ;;  %v6383_v40 = vrot.slane %v6381_v60, 4  ;;  %5590 = vst.msk [vmem:[#allocation4 + $0x258] sm:$0xff] %vm957_vm7, %v5558_v45  ;;  %v6096_v24 = vld [vmem:[#allocation3 + $0xb0] sm:$0x1]  ;;  %v7925_v52 = vld [vmem:[#allocation4 + $0x1e8] sm:$0xff] }
 0x34a   : > { %v6374_v34 = vor.u32 %v6373_v29, %v6370_v36  ;;  %v6389_v58 = vrot.slane %v6387_v56, 5  ;;  %v6392_v55 = vshrl.u32 %v6091_v4, 16  ;;  %v6395_v48 = vshll.u32 %v6091_v4, 16  ;;  %v6097_v41 = vld [vmem:[#allocation3 + $0xb4] sm:$0xf] }
 0x34b   : > { %6560 = vst.msk [vmem:[#allocation4 + $0x178] sm:$0xff] %vm409_vm3, %v9832_v53  ;;  %v6366_v21 = vsel %vm11028_vm2, %v6361_v27, %v6365_v20  ;;  %v6384_v63 = vor.u32 %v6383_v40, %v6379_v17  ;;  %v6401_v1 = vshll.u32 %v6092_v35, 16  ;;  %v6405_v7 = vshrl.u32 %v6092_v35, 16  ;;  %v6098_v42 = vld [vmem:[#allocation3 + $0xb8] sm:$0xf] }
 0x34c   : > { %v9833_v59 = vcombine.low %v6356_v14, %v6366_v21  ;;  %v6375_v18 = vrot.slane %v6374_v34, 4  ;;  %v6394_v9 = vrot.slane %v6392_v55, 4  ;;  %v6397_v5 = vrot.slane %v6395_v48, 5  ;;  %v6840_v19 = vpop.permute.xlu1 %6839  ;;  %v6099_v29 = vld [vmem:[#allocation3 + $0xbc] sm:$0x1]  ;;  %v7901_v34 = vld [vmem:[#allocation4 + $0x128] sm:$0xff] }
 0x34d   : > { %v6385_v61 = vrot.slane %v6384_v63, 4  ;;  %v6403_v12 = vrot.slane %v6401_v1, 5  ;;  %v6407_v6 = vrot.slane %v6405_v7, 4  ;;  %v6411_v30 = vshll.u32 %v6093_v15, 16  ;;  %v7531_v25 = vpop.permute.xlu0 %7530  ;;  %6879 = vst.msk [vmem:[#allocation4 + $0x150] sm:$0xff] %vm957_vm7, %v6840_v19  ;;  %v7907_v21 = vld [vmem:[#allocation4 + $0x158] sm:$0xff] }
 0x34e   : > { %6561 = vst.msk [vmem:[#allocation4 + $0x1a0] sm:$0xff] %vm409_vm3, %v9833_v59  ;;  %v6380_v39 = vsel %vm11028_vm2, %v6375_v18, %v6379_v17  ;;  %v6398_v11 = vor.u32 %v6397_v5, %v6394_v9  ;;  %v6416_v50 = vshrl.u32 %v6094_v31, 16  ;;  %v6419_v23 = vshll.u32 %v6094_v31, 16  ;;  %v6100_v56 = vld [vmem:[#allocation3 + $0xc0] sm:$0xf]  ;;  %v7924_v18 = vld [vmem:[#allocation4 + $0x1e0] sm:$0xff] }
 0x34f   : > { %7569 = vst.msk [vmem:[#allocation4 + $0x180] sm:$0xff] %vm957_vm7, %v7531_v25  ;;  %v6390_v3 = vsel %vm11028_vm2, %v6385_v61, %v6389_v58  ;;  %v6408_v43 = vor.u32 %v6407_v6, %v6403_v12  ;;  %v6413_v0 = vrot.slane %v6411_v30, 5  ;;  %v6425_v49 = vshll.u32 %v6095_v47, 16  ;;  %8401 = vmatmul.mubr.bf16.gmra.mrb[108].mxu1 %v7919_v10  ;;  %v6101_v40 = vld [vmem:[#allocation3 + $0xc4] sm:$0xf] }
 0x350   : > { %8522 = vmatmul.mubr.bf16.gmra.mrb[120].mxu0 %v7896_v62  ;;  %v9834_v28 = vcombine.low %v6380_v39, %v6390_v3  ;;  %v6399_v44 = vrot.slane %v6398_v11, 4  ;;  %v6418_v26 = vrot.slane %v6416_v50, 4  ;;  %v6421_v46 = vrot.slane %v6419_v23, 5  ;;  %8408 = vmatprep.mubr.bf16.mxu1 %v7925_v52  ;;  %v6102_v7 = vld [vmem:[#allocation3 + $0xc8] sm:$0x1] }
 0x351   : > { %8529 = vmatprep.mubr.bf16.mxu0 %v7902_v2  ;;  %v6409_v33 = vrot.slane %v6408_v43, 4  ;;  %v6427_v20 = vrot.slane %v6425_v49, 5  ;;  %v6429_v57 = vshrl.u32 %v6095_v47, 16  ;;  %v6435_v54 = vshll.u32 %v6096_v24, 16  ;;  %v7576_v19 = vld [vmem:[#allocation3 + $0x18] sm:$0xe] }
 0x352   : > { %v7681_v51 = vrot.slane %v13381_v16, 5  ;;  %6562 = vst.msk [vmem:[#allocation4 + $0x1c8] sm:$0xff] %vm409_vm3, %v9834_v28  ;;  %v6422_v8 = vor.u32 %v6421_v46, %v6418_v26  ;;  %v6440_v38 = vshrl.u32 %v6097_v41, 16  ;;  %v6443_v36 = vshll.u32 %v6097_v41, 16  ;;  %v6842_v60 = vpop.permute.xlu1 %6841  ;;  %v7577_v61 = vld [vmem:[#allocation3 + $0x1c] sm:$0xf] }
 0x353   : > { %v6404_v4 = vsel %vm11028_vm2, %v6399_v44, %v6403_v12  ;;  %v6414_v13 = vsel %vm11028_vm2, %v6409_v33, %v6413_v0  ;;  %v6431_v22 = vrot.slane %v6429_v57, 4  ;;  %v6449_v17 = vshll.u32 %v6098_v42, 16  ;;  %v7533_v35 = vpop.permute.xlu0 %7532  ;;  %6880 = vst.msk [vmem:[#allocation4 + $0x178] sm:$0xff] %vm957_vm7, %v6842_v60  ;;  %v7930_v12 = vld [vmem:[#allocation4 + $0x210] sm:$0xff]  ;;  %v7578_v10 = vld [vmem:[#allocation3 + $0x20] sm:$0x1] }
 0x354   : > { %v9835_v45 = vcombine.low %v6404_v4, %v6414_v13  ;;  %v6423_v53 = vrot.slane %v6422_v8, 4  ;;  %v6442_v14 = vrot.slane %v6440_v38, 4  ;;  %v6445_v27 = vrot.slane %v6443_v36, 5  ;;  %7570 = vst.msk [vmem:[#allocation4 + $0x1a8] sm:$0xff] %vm957_vm7, %v7533_v35  ;;  %v7579_v3 = vld [vmem:[#allocation3 + $0x24] sm:$0xe] }
 0x355   : > { %v6432_v58 = vor.u32 %v6431_v22, %v6427_v20  ;;  %v6437_v15 = vrot.slane %v6435_v54, 5  ;;  %v6451_v55 = vrot.slane %v6449_v17, 5  ;;  %v6453_v48 = vshrl.u32 %v6098_v42, 16  ;;  %v7581_v28 = vld [vmem:[#allocation3 + $0x2c] sm:$0x1] }
 0x356   : > { %6563 = vst.msk [vmem:[#allocation4 + $0x1f0] sm:$0xff] %vm409_vm3, %v9835_v45  ;;  %v6446_v63 = vor.u32 %v6445_v27, %v6442_v14  ;;  %v6459_v1 = vshll.u32 %v6099_v29, 16  ;;  %v6464_v31 = vshrl.u32 %v6100_v56, 16  ;;  %v6467_v59 = vshll.u32 %v6100_v56, 16  ;;  %v7583_v44 = vld [vmem:[#allocation3 + $0x34] sm:$0xf] }
 0x357   : > { %v6428_v9 = vsel %vm11028_vm2, %v6423_v53, %v6427_v20  ;;  %v6433_v5 = vrot.slane %v6432_v58, 4  ;;  %v6455_v47 = vrot.slane %v6453_v48, 4  ;;  %v6473_v62 = vshll.u32 %v6101_v40, 16  ;;  %8409 = vmatmul.mubr.bf16.gmra.mrb[112].mxu1 %v7924_v18  ;;  %v7582_v20 = vld [vmem:[#allocation3 + $0x30] sm:$0xe]  ;;  %v7906_v4 = vld [vmem:[#allocation4 + $0x150] sm:$0xff] }
 0x358   : > { %8530 = vmatmul.mubr.bf16.gmra.mrb[124].mxu0 %v7901_v34  ;;  %v6447_v6 = vrot.slane %v6446_v63, 4  ;;  %v6466_v30 = vrot.slane %v6464_v31, 4  ;;  %v6469_v2 = vrot.slane %v6467_v59, 5  ;;  %v6477_v25 = vshrl.u32 %v6101_v40, 16  ;;  %8416 = vmatprep.mubr.bf16.mxu1 %v7930_v12  ;;  %v6844_v39 = vpop.permute.xlu1 %6843  ;;  %v7535_v43 = vpop.permute.xlu0 %7534  ;;  %v7584_v57 = vld [vmem:[#allocation3 + $0x38] sm:$0x1] }
 0x359   : > { %8537 = vmatprep.mubr.bf16.mxu0 %v7907_v21  ;;  %v6438_v11 = vsel %vm11028_vm2, %v6433_v5, %v6437_v15  ;;  %v6456_v24 = vor.u32 %v6455_v47, %v6451_v55  ;;  %v6475_v50 = vrot.slane %v6473_v62, 5  ;;  %v6483_v23 = vshll.u32 %v6102_v7, 16  ;;  %6881 = vst.msk [vmem:[#allocation4 + $0x1a0] sm:$0xff] %vm957_vm7, %v6844_v39  ;;  %7571 = vst.msk [vmem:[#allocation4 + $0x1d0] sm:$0xff] %vm957_vm7, %v7535_v43  ;;  %v13408_v60 = vld [vmem:[#allocation3 + $0x3c] sm:$0xe] }
 0x35a   : > { %v9836_v0 = vcombine.low %v6428_v9, %v6438_v11  ;;  %v6461_v49 = vrot.slane %v6459_v1, 5  ;;  %v6470_v41 = vor.u32 %v6469_v2, %v6466_v30  ;;  %v6479_v52 = vrot.slane %v6477_v25, 4  ;;  %v7586_v56 = vld [vmem:[#allocation3 + $0x40] sm:$0xf]  ;;  %v13414_v35 = vld [vmem:[#allocation3 + $0x44] sm:$0x1] }
 0x35b   : > { %v6452_v26 = vsel %vm11028_vm2, %v6447_v6, %v6451_v55  ;;  %v6457_v46 = vrot.slane %v6456_v24, 4  ;;  %v6485_v42 = vrot.slane %v6483_v23, 5  ;;  %v7674_v33 = vrot.slane %v7577_v61, 5  ;;  %v7588_v40 = vld [vmem:[#allocation3 + $0x48] sm:$0xe]  ;;  %v7929_v55 = vld [vmem:[#allocation4 + $0x208] sm:$0xff] }
 0x35c   : > { %6564 = vst.msk [vmem:[#allocation4 + $0x218] sm:$0xff] %vm409_vm3, %v9836_v0  ;;  %v6471_v54 = vrot.slane %v6470_v41, 4  ;;  %v6480_v8 = vor.u32 %v6479_v52, %v6475_v50  ;;  %v9903_v38 = vrot.slane %v7576_v19, 9  ;;  %v7677_v36 = vrot.slane %v7578_v10, 5  ;;  %v7589_v34 = vld [vmem:[#allocation3 + $0x4c] sm:$0xf] }
 0x35d   : > { %v6462_v13 = vsel %vm11028_vm2, %v6457_v46, %v6461_v49  ;;  %v7676_v22 = vrot.slane %v7674_v33, 4  ;;  %v9904_v29 = vrot.slane %v7579_v3, 9  ;;  %v7683_v17 = vrot.slane %v7681_v51, 4  ;;  %v13420_v58 = vld [vmem:[#allocation3 + $0x50] sm:$0x1]  ;;  %v7912_v31 = vld [vmem:[#allocation4 + $0x180] sm:$0xff] }
 0x35e   : > { %v9837_v45 = vcombine.low %v6452_v26, %v6462_v13  ;;  %v6476_v53 = vsel %vm11028_vm2, %v6471_v54, %v6475_v50  ;;  %v6481_v14 = vrot.slane %v6480_v8, 4  ;;  %v7675_v27 = vsel %vm11243_vm6, %v9903_v38, %v7674_v33  ;;  %v6846_v15 = vpop.permute.xlu1 %6845  ;;  %v13428_v7 = vld [vmem:[#allocation3 + $0x54] sm:$0xe]  ;;  %v7593_v6 = vld [vmem:[#allocation3 + $0x5c] sm:$0x1] }
 0x35f   : > { %v7678_v48 = vsel %vm11243_vm6, %v7676_v22, %v7677_v36  ;;  %v7682_v21 = vsel %vm11243_vm6, %v9904_v29, %v7681_v51  ;;  %v7684_v63 = vrot.slane %v7581_v28, 5  ;;  %v7688_v1 = vrot.slane %v7583_v44, 5  ;;  %v7537_v59 = vpop.permute.xlu0 %7536  ;;  %6882 = vst.msk [vmem:[#allocation4 + $0x1c8] sm:$0xff] %vm957_vm7, %v6846_v15  ;;  %8417 = vmatmul.mubr.bf16.gmra.mrb[116].mxu1 %v7929_v55  ;;  %v7935_v18 = vld [vmem:[#allocation4 + $0x238] sm:$0xff]  ;;  %v7592_v51 = vld [vmem:[#allocation3 + $0x58] sm:$0xf] }
 0x360   : > { %8538 = vmatmul.mubr.bf16.gmra.mrb[128].mxu0 %v7906_v4  ;;  %6565 = vst.msk [vmem:[#allocation4 + $0x240] sm:$0xff] %vm409_vm3, %v9837_v45  ;;  %v6486_v9 = vsel %vm11028_vm2, %v6481_v14, %v6485_v42  ;;  %v9919_v16 = vcombine.low %v7675_v27, %v7678_v48  ;;  %v9905_v5 = vrot.slane %v7582_v20, 9  ;;  %v7691_v47 = vrot.slane %v7584_v57, 5  ;;  %8424 = vmatprep.mubr.bf16.mxu1 %v7935_v18  ;;  %v7594_v30 = vld [vmem:[#allocation3 + $0x60] sm:$0xe]  ;;  %v7911_v22 = vld [vmem:[#allocation4 + $0x178] sm:$0xff] }
 0x361   : > { %8545 = vmatprep.mubr.bf16.mxu0 %v7912_v31  ;;  %7572 = vst.msk [vmem:[#allocation4 + $0x1f8] sm:$0xff] %vm957_vm7, %v7537_v59  ;;  %v9838_v62 = vcombine.low %v6476_v53, %v6486_v9  ;;  %v7685_v19 = vsel %vm11243_vm6, %v7683_v17, %v7684_v63  ;;  %v7690_v61 = vrot.slane %v7688_v1, 4  ;;  %v9906_v12 = vrot.slane %v13408_v60, 9  ;;  %v7595_v11 = vld [vmem:[#allocation3 + $0x64] sm:$0xf]  ;;  %v7934_v29 = vld [vmem:[#allocation4 + $0x230] sm:$0xff] }
 0x362   : > { %7848 = vst.msk [vmem:[#allocation4 + $0x20] sm:$0xff] %vm409_vm3, %v9919_v16  ;;  %v9920_v32 = vcombine.low %v7682_v21, %v7685_v19  ;;  %v7689_v2 = vsel %vm11243_vm6, %v9905_v5, %v7688_v1  ;;  %v7695_v25 = vrot.slane %v7586_v56, 5  ;;  %v7698_v39 = vrot.slane %v13414_v35, 5  ;;  %v7596_v24 = vld [vmem:[#allocation3 + $0x68] sm:$0x1]  ;;  %v7917_v14 = vld [vmem:[#allocation4 + $0x1a8] sm:$0xff] }
 0x363   : > { %6566 = vst.msk [vmem:[#allocation4 + $0x268] sm:$0xff] %vm409_vm3, %v9838_v62  ;;  %v7692_v50 = vsel %vm11243_vm6, %v7690_v61, %v7691_v47  ;;  %v9907_v23 = vrot.slane %v7588_v40, 9  ;;  %v7702_v10 = vrot.slane %v7589_v34, 5  ;;  %v7705_v3 = vrot.slane %v13420_v58, 5  ;;  %v13446_v43 = vld [vmem:[#allocation3 + $0x6c] sm:$0xe] }
 0x364   : > { %7849 = vst.msk [vmem:[#allocation4 + $0x48] sm:$0xff] %vm409_vm3, %v9920_v32  ;;  %v9921_v0 = vcombine.low %v7689_v2, %v7692_v50  ;;  %v7697_v49 = vrot.slane %v7695_v25, 4  ;;  %v9908_v41 = vrot.slane %v13428_v7, 9  ;;  %v7709_v52 = vrot.slane %v7592_v51, 5  ;;  %v7598_v28 = vld [vmem:[#allocation3 + $0x70] sm:$0xf] }
 0x365   : > { %v13450_v44 = vld [vmem:[#allocation3 + $0x74] sm:$0x1]  ;;  %v7696_v26 = vsel %vm11243_vm6, %v9906_v12, %v7695_v25  ;;  %v7703_v46 = vsel %vm11243_vm6, %v9907_v23, %v7702_v10  ;;  %v7704_v42 = vrot.slane %v7702_v10, 4  ;;  %v7712_v33 = vrot.slane %v7593_v6, 5  ;;  %v7600_v20 = vld [vmem:[#allocation3 + $0x78] sm:$0xe]  ;;  %v6848_v8 = vpop.permute.xlu1 %6847 }
 0x366   : > { %v7601_v57 = vld [vmem:[#allocation3 + $0x7c] sm:$0xf]  ;;  %v13456_v54 = vld [vmem:[#allocation3 + $0x80] sm:$0x1]  ;;  %7850 = vst.msk [vmem:[#allocation4 + $0x70] sm:$0xff] %vm409_vm3, %v9921_v0  ;;  %v7699_v38 = vsel %vm11243_vm6, %v7697_v49, %v7698_v39  ;;  %v7711_v36 = vrot.slane %v7709_v52, 4  ;;  %v7710_v35 = vsel %vm11243_vm6, %v9908_v41, %v7709_v52 }
 0x367   : > { %v9909_v60 = vrot.slane %v7594_v30, 9  ;;  %v7716_v4 = vrot.slane %v7595_v11, 5  ;;  %v7603_v13 = vld [vmem:[#allocation3 + $0x84] sm:$0xe]  ;;  %6883 = vst.msk [vmem:[#allocation4 + $0x1f0] sm:$0xff] %vm957_vm7, %v6848_v8  ;;  %v9922_v17 = vcombine.low %v7696_v26, %v7699_v38  ;;  %v7706_v56 = vsel %vm11243_vm6, %v7704_v42, %v7705_v3  ;;  %8425 = vmatmul.mubr.bf16.gmra.mrb[120].mxu1 %v7934_v29  ;;  %v7940_v27 = vld [vmem:[#allocation4 + $0x260] sm:$0xff] }
 0x368   : > { %v7719_v45 = vrot.slane %v7596_v24, 5  ;;  %v7604_v53 = vld [vmem:[#allocation3 + $0x88] sm:$0xf]  ;;  %8546 = vmatmul.mubr.bf16.gmra.mrb[132].mxu0 %v7911_v22  ;;  %v9923_v40 = vcombine.low %v7703_v46, %v7706_v56  ;;  %v7713_v34 = vsel %vm11243_vm6, %v7711_v36, %v7712_v33  ;;  %v9910_v15 = vrot.slane %v13446_v43, 9  ;;  %v7605_v55 = vld [vmem:[#allocation3 + $0x8c] sm:$0x1]  ;;  %8432 = vmatprep.mubr.bf16.mxu1 %v7940_v27  ;;  %v7539_v59 = vpop.permute.xlu0 %7538 }
 0x369   : > { %v7718_v58 = vrot.slane %v7716_v4, 4  ;;  %8553 = vmatprep.mubr.bf16.mxu0 %v7917_v14  ;;  %7851 = vst.msk [vmem:[#allocation4 + $0x98] sm:$0xff] %vm409_vm3, %v9922_v17  ;;  %v9924_v48 = vcombine.low %v7710_v35, %v7713_v34  ;;  %v7717_v21 = vsel %vm11243_vm6, %v9909_v60, %v7716_v4  ;;  %v7723_v63 = vrot.slane %v7598_v28, 5  ;;  %v7606_v7 = vld [vmem:[#allocation3 + $0x90] sm:$0xe]  ;;  %v7916_v26 = vld [vmem:[#allocation4 + $0x1a0] sm:$0xff] }
 0x36a   : > { %v7726_v1 = vrot.slane %v13450_v44, 5  ;;  %v7607_v31 = vld [vmem:[#allocation3 + $0x94] sm:$0xf]  ;;  %7852 = vst.msk [vmem:[#allocation4 + $0xc0] sm:$0xff] %vm409_vm3, %v9923_v40  ;;  %v9911_v9 = vrot.slane %v7600_v20, 9  ;;  %v7730_v16 = vrot.slane %v7601_v57, 5 }
 0x36b   : > { %v7720_v18 = vsel %vm11243_vm6, %v7718_v58, %v7719_v45  ;;  %v7733_v5 = vrot.slane %v13456_v54, 5  ;;  %v7608_v47 = vld [vmem:[#allocation3 + $0x98] sm:$0x1]  ;;  %7573 = vst.msk [vmem:[#allocation4 + $0x220] sm:$0xff] %vm957_vm7, %v7539_v59  ;;  %v7725_v62 = vrot.slane %v7723_v63, 4  ;;  %v9912_v19 = vrot.slane %v7603_v13, 9 }
 0x36c   : > { %7853 = vst.msk [vmem:[#allocation4 + $0xe8] sm:$0xff] %vm409_vm3, %v9924_v48  ;;  %v9925_v51 = vcombine.low %v7717_v21, %v7720_v18  ;;  %v7737_v61 = vrot.slane %v7604_v53, 5  ;;  %v7609_v12 = vld [vmem:[#allocation3 + $0x9c] sm:$0xe]  ;;  %v7724_v6 = vsel %vm11243_vm6, %v9910_v15, %v7723_v63  ;;  %v7731_v30 = vsel %vm11243_vm6, %v9911_v9, %v7730_v16  ;;  %v7610_v25 = vld [vmem:[#allocation3 + $0xa0] sm:$0xf] }
 0x36d   : > { %v7732_v32 = vrot.slane %v7730_v16, 4  ;;  %v7740_v2 = vrot.slane %v7605_v55, 5  ;;  %v7611_v39 = vld [vmem:[#allocation3 + $0xa4] sm:$0x1]  ;;  %v7612_v11 = vld [vmem:[#allocation3 + $0xa8] sm:$0xe]  ;;  %v7727_v24 = vsel %vm11243_vm6, %v7725_v62, %v7726_v1  ;;  %v6850_v43 = vpop.permute.xlu1 %6849 }
 0x36e   : > { %7854 = vst.msk [vmem:[#allocation4 + $0x110] sm:$0xff] %vm409_vm3, %v9925_v51  ;;  %v7739_v50 = vrot.slane %v7737_v61, 4  ;;  %v9913_v23 = vrot.slane %v7606_v7, 9  ;;  %v7744_v10 = vrot.slane %v7607_v31, 5  ;;  %v7613_v3 = vld [vmem:[#allocation3 + $0xac] sm:$0xf]  ;;  %v9926_v0 = vcombine.low %v7724_v6, %v7727_v24 }
 0x36f   : > { %v7734_v49 = vsel %vm11243_vm6, %v7732_v32, %v7733_v5  ;;  %v7738_v41 = vsel %vm11243_vm6, %v9912_v19, %v7737_v61  ;;  %v7747_v52 = vrot.slane %v7608_v47, 5  ;;  %v7614_v28 = vld [vmem:[#allocation3 + $0xb0] sm:$0x1]  ;;  %v7615_v44 = vld [vmem:[#allocation3 + $0xb4] sm:$0xe]  ;;  %6884 = vst.msk [vmem:[#allocation4 + $0x218] sm:$0xff] %vm957_vm7, %v6850_v43 }
 0x370   : > { %v7939_v46 = vld [vmem:[#allocation4 + $0x258] sm:$0xff]  ;;  %v9927_v42 = vcombine.low %v7731_v30, %v7734_v49  ;;  %v7741_v33 = vsel %vm11243_vm6, %v7739_v50, %v7740_v2  ;;  %v7746_v20 = vrot.slane %v7744_v10, 4  ;;  %v9914_v57 = vrot.slane %v7609_v12, 9  ;;  %v7616_v54 = vld [vmem:[#allocation3 + $0xb8] sm:$0xf]  ;;  %8554 = vmatmul.mubr.bf16.gmra.mrb[136].mxu0 %v7916_v26  ;;  %v7922_v38 = vld [vmem:[#allocation4 + $0x1d0] sm:$0xff]  ;;  %v7541_v17 = vpop.permute.xlu0 %7540 }
 0x371   : > { %v13493_v8 = vld [vmem:[#allocation3 + $0xc0] sm:$0xe]  ;;  %8433 = vmatmul.mubr.bf16.gmra.mrb[124].mxu1 %v7939_v46  ;;  %v7868_v36 = vld [vmem:[#allocation4 + $0x20] sm:$0xff]  ;;  %7855 = vst.msk [vmem:[#allocation4 + $0x138] sm:$0xff] %vm409_vm3, %v9926_v0  ;;  %v9928_v60 = vcombine.low %v7738_v41, %v7741_v33  ;;  %v7745_v4 = vsel %vm11243_vm6, %v9913_v23, %v7744_v10  ;;  %v7751_v13 = vrot.slane %v7610_v25, 5  ;;  %v7754_v22 = vrot.slane %v7611_v39, 5  ;;  %8561 = vmatprep.mubr.bf16.mxu0 %v7922_v38  ;;  %v6852_v27 = vpop.permute.xlu1 %6851 }
 0x372   : > { %v7617_v29 = vld [vmem:[#allocation3 + $0xbc] sm:$0x1]  ;;  %10718 = vmatprep.mubr.msk.bf16.mxu1 %vm409_vm3, %v7868_v36  ;;  %7856 = vst.msk [vmem:[#allocation4 + $0x160] sm:$0xff] %vm409_vm3, %v9927_v42  ;;  %v7748_v56 = vsel %vm11243_vm6, %v7746_v20, %v7747_v52  ;;  %v9915_v35 = vrot.slane %v7612_v11, 9  ;;  %v7758_v45 = vrot.slane %v7613_v3, 5  ;;  %v7761_v53 = vrot.slane %v7614_v28, 5 }
 0x373   : > { %v7619_v14 = vld [vmem:[#allocation3 + $0xc4] sm:$0xf]  ;;  %7574 = vst.msk [vmem:[#allocation4 + $0x248] sm:$0xff] %vm957_vm7, %v7541_v17  ;;  %v9929_v40 = vcombine.low %v7745_v4, %v7748_v56  ;;  %v7753_v34 = vrot.slane %v7751_v13, 4  ;;  %v9916_v58 = vrot.slane %v7615_v44, 9  ;;  %v7765_v15 = vrot.slane %v7616_v54, 5 }
 0x374   : > { %7857 = vst.msk [vmem:[#allocation4 + $0x188] sm:$0xff] %vm409_vm3, %v9928_v60  ;;  %v7621_v55 = vld [vmem:[#allocation3 + $0xcc] sm:$0xe]  ;;  %v7752_v48 = vsel %vm11243_vm6, %v9914_v57, %v7751_v13  ;;  %v7759_v21 = vsel %vm11243_vm6, %v9915_v35, %v7758_v45  ;;  %v7760_v63 = vrot.slane %v7758_v45, 4  ;;  %v7768_v1 = vrot.slane %v7617_v29, 5  ;;  %v7921_v2 = vld [vmem:[#allocation4 + $0x1c8] sm:$0xff] }
 0x375   : > { %6885 = vst.msk [vmem:[#allocation4 + $0x240] sm:$0xff] %vm957_vm7, %v6852_v27  ;;  %v7620_v7 = vld [vmem:[#allocation3 + $0xc8] sm:$0x1]  ;;  %v7622_v31 = vld [vmem:[#allocation3 + $0xd0] sm:$0xf]  ;;  %v7755_v59 = vsel %vm11243_vm6, %v7753_v34, %v7754_v22  ;;  %v7767_v18 = vrot.slane %v7765_v15, 4  ;;  %v7766_v62 = vsel %vm11243_vm6, %v9916_v58, %v7765_v15 }
 0x376   : > { %7858 = vst.msk [vmem:[#allocation4 + $0x1b0] sm:$0xff] %vm409_vm3, %v9929_v40  ;;  %v9917_v9 = vrot.slane %v13493_v8, 9  ;;  %v7772_v16 = vrot.slane %v7619_v14, 5  ;;  %v7623_v5 = vld [vmem:[#allocation3 + $0xd4] sm:$0x1]  ;;  %v9930_v47 = vcombine.low %v7752_v48, %v7755_v59  ;;  %v7762_v51 = vsel %vm11243_vm6, %v7760_v63, %v7761_v53  ;;  %v6854_v32 = vpop.permute.xlu1 %6853  ;;  %v7873_v25 = vld [vmem:[#allocation4 + $0x48] sm:$0xff] }
 0x377   : > { %v9918_v19 = vrot.slane %v7621_v55, 9  ;;  %v9931_v61 = vcombine.low %v7759_v21, %v7762_v51  ;;  %v7769_v12 = vsel %vm11243_vm6, %v7767_v18, %v7768_v1  ;;  %v7775_v30 = vrot.slane %v7620_v7, 5  ;;  %6886 = vst.msk [vmem:[#allocation4 + $0x268] sm:$0xff] %vm957_vm7, %v6854_v32  ;;  %v7927_v50 = vld [vmem:[#allocation4 + $0x1f8] sm:$0xff]  ;;  %v7878_v23 = vld [vmem:[#allocation4 + $0x70] sm:$0xff]  ;;  %v7932_v26 = vld [vmem:[#allocation4 + $0x220] sm:$0xff] }
 0x378   : > { %v7774_v6 = vrot.slane %v7772_v16, 4  ;;  %7859 = vst.msk [vmem:[#allocation4 + $0x1d8] sm:$0xff] %vm409_vm3, %v9930_v47  ;;  %v9932_v39 = vcombine.low %v7766_v62, %v7769_v12  ;;  %v7779_v11 = vrot.slane %v7622_v31, 5  ;;  %v7782_v24 = vrot.slane %v7623_v5, 5  ;;  %8562 = vmatmul.mubr.bf16.gmra.mrb[140].mxu0 %v7921_v2  ;;  %v7926_v28 = vld [vmem:[#allocation4 + $0x1f0] sm:$0xff]  ;;  %v7883_v44 = vld [vmem:[#allocation4 + $0x98] sm:$0xff] }
 0x379   : > { %10719 = vmatmul.mubr.msk.bf16.vlgmr.msra.gmra.mrb[128].mxu1 %vm409_vm3, %v7873_v25  ;;  %7860 = vst.msk [vmem:[#allocation4 + $0x200] sm:$0xff] %vm409_vm3, %v9931_v61  ;;  %v7773_v10 = vsel %vm11243_vm6, %v9917_v9, %v7772_v16  ;;  %8569 = vmatprep.mubr.bf16.mxu0 %v7927_v50  ;;  %v7888_v46 = vld [vmem:[#allocation4 + $0xc0] sm:$0xff]  ;;  %v7931_v42 = vld [vmem:[#allocation4 + $0x218] sm:$0xff]  ;;  %v7893_v33 = vld [vmem:[#allocation4 + $0xe8] sm:$0xff] }
 0x37a   : > { %v7776_v3 = vsel %vm11243_vm6, %v7774_v6, %v7775_v30  ;;  %10722 = vmatprep.mubr.msk.bf16.mxu1 %vm409_vm3, %v7878_v23  ;;  %7861 = vst.msk [vmem:[#allocation4 + $0x228] sm:$0xff] %vm409_vm3, %v9932_v39  ;;  %v7780_v0 = vsel %vm11243_vm6, %v9918_v19, %v7779_v11  ;;  %v7781_v49 = vrot.slane %v7779_v11, 4  ;;  %v7937_v20 = vld [vmem:[#allocation4 + $0x248] sm:$0xff]  ;;  %v7898_v37 = vld [vmem:[#allocation4 + $0x110] sm:$0xff]  ;;  %v7903_v8 = vld [vmem:[#allocation4 + $0x138] sm:$0xff] }
 0x37b   : > { %v9933_v43 = vcombine.low %v7773_v10, %v7776_v3  ;;  %v7908_v38 = vld [vmem:[#allocation4 + $0x160] sm:$0xff]  ;;  %v7913_v4 = vld [vmem:[#allocation4 + $0x188] sm:$0xff] }
 0x37c   : > { %v7783_v41 = vsel %vm11243_vm6, %v7781_v49, %v7782_v24  ;;  %v7936_v54 = vld [vmem:[#allocation4 + $0x240] sm:$0xff] }
 0x37d   : > { %7862 = vst.msk [vmem:[#allocation4 + $0x250] sm:$0xff] %vm409_vm3, %v9933_v43  ;;  %v9934_v52 = vcombine.low %v7780_v0, %v7783_v41  ;;  %v7918_v13 = vld [vmem:[#allocation4 + $0x1b0] sm:$0xff] }
 0x37e   : > { %v7941_v60 = vld [vmem:[#allocation4 + $0x268] sm:$0xff] }
 0x37f   : > { %7863 = vst.msk [vmem:[#allocation4 + $0x278] sm:$0xff] %vm409_vm3, %v9934_v52  ;;  %v7923_v22 = vld [vmem:[#allocation4 + $0x1d8] sm:$0xff] }
 0x380   : > { %8570 = vmatmul.mubr.bf16.gmra.mrb[144].mxu0 %v7926_v28  ;;  %v7928_v29 = vld [vmem:[#allocation4 + $0x200] sm:$0xff] }
 0x381   : > { %10723 = vmatmul.mubr.msk.bf16.gmra.mrb[132].mxu1 %vm409_vm3, %v7883_v44  ;;  %8577 = vmatprep.mubr.bf16.mxu0 %v7932_v26  ;;  %v7933_v17 = vld [vmem:[#allocation4 + $0x228] sm:$0xff] }
 0x382   : > { %10726 = vmatprep.mubr.msk.bf16.mxu1 %vm409_vm3, %v7888_v46 }
 0x384   : > { %v7938_v56 = vld [vmem:[#allocation4 + $0x250] sm:$0xff] }
 0x386   : > { %v7943_v35 = vld [vmem:[#allocation4 + $0x278] sm:$0xff] }
 0x388   : > { %8578 = vmatmul.mubr.bf16.gmra.mrb[148].mxu0 %v7931_v42 }
 0x389   : > { %10727 = vmatmul.mubr.msk.bf16.gmra.mrb[136].mxu1 %vm409_vm3, %v7893_v33  ;;  %8585 = vmatprep.mubr.bf16.mxu0 %v7937_v20  ;;  %v7543_v57 = vpop.permute.xlu0 %7542 }
 0x38a   : > { %10730 = vmatprep.mubr.msk.bf16.mxu1 %vm409_vm3, %v7898_v37  ;;  %7575 = vst.msk [vmem:[#allocation4 + $0x270] sm:$0xff] %vm957_vm7, %v7543_v57 }
 0x390   : > { %8586 = vmatmul.mubr.bf16.gmra.mrb[152].mxu0 %v7936_v54 }
 0x391   : > { %10731 = vmatmul.mubr.msk.bf16.gmra.mrb[140].mxu1 %vm409_vm3, %v7903_v8  ;;  %v7942_v36 = vld [vmem:[#allocation4 + $0x270] sm:$0xff] }
 0x392   : > { %10734 = vmatprep.mubr.msk.bf16.mxu1 %vm409_vm3, %v7908_v38  ;;  %8593 = vmatprep.mubr.bf16.mxu0 %v7942_v36 }
 0x398   : > { %8594 = vmatmul.mubr.bf16.gmra.mrb[156].mxu0 %v7941_v60 }
 0x399   : > { %10735 = vmatmul.mubr.msk.bf16.gmra.mrb[144].mxu1 %vm409_vm3, %v7913_v4 }
 0x39a   : > { %10738 = vmatprep.mubr.msk.bf16.mxu1 %vm409_vm3, %v7918_v13 }
 0x3a1   : > { %10739 = vmatmul.mubr.msk.bf16.gmra.mrb[148].mxu1 %vm409_vm3, %v7923_v22 }
 0x3a2   : > { %10742 = vmatprep.mubr.msk.bf16.mxu1 %vm409_vm3, %v7928_v29 }
 0x3a9   : > { %10743 = vmatmul.mubr.msk.bf16.gmra.mrb[152].mxu1 %vm409_vm3, %v7933_v17 }
 0x3aa   : > { %10746 = vmatprep.mubr.msk.bf16.mxu1 %vm409_vm3, %v7938_v56 }
 0x3b1   : > { %10747 = vmatmul.mubr.msk.bf16.gmra.mrb[156].mxu1 %vm409_vm3, %v7943_v35 }
 0x3ca   : > { %v10442_v45 = vpop.f32.mrb[64].mxu1 }
 0x3cb   : > { %v10443_v53 = vpop.f32.mrb[65].mxu1 }
 0x3cc   : > { %v10444_v14 = vadd.f32 %v10443_v53, %v10442_v45  ;;  %v10445_v27 = vpop.f32.mrb[66].mxu1 }
 0x3cd   : > { %v10446_v40 = vpop.f32.mrb[67].mxu1 }
 0x3ce   : > { %v10447_v34 = vadd.f32 %v10446_v40, %v10445_v27 }
 0x3d2   : > { %v10448_v58 = vpop.f32.mrb[68].mxu1 }
 0x3d3   : > { %v10449_v15 = vpop.f32.mrb[69].mxu1 }
 0x3d4   : > { %v10450_v55 = vadd.f32 %v10449_v15, %v10448_v58  ;;  %v10451_v48 = vpop.f32.mrb[70].mxu1 }
 0x3d5   : > { %v10452_v21 = vpop.f32.mrb[71].mxu1 }
 0x3d6   : > { %v10453_v63 = vadd.f32 %v10452_v21, %v10451_v48 }
 0x3da   : > { %v10454_v1 = vpop.f32.mrb[72].mxu1 }
 0x3db   : > { %v10455_v7 = vpop.f32.mrb[73].mxu1 }
 0x3dc   : > { %v10456_v31 = vadd.f32 %v10455_v7, %v10454_v1  ;;  %v10457_v59 = vpop.f32.mrb[74].mxu1 }
 0x3dd   : > { %v10458_v18 = vpop.f32.mrb[75].mxu1 }
 0x3de   : > { %v10459_v9 = vadd.f32 %v10458_v18, %v10457_v59 }
 0x3e2   : > { %v10460_v16 = vpop.f32.mrb[76].mxu1 }
 0x3e3   : > { %v10461_v5 = vpop.f32.mrb[77].mxu1 }
 0x3e4   : > { %v13549_v47 = vadd.f32 %v10461_v5, %v10460_v16  ;;  %v10463_v51 = vpop.f32.mrb[78].mxu1 }
 0x3e5   : > { %v10464_v62 = vpop.f32.mrb[79].mxu1 }
 0x3e6   : > { %v10465_v19 = vadd.f32 %v10464_v62, %v10463_v51 }
 0x3ea   : > { %v10466_v61 = vpop.f32.mrb[80].mxu1 }
 0x3eb   : > { %v10467_v12 = vpop.f32.mrb[81].mxu1 }
 0x3ec   : > { %v13551_v6 = vadd.f32 %v10467_v12, %v10466_v61  ;;  %v10469_v30 = vpop.f32.mrb[82].mxu1 }
 0x3ed   : > { %v10470_v32 = vpop.f32.mrb[83].mxu1 }
 0x3ee   : > { %v13553_v2 = vadd.f32 %v10470_v32, %v10469_v30 }
 0x3f0   : > { %v10554_v25 = vpop.f32.mrb[96].mxu0 }
 0x3f1   : > { %v10555_v39 = vpop.f32.mrb[97].mxu0 }
 0x3f2   : > { %v10556_v11 = vadd.f32 %v10555_v39, %v10554_v25  ;;  %v10557_v24 = vpop.f32.mrb[98].mxu0  ;;  %v10472_v23 = vpop.f32.mrb[84].mxu1 }
 0x3f3   : > { %v10558_v50 = vpop.f32.mrb[99].mxu0  ;;  %v10473_v3 = vpop.f32.mrb[85].mxu1 }
 0x3f4   : > { %v10559_v10 = vadd.f32 %v10558_v50, %v10557_v24  ;;  %v13555_v43 = vadd.f32 %v10556_v11, %v10444_v14  ;;  %v13557_v0 = vadd.f32 %v10473_v3, %v10472_v23  ;;  %v10475_v49 = vpop.f32.mrb[86].mxu1 }
 0x3f5   : > { %v10476_v41 = vpop.f32.mrb[87].mxu1 }
 0x3f6   : > { %v13559_v52 = vadd.f32 %v10559_v10, %v10447_v34  ;;  %v13561_v28 = vadd.f32 %v10476_v41, %v10475_v49 }
 0x3fa   : > { %v10478_v26 = vpop.f32.mrb[88].mxu1 }
 0x3fb   : > { %v10560_v44 = vpop.f32.mrb[100].mxu0  ;;  %v10479_v42 = vpop.f32.mrb[89].mxu1 }
 0x3fc   : > { %v10561_v46 = vpop.f32.mrb[101].mxu0  ;;  %v13563_v37 = vadd.f32 %v10479_v42, %v10478_v26  ;;  %v10481_v57 = vpop.f32.mrb[90].mxu1 }
 0x3fd   : > { %v10562_v33 = vadd.f32 %v10561_v46, %v10560_v44  ;;  %v10563_v20 = vpop.f32.mrb[102].mxu0  ;;  %v10482_v8 = vpop.f32.mrb[91].mxu1 }
 0x3fe   : > { %v10564_v54 = vpop.f32.mrb[103].mxu0  ;;  %v13565_v36 = vadd.f32 %v10482_v8, %v10481_v57 }
 0x3ff   : > { %v10565_v38 = vadd.f32 %v10564_v54, %v10563_v20  ;;  %v13567_v60 = vadd.f32 %v10562_v33, %v10450_v55 }
 0x401   : > { %v13569_v4 = vadd.f32 %v10565_v38, %v10453_v63 }
 0x402   : > { %v10484_v22 = vpop.f32.mrb[92].mxu1 }
 0x403   : > { %v10566_v13 = vpop.f32.mrb[104].mxu0  ;;  %v10485_v17 = vpop.f32.mrb[93].mxu1 }
 0x404   : > { %v10567_v29 = vpop.f32.mrb[105].mxu0  ;;  %v13571_v45 = vadd.f32 %v10485_v17, %v10484_v22  ;;  %v10487_v53 = vpop.f32.mrb[94].mxu1 }
 0x405   : > { %v10568_v56 = vadd.f32 %v10567_v29, %v10566_v13  ;;  %v10569_v35 = vpop.f32.mrb[106].mxu0  ;;  %v10488_v27 = vpop.f32.mrb[95].mxu1 }
 0x406   : > { %v10570_v14 = vpop.f32.mrb[107].mxu0  ;;  %v13573_v34 = vadd.f32 %v10488_v27, %v10487_v53 }
 0x407   : > { %v10571_v40 = vadd.f32 %v10570_v14, %v10569_v35  ;;  %v13575_v58 = vadd.f32 %v10568_v56, %v10456_v31 }
 0x409   : > { %v13577_v15 = vadd.f32 %v10571_v40, %v10459_v9 }
 0x40a   : > { %v10490_v48 = vpop.f32.mrb[96].mxu1 }
 0x40b   : > { %v10572_v55 = vpop.f32.mrb[108].mxu0  ;;  %v10491_v63 = vpop.f32.mrb[97].mxu1 }
 0x40c   : > { %v10573_v21 = vpop.f32.mrb[109].mxu0  ;;  %v13579_v59 = vadd.f32 %v10491_v63, %v10490_v48  ;;  %v10493_v18 = vpop.f32.mrb[98].mxu1 }
 0x40d   : > { %v10574_v1 = vadd.f32 %v10573_v21, %v10572_v55  ;;  %v10575_v7 = vpop.f32.mrb[110].mxu0  ;;  %v10494_v5 = vpop.f32.mrb[99].mxu1 }
 0x40e   : > { %v10576_v16 = vpop.f32.mrb[111].mxu0  ;;  %v13581_v62 = vadd.f32 %v10494_v5, %v10493_v18 }
 0x40f   : > { %v10577_v51 = vadd.f32 %v10576_v16, %v10575_v7  ;;  %v13584_v61 = vadd.f32 %v10574_v1, %v13549_v47 }
 0x411   : > { %v13586_v31 = vadd.f32 %v10577_v51, %v10465_v19 }
 0x412   : > { %v10496_v12 = vpop.f32.mrb[100].mxu1 }
 0x413   : > { %v10578_v9 = vpop.f32.mrb[112].mxu0  ;;  %v10497_v32 = vpop.f32.mrb[101].mxu1 }
 0x414   : > { %v10579_v30 = vpop.f32.mrb[113].mxu0  ;;  %v13588_v11 = vadd.f32 %v10497_v32, %v10496_v12  ;;  %v10499_v24 = vpop.f32.mrb[102].mxu1 }
 0x415   : > { %v10580_v25 = vadd.f32 %v10579_v30, %v10578_v9  ;;  %v10581_v39 = vpop.f32.mrb[114].mxu0  ;;  %v10500_v23 = vpop.f32.mrb[103].mxu1 }
 0x416   : > { %v10582_v50 = vpop.f32.mrb[115].mxu0  ;;  %v13590_v3 = vadd.f32 %v10500_v23, %v10499_v24 }
 0x417   : > { %v10583_v10 = vadd.f32 %v10582_v50, %v10581_v39  ;;  %v13593_v49 = vadd.f32 %v10580_v25, %v13551_v6 }
 0x419   : > { %v13596_v47 = vadd.f32 %v10583_v10, %v13553_v2 }
 0x41a   : > { %v10502_v41 = vpop.f32.mrb[104].mxu1 }
 0x41b   : > { %v10584_v19 = vpop.f32.mrb[116].mxu0  ;;  %v10503_v26 = vpop.f32.mrb[105].mxu1 }
 0x41c   : > { %v10585_v44 = vpop.f32.mrb[117].mxu0  ;;  %v13598_v33 = vadd.f32 %v10503_v26, %v10502_v41  ;;  %v10505_v20 = vpop.f32.mrb[106].mxu1 }
 0x41d   : > { %v10586_v46 = vadd.f32 %v10585_v44, %v10584_v19  ;;  %v10587_v42 = vpop.f32.mrb[118].mxu0  ;;  %v10506_v54 = vpop.f32.mrb[107].mxu1 }
 0x41e   : > { %v10588_v57 = vpop.f32.mrb[119].mxu0  ;;  %v13600_v38 = vadd.f32 %v10506_v54, %v10505_v20 }
 0x41f   : > { %v10589_v8 = vadd.f32 %v10588_v57, %v10587_v42  ;;  %v13603_v6 = vadd.f32 %v10586_v46, %v13557_v0 }
 0x421   : > { %v13606_v2 = vadd.f32 %v10589_v8, %v13561_v28 }
 0x422   : > { %v10508_v22 = vpop.f32.mrb[108].mxu1 }
 0x423   : > { %v10590_v13 = vpop.f32.mrb[120].mxu0  ;;  %v10509_v17 = vpop.f32.mrb[109].mxu1 }
 0x424   : > { %v10591_v29 = vpop.f32.mrb[121].mxu0  ;;  %v13608_v53 = vadd.f32 %v10509_v17, %v10508_v22  ;;  %v10511_v14 = vpop.f32.mrb[110].mxu1 }
 0x425   : > { %v10592_v56 = vadd.f32 %v10591_v29, %v10590_v13  ;;  %v10593_v35 = vpop.f32.mrb[122].mxu0  ;;  %v10512_v40 = vpop.f32.mrb[111].mxu1 }
 0x426   : > { %v10594_v27 = vpop.f32.mrb[123].mxu0  ;;  %v13610_v48 = vadd.f32 %v10512_v40, %v10511_v14 }
 0x427   : > { %v10595_v55 = vadd.f32 %v10594_v27, %v10593_v35  ;;  %v13613_v0 = vadd.f32 %v10592_v56, %v13563_v37 }
 0x429   : > { %v13616_v28 = vadd.f32 %v10595_v55, %v13565_v36 }
 0x42a   : > { %v10514_v63 = vpop.f32.mrb[112].mxu1 }
 0x42b   : > { %v10596_v21 = vpop.f32.mrb[124].mxu0  ;;  %v10515_v7 = vpop.f32.mrb[113].mxu1 }
 0x42c   : > { %v10597_v1 = vpop.f32.mrb[125].mxu0  ;;  %v13618_v5 = vadd.f32 %v10515_v7, %v10514_v63  ;;  %v10517_v51 = vpop.f32.mrb[114].mxu1 }
 0x42d   : > { %v10598_v18 = vadd.f32 %v10597_v1, %v10596_v21  ;;  %v10599_v16 = vpop.f32.mrb[126].mxu0  ;;  %v10518_v12 = vpop.f32.mrb[115].mxu1  ;;  %v8841_v1 = vld [vmem:[#allocation2 + $0x10] sm:$0xff] }
 0x42e   : > { %v10600_v9 = vpop.f32.mrb[127].mxu0  ;;  %v13620_v32 = vadd.f32 %v10518_v12, %v10517_v51 }
 0x42f   : > { %v10601_v30 = vadd.f32 %v10600_v9, %v10599_v16  ;;  %v13623_v37 = vadd.f32 %v10598_v18, %v13571_v45 }
 0x431   : > { %v13626_v36 = vadd.f32 %v10601_v30, %v13573_v34 }
 0x432   : > { %v10520_v39 = vpop.f32.mrb[116].mxu1 }
 0x433   : > { %v10602_v25 = vpop.f32.mrb[128].mxu0  ;;  %v10521_v50 = vpop.f32.mrb[117].mxu1 }
 0x434   : > { %v10603_v24 = vpop.f32.mrb[129].mxu0  ;;  %v13628_v19 = vadd.f32 %v10521_v50, %v10520_v39  ;;  %v10523_v41 = vpop.f32.mrb[118].mxu1  ;;  %v8858_v39 = vunpack.c.h.bf16 %v8841_v1 }
 0x435   : > { %v10604_v23 = vadd.f32 %v10603_v24, %v10602_v25  ;;  %v10605_v10 = vpop.f32.mrb[130].mxu0  ;;  %v10524_v26 = vpop.f32.mrb[119].mxu1  ;;  %v8842_v24 = vld [vmem:[#allocation2 + $0x38] sm:$0xff] }
 0x436   : > { %v10606_v44 = vpop.f32.mrb[131].mxu0  ;;  %v13630_v42 = vadd.f32 %v10524_v26, %v10523_v41  ;;  %v13662_v26 = vld [vmem:[%s13893_s5] ss:$0 sm:$0xff] }
 0x437   : > { %v10607_v46 = vadd.f32 %v10606_v44, %v10605_v10  ;;  %v13633_v45 = vadd.f32 %v10604_v23, %v13579_v59  ;;  %v8844_v23 = vld [vmem:[#allocation2 + $0x88] sm:$0xff]  ;;  %v8843_v10 = vld [vmem:[#allocation2 + $0x60] sm:$0xff] }
 0x439   : > { %v13636_v34 = vadd.f32 %v10607_v46, %v13581_v62 }
 0x43a   : > { %v10526_v57 = vpop.f32.mrb[120].mxu1 }
 0x43b   : > { %v10608_v20 = vpop.f32.mrb[132].mxu0  ;;  %v10527_v8 = vpop.f32.mrb[121].mxu1 }
 0x43c   : > { %v10609_v54 = vpop.f32.mrb[133].mxu0  ;;  %v13638_v29 = vadd.f32 %v10527_v8, %v10526_v57  ;;  %v10529_v17 = vpop.f32.mrb[122].mxu1  ;;  %v8859_v57 = vunpack.c.l.bf16 %v8842_v24  ;;  %v8890_v8 = vsel %vm409_vm3, %v8858_v39, 0.0  ;;  %v13696_v39 = vld [vmem:[#allocation2 + $0xd8] sm:$0xff] }
 0x43d   : > { %v10610_v13 = vadd.f32 %v10609_v54, %v10608_v20  ;;  %v10611_v22 = vpop.f32.mrb[134].mxu0  ;;  %v10530_v35 = vpop.f32.mrb[123].mxu1 }
 0x43e   : > { %v10612_v56 = vpop.f32.mrb[135].mxu0  ;;  %v13640_v27 = vadd.f32 %v10530_v35, %v10529_v17  ;;  %v13676_v17 = vld [vmem:[%s13894_s6] ss:$0 sm:$0xff]  ;;  %v8863_v35 = vunpack.c.l.bf16 %v8844_v23 }
 0x43f   : > { %v10613_v14 = vadd.f32 %v10612_v56, %v10611_v22  ;;  %v13643_v59 = vadd.f32 %v10610_v13, %v13588_v11  ;;  %v8857_v11 = vunpack.c.l.bf16 %v8841_v1  ;;  %v8864_v1 = vunpack.c.h.bf16 %v8844_v23  ;;  %v13701_v23 = vld [vmem:[#allocation2 + $0xb0] sm:$0xff] }
 0x441   : > { %v13646_v62 = vadd.f32 %v10613_v14, %v13590_v3  ;;  %v8889_v46 = vsel %vm409_vm3, %v8857_v11, 0.0  ;;  %v8861_v14 = vunpack.c.l.bf16 %v8843_v10 }
 0x443   : > { %v10614_v40 = vpop.f32.mrb[136].mxu0 }
 0x444   : > { %v10532_v55 = vpop.f32.mrb[124].mxu1  ;;  %v10615_v21 = vpop.f32.mrb[137].mxu0 }
 0x445   : > { %v10533_v63 = vpop.f32.mrb[125].mxu1  ;;  %v10616_v7 = vadd.f32 %v10615_v21, %v10614_v40  ;;  %v10617_v18 = vpop.f32.mrb[138].mxu0 }
 0x446   : > { %v13648_v16 = vadd.f32 %v10533_v63, %v10532_v55  ;;  %v10535_v51 = vpop.f32.mrb[126].mxu1  ;;  %v10618_v9 = vpop.f32.mrb[139].mxu0 }
 0x447   : > { %v10536_v12 = vpop.f32.mrb[127].mxu1  ;;  %v10619_v30 = vadd.f32 %v10618_v9, %v10617_v18  ;;  %v13653_v3 = vadd.f32 %v10616_v7, %v13598_v33  ;;  %v8862_v7 = vunpack.c.h.bf16 %v8843_v10 }
 0x448   : > { %v13650_v25 = vadd.f32 %v10536_v12, %v10535_v51 }
 0x449   : > { %v13657_v50 = vadd.f32 %v10619_v30, %v13600_v38  ;;  %v8860_v38 = vunpack.c.h.bf16 %v8842_v24  ;;  %v8891_v30 = vsel %vm409_vm3, %v8859_v57, 0.0  ;;  %v8895_v24 = vsel %vm409_vm3, %v8863_v35, 0.0 }
 0x44b   : > { %v10620_v41 = vpop.f32.mrb[140].mxu0  ;;  %v8892_v11 = vsel %vm409_vm3, %v8860_v38, 0.0 }
 0x44c   : > { %v10720_v44 = vpop.f32.mrb[128].mxu1  ;;  %v10621_v20 = vpop.f32.mrb[141].mxu0 }
 0x44d   : > { %v8645_v33 = vadd.f32 %v10720_v44, %v13567_v60  ;;  %v8636_v54 = vpop.f32.mrb[129].mxu1  ;;  %v10622_v13 = vadd.f32 %v10621_v20, %v10620_v41  ;;  %v10623_v22 = vpop.f32.mrb[142].mxu0  ;;  %v8893_v20 = vsel %vm409_vm3, %v8861_v14, 0.0  ;;  %v8868_v14 = vunpack.c.h.bf16 %v13696_v39 }
 0x44e   : > { %v8637_v56 = vadd.f32 %v8636_v54, %v13555_v43  ;;  %v10721_v60 = vpop.f32.mrb[130].mxu1  ;;  %v10624_v40 = vpop.f32.mrb[143].mxu0 }
 0x44f   : > { %v8772_v55 = vmul.f32 %v13662_v26, %v8645_v33  ;;  %v8648_v21 = vadd.f32 %v10721_v60, %v13569_v4  ;;  %v8639_v63 = vpop.f32.mrb[131].mxu1  ;;  %v10625_v18 = vadd.f32 %v10624_v40, %v10623_v22  ;;  %v13684_v43 = vadd.f32 %v10622_v13, %v13608_v53 }
 0x450   : > { %v8770_v51 = vmul.f32 %v13662_v26, %v8637_v56  ;;  %v8640_v9 = vadd.f32 %v8639_v63, %v13559_v52  ;;  %v8896_v33 = vsel %vm409_vm3, %v8864_v1, 0.0  ;;  %v8894_v22 = vsel %vm409_vm3, %v8862_v7, 0.0 }
 0x451   : > { %v8811_v12 = vadd.f32 %v13676_v17, %v8772_v55  ;;  %v8773_v4 = vmul.f32 %v13662_v26, %v8648_v21  ;;  %v13704_v10 = vadd.f32 %v10625_v18, %v13610_v48  ;;  %v8867_v56 = vunpack.c.l.bf16 %v13696_v39 }
 0x452   : > { %v8809_v52 = vadd.f32 %v13676_v17, %v8770_v51  ;;  %v8771_v53 = vmul.f32 %v13662_v26, %v8640_v9  ;;  %v8865_v55 = vunpack.c.l.bf16 %v13701_v23 }
 0x453   : > { %v8923_v41 = vadd.f32 %v8891_v30, %v8811_v12  ;;  %v8812_v44 = vadd.f32 %v13676_v17, %v8773_v4  ;;  %v10626_v38 = vpop.f32.mrb[144].mxu0 }
 0x454   : > { %v8921_v57 = vadd.f32 %v8889_v46, %v8809_v52  ;;  %v8810_v54 = vadd.f32 %v13676_v17, %v8771_v53  ;;  %v10724_v13 = vpop.f32.mrb[132].mxu1  ;;  %v10627_v48 = vpop.f32.mrb[145].mxu0 }
 0x455   : > { %v8924_v60 = vadd.f32 %v8892_v11, %v8812_v44  ;;  %v8661_v35 = vadd.f32 %v10724_v13, %v13584_v61  ;;  %v8652_v40 = vpop.f32.mrb[133].mxu1  ;;  %v8955_v21 = vmax.f32 %v8923_v41, 0.0  ;;  %v10628_v63 = vadd.f32 %v10627_v48, %v10626_v38  ;;  %v10629_v1 = vpop.f32.mrb[146].mxu0  ;;  %v13730_v44 = vld [vmem:[#allocation2 + $0x100] sm:$0xff] }
 0x456   : > { %v8922_v46 = vadd.f32 %v8890_v8, %v8810_v54  ;;  %v8653_v18 = vadd.f32 %v8652_v40, %v13575_v58  ;;  %v10725_v51 = vpop.f32.mrb[134].mxu1  ;;  %v8953_v7 = vmax.f32 %v8921_v57, 0.0  ;;  %v10630_v12 = vpop.f32.mrb[147].mxu0  ;;  %v8866_v40 = vunpack.c.h.bf16 %v13701_v23 }
 0x457   : > { %v8956_v9 = vmax.f32 %v8924_v60, 0.0  ;;  %v8776_v30 = vmul.f32 %v13662_v26, %v8661_v35  ;;  %v8664_v4 = vadd.f32 %v10725_v51, %v13586_v31  ;;  %v8655_v61 = vpop.f32.mrb[135].mxu1  ;;  %v10631_v11 = vadd.f32 %v10630_v12, %v10629_v1  ;;  %v13728_v31 = vld [vmem:[#allocation2 + $0x128] sm:$0xff] }
 0x458   : > { %v8954_v8 = vmax.f32 %v8922_v46, 0.0  ;;  %v8774_v39 = vmul.f32 %v13662_v26, %v8653_v18  ;;  %v8656_v58 = vadd.f32 %v8655_v61, %v13577_v15  ;;  %v13733_v57 = vadd.f32 %v10628_v63, %v13618_v5 }
 0x459   : > { %v10095_v52 = vpack.c.bf16 %v8956_v9, %v8955_v21  ;;  %v8815_v53 = vadd.f32 %v13676_v17, %v8776_v30  ;;  %v8777_v41 = vmul.f32 %v13662_v26, %v8664_v4  ;;  %v13738_v15 = vadd.f32 %v10631_v11, %v13620_v32 }
 0x45a   : > { %v10090_v54 = vpack.c.bf16 %v8954_v8, %v8953_v7  ;;  %v8813_v38 = vadd.f32 %v13676_v17, %v8774_v39  ;;  %v8775_v13 = vmul.f32 %v13662_v26, %v8656_v58  ;;  %v8899_v35 = vsel %vm409_vm3, %v8867_v56, 0.0 }
 0x45b   : > { %10167 = vst [vmem:[%s13722_s13 + $0x8] sm:$0xff] %v10095_v52   ;;  %v8927_v60 = vadd.f32 %v8895_v24, %v8815_v53  ;;  %v8816_v48 = vadd.f32 %v13676_v17, %v8777_v41  ;;  %v10632_v46 = vpop.f32.mrb[148].mxu0  ;;  %v8871_v1 = vunpack.c.l.bf16 %v13728_v31  ;;  %v8869_v18 = vunpack.c.l.bf16 %v13730_v44 }
 0x45c   : > { %10091 = vst [vmem:[%s13722_s13] sm:$0xff] %v10090_v54   ;;  %v8925_v21 = vadd.f32 %v8893_v20, %v8813_v38  ;;  %v8814_v5 = vadd.f32 %v13676_v17, %v8775_v13  ;;  %v10728_v63 = vpop.f32.mrb[136].mxu1  ;;  %v10633_v51 = vpop.f32.mrb[149].mxu0  ;;  %v8897_v9 = vsel %vm409_vm3, %v8865_v55, 0.0  ;;  %v8900_v56 = vsel %vm409_vm3, %v8868_v14, 0.0 }
 0x45d   : > { %v8928_v32 = vadd.f32 %v8896_v33, %v8816_v48  ;;  %v8677_v24 = vadd.f32 %v10728_v63, %v13603_v6  ;;  %v8668_v7 = vpop.f32.mrb[137].mxu1  ;;  %v8959_v23 = vmax.f32 %v8927_v60, 0.0  ;;  %v10634_v20 = vadd.f32 %v10633_v51, %v10632_v46  ;;  %v10635_v30 = vpop.f32.mrb[150].mxu0  ;;  %v13763_v60 = vld [vmem:[#allocation2 + $0x178] sm:$0xff] }
 0x45e   : > { %v8926_v12 = vadd.f32 %v8894_v22, %v8814_v5  ;;  %v8669_v4 = vadd.f32 %v8668_v7, %v13593_v49  ;;  %v10729_v61 = vpop.f32.mrb[138].mxu1  ;;  %v8957_v8 = vmax.f32 %v8925_v21, 0.0  ;;  %v10636_v39 = vpop.f32.mrb[151].mxu0  ;;  %v8898_v5 = vsel %vm409_vm3, %v8866_v40, 0.0 }
 0x45f   : > { %v8960_v11 = vmax.f32 %v8928_v32, 0.0  ;;  %v8780_v33 = vmul.f32 %v13662_v26, %v8677_v24  ;;  %v8680_v6 = vadd.f32 %v10729_v61, %v13606_v2  ;;  %v8671_v58 = vpop.f32.mrb[139].mxu1  ;;  %v10637_v55 = vadd.f32 %v10636_v39, %v10635_v30 }
 0x460   : > { %v8958_v52 = vmax.f32 %v8926_v12, 0.0  ;;  %v8778_v14 = vmul.f32 %v13662_v26, %v8669_v4  ;;  %v8672_v22 = vadd.f32 %v8671_v58, %v13596_v47  ;;  %v13759_v54 = vadd.f32 %v10634_v20, %v13628_v19 }
 0x461   : > { %v10105_v53 = vpack.c.bf16 %v8960_v11, %v8959_v23  ;;  %v8819_v49 = vadd.f32 %v13676_v17, %v8780_v33  ;;  %v8781_v41 = vmul.f32 %v13662_v26, %v8680_v6  ;;  %v13766_v48 = vadd.f32 %v10637_v55, %v13630_v42 }
 0x462   : > { %v10100_v38 = vpack.c.bf16 %v8958_v52, %v8957_v8  ;;  %v8817_v13 = vadd.f32 %v13676_v17, %v8778_v14  ;;  %v8779_v2 = vmul.f32 %v13662_v26, %v8672_v22  ;;  %v8872_v46 = vunpack.c.h.bf16 %v13728_v31  ;;  %v13784_v52 = vld [vmem:[#allocation2 + $0x150] sm:$0xff] }
 0x463   : > { %10169 = vst [vmem:[%s13722_s13 + $0x18] sm:$0xff] %v10105_v53   ;;  %v8931_v47 = vadd.f32 %v8899_v35, %v8819_v49  ;;  %v8820_v21 = vadd.f32 %v13676_v17, %v8781_v41  ;;  %v10638_v32 = vpop.f32.mrb[152].mxu0  ;;  %v8903_v24 = vsel %vm409_vm3, %v8871_v1, 0.0  ;;  %v8901_v7 = vsel %vm409_vm3, %v8869_v18, 0.0 }
 0x464   : > { %10168 = vst [vmem:[%s13722_s13 + $0x10] sm:$0xff] %v10100_v38   ;;  %v8929_v19 = vadd.f32 %v8897_v9, %v8817_v13  ;;  %v8818_v63 = vadd.f32 %v13676_v17, %v8779_v2  ;;  %v10732_v51 = vpop.f32.mrb[140].mxu1  ;;  %v10639_v23 = vpop.f32.mrb[153].mxu0  ;;  %v8870_v20 = vunpack.c.h.bf16 %v13730_v44  ;;  %v8875_v40 = vunpack.c.l.bf16 %v13763_v60 }
 0x465   : > { %v8932_v42 = vadd.f32 %v8900_v56, %v8820_v21  ;;  %v8693_v35 = vadd.f32 %v10732_v51, %v13623_v37  ;;  %v8684_v12 = vpop.f32.mrb[141].mxu1  ;;  %v8963_v31 = vmax.f32 %v8931_v47, 0.0  ;;  %v10640_v9 = vadd.f32 %v10639_v23, %v10638_v32  ;;  %v10641_v4 = vpop.f32.mrb[154].mxu0 }
 0x466   : > { %v8930_v30 = vadd.f32 %v8898_v5, %v8818_v63  ;;  %v8685_v61 = vadd.f32 %v8684_v12, %v13613_v0  ;;  %v10733_v8 = vpop.f32.mrb[142].mxu1  ;;  %v8961_v11 = vmax.f32 %v8929_v19, 0.0  ;;  %v10642_v39 = vpop.f32.mrb[155].mxu0  ;;  %v8904_v13 = vsel %vm409_vm3, %v8872_v46, 0.0 }
 0x467   : > { %v8964_v1 = vmax.f32 %v8932_v42, 0.0  ;;  %v8784_v18 = vmul.f32 %v13662_v26, %v8693_v35  ;;  %v8696_v37 = vadd.f32 %v10733_v8, %v13626_v36  ;;  %v8687_v56 = vpop.f32.mrb[143].mxu1  ;;  %v10643_v44 = vadd.f32 %v10642_v39, %v10641_v4 }
 0x468   : > { %v8962_v33 = vmax.f32 %v8930_v30, 0.0  ;;  %v8782_v6 = vmul.f32 %v13662_v26, %v8685_v61  ;;  %v8688_v58 = vadd.f32 %v8687_v56, %v13616_v28  ;;  %v13789_v22 = vadd.f32 %v10640_v9, %v13638_v29 }
 0x469   : > { %v10115_v0 = vpack.c.bf16 %v8964_v1, %v8963_v31  ;;  %v8823_v55 = vadd.f32 %v13676_v17, %v8784_v18  ;;  %v8785_v14 = vmul.f32 %v13662_v26, %v8696_v37  ;;  %v13794_v41 = vadd.f32 %v10643_v44, %v13640_v27  ;;  %v8852_v44 = vld [vmem:[#allocation2 + $0x1c8] sm:$0xff] }
 0x46a   : > { %v10110_v53 = vpack.c.bf16 %v8962_v33, %v8961_v11  ;;  %v8821_v36 = vadd.f32 %v13676_v17, %v8782_v6  ;;  %v8783_v49 = vmul.f32 %v13662_v26, %v8688_v58  ;;  %v8873_v2 = vunpack.c.l.bf16 %v13784_v52 }
 0x46b   : > { %10171 = vst [vmem:[%s13722_s13 + $0x28] sm:$0xff] %v10115_v0   ;;  %v8935_v28 = vadd.f32 %v8903_v24, %v8823_v55  ;;  %v8824_v38 = vadd.f32 %v13676_v17, %v8785_v14  ;;  %v10644_v21 = vpop.f32.mrb[156].mxu0  ;;  %v8876_v19 = vunpack.c.h.bf16 %v13763_v60  ;;  %v8874_v63 = vunpack.c.h.bf16 %v13784_v52  ;;  %v8851_v0 = vld [vmem:[#allocation2 + $0x1a0] sm:$0xff] }
 0x46c   : > { %10170 = vst [vmem:[%s13722_s13 + $0x20] sm:$0xff] %v10110_v53   ;;  %v8933_v47 = vadd.f32 %v8901_v7, %v8821_v36  ;;  %v8822_v29 = vadd.f32 %v13676_v17, %v8783_v49  ;;  %v10736_v5 = vpop.f32.mrb[144].mxu1  ;;  %v8902_v32 = vsel %vm409_vm3, %v8870_v20, 0.0  ;;  %v10645_v51 = vpop.f32.mrb[157].mxu0  ;;  %v8907_v46 = vsel %vm409_vm3, %v8875_v40, 0.0 }
 0x46d   : > { %v8936_v27 = vadd.f32 %v8904_v13, %v8824_v38  ;;  %v8709_v24 = vadd.f32 %v10736_v5, %v13643_v59  ;;  %v8700_v42 = vpop.f32.mrb[145].mxu1  ;;  %v8967_v23 = vmax.f32 %v8935_v28, 0.0  ;;  %v10646_v7 = vadd.f32 %v10645_v51, %v10644_v21  ;;  %v10647_v12 = vpop.f32.mrb[158].mxu0 }
 0x46e   : > { %v8934_v35 = vadd.f32 %v8902_v32, %v8822_v29  ;;  %v8701_v31 = vadd.f32 %v8700_v42, %v13633_v45  ;;  %v10737_v30 = vpop.f32.mrb[146].mxu1  ;;  %v8965_v9 = vmax.f32 %v8933_v47, 0.0  ;;  %v10648_v4 = vpop.f32.mrb[159].mxu0  ;;  %v8906_v49 = vsel %vm409_vm3, %v8874_v63, 0.0 }
 0x46f   : > { %v8968_v60 = vmax.f32 %v8936_v27, 0.0  ;;  %v8788_v61 = vmul.f32 %v13662_v26, %v8709_v24  ;;  %v8712_v20 = vadd.f32 %v10737_v30, %v13646_v62  ;;  %v8703_v8 = vpop.f32.mrb[147].mxu1  ;;  %v10649_v11 = vadd.f32 %v10648_v4, %v10647_v12  ;;  %v8854_v30 = vld [vmem:[#allocation2 + $0x218] sm:$0xff]  ;;  %v8853_v4 = vld [vmem:[#allocation2 + $0x1f0] sm:$0xff] }
 0x470   : > { %v8966_v59 = vmax.f32 %v8934_v35, 0.0  ;;  %v8786_v40 = vmul.f32 %v13662_v26, %v8701_v31  ;;  %v8704_v1 = vadd.f32 %v8703_v8, %v13636_v34  ;;  %v13815_v37 = vadd.f32 %v10646_v7, %v13648_v16 }
 0x471   : > { %v10125_v39 = vpack.c.bf16 %v8968_v60, %v8967_v23  ;;  %v8827_v45 = vadd.f32 %v13676_v17, %v8788_v61  ;;  %v8789_v18 = vmul.f32 %v13662_v26, %v8712_v20  ;;  %v13820_v6 = vadd.f32 %v10649_v11, %v13650_v25 }
 0x472   : > { %v10120_v56 = vpack.c.bf16 %v8966_v59, %v8965_v9  ;;  %v8825_v33 = vadd.f32 %v13676_v17, %v8786_v40  ;;  %v8787_v62 = vmul.f32 %v13662_v26, %v8704_v1  ;;  %v8905_v34 = vsel %vm409_vm3, %v8873_v2, 0.0 }
 0x473   : > { %10173 = vst [vmem:[%s13722_s13 + $0x38] sm:$0xff] %v10125_v39   ;;  %v8939_v58 = vadd.f32 %v8907_v46, %v8827_v45  ;;  %v8828_v52 = vadd.f32 %v13676_v17, %v8789_v18  ;;  %v8908_v16 = vsel %vm409_vm3, %v8876_v19, 0.0  ;;  %v8879_v28 = vunpack.c.l.bf16 %v8852_v44 }
 0x474   : > { %10172 = vst [vmem:[%s13722_s13 + $0x30] sm:$0xff] %v10120_v56   ;;  %v8937_v55 = vadd.f32 %v8905_v34, %v8825_v33  ;;  %v8826_v14 = vadd.f32 %v13676_v17, %v8787_v62  ;;  %v10740_v53 = vpop.f32.mrb[148].mxu1  ;;  %v8877_v47 = vunpack.c.l.bf16 %v8851_v0  ;;  %v8880_v21 = vunpack.c.h.bf16 %v8852_v44 }
 0x475   : > { %v8940_v36 = vadd.f32 %v8908_v16, %v8828_v52  ;;  %v8725_v25 = vadd.f32 %v10740_v53, %v13684_v43  ;;  %v8716_v38 = vpop.f32.mrb[149].mxu1  ;;  %v8971_v5 = vmax.f32 %v8939_v58, 0.0  ;;  %v8878_v35 = vunpack.c.h.bf16 %v8851_v0 }
 0x476   : > { %v8938_v13 = vadd.f32 %v8906_v49, %v8826_v14  ;;  %v8717_v2 = vadd.f32 %v8716_v38, %v13653_v3  ;;  %v10741_v29 = vpop.f32.mrb[150].mxu1  ;;  %v8969_v24 = vmax.f32 %v8937_v55, 0.0  ;;  %v8911_v12 = vsel %vm409_vm3, %v8879_v28, 0.0 }
 0x477   : > { %v8972_v27 = vmax.f32 %v8940_v36, 0.0  ;;  %v8792_v19 = vmul.f32 %v13662_v26, %v8725_v25  ;;  %v8728_v32 = vadd.f32 %v10741_v29, %v13704_v10  ;;  %v8719_v51 = vpop.f32.mrb[151].mxu1  ;;  %v8909_v60 = vsel %vm409_vm3, %v8877_v47, 0.0 }
 0x478   : > { %v8970_v63 = vmax.f32 %v8938_v13, 0.0  ;;  %v8790_v43 = vmul.f32 %v13662_v26, %v8717_v2  ;;  %v8720_v46 = vadd.f32 %v8719_v51, %v13657_v50  ;;  %v8912_v20 = vsel %vm409_vm3, %v8880_v21, 0.0  ;;  %v8856_v2 = vld [vmem:[#allocation2 + $0x268] sm:$0xff]  ;;  %v8855_v21 = vld [vmem:[#allocation2 + $0x240] sm:$0xff] }
 0x479   : > { %v10135_v42 = vpack.c.bf16 %v8972_v27, %v8971_v5  ;;  %v8831_v3 = vadd.f32 %v13676_v17, %v8792_v19  ;;  %v8793_v23 = vmul.f32 %v13662_v26, %v8728_v32  ;;  %v8910_v40 = vsel %vm409_vm3, %v8878_v35, 0.0 }
 0x47a   : > { %v10130_v7 = vpack.c.bf16 %v8970_v63, %v8969_v24  ;;  %v8829_v31 = vadd.f32 %v13676_v17, %v8790_v43  ;;  %v8791_v10 = vmul.f32 %v13662_v26, %v8720_v46  ;;  %v8883_v39 = vunpack.c.l.bf16 %v8854_v30 }
 0x47b   : > { %10175 = vst [vmem:[%s13722_s13 + $0x48] sm:$0xff] %v10135_v42   ;;  %v8943_v9 = vadd.f32 %v8911_v12, %v8831_v3  ;;  %v8832_v50 = vadd.f32 %v13676_v17, %v8793_v23  ;;  %v8881_v33 = vunpack.c.l.bf16 %v8853_v4  ;;  %v8884_v44 = vunpack.c.h.bf16 %v8854_v30 }
 0x47c   : > { %10174 = vst [vmem:[%s13722_s13 + $0x40] sm:$0xff] %v10130_v7   ;;  %v8941_v61 = vadd.f32 %v8909_v60, %v8829_v31  ;;  %v8830_v8 = vadd.f32 %v13676_v17, %v8791_v10  ;;  %v10744_v59 = vpop.f32.mrb[152].mxu1  ;;  %v8882_v25 = vunpack.c.h.bf16 %v8853_v4  ;;  %v8915_v38 = vsel %vm409_vm3, %v8883_v39, 0.0 }
 0x47d   : > { %v8944_v11 = vadd.f32 %v8912_v20, %v8832_v50  ;;  %v8741_v1 = vadd.f32 %v10744_v59, %v13759_v54  ;;  %v8732_v45 = vpop.f32.mrb[153].mxu1  ;;  %v8975_v58 = vmax.f32 %v8943_v9, 0.0  ;;  %v8913_v29 = vsel %vm409_vm3, %v8881_v33, 0.0 }
 0x47e   : > { %v8942_v18 = vadd.f32 %v8910_v40, %v8830_v8  ;;  %v8733_v56 = vadd.f32 %v8732_v45, %v13733_v57  ;;  %v10745_v62 = vpop.f32.mrb[154].mxu1  ;;  %v8973_v16 = vmax.f32 %v8941_v61, 0.0  ;;  %v8916_v27 = vsel %vm409_vm3, %v8884_v44, 0.0 }
 0x47f   : > { %v8976_v34 = vmax.f32 %v8944_v11, 0.0  ;;  %v8796_v52 = vmul.f32 %v13662_v26, %v8741_v1  ;;  %v8744_v0 = vadd.f32 %v10745_v62, %v13766_v48  ;;  %v8735_v55 = vpop.f32.mrb[155].mxu1  ;;  %v8914_v24 = vsel %vm409_vm3, %v8882_v25, 0.0 }
 0x480   : > { %v8974_v14 = vmax.f32 %v8942_v18, 0.0  ;;  %v8794_v54 = vmul.f32 %v13662_v26, %v8733_v56  ;;  %v8736_v53 = vadd.f32 %v8735_v55, %v13738_v15  ;;  %v8887_v43 = vunpack.c.l.bf16 %v8856_v2 }
 0x481   : > { %v10145_v36 = vpack.c.bf16 %v8976_v34, %v8975_v58  ;;  %v8835_v57 = vadd.f32 %v13676_v17, %v8796_v52  ;;  %v8797_v49 = vmul.f32 %v13662_v26, %v8744_v0  ;;  %v8885_v23 = vunpack.c.l.bf16 %v8855_v21 }
 0x482   : > { %v10140_v28 = vpack.c.bf16 %v8974_v14, %v8973_v16  ;;  %v8833_v13 = vadd.f32 %v13676_v17, %v8794_v54  ;;  %v8795_v48 = vmul.f32 %v13662_v26, %v8736_v53  ;;  %v8888_v7 = vunpack.c.h.bf16 %v8856_v2 }
 0x483   : > { %10177 = vst [vmem:[%s13722_s13 + $0x58] sm:$0xff] %v10145_v36   ;;  %v8947_v47 = vadd.f32 %v8915_v38, %v8835_v57  ;;  %v8836_v15 = vadd.f32 %v13676_v17, %v8797_v49  ;;  %v8886_v8 = vunpack.c.h.bf16 %v8855_v21  ;;  %v8919_v11 = vsel %vm409_vm3, %v8887_v43, 0.0 }
 0x484   : > { %10176 = vst [vmem:[%s13722_s13 + $0x50] sm:$0xff] %v10140_v28   ;;  %v8945_v5 = vadd.f32 %v8913_v29, %v8833_v13  ;;  %v8834_v19 = vadd.f32 %v13676_v17, %v8795_v48  ;;  %v10748_v32 = vpop.f32.mrb[156].mxu1  ;;  %v8917_v39 = vsel %vm409_vm3, %v8885_v23, 0.0  ;;  %v8920_v18 = vsel %vm409_vm3, %v8888_v7, 0.0 }
 0x485   : > { %v8948_v51 = vadd.f32 %v8916_v27, %v8836_v15  ;;  %v8757_v63 = vadd.f32 %v10748_v32, %v13815_v37  ;;  %v8748_v46 = vpop.f32.mrb[157].mxu1  ;;  %v8979_v12 = vmax.f32 %v8947_v47, 0.0  ;;  %v8918_v62 = vsel %vm409_vm3, %v8886_v8, 0.0 }
 0x486   : > { %v8946_v42 = vadd.f32 %v8914_v24, %v8834_v19  ;;  %v8749_v3 = vadd.f32 %v8748_v46, %v13789_v22  ;;  %v10749_v35 = vpop.f32.mrb[158].mxu1  ;;  %v8977_v60 = vmax.f32 %v8945_v5, 0.0 }
 0x487   : > { %v8980_v31 = vmax.f32 %v8948_v51, 0.0  ;;  %v8800_v10 = vmul.f32 %v13662_v26, %v8757_v63  ;;  %v8760_v30 = vadd.f32 %v10749_v35, %v13820_v6  ;;  %v8751_v9 = vpop.f32.mrb[159].mxu1 }
 0x488   : > { %v8978_v50 = vmax.f32 %v8946_v42, 0.0  ;;  %v8798_v37 = vmul.f32 %v13662_v26, %v8749_v3  ;;  %v8752_v4 = vadd.f32 %v8751_v9, %v13794_v41 }
 0x489   : > { %v10155_v61 = vpack.c.bf16 %v8980_v31, %v8979_v12  ;;  %v8839_v22 = vadd.f32 %v13676_v17, %v8800_v10  ;;  %v8801_v20 = vmul.f32 %v13662_v26, %v8760_v30 }
 0x48a   : > { %v10150_v59 = vpack.c.bf16 %v8978_v50, %v8977_v60  ;;  %v8837_v40 = vadd.f32 %v13676_v17, %v8798_v37  ;;  %v8799_v6 = vmul.f32 %v13662_v26, %v8752_v4 }
 0x48b   : > { %10179 = vst [vmem:[%s13722_s13 + $0x68] sm:$0xff] %v10155_v61   ;;  %v8951_v1 = vadd.f32 %v8919_v11, %v8839_v22  ;;  %v8840_v41 = vadd.f32 %v13676_v17, %v8801_v20 }
 0x48c   : > { %10178 = vst [vmem:[%s13722_s13 + $0x60] sm:$0xff] %v10150_v59   ;;  %v8949_v45 = vadd.f32 %v8917_v39, %v8837_v40  ;;  %v8838_v56 = vadd.f32 %v13676_v17, %v8799_v6 }
 0x48d   : > { %v8952_v33 = vadd.f32 %v8920_v18, %v8840_v41  ;;  %v8983_v58 = vmax.f32 %v8951_v1, 0.0 }
 0x48e   : > { %v8950_v44 = vadd.f32 %v8918_v62, %v8838_v56  ;;  %v8981_v34 = vmax.f32 %v8949_v45, 0.0 }
 0x48f   : > { %v8984_v26 = vmax.f32 %v8952_v33, 0.0 }
 0x490   : > { %v8982_v52 = vmax.f32 %v8950_v44, 0.0 }
 0x491   : > { %v10165_v0 = vpack.c.bf16 %v8984_v26, %v8983_v58 }
 0x492   : > { %v10160_v55 = vpack.c.bf16 %v8982_v52, %v8981_v34 }
 0x493   : > { %10181 = vst [vmem:[%s13722_s13 + $0x78] sm:$0xff] %v10165_v0  }
 0x494   : > { %10180 = vst [vmem:[%s13722_s13 + $0x70] sm:$0xff] %v10160_v55  }
 0x495 PF: > { %s17_s24 = sadd.s32 1, %s10939_s24  }
 0x496   : > { %p14_p5 = scmp.ge.s32.totalorder %s17_s24, 4  }
 0x498   :  { %16 = sbr.rel (!%p14_p5) target bundleno = 1 (0x1), region = 83 }

</bundles_post_ra>
